<compile_context>
chip_gen: v6e
topology: v6e:2x2x1
jax: 0.10.0
libtpu: 0.0.40
codegen_flags: <defaults>
</compile_context>

<pallas_src>
import functools
import math

import numpy as np
import jax
import jax.numpy as jnp
from jax.experimental import pallas as pl
from jax.experimental.pallas import tpu as pltpu


# MXU operand dtype (weights + activation slabs).  Accumulation is always f32.
MATMUL_DTYPE = jnp.bfloat16


# --------------------------------------------------------------------------------------
# VMEM sizing helpers (generation aware)
# --------------------------------------------------------------------------------------
def _rup(x, m):
    return ((x + m - 1) // m) * m


def _arr_bytes(shape, itemsize=4):
    """Approx VMEM bytes of an array including (8, 128) sublane/lane padding."""
    if len(shape) == 1:
        return _rup(int(shape[0]), 128) * itemsize
    lead = 1
    for d in shape[:-2]:
        lead *= int(d)
    return lead * _rup(int(shape[-2]), 8) * _rup(int(shape[-1]), 128) * itemsize


def _vmem_limit_bytes():
    cap = None
    try:
        cap = getattr(pltpu.get_tpu_info(), "vmem_capacity_bytes", None)
    except Exception:
        cap = None
    if not cap:
        cap = 64 << 20                 # conservative: v7x physical VMEM per TensorCore
    return int(min(cap // 2, 64 << 20))


_VMEM_LIMIT = _vmem_limit_bytes()
_VMEM_BUDGET = int(_VMEM_LIMIT * 0.7)


# --------------------------------------------------------------------------------------
# In-kernel math helpers
# --------------------------------------------------------------------------------------
def _erf_poly(x):
    """Abramowitz-Stegun 7.1.26 erf approximation (|err| < 1.5e-7) -- exp/VPU ops only."""
    ax = jnp.abs(x)
    t = 1.0 / (1.0 + 0.3275911 * ax)
    poly = ((((1.061405429 * t - 1.453152027) * t + 1.421413741) * t
             - 0.284496736) * t + 0.254829592) * t
    y = 1.0 - poly * jnp.exp(-ax * ax)
    return jnp.where(x < 0.0, -y, y)


def _gelu_exact(x):
    # TODO(synk): swap for jax.nn.gelu(approximate=False) once lax.erf lowering is guaranteed.
    return 0.5 * x * (1.0 + _erf_poly(x * 0.7071067811865476))


# --------------------------------------------------------------------------------------
# Pallas kernels
# --------------------------------------------------------------------------------------
def _window_attention_body(x_ref, bias_ref, mask_ref, scale_ref, wqkv_ref, bqkv_ref,
                           wp_ref, bp_ref, o_ref, *, num_heads, head_dim, wb, n_tok):
    """Wb windows per grid step.  x_ref: (Wb*N, C) flattened window tokens."""
    C = num_heads * head_dim
    rows = wb * n_tok

    # Fused QKV projection on the whole (Wb*N, C) slab -- one well-fed MXU matmul, bf16 operands.
    x = x_ref[...].astype(MATMUL_DTYPE)
    qkv = jnp.dot(x, wqkv_ref[...].astype(MATMUL_DTYPE),
                  preferred_element_type=jnp.float32) + bqkv_ref[...]          # (rows, 3C) f32

    # Cosine attention: normalize q/k per head (lane reduce + rsqrt), fold the per-head logit
    # scale into q.  Heads are stacked into the leading batch dim: g = h * wb + b.
    scale = scale_ref[...]                                                     # (1, C)
    q_parts, k_parts, v_parts = [], [], []
    for h in range(num_heads):                     # static loop; only builds the stacked layout
        sl = slice(h * head_dim, (h + 1) * head_dim)
        qh = qkv[:, sl]
        kh = qkv[:, C + h * head_dim:C + (h + 1) * head_dim]
        vh = qkv[:, 2 * C + h * head_dim:2 * C + (h + 1) * head_dim]
        qh = qh * jax.lax.rsqrt(jnp.maximum(jnp.sum(qh * qh, -1, keepdims=True), 1e-24))
        qh = qh * scale[:, sl]
        kh = kh * jax.lax.rsqrt(jnp.maximum(jnp.sum(kh * kh, -1, keepdims=True), 1e-24))
        q_parts.append(qh.reshape(wb, n_tok, head_dim))
        k_parts.append(kh.reshape(wb, n_tok, head_dim))
        v_parts.append(vh.reshape(wb, n_tok, head_dim))
    qg = jnp.concatenate(q_parts, axis=0)          # (G, N, hd) with G = nH * Wb
    kg = jnp.concatenate(k_parts, axis=0)
    vg = jnp.concatenate(v_parts, axis=0)

    # ONE batched QK^T and ONE softmax over all heads x windows.
    attn = jnp.einsum("gnd,gmd->gnm", qg.astype(MATMUL_DTYPE), kg.astype(MATMUL_DTYPE),
                      preferred_element_type=jnp.float32)                      # (G, N, N)
    attn = attn.reshape(num_heads, wb, n_tok, n_tok) + bias_ref[...][:, None]
    if mask_ref is not None:                       # static specialization (shift == 0 variant)
        attn = attn + mask_ref[...][None]
    attn = attn.reshape(num_heads * wb, n_tok, n_tok)
    attn = attn - jnp.max(attn, axis=-1, keepdims=True)
    p = jnp.exp(attn)
    p = p * pl.reciprocal(jnp.sum(p, axis=-1, keepdims=True), approx=True)

    # ONE batched attn@V; reassemble heads on the lane axis; single K=C output projection.
    og = jnp.einsum("gnm,gmd->gnd", p.astype(MATMUL_DTYPE), vg.astype(MATMUL_DTYPE),
                    preferred_element_type=jnp.float32)                        # (G, N, hd)
    y_all = jnp.concatenate(
        [og[h * wb:(h + 1) * wb].reshape(rows, head_dim) for h in range(num_heads)], axis=-1)
    y = jnp.dot(y_all.astype(MATMUL_DTYPE), wp_ref[...].astype(MATMUL_DTYPE),
                preferred_element_type=jnp.float32) + bp_ref[...]
    # TODO(synk): with C < 128 this store is lane-masked; a lane-dense (Wb, N*C) slab needs an
    #             in-kernel minor-dim relayout whose Mosaic lowering is not guaranteed.
    o_ref[...] = y.astype(o_ref.dtype)


def _make_attention_kernel(num_heads, head_dim, wb, n_tok, has_mask):
    body = functools.partial(_window_attention_body, num_heads=num_heads,
                             head_dim=head_dim, wb=wb, n_tok=n_tok)
    if has_mask:
        return body

    def body_nomask(x_ref, bias_ref, scale_ref, wqkv_ref, bqkv_ref, wp_ref, bp_ref, o_ref):
        body(x_ref, bias_ref, None, scale_ref, wqkv_ref, bqkv_ref, wp_ref, bp_ref, o_ref)

    return body_nomask


def _block_ffn_kernel(short_ref, y_ref, g1_ref, b1n_ref, w1_ref, b1_ref,
                      w2_ref, b2_ref, g2_ref, b2n_ref, o_ref):
    """Fused post-norm residual + MLP of one Swin block:
       x1 = shortcut + LN(attn_out);  o = x1 + LN(GELU(x1@W1+b1)@W2+b2)."""
    y = y_ref[...].astype(jnp.float32)
    mu = jnp.mean(y, axis=-1, keepdims=True)
    var = jnp.mean(jnp.square(y - mu), axis=-1, keepdims=True)
    yn = (y - mu) * jax.lax.rsqrt(var + 1e-5)
    x1 = short_ref[...].astype(jnp.float32) + yn * g1_ref[...] + b1n_ref[...]

    h = jnp.dot(x1.astype(MATMUL_DTYPE), w1_ref[...].astype(MATMUL_DTYPE),
                preferred_element_type=jnp.float32) + b1_ref[...]
    h = _gelu_exact(h)
    z = jnp.dot(h.astype(MATMUL_DTYPE), w2_ref[...].astype(MATMUL_DTYPE),
                preferred_element_type=jnp.float32) + b2_ref[...]
    mu2 = jnp.mean(z, axis=-1, keepdims=True)
    var2 = jnp.mean(jnp.square(z - mu2), axis=-1, keepdims=True)
    zn = (z - mu2) * jax.lax.rsqrt(var2 + 1e-5)
    o_ref[...] = (x1 + zn * g2_ref[...] + b2n_ref[...]).astype(o_ref.dtype)


# --------------------------------------------------------------------------------------
# Tile-size selection (padding-aware, hardware-derived budgets)
# --------------------------------------------------------------------------------------
def _attn_vmem_bytes(wb, n_tok, C, num_heads, has_mask):
    rows = wb * n_tok
    hd = C // num_heads
    G = num_heads * wb
    b = 2 * 2 * _arr_bytes((rows, C))                                   # x + out, double-buffered
    if has_mask:
        b += 2 * _arr_bytes((wb, n_tok, n_tok))
    b += 2 * (_arr_bytes((C, 3 * C), 2) + _arr_bytes((C, C), 2)         # bf16 weights
              + _arr_bytes((num_heads, n_tok, n_tok)) + _arr_bytes((1, 3 * C))
              + 2 * _arr_bytes((1, C)))
    b += _arr_bytes((rows, 3 * C))                                      # qkv slab
    b += 4 * _arr_bytes((rows, C))                                      # q/k/v/y_all slabs
    b += 4 * _arr_bytes((G, n_tok, hd))                                 # stacked q/k/v + attn@v
    b += 3 * _arr_bytes((G, n_tok, n_tok))                              # scores / probs
    return b


def _choose_window_block(n_total, divisor_base, n_tok, C, num_heads, has_mask):
    """Largest window-count per grid step that divides `divisor_base` and fits VMEM."""
    best = 1
    for d in range(1, divisor_base + 1):
        if divisor_base % d or d > n_total:
            continue
        if _attn_vmem_bytes(d, n_tok, C, num_heads, has_mask) <= _VMEM_BUDGET:
            best = d
    return best


def _ffn_vmem_bytes(t, C, Hd):
    b = 2 * 3 * _arr_bytes((t, C))                                      # shortcut / attn / out
    b += 2 * (_arr_bytes((C, Hd), 2) + _arr_bytes((Hd, C), 2)
              + 4 * _arr_bytes((1, C)) + 2 * _arr_bytes((1, Hd)))
    b += 2 * _arr_bytes((t, Hd)) + 4 * _arr_bytes((t, C))               # temporaries
    return b


def _choose_row_tile(T, C, Hd, cap=2048):
    """Largest multiple-of-8 row tile that fits; T is padded up to a multiple of it."""
    best = 8
    t = 8
    hi = min(_rup(T, 8), cap)
    while t <= hi:
        if _ffn_vmem_bytes(t, C, Hd) <= _VMEM_BUDGET:
            best = t
        t += 8
    return best, _rup(T, best)


# --------------------------------------------------------------------------------------
# Pallas wrappers
# --------------------------------------------------------------------------------------
def window_attention(x2d, p, num_heads, n_tok, n_windows, mask_nw):
    """x2d: (n_windows * N, C) window tokens; mask_nw: (nW, N, N) for shifted blocks, else None."""
    C = x2d.shape[-1]
    head_dim = C // num_heads
    has_mask = mask_nw is not None
    divisor_base = int(mask_nw.shape[0]) if has_mask else n_windows
    wb = _choose_window_block(n_windows, divisor_base, n_tok, C, num_heads, has_mask)
    grid = (n_windows // wb,)

    in_specs = [
        pl.BlockSpec((wb * n_tok, C), lambda i: (i, 0)),                   # window tokens
        pl.BlockSpec((num_heads, n_tok, n_tok), lambda i: (0, 0, 0)),      # rel-pos bias (prep'd)
    ]
    args = [x2d, p["bias"]]
    if has_mask:
        nW = int(mask_nw.shape[0])
        mblocks = nW // wb
        if mblocks == 1:
            mask_map = lambda i: (0, 0, 0)
        else:
            mask_map = lambda i: (i % mblocks, 0, 0)                       # no bz-tiled mask
        in_specs.append(pl.BlockSpec((wb, n_tok, n_tok), mask_map))
        args.append(mask_nw)
    in_specs += [
        pl.BlockSpec((1, C), lambda i: (0, 0)),                            # per-channel logit scale
        pl.BlockSpec((C, 3 * C), lambda i: (0, 0)),                        # fused Wqkv^T (bf16)
        pl.BlockSpec((1, 3 * C), lambda i: (0, 0)),                        # fused qkv bias
        pl.BlockSpec((C, C), lambda i: (0, 0)),                            # Wproj^T (bf16)
        pl.BlockSpec((1, C), lambda i: (0, 0)),                            # bproj
    ]
    args += [p["scale_row"], p["wqkv_t"], p["bqkv"], p["wp_t"], p["bp"]]

    kernel = _make_attention_kernel(num_heads, head_dim, wb, n_tok, has_mask)
    # TODO(synk): on v7x the window axis should be CORE_PARALLEL (2 TCs); plain "parallel" is
    #             harmless on 1-TC v5e/v6e, so we maximize the tile instead.
    return pl.pallas_call(
        kernel,
        out_shape=jax.ShapeDtypeStruct((n_windows * n_tok, C), x2d.dtype),
        grid=grid,
        in_specs=in_specs,
        out_specs=pl.BlockSpec((wb * n_tok, C), lambda i: (i, 0)),
        compiler_params=pltpu.CompilerParams(
            dimension_semantics=("parallel",), vmem_limit_bytes=_VMEM_LIMIT),
    )(*args)


def block_ffn(shortcut, attn_out, p):
    """Fused: x1 = shortcut + LN(attn_out); return x1 + LN(MLP(x1))."""
    T, C = shortcut.shape
    Hd = p["w1_t"].shape[1]
    tile, Tp = _choose_row_tile(T, C, Hd)
    if Tp != T:                                   # pad awkward T instead of a giant single block
        shortcut = jnp.pad(shortcut, ((0, Tp - T), (0, 0)))
        attn_out = jnp.pad(attn_out, ((0, Tp - T), (0, 0)))
    out = pl.pallas_call(
        _block_ffn_kernel,
        out_shape=jax.ShapeDtypeStruct((Tp, C), shortcut.dtype),
        grid=(Tp // tile,),
        in_specs=[
            pl.BlockSpec((tile, C), lambda i: (i, 0)),   # shortcut
            pl.BlockSpec((tile, C), lambda i: (i, 0)),   # attn output
            pl.BlockSpec((1, C), lambda i: (0, 0)),      # norm1 gamma
            pl.BlockSpec((1, C), lambda i: (0, 0)),      # norm1 beta
            pl.BlockSpec((C, Hd), lambda i: (0, 0)),     # MLP W1^T (bf16)
            pl.BlockSpec((1, Hd), lambda i: (0, 0)),     # MLP b1
            pl.BlockSpec((Hd, C), lambda i: (0, 0)),     # MLP W2^T (bf16)
            pl.BlockSpec((1, C), lambda i: (0, 0)),      # MLP b2
            pl.BlockSpec((1, C), lambda i: (0, 0)),      # norm2 gamma
            pl.BlockSpec((1, C), lambda i: (0, 0)),      # norm2 beta
        ],
        out_specs=pl.BlockSpec((tile, C), lambda i: (i, 0)),
        compiler_params=pltpu.CompilerParams(
            dimension_semantics=("parallel",), vmem_limit_bytes=_VMEM_LIMIT),
    )(shortcut, attn_out, p["g1"], p["b1n"], p["w1_t"], p["b1"],
      p["w2_t"], p["b2"], p["g2"], p["b2n"])
    return out[:T] if Tp != T else out


# --------------------------------------------------------------------------------------
# JAX glue: window partition / reverse, rel-pos tables, shift mask, block & layer forward
# --------------------------------------------------------------------------------------
def window_partition(x, ws):
    B, H, W, C = x.shape
    x = x.reshape(B, H // ws, ws, W // ws, ws, C)
    return jnp.transpose(x, (0, 1, 3, 2, 4, 5)).reshape(-1, ws * ws, C)


def window_reverse(win, ws, H, W):
    C = win.shape[-1]
    B = win.shape[0] // ((H // ws) * (W // ws))
    x = win.reshape(B, H // ws, W // ws, ws, ws, C)
    return jnp.transpose(x, (0, 1, 3, 2, 4, 5)).reshape(B, H, W, C)


def make_relative_position_index(ws):
    coords = np.stack(np.meshgrid(np.arange(ws), np.arange(ws), indexing="ij"))
    flat = coords.reshape(2, -1)
    rel = flat[:, :, None] - flat[:, None, :]
    rel = rel.transpose(1, 2, 0).astype(np.int32)
    rel[:, :, 0] += ws - 1
    rel[:, :, 1] += ws - 1
    rel[:, :, 0] *= 2 * ws - 1
    return rel.sum(-1)                                                       # (N, N)


def make_relative_coords_table(ws, pretrained_ws=0):
    rh = np.arange(-(ws - 1), ws, dtype=np.float32)
    rw = np.arange(-(ws - 1), ws, dtype=np.float32)
    table = np.stack(np.meshgrid(rh, rw, indexing="ij")).transpose(1, 2, 0)[None]
    denom = (pretrained_ws - 1) if pretrained_ws > 0 else (ws - 1)
    table = table / denom
    table = table * 8.0
    table = np.sign(table) * np.log2(np.abs(table) + 1.0) / np.log2(8.0)
    return table.astype(np.float32)


def make_attn_mask(H, W, ws, shift):
    img_mask = np.zeros((1, H, W, 1), np.float32)
    cnt = 0
    for hs in (slice(0, -ws), slice(-ws, -shift), slice(-shift, None)):
        for wsl in (slice(0, -ws), slice(-ws, -shift), slice(-shift, None)):
            img_mask[:, hs, wsl, :] = cnt
            cnt += 1
    mw = img_mask.reshape(1, H // ws, ws, W // ws, ws, 1)
    mw = mw.transpose(0, 1, 3, 2, 4, 5).reshape(-1, ws * ws)
    am = mw[:, None, :] - mw[:, :, None]
    return np.where(am != 0, -100.0, 0.0).astype(np.float32)                 # (nW, N, N)


def swin_block(x, p, H, W, ws, shift, num_heads, mask_nw):
    B, L, C = x.shape
    shortcut = x.reshape(B * L, C)

    xi = x.reshape(B, H, W, C)
    if shift > 0:
        xi = jnp.roll(xi, shift=(-shift, -shift), axis=(1, 2))
    # TODO(synk): cyclic shift + window partition/reverse stay as XLA reshapes; folding them into
    #             the BlockSpec needs an in-kernel sublane-merging relayout with no guaranteed
    #             Mosaic lowering.
    xw = window_partition(xi, ws)                                            # (B*nW, N, C)
    nWB, N, _ = xw.shape

    attn = window_attention(xw.reshape(nWB * N, C), p, num_heads, N, nWB, mask_nw)

    xr = window_reverse(attn.reshape(nWB, N, C), ws, H, W)
    if shift > 0:
        xr = jnp.roll(xr, shift=(shift, shift), axis=(1, 2))
    attn_out = xr.reshape(B * L, C)

    # x = shortcut + norm1(attn_out); x = x + norm2(mlp(x))  -- fused into one Pallas call.
    return block_ffn(shortcut, attn_out, p).reshape(B, L, C)


def swin_basic_layer_forward(image, gps, ape, blocks, mask_nw, cfg):
    n_views, seq_len = cfg["n_views"], cfg["seq_len"]
    vert, horz = cfg["vert_anchors"], cfg["horz_anchors"]
    dim, num_heads, ws = cfg["dim"], cfg["num_heads"], cfg["window_size"]
    H, W = cfg["input_resolution"]

    bz = image.shape[0] // (n_views * seq_len)
    h, w = image.shape[2], image.shape[3]

    img = image.reshape(bz, n_views * seq_len, -1, h, w)
    x = jnp.transpose(img, (0, 1, 3, 4, 2)).reshape(bz, -1, dim)
    x = jnp.concatenate([x, gps], axis=1)
    x = x + ape

    shift = ws // 2
    for i, p in enumerate(blocks):
        sh = 0 if i % 2 == 0 else shift
        x = swin_block(x, p, H, W, ws, sh, num_heads, mask_nw if sh > 0 else None)

    n_img = n_views * seq_len * vert * horz
    gps_out = x[:, n_img:, :]
    xi = x[:, :n_img, :].reshape(bz, n_views * seq_len, vert, horz, dim)
    xi = jnp.transpose(xi, (0, 1, 4, 2, 3)).reshape(bz * n_views * seq_len, -1, h, w)
    return xi, gps_out


# --------------------------------------------------------------------------------------
# Deterministic parameter init + inference-time weight prep
# --------------------------------------------------------------------------------------
def init_params(key, dim, num_heads, depth, mlp_hidden, L):
    keys = jax.random.split(key, 1 + depth)
    ape = 0.02 * jax.random.normal(keys[0], (1, L, dim), jnp.float32)
    blocks = []
    for i in range(depth):
        ks = jax.random.split(keys[1 + i], 8)
        wq = 0.02 * jax.random.normal(ks[0], (dim, dim), jnp.float32)
        wk = 0.02 * jax.random.normal(ks[1], (dim, dim), jnp.float32)
        wv = 0.02 * jax.random.normal(ks[2], (dim, dim), jnp.float32)
        bq = jnp.zeros((1, dim), jnp.float32)
        bk = jnp.zeros((1, dim), jnp.float32)             # k has no bias in Swin-V2 qkv
        bv = jnp.zeros((1, dim), jnp.float32)
        blocks.append(dict(
            wqkv_t=jnp.concatenate([wq, wk, wv], axis=1),          # fused (dim, 3*dim)
            bqkv=jnp.concatenate([bq, bk, bv], axis=1),            # fused (1, 3*dim)
            wp_t=0.02 * jax.random.normal(ks[3], (dim, dim), jnp.float32),
            bp=jnp.zeros((1, dim), jnp.float32),
            logit_scale=jnp.full((num_heads, 1, 1), math.log(10.0), jnp.float32),
            cpb_w1=0.02 * jax.random.normal(ks[4], (512, 2), jnp.float32),
            cpb_b1=jnp.zeros((512,), jnp.float32),
            cpb_w2=0.02 * jax.random.normal(ks[5], (num_heads, 512), jnp.float32),
            g1=jnp.ones((1, dim), jnp.float32), b1n=jnp.zeros((1, dim), jnp.float32),
            w1_t=0.02 * jax.random.normal(ks[6], (dim, mlp_hidden), jnp.float32),
            b1=jnp.zeros((1, mlp_hidden), jnp.float32),
            w2_t=0.02 * jax.random.normal(ks[7], (mlp_hidden, dim), jnp.float32),
            b2=jnp.zeros((1, dim), jnp.float32),
            g2=jnp.ones((1, dim), jnp.float32), b2n=jnp.zeros((1, dim), jnp.float32),
        ))
    return ape, blocks


def prepare_block_params(p, ws, num_heads, dim):
    """Inference weight prep: bf16 MXU weights + precomputed rel-pos bias / logit-scale row."""
    N = ws * ws
    head_dim = dim // num_heads
    rel_index = make_relative_position_index(ws)                         # (N, N) int
    table = jnp.asarray(make_relative_coords_table(ws)).reshape(-1, 2)   # (M, 2)
    hmid = jnp.maximum(table @ p["cpb_w1"].T + p["cpb_b1"], 0.0)
    b = hmid @ p["cpb_w2"].T                                             # (M, nH)
    bias = b[rel_index.reshape(-1)].reshape(N, N, num_heads)
    bias = 16.0 * jax.nn.sigmoid(jnp.transpose(bias, (2, 0, 1)))         # (nH, N, N)
    scale = jnp.exp(jnp.minimum(p["logit_scale"], math.log(100.0))).reshape(-1)
    scale_row = jnp.repeat(scale, head_dim).reshape(1, dim)              # per-channel
    return dict(
        bias=bias.astype(jnp.float32),
        scale_row=scale_row.astype(jnp.float32),
        wqkv_t=p["wqkv_t"].astype(MATMUL_DTYPE), bqkv=p["bqkv"],
        wp_t=p["wp_t"].astype(MATMUL_DTYPE), bp=p["bp"],
        g1=p["g1"], b1n=p["b1n"],
        w1_t=p["w1_t"].astype(MATMUL_DTYPE), b1=p["b1"],
        w2_t=p["w2_t"].astype(MATMUL_DTYPE), b2=p["b2"],
        g2=p["g2"], b2n=p["b2n"],
    )


# --------------------------------------------------------------------------------------
# main
# --------------------------------------------------------------------------------------
if __name__ == "__main__":
    # Small config: n_views*seq_len*vert*horz + seq_len*n_gps = 56 + 8 = 64 = 8*8 tokens.
    cfg = dict(
        n_views=1, seq_len=1, vert_anchors=8, horz_anchors=7, n_gps=8,
        dim=32, num_heads=4, window_size=4, input_resolution=(8, 8),
        depth=2, mlp_ratio=4.0,
    )

    L = cfg["n_views"] * cfg["seq_len"] * cfg["vert_anchors"] * cfg["horz_anchors"] \
        + cfg["seq_len"] * cfg["n_gps"]
    mlp_hidden = int(cfg["dim"] * cfg["mlp_ratio"])

    key = jax.random.PRNGKey(0)
    k_img, k_gps, k_par = jax.random.split(key, 3)

    bz = 2
    # image: NCHW (bz*n_views*seq_len, dim, vert_anchors, horz_anchors)
    image = jax.random.normal(
        k_img, (bz * cfg["n_views"] * cfg["seq_len"], cfg["dim"],
                cfg["vert_anchors"], cfg["horz_anchors"]), jnp.float32)
    # gps tokens: (bz, seq_len*n_gps, dim)
    gps = jax.random.normal(k_gps, (bz, cfg["seq_len"] * cfg["n_gps"], cfg["dim"]), jnp.float32)

    ape, raw_blocks = init_params(k_par, cfg["dim"], cfg["num_heads"], cfg["depth"],
                                  mlp_hidden, L)
    blocks = [prepare_block_params(p, cfg["window_size"], cfg["num_heads"], cfg["dim"])
              for p in raw_blocks]

    H, W = cfg["input_resolution"]
    ws = cfg["window_size"]
    mask_nw = jnp.asarray(make_attn_mask(H, W, ws, ws // 2))             # (nW, N, N), odd blocks

    fwd = jax.jit(functools.partial(swin_basic_layer_forward, cfg=cfg))
    x_out, gps_out = fwd(image, gps, ape, blocks, mask_nw)
    jax.block_until_ready((x_out, gps_out))

    assert x_out.shape == image.shape, x_out.shape
    assert gps_out.shape == gps.shape, gps_out.shape
    assert bool(jnp.all(jnp.isfinite(x_out))) and bool(jnp.all(jnp.isfinite(gps_out)))
    print("KERNEL_OK")
</pallas_src>

<mosaic_0001>
module attributes {stable_mosaic.version = 11 : i64} {
  func.func @body_nomask(%arg0: i32, %arg1: memref<128x32xf32, #tpu.memory_space<vmem>>, %arg2: memref<4x16x16xf32, #tpu.memory_space<vmem>>, %arg3: memref<1x32xf32, #tpu.memory_space<vmem>>, %arg4: memref<32x96xbf16, #tpu.memory_space<vmem>>, %arg5: memref<1x96xf32, #tpu.memory_space<vmem>>, %arg6: memref<32x32xbf16, #tpu.memory_space<vmem>>, %arg7: memref<1x32xf32, #tpu.memory_space<vmem>>, %arg8: memref<128x32xf32, #tpu.memory_space<vmem>>) attributes {dimension_semantics = [#tpu.dimension_semantics<parallel>], iteration_bounds = array<i64: 1>, scalar_prefetch = 0 : i64, scratch_operands = 0 : i64, tpu.core_type = #tpu.core_type<tc>, window_params = [{transform_indices = @transform_0, window_bounds = array<i64: 128, 32>}, {pipeline_mode = #tpu.pipeline_mode<synchronous>, transform_indices = @transform_1, window_bounds = array<i64: 4, 16, 16>}, {pipeline_mode = #tpu.pipeline_mode<synchronous>, transform_indices = @transform_2, window_bounds = array<i64: 1, 32>}, {pipeline_mode = #tpu.pipeline_mode<synchronous>, transform_indices = @transform_3, window_bounds = array<i64: 32, 96>}, {pipeline_mode = #tpu.pipeline_mode<synchronous>, transform_indices = @transform_4, window_bounds = array<i64: 1, 96>}, {pipeline_mode = #tpu.pipeline_mode<synchronous>, transform_indices = @transform_5, window_bounds = array<i64: 32, 32>}, {pipeline_mode = #tpu.pipeline_mode<synchronous>, transform_indices = @transform_6, window_bounds = array<i64: 1, 32>}, {transform_indices = @transform_7, window_bounds = array<i64: 128, 32>}]} {
    %c0 = arith.constant 0 : index
    %c0_0 = arith.constant 0 : index
    %0 = vector.load %arg1[%c0, %c0_0] : memref<128x32xf32, #tpu.memory_space<vmem>>, vector<128x32xf32>
    %1 = arith.truncf %0 : vector<128x32xf32> to vector<128x32xbf16>
    %c0_1 = arith.constant 0 : index
    %c0_2 = arith.constant 0 : index
    %2 = vector.load %arg4[%c0_1, %c0_2] : memref<32x96xbf16, #tpu.memory_space<vmem>>, vector<32x96xbf16>
    %cst = arith.constant dense<0.000000e+00> : vector<128x96xf32>
    %3 = tpu.matmul %1, %2, %cst {dimension_numbers = #tpu.dot_dimension_numbers<[1], [0], [0], [1], [0, 0, 1, 1], [], []>} : vector<128x32xbf16>, vector<32x96xbf16>, vector<128x96xf32> -> vector<128x96xf32>
    %c0_3 = arith.constant 0 : index
    %c0_4 = arith.constant 0 : index
    %4 = vector.load %arg5[%c0_3, %c0_4] : memref<1x96xf32, #tpu.memory_space<vmem>>, vector<1x96xf32>
    %5 = vector.broadcast %4 : vector<1x96xf32> to vector<128x96xf32>
    %6 = arith.addf %3, %5 : vector<128x96xf32>
    %c0_5 = arith.constant 0 : index
    %c0_6 = arith.constant 0 : index
    %7 = vector.load %arg3[%c0_5, %c0_6] : memref<1x32xf32, #tpu.memory_space<vmem>>, vector<1x32xf32>
    %8 = vector.extract_strided_slice %6 {offsets = [0, 0], sizes = [128, 8], strides = [1, 1]} : vector<128x96xf32> to vector<128x8xf32>
    %9 = vector.extract_strided_slice %6 {offsets = [0, 32], sizes = [128, 8], strides = [1, 1]} : vector<128x96xf32> to vector<128x8xf32>
    %10 = vector.extract_strided_slice %6 {offsets = [0, 64], sizes = [128, 8], strides = [1, 1]} : vector<128x96xf32> to vector<128x8xf32>
    %11 = arith.mulf %8, %8 : vector<128x8xf32>
    %cst_7 = arith.constant dense<0.000000e+00> : vector<128xf32>
    %12 = vector.multi_reduction <add>, %11, %cst_7 [1] : vector<128x8xf32> to vector<128xf32>
    %13 = vector.shape_cast %12 : vector<128xf32> to vector<128x1xf32>
    %cst_8 = arith.constant 1.000000e-24 : f32
    %14 = vector.broadcast %cst_8 : f32 to vector<128x1xf32>
    %15 = arith.maximumf %13, %14 : vector<128x1xf32>
    %16 = math.rsqrt %15 : vector<128x1xf32>
    %17 = vector.broadcast %16 : vector<128x1xf32> to vector<128x8xf32>
    %18 = arith.mulf %8, %17 : vector<128x8xf32>
    %19 = vector.extract_strided_slice %7 {offsets = [0, 0], sizes = [1, 8], strides = [1, 1]} : vector<1x32xf32> to vector<1x8xf32>
    %20 = vector.broadcast %19 : vector<1x8xf32> to vector<128x8xf32>
    %21 = arith.mulf %18, %20 : vector<128x8xf32>
    %22 = arith.mulf %9, %9 : vector<128x8xf32>
    %cst_9 = arith.constant dense<0.000000e+00> : vector<128xf32>
    %23 = vector.multi_reduction <add>, %22, %cst_9 [1] : vector<128x8xf32> to vector<128xf32>
    %24 = vector.shape_cast %23 : vector<128xf32> to vector<128x1xf32>
    %cst_10 = arith.constant 1.000000e-24 : f32
    %25 = vector.broadcast %cst_10 : f32 to vector<128x1xf32>
    %26 = arith.maximumf %24, %25 : vector<128x1xf32>
    %27 = math.rsqrt %26 : vector<128x1xf32>
    %28 = vector.broadcast %27 : vector<128x1xf32> to vector<128x8xf32>
    %29 = arith.mulf %9, %28 : vector<128x8xf32>
    %30 = vector.shape_cast %21 : vector<128x8xf32> to vector<8x16x8xf32>
    %31 = vector.shape_cast %29 : vector<128x8xf32> to vector<8x16x8xf32>
    %32 = vector.shape_cast %10 : vector<128x8xf32> to vector<8x16x8xf32>
    %33 = vector.extract_strided_slice %6 {offsets = [0, 8], sizes = [128, 8], strides = [1, 1]} : vector<128x96xf32> to vector<128x8xf32>
    %34 = vector.extract_strided_slice %6 {offsets = [0, 40], sizes = [128, 8], strides = [1, 1]} : vector<128x96xf32> to vector<128x8xf32>
    %35 = vector.extract_strided_slice %6 {offsets = [0, 72], sizes = [128, 8], strides = [1, 1]} : vector<128x96xf32> to vector<128x8xf32>
    %36 = arith.mulf %33, %33 : vector<128x8xf32>
    %cst_11 = arith.constant dense<0.000000e+00> : vector<128xf32>
    %37 = vector.multi_reduction <add>, %36, %cst_11 [1] : vector<128x8xf32> to vector<128xf32>
    %38 = vector.shape_cast %37 : vector<128xf32> to vector<128x1xf32>
    %cst_12 = arith.constant 1.000000e-24 : f32
    %39 = vector.broadcast %cst_12 : f32 to vector<128x1xf32>
    %40 = arith.maximumf %38, %39 : vector<128x1xf32>
    %41 = math.rsqrt %40 : vector<128x1xf32>
    %42 = vector.broadcast %41 : vector<128x1xf32> to vector<128x8xf32>
    %43 = arith.mulf %33, %42 : vector<128x8xf32>
    %44 = vector.extract_strided_slice %7 {offsets = [0, 8], sizes = [1, 8], strides = [1, 1]} : vector<1x32xf32> to vector<1x8xf32>
    %45 = vector.broadcast %44 : vector<1x8xf32> to vector<128x8xf32>
    %46 = arith.mulf %43, %45 : vector<128x8xf32>
    %47 = arith.mulf %34, %34 : vector<128x8xf32>
    %cst_13 = arith.constant dense<0.000000e+00> : vector<128xf32>
    %48 = vector.multi_reduction <add>, %47, %cst_13 [1] : vector<128x8xf32> to vector<128xf32>
    %49 = vector.shape_cast %48 : vector<128xf32> to vector<128x1xf32>
    %cst_14 = arith.constant 1.000000e-24 : f32
    %50 = vector.broadcast %cst_14 : f32 to vector<128x1xf32>
    %51 = arith.maximumf %49, %50 : vector<128x1xf32>
    %52 = math.rsqrt %51 : vector<128x1xf32>
    %53 = vector.broadcast %52 : vector<128x1xf32> to vector<128x8xf32>
    %54 = arith.mulf %34, %53 : vector<128x8xf32>
    %55 = vector.shape_cast %46 : vector<128x8xf32> to vector<8x16x8xf32>
    %56 = vector.shape_cast %54 : vector<128x8xf32> to vector<8x16x8xf32>
    %57 = vector.shape_cast %35 : vector<128x8xf32> to vector<8x16x8xf32>
    %58 = vector.extract_strided_slice %6 {offsets = [0, 16], sizes = [128, 8], strides = [1, 1]} : vector<128x96xf32> to vector<128x8xf32>
    %59 = vector.extract_strided_slice %6 {offsets = [0, 48], sizes = [128, 8], strides = [1, 1]} : vector<128x96xf32> to vector<128x8xf32>
    %60 = vector.extract_strided_slice %6 {offsets = [0, 80], sizes = [128, 8], strides = [1, 1]} : vector<128x96xf32> to vector<128x8xf32>
    %61 = arith.mulf %58, %58 : vector<128x8xf32>
    %cst_15 = arith.constant dense<0.000000e+00> : vector<128xf32>
    %62 = vector.multi_reduction <add>, %61, %cst_15 [1] : vector<128x8xf32> to vector<128xf32>
    %63 = vector.shape_cast %62 : vector<128xf32> to vector<128x1xf32>
    %cst_16 = arith.constant 1.000000e-24 : f32
    %64 = vector.broadcast %cst_16 : f32 to vector<128x1xf32>
    %65 = arith.maximumf %63, %64 : vector<128x1xf32>
    %66 = math.rsqrt %65 : vector<128x1xf32>
    %67 = vector.broadcast %66 : vector<128x1xf32> to vector<128x8xf32>
    %68 = arith.mulf %58, %67 : vector<128x8xf32>
    %69 = vector.extract_strided_slice %7 {offsets = [0, 16], sizes = [1, 8], strides = [1, 1]} : vector<1x32xf32> to vector<1x8xf32>
    %70 = vector.broadcast %69 : vector<1x8xf32> to vector<128x8xf32>
    %71 = arith.mulf %68, %70 : vector<128x8xf32>
    %72 = arith.mulf %59, %59 : vector<128x8xf32>
    %cst_17 = arith.constant dense<0.000000e+00> : vector<128xf32>
    %73 = vector.multi_reduction <add>, %72, %cst_17 [1] : vector<128x8xf32> to vector<128xf32>
    %74 = vector.shape_cast %73 : vector<128xf32> to vector<128x1xf32>
    %cst_18 = arith.constant 1.000000e-24 : f32
    %75 = vector.broadcast %cst_18 : f32 to vector<128x1xf32>
    %76 = arith.maximumf %74, %75 : vector<128x1xf32>
    %77 = math.rsqrt %76 : vector<128x1xf32>
    %78 = vector.broadcast %77 : vector<128x1xf32> to vector<128x8xf32>
    %79 = arith.mulf %59, %78 : vector<128x8xf32>
    %80 = vector.shape_cast %71 : vector<128x8xf32> to vector<8x16x8xf32>
    %81 = vector.shape_cast %79 : vector<128x8xf32> to vector<8x16x8xf32>
    %82 = vector.shape_cast %60 : vector<128x8xf32> to vector<8x16x8xf32>
    %83 = vector.extract_strided_slice %6 {offsets = [0, 24], sizes = [128, 8], strides = [1, 1]} : vector<128x96xf32> to vector<128x8xf32>
    %84 = vector.extract_strided_slice %6 {offsets = [0, 56], sizes = [128, 8], strides = [1, 1]} : vector<128x96xf32> to vector<128x8xf32>
    %85 = vector.extract_strided_slice %6 {offsets = [0, 88], sizes = [128, 8], strides = [1, 1]} : vector<128x96xf32> to vector<128x8xf32>
    %86 = arith.mulf %83, %83 : vector<128x8xf32>
    %cst_19 = arith.constant dense<0.000000e+00> : vector<128xf32>
    %87 = vector.multi_reduction <add>, %86, %cst_19 [1] : vector<128x8xf32> to vector<128xf32>
    %88 = vector.shape_cast %87 : vector<128xf32> to vector<128x1xf32>
    %cst_20 = arith.constant 1.000000e-24 : f32
    %89 = vector.broadcast %cst_20 : f32 to vector<128x1xf32>
    %90 = arith.maximumf %88, %89 : vector<128x1xf32>
    %91 = math.rsqrt %90 : vector<128x1xf32>
    %92 = vector.broadcast %91 : vector<128x1xf32> to vector<128x8xf32>
    %93 = arith.mulf %83, %92 : vector<128x8xf32>
    %94 = vector.extract_strided_slice %7 {offsets = [0, 24], sizes = [1, 8], strides = [1, 1]} : vector<1x32xf32> to vector<1x8xf32>
    %95 = vector.broadcast %94 : vector<1x8xf32> to vector<128x8xf32>
    %96 = arith.mulf %93, %95 : vector<128x8xf32>
    %97 = arith.mulf %84, %84 : vector<128x8xf32>
    %cst_21 = arith.constant dense<0.000000e+00> : vector<128xf32>
    %98 = vector.multi_reduction <add>, %97, %cst_21 [1] : vector<128x8xf32> to vector<128xf32>
    %99 = vector.shape_cast %98 : vector<128xf32> to vector<128x1xf32>
    %cst_22 = arith.constant 1.000000e-24 : f32
    %100 = vector.broadcast %cst_22 : f32 to vector<128x1xf32>
    %101 = arith.maximumf %99, %100 : vector<128x1xf32>
    %102 = math.rsqrt %101 : vector<128x1xf32>
    %103 = vector.broadcast %102 : vector<128x1xf32> to vector<128x8xf32>
    %104 = arith.mulf %84, %103 : vector<128x8xf32>
    %105 = vector.shape_cast %96 : vector<128x8xf32> to vector<8x16x8xf32>
    %106 = vector.shape_cast %104 : vector<128x8xf32> to vector<8x16x8xf32>
    %107 = vector.shape_cast %85 : vector<128x8xf32> to vector<8x16x8xf32>
    %108 = tpu.concatenate %30, %55, %80, %105 in 0 : vector<8x16x8xf32>, vector<8x16x8xf32>, vector<8x16x8xf32>, vector<8x16x8xf32> -> vector<32x16x8xf32>
    %109 = tpu.concatenate %31, %56, %81, %106 in 0 : vector<8x16x8xf32>, vector<8x16x8xf32>, vector<8x16x8xf32>, vector<8x16x8xf32> -> vector<32x16x8xf32>
    %110 = tpu.concatenate %32, %57, %82, %107 in 0 : vector<8x16x8xf32>, vector<8x16x8xf32>, vector<8x16x8xf32>, vector<8x16x8xf32> -> vector<32x16x8xf32>
    %111 = arith.truncf %108 : vector<32x16x8xf32> to vector<32x16x8xbf16>
    %112 = arith.truncf %109 : vector<32x16x8xf32> to vector<32x16x8xbf16>
    "tpu.trace_start"() <{level = 10 : i32, message = "gnd,gmd->gnm"}> : () -> ()
    %cst_23 = arith.constant dense<0.000000e+00> : vector<32x16x16xf32>
    %113 = tpu.matmul %111, %112, %cst_23 {dimension_numbers = #tpu.dot_dimension_numbers<[2], [2], [1], [1], [0, 0, 0, 1, 1, 1], [0], [0]>} : vector<32x16x8xbf16>, vector<32x16x8xbf16>, vector<32x16x16xf32> -> vector<32x16x16xf32>
    "tpu.trace_stop"() : () -> ()
    %114 = vector.shape_cast %113 : vector<32x16x16xf32> to vector<4x8x16x16xf32>
    %c0_24 = arith.constant 0 : index
    %c0_25 = arith.constant 0 : index
    %c0_26 = arith.constant 0 : index
    %115 = vector.load %arg2[%c0_24, %c0_25, %c0_26] : memref<4x16x16xf32, #tpu.memory_space<vmem>>, vector<4x16x16xf32>
    %116 = vector.shape_cast %115 : vector<4x16x16xf32> to vector<4x1x16x16xf32>
    %117 = vector.broadcast %116 : vector<4x1x16x16xf32> to vector<4x8x16x16xf32>
    %118 = arith.addf %114, %117 : vector<4x8x16x16xf32>
    %119 = vector.shape_cast %118 : vector<4x8x16x16xf32> to vector<32x16x16xf32>
    %cst_27 = arith.constant dense<0xFF800000> : vector<32x16xf32>
    %120 = vector.multi_reduction <maximumf>, %119, %cst_27 [2] : vector<32x16x16xf32> to vector<32x16xf32>
    %121 = vector.shape_cast %120 : vector<32x16xf32> to vector<32x16x1xf32>
    %122 = vector.broadcast %121 : vector<32x16x1xf32> to vector<32x16x16xf32>
    %123 = arith.subf %119, %122 : vector<32x16x16xf32>
    %124 = math.exp %123 : vector<32x16x16xf32>
    %cst_28 = arith.constant dense<0.000000e+00> : vector<32x16xf32>
    %125 = vector.multi_reduction <add>, %124, %cst_28 [2] : vector<32x16x16xf32> to vector<32x16xf32>
    %126 = vector.shape_cast %125 : vector<32x16xf32> to vector<32x16x1xf32>
    %127 = tpu.reciprocal %126 {approx = true} : vector<32x16x1xf32> -> vector<32x16x1xf32>
    %128 = vector.broadcast %127 : vector<32x16x1xf32> to vector<32x16x16xf32>
    %129 = arith.mulf %124, %128 : vector<32x16x16xf32>
    %130 = arith.truncf %129 : vector<32x16x16xf32> to vector<32x16x16xbf16>
    %131 = arith.truncf %110 : vector<32x16x8xf32> to vector<32x16x8xbf16>
    "tpu.trace_start"() <{level = 10 : i32, message = "gnm,gmd->gnd"}> : () -> ()
    %cst_29 = arith.constant dense<0.000000e+00> : vector<32x16x8xf32>
    %132 = tpu.matmul %130, %131, %cst_29 {dimension_numbers = #tpu.dot_dimension_numbers<[2], [1], [1], [2], [0, 0, 0, 1, 1, 2], [0], [0]>} : vector<32x16x16xbf16>, vector<32x16x8xbf16>, vector<32x16x8xf32> -> vector<32x16x8xf32>
    "tpu.trace_stop"() : () -> ()
    %133 = vector.extract_strided_slice %132 {offsets = [0, 0, 0], sizes = [8, 16, 8], strides = [1, 1, 1]} : vector<32x16x8xf32> to vector<8x16x8xf32>
    %134 = vector.shape_cast %133 : vector<8x16x8xf32> to vector<128x8xf32>
    %135 = vector.extract_strided_slice %132 {offsets = [8, 0, 0], sizes = [8, 16, 8], strides = [1, 1, 1]} : vector<32x16x8xf32> to vector<8x16x8xf32>
    %136 = vector.shape_cast %135 : vector<8x16x8xf32> to vector<128x8xf32>
    %137 = vector.extract_strided_slice %132 {offsets = [16, 0, 0], sizes = [8, 16, 8], strides = [1, 1, 1]} : vector<32x16x8xf32> to vector<8x16x8xf32>
    %138 = vector.shape_cast %137 : vector<8x16x8xf32> to vector<128x8xf32>
    %139 = vector.extract_strided_slice %132 {offsets = [24, 0, 0], sizes = [8, 16, 8], strides = [1, 1, 1]} : vector<32x16x8xf32> to vector<8x16x8xf32>
    %140 = vector.shape_cast %139 : vector<8x16x8xf32> to vector<128x8xf32>
    %141 = tpu.concatenate %134, %136, %138, %140 in 1 : vector<128x8xf32>, vector<128x8xf32>, vector<128x8xf32>, vector<128x8xf32> -> vector<128x32xf32>
    %142 = arith.truncf %141 : vector<128x32xf32> to vector<128x32xbf16>
    %c0_30 = arith.constant 0 : index
    %c0_31 = arith.constant 0 : index
    %143 = vector.load %arg6[%c0_30, %c0_31] : memref<32x32xbf16, #tpu.memory_space<vmem>>, vector<32x32xbf16>
    %cst_32 = arith.constant dense<0.000000e+00> : vector<128x32xf32>
    %144 = tpu.matmul %142, %143, %cst_32 {dimension_numbers = #tpu.dot_dimension_numbers<[1], [0], [0], [1], [0, 0, 1, 1], [], []>} : vector<128x32xbf16>, vector<32x32xbf16>, vector<128x32xf32> -> vector<128x32xf32>
    %c0_33 = arith.constant 0 : index
    %c0_34 = arith.constant 0 : index
    %145 = vector.load %arg7[%c0_33, %c0_34] : memref<1x32xf32, #tpu.memory_space<vmem>>, vector<1x32xf32>
    %146 = vector.broadcast %145 : vector<1x32xf32> to vector<128x32xf32>
    %147 = arith.addf %144, %146 : vector<128x32xf32>
    %c0_35 = arith.constant 0 : index
    %c0_36 = arith.constant 0 : index
    %148 = vector.load %arg8[%c0_35, %c0_36] : memref<128x32xf32, #tpu.memory_space<vmem>>, vector<128x32xf32>
    tpu.vector_store %arg8[%c0_35, %c0_36], %147 {strides = array<i32>} : memref<128x32xf32, #tpu.memory_space<vmem>>, vector<128x32xf32>,
    return
  }
  func.func @transform_0(%arg0: i32) -> (i32, i32) {
    %c0_i32 = arith.constant 0 : i32
    %c0_i32_0 = arith.constant 0 : i32
    return %arg0, %c0_i32 : i32, i32
  }
  func.func @transform_1(%arg0: i32) -> (i32, i32, i32) {
    %c0_i32 = arith.constant 0 : i32
    %c0_i32_0 = arith.constant 0 : i32
    %c0_i32_1 = arith.constant 0 : i32
    %c0_i32_2 = arith.constant 0 : i32
    return %c0_i32, %c0_i32_0, %c0_i32_1 : i32, i32, i32
  }
  func.func @transform_2(%arg0: i32) -> (i32, i32) {
    %c0_i32 = arith.constant 0 : i32
    %c0_i32_0 = arith.constant 0 : i32
    %c0_i32_1 = arith.constant 0 : i32
    return %c0_i32, %c0_i32_0 : i32, i32
  }
  func.func @transform_3(%arg0: i32) -> (i32, i32) {
    %c0_i32 = arith.constant 0 : i32
    %c0_i32_0 = arith.constant 0 : i32
    %c0_i32_1 = arith.constant 0 : i32
    return %c0_i32, %c0_i32_0 : i32, i32
  }
  func.func @transform_4(%arg0: i32) -> (i32, i32) {
    %c0_i32 = arith.constant 0 : i32
    %c0_i32_0 = arith.constant 0 : i32
    %c0_i32_1 = arith.constant 0 : i32
    return %c0_i32, %c0_i32_0 : i32, i32
  }
  func.func @transform_5(%arg0: i32) -> (i32, i32) {
    %c0_i32 = arith.constant 0 : i32
    %c0_i32_0 = arith.constant 0 : i32
    %c0_i32_1 = arith.constant 0 : i32
    return %c0_i32, %c0_i32_0 : i32, i32
  }
  func.func @transform_6(%arg0: i32) -> (i32, i32) {
    %c0_i32 = arith.constant 0 : i32
    %c0_i32_0 = arith.constant 0 : i32
    %c0_i32_1 = arith.constant 0 : i32
    return %c0_i32, %c0_i32_0 : i32, i32
  }
  func.func @transform_7(%arg0: i32) -> (i32, i32) {
    %c0_i32 = arith.constant 0 : i32
    %c0_i32_0 = arith.constant 0 : i32
    return %arg0, %c0_i32 : i32, i32
  }
}

module attributes {stable_mosaic.version = 11 : i64} {
  func.func @_block_ffn_kernel(%arg0: i32, %arg1: memref<128x32xf32, #tpu.memory_space<vmem>>, %arg2: memref<128x32xf32, #tpu.memory_space<vmem>>, %arg3: memref<1x32xf32, #tpu.memory_space<vmem>>, %arg4: memref<1x32xf32, #tpu.memory_space<vmem>>, %arg5: memref<32x128xbf16, #tpu.memory_space<vmem>>, %arg6: memref<1x128xf32, #tpu.memory_space<vmem>>, %arg7: memref<128x32xbf16, #tpu.memory_space<vmem>>, %arg8: memref<1x32xf32, #tpu.memory_space<vmem>>, %arg9: memref<1x32xf32, #tpu.memory_space<vmem>>, %arg10: memref<1x32xf32, #tpu.memory_space<vmem>>, %arg11: memref<128x32xf32, #tpu.memory_space<vmem>>) attributes {dimension_semantics = [#tpu.dimension_semantics<parallel>], iteration_bounds = array<i64: 1>, scalar_prefetch = 0 : i64, scratch_operands = 0 : i64, tpu.core_type = #tpu.core_type<tc>, window_params = [{transform_indices = @transform_0, window_bounds = array<i64: 128, 32>}, {transform_indices = @transform_1, window_bounds = array<i64: 128, 32>}, {pipeline_mode = #tpu.pipeline_mode<synchronous>, transform_indices = @transform_2, window_bounds = array<i64: 1, 32>}, {pipeline_mode = #tpu.pipeline_mode<synchronous>, transform_indices = @transform_3, window_bounds = array<i64: 1, 32>}, {pipeline_mode = #tpu.pipeline_mode<synchronous>, transform_indices = @transform_4, window_bounds = array<i64: 32, 128>}, {pipeline_mode = #tpu.pipeline_mode<synchronous>, transform_indices = @transform_5, window_bounds = array<i64: 1, 128>}, {pipeline_mode = #tpu.pipeline_mode<synchronous>, transform_indices = @transform_6, window_bounds = array<i64: 128, 32>}, {pipeline_mode = #tpu.pipeline_mode<synchronous>, transform_indices = @transform_7, window_bounds = array<i64: 1, 32>}, {pipeline_mode = #tpu.pipeline_mode<synchronous>, transform_indices = @transform_8, window_bounds = array<i64: 1, 32>}, {pipeline_mode = #tpu.pipeline_mode<synchronous>, transform_indices = @transform_9, window_bounds = array<i64: 1, 32>}, {transform_indices = @transform_10, window_bounds = array<i64: 128, 32>}]} {
    %c0 = arith.constant 0 : index
    %c0_0 = arith.constant 0 : index
    %0 = vector.load %arg2[%c0, %c0_0] : memref<128x32xf32, #tpu.memory_space<vmem>>, vector<128x32xf32>
    %cst = arith.constant dense<0.000000e+00> : vector<128xf32>
    %1 = vector.multi_reduction <add>, %0, %cst [1] : vector<128x32xf32> to vector<128xf32>
    %2 = vector.shape_cast %1 : vector<128xf32> to vector<128x1xf32>
    %cst_1 = arith.constant 3.200000e+01 : f32
    %3 = vector.broadcast %cst_1 : f32 to vector<128x1xf32>
    %4 = arith.divf %2, %3 : vector<128x1xf32>
    %5 = vector.broadcast %4 : vector<128x1xf32> to vector<128x32xf32>
    %6 = arith.subf %0, %5 : vector<128x32xf32>
    %7 = arith.mulf %6, %6 : vector<128x32xf32>
    %cst_2 = arith.constant dense<0.000000e+00> : vector<128xf32>
    %8 = vector.multi_reduction <add>, %7, %cst_2 [1] : vector<128x32xf32> to vector<128xf32>
    %9 = vector.shape_cast %8 : vector<128xf32> to vector<128x1xf32>
    %cst_3 = arith.constant 3.200000e+01 : f32
    %10 = vector.broadcast %cst_3 : f32 to vector<128x1xf32>
    %11 = arith.divf %9, %10 : vector<128x1xf32>
    %12 = vector.broadcast %4 : vector<128x1xf32> to vector<128x32xf32>
    %13 = arith.subf %0, %12 : vector<128x32xf32>
    %cst_4 = arith.constant 9.99999974E-6 : f32
    %14 = vector.broadcast %cst_4 : f32 to vector<128x1xf32>
    %15 = arith.addf %11, %14 : vector<128x1xf32>
    %16 = math.rsqrt %15 : vector<128x1xf32>
    %17 = vector.broadcast %16 : vector<128x1xf32> to vector<128x32xf32>
    %18 = arith.mulf %13, %17 : vector<128x32xf32>
    %c0_5 = arith.constant 0 : index
    %c0_6 = arith.constant 0 : index
    %19 = vector.load %arg1[%c0_5, %c0_6] : memref<128x32xf32, #tpu.memory_space<vmem>>, vector<128x32xf32>
    %c0_7 = arith.constant 0 : index
    %c0_8 = arith.constant 0 : index
    %20 = vector.load %arg3[%c0_7, %c0_8] : memref<1x32xf32, #tpu.memory_space<vmem>>, vector<1x32xf32>
    %21 = vector.broadcast %20 : vector<1x32xf32> to vector<128x32xf32>
    %22 = arith.mulf %18, %21 : vector<128x32xf32>
    %23 = arith.addf %19, %22 : vector<128x32xf32>
    %c0_9 = arith.constant 0 : index
    %c0_10 = arith.constant 0 : index
    %24 = vector.load %arg4[%c0_9, %c0_10] : memref<1x32xf32, #tpu.memory_space<vmem>>, vector<1x32xf32>
    %25 = vector.broadcast %24 : vector<1x32xf32> to vector<128x32xf32>
    %26 = arith.addf %23, %25 : vector<128x32xf32>
    %27 = arith.truncf %26 : vector<128x32xf32> to vector<128x32xbf16>
    %c0_11 = arith.constant 0 : index
    %c0_12 = arith.constant 0 : index
    %28 = vector.load %arg5[%c0_11, %c0_12] : memref<32x128xbf16, #tpu.memory_space<vmem>>, vector<32x128xbf16>
    %cst_13 = arith.constant dense<0.000000e+00> : vector<128x128xf32>
    %29 = tpu.matmul %27, %28, %cst_13 {dimension_numbers = #tpu.dot_dimension_numbers<[1], [0], [0], [1], [0, 0, 1, 1], [], []>} : vector<128x32xbf16>, vector<32x128xbf16>, vector<128x128xf32> -> vector<128x128xf32>
    %c0_14 = arith.constant 0 : index
    %c0_15 = arith.constant 0 : index
    %30 = vector.load %arg6[%c0_14, %c0_15] : memref<1x128xf32, #tpu.memory_space<vmem>>, vector<1x128xf32>
    %31 = vector.broadcast %30 : vector<1x128xf32> to vector<128x128xf32>
    %32 = arith.addf %29, %31 : vector<128x128xf32>
    %cst_16 = arith.constant 5.000000e-01 : f32
    %33 = vector.broadcast %cst_16 : f32 to vector<128x128xf32>
    %34 = arith.mulf %33, %32 : vector<128x128xf32>
    %cst_17 = arith.constant 0.707106769 : f32
    %35 = vector.broadcast %cst_17 : f32 to vector<128x128xf32>
    %36 = arith.mulf %32, %35 : vector<128x128xf32>
    %37 = math.absf %36 : vector<128x128xf32>
    %cst_18 = arith.constant 0.327591091 : f32
    %38 = vector.broadcast %cst_18 : f32 to vector<128x128xf32>
    %39 = arith.mulf %38, %37 : vector<128x128xf32>
    %cst_19 = arith.constant 1.000000e+00 : f32
    %40 = vector.broadcast %cst_19 : f32 to vector<128x128xf32>
    %41 = arith.addf %40, %39 : vector<128x128xf32>
    %cst_20 = arith.constant 1.000000e+00 : f32
    %42 = vector.broadcast %cst_20 : f32 to vector<128x128xf32>
    %43 = arith.divf %42, %41 : vector<128x128xf32>
    %cst_21 = arith.constant 1.06140542 : f32
    %44 = vector.broadcast %cst_21 : f32 to vector<128x128xf32>
    %45 = arith.mulf %44, %43 : vector<128x128xf32>
    %cst_22 = arith.constant 1.45315206 : f32
    %46 = vector.broadcast %cst_22 : f32 to vector<128x128xf32>
    %47 = arith.subf %45, %46 : vector<128x128xf32>
    %48 = arith.mulf %47, %43 : vector<128x128xf32>
    %cst_23 = arith.constant 1.42141378 : f32
    %49 = vector.broadcast %cst_23 : f32 to vector<128x128xf32>
    %50 = arith.addf %48, %49 : vector<128x128xf32>
    %51 = arith.mulf %50, %43 : vector<128x128xf32>
    %cst_24 = arith.constant 0.284496725 : f32
    %52 = vector.broadcast %cst_24 : f32 to vector<128x128xf32>
    %53 = arith.subf %51, %52 : vector<128x128xf32>
    %54 = arith.mulf %53, %43 : vector<128x128xf32>
    %cst_25 = arith.constant 0.254829586 : f32
    %55 = vector.broadcast %cst_25 : f32 to vector<128x128xf32>
    %56 = arith.addf %54, %55 : vector<128x128xf32>
    %57 = arith.mulf %56, %43 : vector<128x128xf32>
    %cst_26 = arith.constant 0.000000e+00 : f32
    %58 = vector.broadcast %cst_26 : f32 to vector<128x128xf32>
    %59 = arith.subf %58, %37 : vector<128x128xf32>
    %60 = arith.mulf %59, %37 : vector<128x128xf32>
    %61 = math.exp %60 : vector<128x128xf32>
    %62 = arith.mulf %57, %61 : vector<128x128xf32>
    %cst_27 = arith.constant 1.000000e+00 : f32
    %63 = vector.broadcast %cst_27 : f32 to vector<128x128xf32>
    %64 = arith.subf %63, %62 : vector<128x128xf32>
    %cst_28 = arith.constant 0.000000e+00 : f32
    %65 = vector.broadcast %cst_28 : f32 to vector<128x128xf32>
    %66 = arith.cmpf olt, %36, %65 : vector<128x128xf32>
    %cst_29 = arith.constant 0.000000e+00 : f32
    %67 = vector.broadcast %cst_29 : f32 to vector<128x128xf32>
    %68 = arith.subf %67, %64 : vector<128x128xf32>
    %69 = arith.select %66, %68, %64 : vector<128x128xi1>, vector<128x128xf32>
    %cst_30 = arith.constant 1.000000e+00 : f32
    %70 = vector.broadcast %cst_30 : f32 to vector<128x128xf32>
    %71 = arith.addf %70, %69 : vector<128x128xf32>
    %72 = arith.mulf %34, %71 : vector<128x128xf32>
    %73 = arith.truncf %72 : vector<128x128xf32> to vector<128x128xbf16>
    %c0_31 = arith.constant 0 : index
    %c0_32 = arith.constant 0 : index
    %74 = vector.load %arg7[%c0_31, %c0_32] : memref<128x32xbf16, #tpu.memory_space<vmem>>, vector<128x32xbf16>
    %cst_33 = arith.constant dense<0.000000e+00> : vector<128x32xf32>
    %75 = tpu.matmul %73, %74, %cst_33 {dimension_numbers = #tpu.dot_dimension_numbers<[1], [0], [0], [1], [0, 0, 1, 1], [], []>} : vector<128x128xbf16>, vector<128x32xbf16>, vector<128x32xf32> -> vector<128x32xf32>
    %c0_34 = arith.constant 0 : index
    %c0_35 = arith.constant 0 : index
    %76 = vector.load %arg8[%c0_34, %c0_35] : memref<1x32xf32, #tpu.memory_space<vmem>>, vector<1x32xf32>
    %77 = vector.broadcast %76 : vector<1x32xf32> to vector<128x32xf32>
    %78 = arith.addf %75, %77 : vector<128x32xf32>
    %cst_36 = arith.constant dense<0.000000e+00> : vector<128xf32>
    %79 = vector.multi_reduction <add>, %78, %cst_36 [1] : vector<128x32xf32> to vector<128xf32>
    %80 = vector.shape_cast %79 : vector<128xf32> to vector<128x1xf32>
    %cst_37 = arith.constant 3.200000e+01 : f32
    %81 = vector.broadcast %cst_37 : f32 to vector<128x1xf32>
    %82 = arith.divf %80, %81 : vector<128x1xf32>
    %83 = vector.broadcast %82 : vector<128x1xf32> to vector<128x32xf32>
    %84 = arith.subf %78, %83 : vector<128x32xf32>
    %85 = arith.mulf %84, %84 : vector<128x32xf32>
    %cst_38 = arith.constant dense<0.000000e+00> : vector<128xf32>
    %86 = vector.multi_reduction <add>, %85, %cst_38 [1] : vector<128x32xf32> to vector<128xf32>
    %87 = vector.shape_cast %86 : vector<128xf32> to vector<128x1xf32>
    %cst_39 = arith.constant 3.200000e+01 : f32
    %88 = vector.broadcast %cst_39 : f32 to vector<128x1xf32>
    %89 = arith.divf %87, %88 : vector<128x1xf32>
    %90 = vector.broadcast %82 : vector<128x1xf32> to vector<128x32xf32>
    %91 = arith.subf %78, %90 : vector<128x32xf32>
    %cst_40 = arith.constant 9.99999974E-6 : f32
    %92 = vector.broadcast %cst_40 : f32 to vector<128x1xf32>
    %93 = arith.addf %89, %92 : vector<128x1xf32>
    %94 = math.rsqrt %93 : vector<128x1xf32>
    %95 = vector.broadcast %94 : vector<128x1xf32> to vector<128x32xf32>
    %96 = arith.mulf %91, %95 : vector<128x32xf32>
    %c0_41 = arith.constant 0 : index
    %c0_42 = arith.constant 0 : index
    %97 = vector.load %arg9[%c0_41, %c0_42] : memref<1x32xf32, #tpu.memory_space<vmem>>, vector<1x32xf32>
    %98 = vector.broadcast %97 : vector<1x32xf32> to vector<128x32xf32>
    %99 = arith.mulf %96, %98 : vector<128x32xf32>
    %100 = arith.addf %26, %99 : vector<128x32xf32>
    %c0_43 = arith.constant 0 : index
    %c0_44 = arith.constant 0 : index
    %101 = vector.load %arg10[%c0_43, %c0_44] : memref<1x32xf32, #tpu.memory_space<vmem>>, vector<1x32xf32>
    %102 = vector.broadcast %101 : vector<1x32xf32> to vector<128x32xf32>
    %103 = arith.addf %100, %102 : vector<128x32xf32>
    %c0_45 = arith.constant 0 : index
    %c0_46 = arith.constant 0 : index
    %104 = vector.load %arg11[%c0_45, %c0_46] : memref<128x32xf32, #tpu.memory_space<vmem>>, vector<128x32xf32>
    tpu.vector_store %arg11[%c0_45, %c0_46], %103 {strides = array<i32>} : memref<128x32xf32, #tpu.memory_space<vmem>>, vector<128x32xf32>,
    return
  }
  func.func @transform_0(%arg0: i32) -> (i32, i32) {
    %c0_i32 = arith.constant 0 : i32
    %c0_i32_0 = arith.constant 0 : i32
    return %arg0, %c0_i32 : i32, i32
  }
  func.func @transform_1(%arg0: i32) -> (i32, i32) {
    %c0_i32 = arith.constant 0 : i32
    %c0_i32_0 = arith.constant 0 : i32
    return %arg0, %c0_i32 : i32, i32
  }
  func.func @transform_2(%arg0: i32) -> (i32, i32) {
    %c0_i32 = arith.constant 0 : i32
    %c0_i32_0 = arith.constant 0 : i32
    %c0_i32_1 = arith.constant 0 : i32
    return %c0_i32, %c0_i32_0 : i32, i32
  }
  func.func @transform_3(%arg0: i32) -> (i32, i32) {
    %c0_i32 = arith.constant 0 : i32
    %c0_i32_0 = arith.constant 0 : i32
    %c0_i32_1 = arith.constant 0 : i32
    return %c0_i32, %c0_i32_0 : i32, i32
  }
  func.func @transform_4(%arg0: i32) -> (i32, i32) {
    %c0_i32 = arith.constant 0 : i32
    %c0_i32_0 = arith.constant 0 : i32
    %c0_i32_1 = arith.constant 0 : i32
    return %c0_i32, %c0_i32_0 : i32, i32
  }
  func.func @transform_5(%arg0: i32) -> (i32, i32) {
    %c0_i32 = arith.constant 0 : i32
    %c0_i32_0 = arith.constant 0 : i32
    %c0_i32_1 = arith.constant 0 : i32
    return %c0_i32, %c0_i32_0 : i32, i32
  }
  func.func @transform_6(%arg0: i32) -> (i32, i32) {
    %c0_i32 = arith.constant 0 : i32
    %c0_i32_0 = arith.constant 0 : i32
    %c0_i32_1 = arith.constant 0 : i32
    return %c0_i32, %c0_i32_0 : i32, i32
  }
  func.func @transform_7(%arg0: i32) -> (i32, i32) {
    %c0_i32 = arith.constant 0 : i32
    %c0_i32_0 = arith.constant 0 : i32
    %c0_i32_1 = arith.constant 0 : i32
    return %c0_i32, %c0_i32_0 : i32, i32
  }
  func.func @transform_8(%arg0: i32) -> (i32, i32) {
    %c0_i32 = arith.constant 0 : i32
    %c0_i32_0 = arith.constant 0 : i32
    %c0_i32_1 = arith.constant 0 : i32
    return %c0_i32, %c0_i32_0 : i32, i32
  }
  func.func @transform_9(%arg0: i32) -> (i32, i32) {
    %c0_i32 = arith.constant 0 : i32
    %c0_i32_0 = arith.constant 0 : i32
    %c0_i32_1 = arith.constant 0 : i32
    return %c0_i32, %c0_i32_0 : i32, i32
  }
  func.func @transform_10(%arg0: i32) -> (i32, i32) {
    %c0_i32 = arith.constant 0 : i32
    %c0_i32_0 = arith.constant 0 : i32
    return %arg0, %c0_i32 : i32, i32
  }
}

module attributes {stable_mosaic.version = 11 : i64} {
  func.func @_window_attention_body(%arg0: i32, %arg1: memref<64x32xf32, #tpu.memory_space<vmem>>, %arg2: memref<4x16x16xf32, #tpu.memory_space<vmem>>, %arg3: memref<4x16x16xf32, #tpu.memory_space<vmem>>, %arg4: memref<1x32xf32, #tpu.memory_space<vmem>>, %arg5: memref<32x96xbf16, #tpu.memory_space<vmem>>, %arg6: memref<1x96xf32, #tpu.memory_space<vmem>>, %arg7: memref<32x32xbf16, #tpu.memory_space<vmem>>, %arg8: memref<1x32xf32, #tpu.memory_space<vmem>>, %arg9: memref<64x32xf32, #tpu.memory_space<vmem>>) attributes {dimension_semantics = [#tpu.dimension_semantics<parallel>], iteration_bounds = array<i64: 2>, scalar_prefetch = 0 : i64, scratch_operands = 0 : i64, tpu.core_type = #tpu.core_type<tc>, window_params = [{transform_indices = @transform_0, window_bounds = array<i64: 64, 32>}, {pipeline_mode = #tpu.pipeline_mode<synchronous>, transform_indices = @transform_1, window_bounds = array<i64: 4, 16, 16>}, {pipeline_mode = #tpu.pipeline_mode<synchronous>, transform_indices = @transform_2, window_bounds = array<i64: 4, 16, 16>}, {pipeline_mode = #tpu.pipeline_mode<synchronous>, transform_indices = @transform_3, window_bounds = array<i64: 1, 32>}, {pipeline_mode = #tpu.pipeline_mode<synchronous>, transform_indices = @transform_4, window_bounds = array<i64: 32, 96>}, {pipeline_mode = #tpu.pipeline_mode<synchronous>, transform_indices = @transform_5, window_bounds = array<i64: 1, 96>}, {pipeline_mode = #tpu.pipeline_mode<synchronous>, transform_indices = @transform_6, window_bounds = array<i64: 32, 32>}, {pipeline_mode = #tpu.pipeline_mode<synchronous>, transform_indices = @transform_7, window_bounds = array<i64: 1, 32>}, {transform_indices = @transform_8, window_bounds = array<i64: 64, 32>}]} {
    %c0 = arith.constant 0 : index
    %c0_0 = arith.constant 0 : index
    %0 = vector.load %arg1[%c0, %c0_0] : memref<64x32xf32, #tpu.memory_space<vmem>>, vector<64x32xf32>
    %1 = arith.truncf %0 : vector<64x32xf32> to vector<64x32xbf16>
    %c0_1 = arith.constant 0 : index
    %c0_2 = arith.constant 0 : index
    %2 = vector.load %arg5[%c0_1, %c0_2] : memref<32x96xbf16, #tpu.memory_space<vmem>>, vector<32x96xbf16>
    %cst = arith.constant dense<0.000000e+00> : vector<64x96xf32>
    %3 = tpu.matmul %1, %2, %cst {dimension_numbers = #tpu.dot_dimension_numbers<[1], [0], [0], [1], [0, 0, 1, 1], [], []>} : vector<64x32xbf16>, vector<32x96xbf16>, vector<64x96xf32> -> vector<64x96xf32>
    %c0_3 = arith.constant 0 : index
    %c0_4 = arith.constant 0 : index
    %4 = vector.load %arg6[%c0_3, %c0_4] : memref<1x96xf32, #tpu.memory_space<vmem>>, vector<1x96xf32>
    %5 = vector.broadcast %4 : vector<1x96xf32> to vector<64x96xf32>
    %6 = arith.addf %3, %5 : vector<64x96xf32>
    %c0_5 = arith.constant 0 : index
    %c0_6 = arith.constant 0 : index
    %7 = vector.load %arg4[%c0_5, %c0_6] : memref<1x32xf32, #tpu.memory_space<vmem>>, vector<1x32xf32>
    %8 = vector.extract_strided_slice %6 {offsets = [0, 0], sizes = [64, 8], strides = [1, 1]} : vector<64x96xf32> to vector<64x8xf32>
    %9 = vector.extract_strided_slice %6 {offsets = [0, 32], sizes = [64, 8], strides = [1, 1]} : vector<64x96xf32> to vector<64x8xf32>
    %10 = vector.extract_strided_slice %6 {offsets = [0, 64], sizes = [64, 8], strides = [1, 1]} : vector<64x96xf32> to vector<64x8xf32>
    %11 = arith.mulf %8, %8 : vector<64x8xf32>
    %cst_7 = arith.constant dense<0.000000e+00> : vector<64xf32>
    %12 = vector.multi_reduction <add>, %11, %cst_7 [1] : vector<64x8xf32> to vector<64xf32>
    %13 = vector.shape_cast %12 : vector<64xf32> to vector<64x1xf32>
    %cst_8 = arith.constant 1.000000e-24 : f32
    %14 = vector.broadcast %cst_8 : f32 to vector<64x1xf32>
    %15 = arith.maximumf %13, %14 : vector<64x1xf32>
    %16 = math.rsqrt %15 : vector<64x1xf32>
    %17 = vector.broadcast %16 : vector<64x1xf32> to vector<64x8xf32>
    %18 = arith.mulf %8, %17 : vector<64x8xf32>
    %19 = vector.extract_strided_slice %7 {offsets = [0, 0], sizes = [1, 8], strides = [1, 1]} : vector<1x32xf32> to vector<1x8xf32>
    %20 = vector.broadcast %19 : vector<1x8xf32> to vector<64x8xf32>
    %21 = arith.mulf %18, %20 : vector<64x8xf32>
    %22 = arith.mulf %9, %9 : vector<64x8xf32>
    %cst_9 = arith.constant dense<0.000000e+00> : vector<64xf32>
    %23 = vector.multi_reduction <add>, %22, %cst_9 [1] : vector<64x8xf32> to vector<64xf32>
    %24 = vector.shape_cast %23 : vector<64xf32> to vector<64x1xf32>
    %cst_10 = arith.constant 1.000000e-24 : f32
    %25 = vector.broadcast %cst_10 : f32 to vector<64x1xf32>
    %26 = arith.maximumf %24, %25 : vector<64x1xf32>
    %27 = math.rsqrt %26 : vector<64x1xf32>
    %28 = vector.broadcast %27 : vector<64x1xf32> to vector<64x8xf32>
    %29 = arith.mulf %9, %28 : vector<64x8xf32>
    %30 = vector.shape_cast %21 : vector<64x8xf32> to vector<4x16x8xf32>
    %31 = vector.shape_cast %29 : vector<64x8xf32> to vector<4x16x8xf32>
    %32 = vector.shape_cast %10 : vector<64x8xf32> to vector<4x16x8xf32>
    %33 = vector.extract_strided_slice %6 {offsets = [0, 8], sizes = [64, 8], strides = [1, 1]} : vector<64x96xf32> to vector<64x8xf32>
    %34 = vector.extract_strided_slice %6 {offsets = [0, 40], sizes = [64, 8], strides = [1, 1]} : vector<64x96xf32> to vector<64x8xf32>
    %35 = vector.extract_strided_slice %6 {offsets = [0, 72], sizes = [64, 8], strides = [1, 1]} : vector<64x96xf32> to vector<64x8xf32>
    %36 = arith.mulf %33, %33 : vector<64x8xf32>
    %cst_11 = arith.constant dense<0.000000e+00> : vector<64xf32>
    %37 = vector.multi_reduction <add>, %36, %cst_11 [1] : vector<64x8xf32> to vector<64xf32>
    %38 = vector.shape_cast %37 : vector<64xf32> to vector<64x1xf32>
    %cst_12 = arith.constant 1.000000e-24 : f32
    %39 = vector.broadcast %cst_12 : f32 to vector<64x1xf32>
    %40 = arith.maximumf %38, %39 : vector<64x1xf32>
    %41 = math.rsqrt %40 : vector<64x1xf32>
    %42 = vector.broadcast %41 : vector<64x1xf32> to vector<64x8xf32>
    %43 = arith.mulf %33, %42 : vector<64x8xf32>
    %44 = vector.extract_strided_slice %7 {offsets = [0, 8], sizes = [1, 8], strides = [1, 1]} : vector<1x32xf32> to vector<1x8xf32>
    %45 = vector.broadcast %44 : vector<1x8xf32> to vector<64x8xf32>
    %46 = arith.mulf %43, %45 : vector<64x8xf32>
    %47 = arith.mulf %34, %34 : vector<64x8xf32>
    %cst_13 = arith.constant dense<0.000000e+00> : vector<64xf32>
    %48 = vector.multi_reduction <add>, %47, %cst_13 [1] : vector<64x8xf32> to vector<64xf32>
    %49 = vector.shape_cast %48 : vector<64xf32> to vector<64x1xf32>
    %cst_14 = arith.constant 1.000000e-24 : f32
    %50 = vector.broadcast %cst_14 : f32 to vector<64x1xf32>
    %51 = arith.maximumf %49, %50 : vector<64x1xf32>
    %52 = math.rsqrt %51 : vector<64x1xf32>
    %53 = vector.broadcast %52 : vector<64x1xf32> to vector<64x8xf32>
    %54 = arith.mulf %34, %53 : vector<64x8xf32>
    %55 = vector.shape_cast %46 : vector<64x8xf32> to vector<4x16x8xf32>
    %56 = vector.shape_cast %54 : vector<64x8xf32> to vector<4x16x8xf32>
    %57 = vector.shape_cast %35 : vector<64x8xf32> to vector<4x16x8xf32>
    %58 = vector.extract_strided_slice %6 {offsets = [0, 16], sizes = [64, 8], strides = [1, 1]} : vector<64x96xf32> to vector<64x8xf32>
    %59 = vector.extract_strided_slice %6 {offsets = [0, 48], sizes = [64, 8], strides = [1, 1]} : vector<64x96xf32> to vector<64x8xf32>
    %60 = vector.extract_strided_slice %6 {offsets = [0, 80], sizes = [64, 8], strides = [1, 1]} : vector<64x96xf32> to vector<64x8xf32>
    %61 = arith.mulf %58, %58 : vector<64x8xf32>
    %cst_15 = arith.constant dense<0.000000e+00> : vector<64xf32>
    %62 = vector.multi_reduction <add>, %61, %cst_15 [1] : vector<64x8xf32> to vector<64xf32>
    %63 = vector.shape_cast %62 : vector<64xf32> to vector<64x1xf32>
    %cst_16 = arith.constant 1.000000e-24 : f32
    %64 = vector.broadcast %cst_16 : f32 to vector<64x1xf32>
    %65 = arith.maximumf %63, %64 : vector<64x1xf32>
    %66 = math.rsqrt %65 : vector<64x1xf32>
    %67 = vector.broadcast %66 : vector<64x1xf32> to vector<64x8xf32>
    %68 = arith.mulf %58, %67 : vector<64x8xf32>
    %69 = vector.extract_strided_slice %7 {offsets = [0, 16], sizes = [1, 8], strides = [1, 1]} : vector<1x32xf32> to vector<1x8xf32>
    %70 = vector.broadcast %69 : vector<1x8xf32> to vector<64x8xf32>
    %71 = arith.mulf %68, %70 : vector<64x8xf32>
    %72 = arith.mulf %59, %59 : vector<64x8xf32>
    %cst_17 = arith.constant dense<0.000000e+00> : vector<64xf32>
    %73 = vector.multi_reduction <add>, %72, %cst_17 [1] : vector<64x8xf32> to vector<64xf32>
    %74 = vector.shape_cast %73 : vector<64xf32> to vector<64x1xf32>
    %cst_18 = arith.constant 1.000000e-24 : f32
    %75 = vector.broadcast %cst_18 : f32 to vector<64x1xf32>
    %76 = arith.maximumf %74, %75 : vector<64x1xf32>
    %77 = math.rsqrt %76 : vector<64x1xf32>
    %78 = vector.broadcast %77 : vector<64x1xf32> to vector<64x8xf32>
    %79 = arith.mulf %59, %78 : vector<64x8xf32>
    %80 = vector.shape_cast %71 : vector<64x8xf32> to vector<4x16x8xf32>
    %81 = vector.shape_cast %79 : vector<64x8xf32> to vector<4x16x8xf32>
    %82 = vector.shape_cast %60 : vector<64x8xf32> to vector<4x16x8xf32>
    %83 = vector.extract_strided_slice %6 {offsets = [0, 24], sizes = [64, 8], strides = [1, 1]} : vector<64x96xf32> to vector<64x8xf32>
    %84 = vector.extract_strided_slice %6 {offsets = [0, 56], sizes = [64, 8], strides = [1, 1]} : vector<64x96xf32> to vector<64x8xf32>
    %85 = vector.extract_strided_slice %6 {offsets = [0, 88], sizes = [64, 8], strides = [1, 1]} : vector<64x96xf32> to vector<64x8xf32>
    %86 = arith.mulf %83, %83 : vector<64x8xf32>
    %cst_19 = arith.constant dense<0.000000e+00> : vector<64xf32>
    %87 = vector.multi_reduction <add>, %86, %cst_19 [1] : vector<64x8xf32> to vector<64xf32>
    %88 = vector.shape_cast %87 : vector<64xf32> to vector<64x1xf32>
    %cst_20 = arith.constant 1.000000e-24 : f32
    %89 = vector.broadcast %cst_20 : f32 to vector<64x1xf32>
    %90 = arith.maximumf %88, %89 : vector<64x1xf32>
    %91 = math.rsqrt %90 : vector<64x1xf32>
    %92 = vector.broadcast %91 : vector<64x1xf32> to vector<64x8xf32>
    %93 = arith.mulf %83, %92 : vector<64x8xf32>
    %94 = vector.extract_strided_slice %7 {offsets = [0, 24], sizes = [1, 8], strides = [1, 1]} : vector<1x32xf32> to vector<1x8xf32>
    %95 = vector.broadcast %94 : vector<1x8xf32> to vector<64x8xf32>
    %96 = arith.mulf %93, %95 : vector<64x8xf32>
    %97 = arith.mulf %84, %84 : vector<64x8xf32>
    %cst_21 = arith.constant dense<0.000000e+00> : vector<64xf32>
    %98 = vector.multi_reduction <add>, %97, %cst_21 [1] : vector<64x8xf32> to vector<64xf32>
    %99 = vector.shape_cast %98 : vector<64xf32> to vector<64x1xf32>
    %cst_22 = arith.constant 1.000000e-24 : f32
    %100 = vector.broadcast %cst_22 : f32 to vector<64x1xf32>
    %101 = arith.maximumf %99, %100 : vector<64x1xf32>
    %102 = math.rsqrt %101 : vector<64x1xf32>
    %103 = vector.broadcast %102 : vector<64x1xf32> to vector<64x8xf32>
    %104 = arith.mulf %84, %103 : vector<64x8xf32>
    %105 = vector.shape_cast %96 : vector<64x8xf32> to vector<4x16x8xf32>
    %106 = vector.shape_cast %104 : vector<64x8xf32> to vector<4x16x8xf32>
    %107 = vector.shape_cast %85 : vector<64x8xf32> to vector<4x16x8xf32>
    %108 = tpu.concatenate %30, %55, %80, %105 in 0 : vector<4x16x8xf32>, vector<4x16x8xf32>, vector<4x16x8xf32>, vector<4x16x8xf32> -> vector<16x16x8xf32>
    %109 = tpu.concatenate %31, %56, %81, %106 in 0 : vector<4x16x8xf32>, vector<4x16x8xf32>, vector<4x16x8xf32>, vector<4x16x8xf32> -> vector<16x16x8xf32>
    %110 = tpu.concatenate %32, %57, %82, %107 in 0 : vector<4x16x8xf32>, vector<4x16x8xf32>, vector<4x16x8xf32>, vector<4x16x8xf32> -> vector<16x16x8xf32>
    %111 = arith.truncf %108 : vector<16x16x8xf32> to vector<16x16x8xbf16>
    %112 = arith.truncf %109 : vector<16x16x8xf32> to vector<16x16x8xbf16>
    "tpu.trace_start"() <{level = 10 : i32, message = "gnd,gmd->gnm"}> : () -> ()
    %cst_23 = arith.constant dense<0.000000e+00> : vector<16x16x16xf32>
    %113 = tpu.matmul %111, %112, %cst_23 {dimension_numbers = #tpu.dot_dimension_numbers<[2], [2], [1], [1], [0, 0, 0, 1, 1, 1], [0], [0]>} : vector<16x16x8xbf16>, vector<16x16x8xbf16>, vector<16x16x16xf32> -> vector<16x16x16xf32>
    "tpu.trace_stop"() : () -> ()
    %114 = vector.shape_cast %113 : vector<16x16x16xf32> to vector<4x4x16x16xf32>
    %c0_24 = arith.constant 0 : index
    %c0_25 = arith.constant 0 : index
    %c0_26 = arith.constant 0 : index
    %115 = vector.load %arg2[%c0_24, %c0_25, %c0_26] : memref<4x16x16xf32, #tpu.memory_space<vmem>>, vector<4x16x16xf32>
    %116 = vector.shape_cast %115 : vector<4x16x16xf32> to vector<4x1x16x16xf32>
    %117 = vector.broadcast %116 : vector<4x1x16x16xf32> to vector<4x4x16x16xf32>
    %118 = arith.addf %114, %117 : vector<4x4x16x16xf32>
    %c0_27 = arith.constant 0 : index
    %c0_28 = arith.constant 0 : index
    %c0_29 = arith.constant 0 : index
    %119 = vector.load %arg3[%c0_27, %c0_28, %c0_29] : memref<4x16x16xf32, #tpu.memory_space<vmem>>, vector<4x16x16xf32>
    %120 = vector.shape_cast %119 : vector<4x16x16xf32> to vector<1x4x16x16xf32>
    %121 = vector.broadcast %120 : vector<1x4x16x16xf32> to vector<4x4x16x16xf32>
    %122 = arith.addf %118, %121 : vector<4x4x16x16xf32>
    %123 = vector.shape_cast %122 : vector<4x4x16x16xf32> to vector<16x16x16xf32>
    %cst_30 = arith.constant dense<0xFF800000> : vector<16x16xf32>
    %124 = vector.multi_reduction <maximumf>, %123, %cst_30 [2] : vector<16x16x16xf32> to vector<16x16xf32>
    %125 = vector.shape_cast %124 : vector<16x16xf32> to vector<16x16x1xf32>
    %126 = vector.broadcast %125 : vector<16x16x1xf32> to vector<16x16x16xf32>
    %127 = arith.subf %123, %126 : vector<16x16x16xf32>
    %128 = math.exp %127 : vector<16x16x16xf32>
    %cst_31 = arith.constant dense<0.000000e+00> : vector<16x16xf32>
    %129 = vector.multi_reduction <add>, %128, %cst_31 [2] : vector<16x16x16xf32> to vector<16x16xf32>
    %130 = vector.shape_cast %129 : vector<16x16xf32> to vector<16x16x1xf32>
    %131 = tpu.reciprocal %130 {approx = true} : vector<16x16x1xf32> -> vector<16x16x1xf32>
    %132 = vector.broadcast %131 : vector<16x16x1xf32> to vector<16x16x16xf32>
    %133 = arith.mulf %128, %132 : vector<16x16x16xf32>
    %134 = arith.truncf %133 : vector<16x16x16xf32> to vector<16x16x16xbf16>
    %135 = arith.truncf %110 : vector<16x16x8xf32> to vector<16x16x8xbf16>
    "tpu.trace_start"() <{level = 10 : i32, message = "gnm,gmd->gnd"}> : () -> ()
    %cst_32 = arith.constant dense<0.000000e+00> : vector<16x16x8xf32>
    %136 = tpu.matmul %134, %135, %cst_32 {dimension_numbers = #tpu.dot_dimension_numbers<[2], [1], [1], [2], [0, 0, 0, 1, 1, 2], [0], [0]>} : vector<16x16x16xbf16>, vector<16x16x8xbf16>, vector<16x16x8xf32> -> vector<16x16x8xf32>
    "tpu.trace_stop"() : () -> ()
    %137 = vector.extract_strided_slice %136 {offsets = [0, 0, 0], sizes = [4, 16, 8], strides = [1, 1, 1]} : vector<16x16x8xf32> to vector<4x16x8xf32>
    %138 = vector.shape_cast %137 : vector<4x16x8xf32> to vector<64x8xf32>
    %139 = vector.extract_strided_slice %136 {offsets = [4, 0, 0], sizes = [4, 16, 8], strides = [1, 1, 1]} : vector<16x16x8xf32> to vector<4x16x8xf32>
    %140 = vector.shape_cast %139 : vector<4x16x8xf32> to vector<64x8xf32>
    %141 = vector.extract_strided_slice %136 {offsets = [8, 0, 0], sizes = [4, 16, 8], strides = [1, 1, 1]} : vector<16x16x8xf32> to vector<4x16x8xf32>
    %142 = vector.shape_cast %141 : vector<4x16x8xf32> to vector<64x8xf32>
    %143 = vector.extract_strided_slice %136 {offsets = [12, 0, 0], sizes = [4, 16, 8], strides = [1, 1, 1]} : vector<16x16x8xf32> to vector<4x16x8xf32>
    %144 = vector.shape_cast %143 : vector<4x16x8xf32> to vector<64x8xf32>
    %145 = tpu.concatenate %138, %140, %142, %144 in 1 : vector<64x8xf32>, vector<64x8xf32>, vector<64x8xf32>, vector<64x8xf32> -> vector<64x32xf32>
    %146 = arith.truncf %145 : vector<64x32xf32> to vector<64x32xbf16>
    %c0_33 = arith.constant 0 : index
    %c0_34 = arith.constant 0 : index
    %147 = vector.load %arg7[%c0_33, %c0_34] : memref<32x32xbf16, #tpu.memory_space<vmem>>, vector<32x32xbf16>
    %cst_35 = arith.constant dense<0.000000e+00> : vector<64x32xf32>
    %148 = tpu.matmul %146, %147, %cst_35 {dimension_numbers = #tpu.dot_dimension_numbers<[1], [0], [0], [1], [0, 0, 1, 1], [], []>} : vector<64x32xbf16>, vector<32x32xbf16>, vector<64x32xf32> -> vector<64x32xf32>
    %c0_36 = arith.constant 0 : index
    %c0_37 = arith.constant 0 : index
    %149 = vector.load %arg8[%c0_36, %c0_37] : memref<1x32xf32, #tpu.memory_space<vmem>>, vector<1x32xf32>
    %150 = vector.broadcast %149 : vector<1x32xf32> to vector<64x32xf32>
    %151 = arith.addf %148, %150 : vector<64x32xf32>
    %c0_38 = arith.constant 0 : index
    %c0_39 = arith.constant 0 : index
    %152 = vector.load %arg9[%c0_38, %c0_39] : memref<64x32xf32, #tpu.memory_space<vmem>>, vector<64x32xf32>
    tpu.vector_store %arg9[%c0_38, %c0_39], %151 {strides = array<i32>} : memref<64x32xf32, #tpu.memory_space<vmem>>, vector<64x32xf32>,
    return
  }
  func.func @transform_0(%arg0: i32) -> (i32, i32) {
    %c0_i32 = arith.constant 0 : i32
    %c0_i32_0 = arith.constant 0 : i32
    return %arg0, %c0_i32 : i32, i32
  }
  func.func @transform_1(%arg0: i32) -> (i32, i32, i32) {
    %c0_i32 = arith.constant 0 : i32
    %c0_i32_0 = arith.constant 0 : i32
    %c0_i32_1 = arith.constant 0 : i32
    %c0_i32_2 = arith.constant 0 : i32
    return %c0_i32, %c0_i32_0, %c0_i32_1 : i32, i32, i32
  }
  func.func @transform_2(%arg0: i32) -> (i32, i32, i32) {
    %c0_i32 = arith.constant 0 : i32
    %c0_i32_0 = arith.constant 0 : i32
    %c0_i32_1 = arith.constant 0 : i32
    %c0_i32_2 = arith.constant 0 : i32
    return %c0_i32, %c0_i32_0, %c0_i32_1 : i32, i32, i32
  }
  func.func @transform_3(%arg0: i32) -> (i32, i32) {
    %c0_i32 = arith.constant 0 : i32
    %c0_i32_0 = arith.constant 0 : i32
    %c0_i32_1 = arith.constant 0 : i32
    return %c0_i32, %c0_i32_0 : i32, i32
  }
  func.func @transform_4(%arg0: i32) -> (i32, i32) {
    %c0_i32 = arith.constant 0 : i32
    %c0_i32_0 = arith.constant 0 : i32
    %c0_i32_1 = arith.constant 0 : i32
    return %c0_i32, %c0_i32_0 : i32, i32
  }
  func.func @transform_5(%arg0: i32) -> (i32, i32) {
    %c0_i32 = arith.constant 0 : i32
    %c0_i32_0 = arith.constant 0 : i32
    %c0_i32_1 = arith.constant 0 : i32
    return %c0_i32, %c0_i32_0 : i32, i32
  }
  func.func @transform_6(%arg0: i32) -> (i32, i32) {
    %c0_i32 = arith.constant 0 : i32
    %c0_i32_0 = arith.constant 0 : i32
    %c0_i32_1 = arith.constant 0 : i32
    return %c0_i32, %c0_i32_0 : i32, i32
  }
  func.func @transform_7(%arg0: i32) -> (i32, i32) {
    %c0_i32 = arith.constant 0 : i32
    %c0_i32_0 = arith.constant 0 : i32
    %c0_i32_1 = arith.constant 0 : i32
    return %c0_i32, %c0_i32_0 : i32, i32
  }
  func.func @transform_8(%arg0: i32) -> (i32, i32) {
    %c0_i32 = arith.constant 0 : i32
    %c0_i32_0 = arith.constant 0 : i32
    return %arg0, %c0_i32 : i32, i32
  }
}

</mosaic_0001>

<bundles_post_ra>
// kernel: swin_basic_layer_forward.5
= control target key start
LH: loop header
LB: loop body
LE: loop exit
PB: predicated region body
PF: predicated region fallthrough
CT: control target
= control target key end

     0   :  { %vm52_vm0 = vcmask 261120   ;;  %s2788_s1 = inlined_call_operand.vmem [shape: f32[128,32], index: 1, kind: input, shape index: {}]   ;;  %s2789_s4 = inlined_call_operand.vmem [shape: bf16[32,128], index: 4, kind: input, shape index: {}]   ;;  %s2790_s2 = inlined_call_operand.vmem [shape: f32[1,32], index: 2, kind: input, shape index: {}]   ;;  %s2791_s0 = inlined_call_operand.vmem [shape: f32[128,32], index: 0, kind: input, shape index: {}]   ;;  %s2792_s3 = inlined_call_operand.vmem [shape: f32[1,32], index: 3, kind: input, shape index: {}]   ;;  %s2793_s6 = inlined_call_operand.vmem [shape: bf16[128,32], index: 6, kind: input, shape index: {}]   ;;  %s2794_s5 = inlined_call_operand.vmem [shape: f32[1,128], index: 5, kind: input, shape index: {}]   ;;  %s2795_s7 = inlined_call_operand.vmem [shape: f32[1,32], index: 7, kind: input, shape index: {}]   ;;  %s2796_s8 = inlined_call_operand.vmem [shape: f32[1,32], index: 8, kind: input, shape index: {}]   ;;  %s2797_s9 = inlined_call_operand.vmem [shape: f32[1,32], index: 9, kind: input, shape index: {}]   ;;  %s2798_s10 = inlined_call_operand.vmem [shape: f32[128,32], index: 10, kind: output, shape index: {}]  }
   0x1   :  { %v36_v0 = vld [vmem:[%s2788_s1] sm:$0xff]  ;;  %v38_v1 = vld [vmem:[%s2788_s1 + $0x10] sm:$0xff]  ;;  %v37_v2 = vld [vmem:[%s2788_s1 + $0x8] sm:$0xff] }
   0x2   :  { %v53_v3 = vsel %vm52_vm0, %v36_v0, 0.0  ;;  %v59_v4 = vsel %vm52_vm0, %v38_v1, 0.0  ;;  %v39_v5 = vld [vmem:[%s2788_s1 + $0x18] sm:$0xff]  ;;  %v56_v6 = vsel %vm52_vm0, %v37_v2, 0.0  ;;  %v40_v8 = vld [vmem:[%s2788_s1 + $0x20] sm:$0xff]  ;;  %v41_v9 = vld [vmem:[%s2788_s1 + $0x28] sm:$0xff] }
   0x3   :  { %54 = vadd.xlane.f32.xlu0 %v53_v3  ;;  %60 = vadd.xlane.f32.xlu1 %v59_v4  ;;  %v62_v7 = vsel %vm52_vm0, %v39_v5, 0.0  ;;  %v65_v10 = vsel %vm52_vm0, %v40_v8, 0.0  ;;  %v68_v11 = vsel %vm52_vm0, %v41_v9, 0.0  ;;  %v1760_v12 = vld [vmem:[%s2788_s1 + $0x30] sm:$0xff]  ;;  %v1765_v13 = vld [vmem:[%s2788_s1 + $0x38] sm:$0xff]  ;;  %v1774_v16 = vld [vmem:[%s2788_s1 + $0x40] sm:$0xff] }
   0x4   :  { %v71_v14 = vsel %vm52_vm0, %v1760_v12, 0.0  ;;  %v74_v15 = vsel %vm52_vm0, %v1765_v13, 0.0  ;;  %v1779_v17 = vld [vmem:[%s2788_s1 + $0x48] sm:$0xff]  ;;  %v77_v18 = vsel %vm52_vm0, %v1774_v16, 0.0  ;;  %v1788_v20 = vld [vmem:[%s2788_s1 + $0x50] sm:$0xff]  ;;  %v1793_v21 = vld [vmem:[%s2788_s1 + $0x58] sm:$0xff] }
   0x5   :  { %v80_v19 = vsel %vm52_vm0, %v1779_v17, 0.0  ;;  %v83_v22 = vsel %vm52_vm0, %v1788_v20, 0.0  ;;  %v86_v23 = vsel %vm52_vm0, %v1793_v21, 0.0  ;;  %v1802_v24 = vld [vmem:[%s2788_s1 + $0x60] sm:$0xff]  ;;  %v1807_v25 = vld [vmem:[%s2788_s1 + $0x68] sm:$0xff]  ;;  %v1816_v28 = vld [vmem:[%s2788_s1 + $0x70] sm:$0xff] }
   0x6   :  { %v89_v26 = vsel %vm52_vm0, %v1802_v24, 0.0  ;;  %v92_v27 = vsel %vm52_vm0, %v1807_v25, 0.0  ;;  %v1821_v29 = vld [vmem:[%s2788_s1 + $0x78] sm:$0xff]  ;;  %v95_v30 = vsel %vm52_vm0, %v1816_v28, 0.0 }
   0x7   :  { %57 = vadd.xlane.f32.xlu0 %v56_v6  ;;  %63 = vadd.xlane.f32.xlu1 %v62_v7  ;;  %v98_v31 = vsel %vm52_vm0, %v1821_v29, 0.0 }
   0xb   :  { %66 = vadd.xlane.f32.xlu0 %v65_v10  ;;  %69 = vadd.xlane.f32.xlu1 %v68_v11 }
   0xf   :  { %72 = vadd.xlane.f32.xlu0 %v71_v14  ;;  %75 = vadd.xlane.f32.xlu1 %v74_v15 }
  0x13   :  { %78 = vadd.xlane.f32.xlu0 %v77_v18  ;;  %81 = vadd.xlane.f32.xlu1 %v80_v19 }
  0x17   :  { %84 = vadd.xlane.f32.xlu0 %v83_v22  ;;  %87 = vadd.xlane.f32.xlu1 %v86_v23 }
  0x1b   :  { %90 = vadd.xlane.f32.xlu0 %v89_v26  ;;  %93 = vadd.xlane.f32.xlu1 %v92_v27 }
  0x1f   :  { %96 = vadd.xlane.f32.xlu0 %v95_v30  ;;  %99 = vadd.xlane.f32.xlu1 %v98_v31 }
  0x8c   :  { %v55_v32 = vpop.xlane.xlu0 %54  ;;  %v61_v33 = vpop.xlane.xlu1 %60 }
  0x8d   :  { %v102_v34 = vmul.f32 0.03125, %v55_v32  ;;  %v104_v35 = vmul.f32 0.03125, %v61_v33 }
  0x8f   :  { %v1827_v36 = vsub.f32 %v36_v0, %v102_v34  ;;  %v1829_v37 = vsub.f32 %v38_v1, %v104_v35 }
  0x90   :  { %v58_v38 = vpop.xlane.xlu0 %57  ;;  %v64_v39 = vpop.xlane.xlu1 %63 }
  0x91   :  { %v103_v40 = vmul.f32 0.03125, %v58_v38  ;;  %v105_v41 = vmul.f32 0.03125, %v64_v39  ;;  %v134_v42 = vmul.f32 %v1827_v36, %v1827_v36  ;;  %v136_v43 = vmul.f32 %v1829_v37, %v1829_v37 }
  0x93   :  { %v1835_v44 = vsub.f32 %v37_v2, %v103_v40  ;;  %v1837_v45 = vsub.f32 %v39_v5, %v105_v41  ;;  %v150_v46 = vsel %vm52_vm0, %v134_v42, 0.0  ;;  %v156_v49 = vsel %vm52_vm0, %v136_v43, 0.0 }
  0x94   :  { %151 = vadd.xlane.f32.xlu0 %v150_v46  ;;  %v67_v47 = vpop.xlane.xlu0 %66  ;;  %v70_v48 = vpop.xlane.xlu1 %69 }
  0x95   :  { %v106_v50 = vmul.f32 0.03125, %v67_v47  ;;  %v107_v51 = vmul.f32 0.03125, %v70_v48  ;;  %v135_v52 = vmul.f32 %v1835_v44, %v1835_v44  ;;  %v137_v53 = vmul.f32 %v1837_v45, %v1837_v45 }
  0x97   :  { %v1845_v54 = vsub.f32 %v40_v8, %v106_v50  ;;  %v1847_v55 = vsub.f32 %v41_v9, %v107_v51  ;;  %v153_v56 = vsel %vm52_vm0, %v135_v52, 0.0  ;;  %v159_v59 = vsel %vm52_vm0, %v137_v53, 0.0  ;;  %v1541_v53 = vld [vmem:[%s2789_s4] sm:$0xff]  }
  0x98   :  { %157 = vadd.xlane.f32.xlu0 %v156_v49  ;;  %154 = vadd.xlane.f32.xlu1 %v153_v56  ;;  %v73_v57 = vpop.xlane.xlu0 %72  ;;  %v76_v58 = vpop.xlane.xlu1 %75 }
  0x99   :  { %v108_v60 = vmul.f32 0.03125, %v73_v57  ;;  %v109_v61 = vmul.f32 0.03125, %v76_v58  ;;  %v138_v62 = vmul.f32 %v1845_v54, %v1845_v54  ;;  %v139_v63 = vmul.f32 %v1847_v55, %v1847_v55 }
  0x9b   :  { %v1856_v0 = vsub.f32 %v1760_v12, %v108_v60  ;;  %v1859_v1 = vsub.f32 %v1765_v13, %v109_v61  ;;  %v162_v2 = vsel %vm52_vm0, %v138_v62, 0.0  ;;  %v165_v5 = vsel %vm52_vm0, %v139_v63, 0.0 }
  0x9c   :  { %160 = vadd.xlane.f32.xlu1 %v159_v59  ;;  %163 = vadd.xlane.f32.xlu0 %v162_v2  ;;  %v79_v3 = vpop.xlane.xlu0 %78  ;;  %v82_v4 = vpop.xlane.xlu1 %81 }
  0x9d   :  { %v110_v6 = vmul.f32 0.03125, %v79_v3  ;;  %v111_v7 = vmul.f32 0.03125, %v82_v4  ;;  %v140_v8 = vmul.f32 %v1856_v0, %v1856_v0  ;;  %v141_v9 = vmul.f32 %v1859_v1, %v1859_v1 }
  0x9f   :  { %v1868_v10 = vsub.f32 %v1774_v16, %v110_v6  ;;  %v1871_v11 = vsub.f32 %v1779_v17, %v111_v7  ;;  %v168_v12 = vsel %vm52_vm0, %v140_v8, 0.0  ;;  %v171_v15 = vsel %vm52_vm0, %v141_v9, 0.0 }
  0xa0   :  { %166 = vadd.xlane.f32.xlu1 %v165_v5  ;;  %169 = vadd.xlane.f32.xlu0 %v168_v12  ;;  %v85_v13 = vpop.xlane.xlu0 %84  ;;  %v88_v14 = vpop.xlane.xlu1 %87 }
  0xa1   :  { %v112_v18 = vmul.f32 0.03125, %v85_v13  ;;  %v113_v19 = vmul.f32 0.03125, %v88_v14  ;;  %v142_v22 = vmul.f32 %v1868_v10, %v1868_v10  ;;  %v143_v16 = vmul.f32 %v1871_v11, %v1871_v11 }
  0xa3   :  { %v1880_v23 = vsub.f32 %v1788_v20, %v112_v18  ;;  %v1883_v17 = vsub.f32 %v1793_v21, %v113_v19  ;;  %v174_v26 = vsel %vm52_vm0, %v142_v22, 0.0  ;;  %v177_v31 = vsel %vm52_vm0, %v143_v16, 0.0 }
  0xa4   :  { %172 = vadd.xlane.f32.xlu1 %v171_v15  ;;  %175 = vadd.xlane.f32.xlu0 %v174_v26  ;;  %v91_v27 = vpop.xlane.xlu0 %90  ;;  %v94_v30 = vpop.xlane.xlu1 %93 }
  0xa5   :  { %v114_v32 = vmul.f32 0.03125, %v91_v27  ;;  %v115_v33 = vmul.f32 0.03125, %v94_v30  ;;  %v144_v34 = vmul.f32 %v1880_v23, %v1880_v23  ;;  %v145_v20 = vmul.f32 %v1883_v17, %v1883_v17  ;;  %v1926_v30 = vld [vmem:[%s2790_s2] ss:$0 sm:$0xff] }
  0xa7   :  { %v1892_v35 = vsub.f32 %v1802_v24, %v114_v32  ;;  %v1895_v21 = vsub.f32 %v1807_v25, %v115_v33  ;;  %v180_v38 = vsel %vm52_vm0, %v144_v34, 0.0  ;;  %v183_v41 = vsel %vm52_vm0, %v145_v20, 0.0 }
  0xa8   :  { %178 = vadd.xlane.f32.xlu1 %v177_v31  ;;  %181 = vadd.xlane.f32.xlu0 %v180_v38  ;;  %v97_v39 = vpop.xlane.xlu0 %96  ;;  %v100_v40 = vpop.xlane.xlu1 %99 }
  0xa9   :  { %v116_v42 = vmul.f32 0.03125, %v97_v39  ;;  %v117_v43 = vmul.f32 0.03125, %v100_v40  ;;  %v146_v46 = vmul.f32 %v1892_v35, %v1892_v35  ;;  %v147_v24 = vmul.f32 %v1895_v21, %v1895_v21  ;;  %v262_v40 = vld [vmem:[%s2791_s0] sm:$0xff] }
  0xab   :  { %v1904_v47 = vsub.f32 %v1816_v28, %v116_v42  ;;  %v1907_v25 = vsub.f32 %v1821_v29, %v117_v43  ;;  %v186_v48 = vsel %vm52_vm0, %v146_v46, 0.0  ;;  %v189_v49 = vsel %vm52_vm0, %v147_v24, 0.0  ;;  %v1540_v29 = vld [vmem:[%s2789_s4 + $0x8] sm:$0xff]  }
  0xac   :  { %184 = vadd.xlane.f32.xlu1 %v183_v41  ;;  %187 = vadd.xlane.f32.xlu0 %v186_v48 }
  0xad   :  { %v148_v50 = vmul.f32 %v1904_v47, %v1904_v47  ;;  %v149_v51 = vmul.f32 %v1907_v25, %v1907_v25  ;;  %1472 = vmatprep.subr.bf16.mxu0 %v1540_v29 }
  0xae   :  { %1473 = vmatpush3.bf16.msra.mxu0 %v1540_v29 }
  0xaf   :  { %v192_v52 = vsel %vm52_vm0, %v148_v50, 0.0  ;;  %v195_v28 = vsel %vm52_vm0, %v149_v51, 0.0  ;;  %1474 = vmatprep.subr.bf16.mxu0 %v1541_v53  ;;  %v263_v50 = vld [vmem:[%s2791_s0 + $0x8] sm:$0xff] }
  0xb0   :  { %190 = vadd.xlane.f32.xlu1 %v189_v49  ;;  %193 = vadd.xlane.f32.xlu0 %v192_v52 }
  0xb2   :  { %1475 = vmatpush3.bf16.msra.mxu0 %v1541_v53 }
  0xb4   :  { %196 = vadd.xlane.f32.xlu1 %v195_v28 }
 0x11d   :  { %v152_v56 = vpop.xlane.xlu0 %151 }
 0x11e   :  { %v198_v57 = vmul.f32 0.03125, %v152_v56  ;;  %v1942_v56 = vld [vmem:[%s2792_s3] ss:$0 sm:$0xff] }
 0x120   :  { %v214_v58 = vadd.f32 1e-05, %v198_v57 }
 0x121   :  { %v155_v59 = vpop.xlane.xlu1 %154  ;;  %v158_v60 = vpop.xlane.xlu0 %157 }
 0x122   :  { %1550 = vrsqrt.f32 %v214_v58  ;;  %v199_v61 = vmul.f32 0.03125, %v155_v59  ;;  %v200_v62 = vmul.f32 0.03125, %v158_v60 }
 0x124   :  { %v215_v63 = vadd.f32 1e-05, %v199_v61  ;;  %v216_v2 = vadd.f32 1e-05, %v200_v62  ;;  %v264_v62 = vld [vmem:[%s2791_s0 + $0x10] sm:$0xff] }
 0x125   :  { %v161_v3 = vpop.xlane.xlu1 %160  ;;  %v164_v4 = vpop.xlane.xlu0 %163 }
 0x126   :  { %1552 = vrsqrt.f32 %v215_v63  ;;  %v201_v5 = vmul.f32 0.03125, %v161_v3  ;;  %v202_v6 = vmul.f32 0.03125, %v164_v4 }
 0x127   :  { %1554 = vrsqrt.f32 %v216_v2 }
 0x128   :  { %v217_v7 = vadd.f32 1e-05, %v201_v5  ;;  %v218_v8 = vadd.f32 1e-05, %v202_v6 }
 0x129   :  { %v167_v9 = vpop.xlane.xlu1 %166  ;;  %v170_v12 = vpop.xlane.xlu0 %169 }
 0x12a   :  { %1556 = vrsqrt.f32 %v217_v7  ;;  %v203_v13 = vmul.f32 0.03125, %v167_v9  ;;  %v204_v14 = vmul.f32 0.03125, %v170_v12 }
 0x12b   :  { %1558 = vrsqrt.f32 %v218_v8  ;;  %v266_v8 = vld [vmem:[%s2791_s0 + $0x20] sm:$0xff] }
 0x12c   :  { %v219_v15 = vadd.f32 1e-05, %v203_v13  ;;  %v220_v18 = vadd.f32 1e-05, %v204_v14 }
 0x12d   :  { %v173_v19 = vpop.xlane.xlu1 %172  ;;  %v176_v22 = vpop.xlane.xlu0 %175 }
 0x12e   :  { %1560 = vrsqrt.f32 %v219_v15  ;;  %v205_v16 = vmul.f32 0.03125, %v173_v19  ;;  %v206_v26 = vmul.f32 0.03125, %v176_v22 }
 0x12f   :  { %v1551_v27 = vpop.eup %1550  ;;  %1562 = vrsqrt.f32 %v220_v18 }
 0x130   :  { %v221_v31 = vadd.f32 1e-05, %v205_v16  ;;  %v222_v32 = vadd.f32 1e-05, %v206_v26  ;;  %v246_v33 = vmul.f32 %v1551_v27, %v1827_v36  ;;  %v267_v27 = vld [vmem:[%s2791_s0 + $0x28] sm:$0xff] }
 0x131   :  { %v179_v34 = vpop.xlane.xlu1 %178  ;;  %v182_v20 = vpop.xlane.xlu0 %181 }
 0x132   :  { %1564 = vrsqrt.f32 %v221_v31  ;;  %v207_v38 = vmul.f32 0.03125, %v179_v34  ;;  %v208_v39 = vmul.f32 0.03125, %v182_v20  ;;  %v285_v41 = vmul.f32 %v1926_v30, %v246_v33 }
 0x133   :  { %v1553_v42 = vpop.eup %1552  ;;  %1566 = vrsqrt.f32 %v222_v32 }
 0x134   :  { %v1555_v43 = vpop.eup %1554  ;;  %v223_v46 = vadd.f32 1e-05, %v207_v38  ;;  %v224_v24 = vadd.f32 1e-05, %v208_v39  ;;  %v247_v48 = vmul.f32 %v1553_v42, %v1835_v44  ;;  %v301_v51 = vadd.f32 %v285_v41, %v262_v40  ;;  %v268_v39 = vld [vmem:[%s2791_s0 + $0x30] sm:$0xff] }
 0x135   :  { %v185_v49 = vpop.xlane.xlu1 %184  ;;  %v188_v36 = vpop.xlane.xlu0 %187  ;;  %v248_v52 = vmul.f32 %v1555_v43, %v1829_v37 }
 0x136   :  { %1568 = vrsqrt.f32 %v223_v46  ;;  %v209_v28 = vmul.f32 0.03125, %v185_v49  ;;  %v210_v29 = vmul.f32 0.03125, %v188_v36  ;;  %v286_v53 = vmul.f32 %v1926_v30, %v247_v48  ;;  %v269_v48 = vld [vmem:[%s2791_s0 + $0x38] sm:$0xff] }
 0x137   :  { %v1557_v44 = vpop.eup %1556  ;;  %1570 = vrsqrt.f32 %v224_v24  ;;  %v287_v57 = vmul.f32 %v1926_v30, %v248_v52  ;;  %v1950_v3 = vadd.f32 %v1942_v56, %v301_v51  ;;  %v270_v52 = vld [vmem:[%s2791_s0 + $0x40] sm:$0xff] }
 0x138   :  { %v1559_v58 = vpop.eup %1558  ;;  %v225_v59 = vadd.f32 1e-05, %v209_v28  ;;  %v226_v60 = vadd.f32 1e-05, %v210_v29  ;;  %v302_v61 = vadd.f32 %v286_v53, %v263_v50  ;;  %v249_v37 = vmul.f32 %v1557_v44, %v1837_v45  ;;  %v265_v45 = vld [vmem:[%s2791_s0 + $0x18] sm:$0xff] }
 0x139   :  { %v191_v63 = vpop.xlane.xlu1 %190  ;;  %v194_v2 = vpop.xlane.xlu0 %193  ;;  %v250_v4 = vmul.f32 %v1559_v58, %v1845_v54  ;;  %v303_v13 = vadd.f32 %v287_v57, %v264_v62  ;;  %v271_v57 = vld [vmem:[%s2791_s0 + $0x48] sm:$0xff] }
 0x13a   :  { %1572 = vrsqrt.f32 %v225_v59  ;;  %v211_v5 = vmul.f32 0.03125, %v191_v63  ;;  %v212_v6 = vmul.f32 0.03125, %v194_v2  ;;  %v1954_v7 = vadd.f32 %v1942_v56, %v302_v61 }
 0x13b   :  { %v1561_v9 = vpop.eup %1560  ;;  %1574 = vrsqrt.f32 %v226_v60  ;;  %v288_v12 = vmul.f32 %v1926_v30, %v249_v37  ;;  %v289_v54 = vmul.f32 %v1926_v30, %v250_v4  ;;  %v1974_v38 = vadd.f32 %v1942_v56, %v303_v13 }
 0x13c   :  { %2813 = vst [vmem:[#allocation2_spill] sm:$0xff] %v1954_v7  ;;  %v1563_v14 = vpop.eup %1562  ;;  %v227_v15 = vadd.f32 1e-05, %v211_v5  ;;  %v228_v18 = vadd.f32 1e-05, %v212_v6  ;;  %v340_v19 = vpack.c.bf16 %v1954_v7, %v1950_v3  ;;  %v251_v22 = vmul.f32 %v1561_v9, %v1847_v55  ;;  %v273_v6 = vld [vmem:[%s2791_s0 + $0x58] sm:$0xff] }
 0x13d   :  { %v197_v16 = vpop.xlane.xlu1 %196  ;;  %v304_v26 = vadd.f32 %v288_v12, %v265_v45  ;;  %v305_v31 = vadd.f32 %v289_v54, %v266_v8  ;;  %v252_v32 = vmul.f32 %v1563_v14, %v1856_v0 }
 0x13e   :  { %1576 = vrsqrt.f32 %v227_v15  ;;  %v213_v33 = vmul.f32 0.03125, %v197_v16  ;;  %1476 = vmatprep.mubr.msk.bf16.mxu0 %vm52_vm0, %v340_v19  ;;  %v290_v34 = vmul.f32 %v1926_v30, %v251_v22  ;;  %v275_v22 = vld [vmem:[%s2791_s0 + $0x68] sm:$0xff] }
 0x13f   :  { %v1565_v20 = vpop.eup %1564  ;;  %1578 = vrsqrt.f32 %v228_v18  ;;  %v1977_v55 = vadd.f32 %v1942_v56, %v304_v26  ;;  %v291_v0 = vmul.f32 %v1926_v30, %v252_v32  ;;  %v1987_v24 = vadd.f32 %v1942_v56, %v305_v31 }
 0x140   :  { %v1567_v40 = vpop.eup %1566  ;;  %v229_v41 = vadd.f32 1e-05, %v213_v33  ;;  %v306_v42 = vadd.f32 %v290_v34, %v267_v27  ;;  %v253_v43 = vmul.f32 %v1565_v20, %v1859_v1 }
 0x141   :  { %v341_v46 = vpack.c.bf16 %v1977_v55, %v1974_v38  ;;  %2814 = vst [vmem:[#allocation3_spill] sm:$0xff] %v1987_v24  ;;  %v254_v49 = vmul.f32 %v1567_v40, %v1868_v10  ;;  %v307_v51 = vadd.f32 %v291_v0, %v268_v39  ;;  %v277_v0 = vld [vmem:[%s2791_s0 + $0x78] sm:$0xff] }
 0x142   :  { %1580 = vrsqrt.f32 %v229_v41  ;;  %v1994_v36 = vadd.f32 %v1942_v56, %v306_v42  ;;  %v292_v50 = vmul.f32 %v1926_v30, %v253_v43 }
 0x143   :  { %v1569_v1 = vpop.eup %1568  ;;  %1477 = vmatmul.mubr.msk.bf16.vlgmr.msra.gmra.mxu0 %vm52_vm0, %v341_v46  ;;  %v293_v28 = vmul.f32 %v1926_v30, %v254_v49  ;;  %v2011_v59 = vadd.f32 %v1942_v56, %v307_v51  ;;  %v1543_v51 = vld [vmem:[%s2793_s6 + $0x30] sm:$0xff]  }
 0x144   :  { %2815 = vst [vmem:[#allocation4_spill] sm:$0xff] %v1994_v36  ;;  %v1571_v29 = vpop.eup %1570  ;;  %v342_v10 = vpack.c.bf16 %v1994_v36, %v1987_v24  ;;  %v308_v53 = vadd.f32 %v292_v50, %v269_v48  ;;  %v255_v44 = vmul.f32 %v1569_v1, %v1871_v11  ;;  %v272_v11 = vld [vmem:[%s2791_s0 + $0x50] sm:$0xff]  ;;  %v1545_v1 = vld [vmem:[%s2793_s6 + $0x20] sm:$0xff]  }
 0x145   :  { %v256_v58 = vmul.f32 %v1571_v29, %v1880_v23  ;;  %2816 = vst [vmem:[#allocation5_spill] sm:$0xff] %v2011_v59  ;;  %v309_v37 = vadd.f32 %v293_v28, %v270_v52  ;;  %v1546_v52 = vld [vmem:[%s2793_s6 + $0x18] sm:$0xff]   ;;  %v1547_v28 = vld [vmem:[%s2793_s6 + $0x10] sm:$0xff]   ;;  %v1548_v29 = vld [vmem:[%s2793_s6 + $0x8] sm:$0xff]  }
 0x146   :  { %1480 = vmatprep.mubr.msk.bf16.mxu0 %vm52_vm0, %v342_v10  ;;  %v2014_v60 = vadd.f32 %v1942_v56, %v308_v53  ;;  %v294_v61 = vmul.f32 %v1926_v30, %v255_v44  ;;  %v1549_v10 = vld [vmem:[%s2793_s6] sm:$0xff]  }
 0x147   :  { %v1573_v62 = vpop.eup %1572  ;;  %v295_v63 = vmul.f32 %v1926_v30, %v256_v58  ;;  %v2029_v8 = vadd.f32 %v1942_v56, %v309_v37  ;;  %v2112_v53 = vld [vmem:[%s2794_s5] ss:$0 sm:$0xff] }
 0x148   :  { %2817 = vst [vmem:[#allocation6_spill] sm:$0xff] %v2014_v60  ;;  %v1575_v2 = vpop.eup %1574  ;;  %v343_v23 = vpack.c.bf16 %v2014_v60, %v2011_v59  ;;  %v310_v4 = vadd.f32 %v294_v61, %v271_v57  ;;  %v257_v5 = vmul.f32 %v1573_v62, %v1883_v17  ;;  %v274_v17 = vld [vmem:[%s2791_s0 + $0x60] sm:$0xff] }
 0x149   :  { %v258_v45 = vmul.f32 %v1575_v2, %v1892_v35  ;;  %2818 = vst [vmem:[#allocation7_spill] sm:$0xff] %v2029_v8  ;;  %v311_v13 = vadd.f32 %v295_v63, %v272_v11 }
 0x14a   :  { %v2032_v9 = vadd.f32 %v1942_v56, %v310_v4  ;;  %v296_v12 = vmul.f32 %v1926_v30, %v257_v5 }
 0x14b   :  { %v1577_v54 = vpop.eup %1576  ;;  %1481 = vmatmul.mubr.msk.bf16.gmra.mxu0 %vm52_vm0, %v343_v23  ;;  %v297_v14 = vmul.f32 %v1926_v30, %v258_v45  ;;  %v2049_v26 = vadd.f32 %v1942_v56, %v311_v13 }
 0x14c   :  { %2819 = vst [vmem:[#allocation8_spill] sm:$0xff] %v2032_v9  ;;  %v1579_v15 = vpop.eup %1578  ;;  %v344_v35 = vpack.c.bf16 %v2032_v9, %v2029_v8  ;;  %v312_v18 = vadd.f32 %v296_v12, %v273_v6  ;;  %v259_v19 = vmul.f32 %v1577_v54, %v1895_v21  ;;  %v276_v21 = vld [vmem:[%s2791_s0 + $0x70] sm:$0xff] }
 0x14d   :  { %v260_v16 = vmul.f32 %v1579_v15, %v1904_v47  ;;  %2820 = vst [vmem:[#allocation9_spill] sm:$0xff] %v2049_v26  ;;  %v313_v32 = vadd.f32 %v297_v14, %v274_v17 }
 0x14e   :  { %1484 = vmatprep.mubr.msk.bf16.mxu0 %vm52_vm0, %v344_v35  ;;  %v2052_v27 = vadd.f32 %v1942_v56, %v312_v18  ;;  %v298_v31 = vmul.f32 %v1926_v30, %v259_v19 }
 0x14f   :  { %v1581_v33 = vpop.eup %1580  ;;  %v299_v34 = vmul.f32 %v1926_v30, %v260_v16  ;;  %v2066_v40 = vadd.f32 %v1942_v56, %v313_v32 }
 0x150   :  { %2821 = vst [vmem:[#allocation10_spill] sm:$0xff] %v2052_v27  ;;  %v345_v47 = vpack.c.bf16 %v2052_v27, %v2049_v26  ;;  %v314_v20 = vadd.f32 %v298_v31, %v275_v22  ;;  %v261_v39 = vmul.f32 %v1581_v33, %v1907_v25 }
 0x151   :  { %2822 = vst [vmem:[#allocation11_spill] sm:$0xff] %v2066_v40  ;;  %v315_v43 = vadd.f32 %v299_v34, %v276_v21 }
 0x152   :  { %v2069_v41 = vadd.f32 %v1942_v56, %v314_v20  ;;  %v300_v42 = vmul.f32 %v1926_v30, %v261_v39  ;;  %v1542_v30 = vld [vmem:[%s2793_s6 + $0x38] sm:$0xff]  }
 0x153   :  { %1485 = vmatmul.mubr.msk.bf16.gmra.mxu0 %vm52_vm0, %v345_v47  ;;  %v2077_v25 = vadd.f32 %v1942_v56, %v315_v43  ;;  %1492 = vmatprep.subr.bf16.mxu0 %v1542_v30 }
 0x154   :  { %2823 = vst [vmem:[#allocation12_spill] sm:$0xff] %v2069_v41  ;;  %v346_v46 = vpack.c.bf16 %v2069_v41, %v2066_v40  ;;  %v316_v48 = vadd.f32 %v300_v42, %v277_v0  ;;  %1524 = vmatprep.subr.bf16.mxu1 %v1542_v30  ;;  %1493 = vmatpush3.bf16.msra.mxu0 %v1542_v30 }
 0x155   :  { %2824 = vst [vmem:[#allocation13_spill] sm:$0xff] %v2077_v25  ;;  %1532 = vmatpush3.bf16.msra.mxu1 %v1542_v30  ;;  %1494 = vmatprep.subr.bf16.mxu0 %v1543_v51 }
 0x156   :  { %1488 = vmatprep.mubr.msk.bf16.mxu0 %vm52_vm0, %v346_v46  ;;  %v2080_v49 = vadd.f32 %v1942_v56, %v316_v48  ;;  %1525 = vmatprep.subr.bf16.mxu1 %v1543_v51  ;;  %v1544_v56 = vld [vmem:[%s2793_s6 + $0x28] sm:$0xff]  }
 0x158   :  { %2825 = vst [vmem:[#allocation14_spill] sm:$0xff] %v2080_v49  ;;  %v347_v50 = vpack.c.bf16 %v2080_v49, %v2077_v25  ;;  %1495 = vmatpush3.bf16.msra.mxu0 %v1543_v51 }
 0x159   :  { %1533 = vmatpush3.bf16.msra.mxu1 %v1543_v51  ;;  %1496 = vmatprep.subr.bf16.mxu0 %v1544_v56 }
 0x15a   :  { %1526 = vmatprep.subr.bf16.mxu1 %v1544_v56 }
 0x15b   :  { %1489 = vmatmul.mubr.msk.bf16.gmra.mxu0 %vm52_vm0, %v347_v50 }
 0x15c   :  { %1497 = vmatpush3.bf16.msra.mxu0 %v1544_v56 }
 0x15d   :  { %1534 = vmatpush3.bf16.msra.mxu1 %v1544_v56  ;;  %1498 = vmatprep.subr.bf16.mxu0 %v1545_v1 }
 0x15e   :  { %1527 = vmatprep.subr.bf16.mxu1 %v1545_v1 }
 0x160   :  { %1499 = vmatpush3.bf16.msra.mxu0 %v1545_v1 }
 0x161   :  { %1535 = vmatpush3.bf16.msra.mxu1 %v1545_v1  ;;  %1500 = vmatprep.subr.bf16.mxu0 %v1546_v52 }
 0x162   :  { %1528 = vmatprep.subr.bf16.mxu1 %v1546_v52 }
 0x164   :  { %1501 = vmatpush3.bf16.msra.mxu0 %v1546_v52 }
 0x165   :  { %1536 = vmatpush3.bf16.msra.mxu1 %v1546_v52  ;;  %1502 = vmatprep.subr.bf16.mxu0 %v1547_v28 }
 0x166   :  { %1529 = vmatprep.subr.bf16.mxu1 %v1547_v28 }
 0x168   :  { %1503 = vmatpush3.bf16.msra.mxu0 %v1547_v28 }
 0x169   :  { %1537 = vmatpush3.bf16.msra.mxu1 %v1547_v28  ;;  %1504 = vmatprep.subr.bf16.mxu0 %v1548_v29 }
 0x16a   :  { %1530 = vmatprep.subr.bf16.mxu1 %v1548_v29 }
 0x16c   :  { %1505 = vmatpush3.bf16.msra.mxu0 %v1548_v29 }
 0x16d   :  { %1538 = vmatpush3.bf16.msra.mxu1 %v1548_v29  ;;  %1506 = vmatprep.subr.bf16.mxu0 %v1549_v10 }
 0x16e   :  { %1531 = vmatprep.subr.bf16.mxu1 %v1549_v10 }
 0x170   :  { %1507 = vmatpush3.bf16.msra.mxu0 %v1549_v10 }
 0x171   :  { %1539 = vmatpush3.bf16.msra.mxu1 %v1549_v10 }
 0x203   :  { %v1478_v44 = vpop.f32.mrf.mxu0 }
 0x204   :  { %v438_v57 = vadd.f32 %v1478_v44, %v2112_v53 }
 0x205   :  { %v429_v58 = vpop.f32.mrf.mxu0 }
 0x206   :  { %v2115_v61 = vmul.f32 0.70710677, %v438_v57  ;;  %v430_v37 = vadd.f32 %v2112_v53, %v429_v58 }
 0x207   :  { %v1479_v62 = vpop.f32.mrf.mxu0 }
 0x208   :  { %v526_v11 = vand.u32 2147483647, %v2115_v61  ;;  %v2119_v63 = vmul.f32 0.70710677, %v430_v37  ;;  %v2122_v2 = vadd.f32 %v1479_v62, %v2112_v53  ;;  %v2166_v62 = vmul.f32 0.5, %v438_v57 }
 0x209   :  { %v432_v23 = vpop.f32.mrf.mxu0  ;;  %vm846_vm2 = vcmp.lt.f32.partialorder %v2115_v61, 0.0 }
 0x20a   :  { %v542_v4 = vmul.f32 0.3275911, %v526_v11  ;;  %v524_v5 = vand.u32 2147483647, %v2119_v63  ;;  %v2126_v6 = vmul.f32 0.70710677, %v2122_v2  ;;  %v2129_v45 = vadd.f32 %v2112_v53, %v432_v23 }
 0x20b   :  { %v1482_v12 = vpop.f32.mrf.mxu0  ;;  %v750_v48 = vsub.f32 0.0, %v526_v11  ;;  %vm844_vm3 = vcmp.lt.f32.partialorder %v2119_v63, 0.0 }
 0x20c   :  { %v558_v13 = vadd.f32 1.0, %v542_v4  ;;  %v540_v54 = vmul.f32 0.3275911, %v524_v5  ;;  %v527_v17 = vand.u32 2147483647, %v2126_v6  ;;  %v2137_v22 = vadd.f32 %v1482_v12, %v2112_v53 }
 0x20d   :  { %v2133_v14 = vmul.f32 0.70710677, %v2129_v45  ;;  %v445_v15 = vpop.f32.mrf.mxu0  ;;  %v748_v1 = vsub.f32 0.0, %v524_v5  ;;  %v766_v44 = vmul.f32 %v750_v48, %v526_v11  ;;  %vm847_vm4 = vcmp.lt.f32.partialorder %v2126_v6, 0.0 }
 0x20e   :  { %1582 = vrcp.f32 %v558_v13  ;;  %v556_v35 = vadd.f32 1.0, %v540_v54  ;;  %v543_v18 = vmul.f32 0.3275911, %v527_v17  ;;  %v2140_v33 = vmul.f32 0.70710677, %v2137_v22 }
 0x20f   :  { %v525_v19 = vand.u32 2147483647, %v2133_v14  ;;  %v1483_v16 = vpop.f32.mrf.mxu0  ;;  %v751_v52 = vsub.f32 0.0, %v527_v17  ;;  %vm845_vm1 = vcmp.lt.f32.partialorder %v2133_v14, 0.0 }
 0x210   :  { %1584 = vrcp.f32 %v556_v35  ;;  %v559_v31 = vadd.f32 1.0, %v543_v18  ;;  %v2143_v34 = vand.u32 2147483647, %v2140_v33  ;;  %v2148_v20 = vadd.f32 %v1483_v16, %v2112_v53 }
 0x211   :  { %v541_v32 = vmul.f32 0.3275911, %v525_v19  ;;  %v2145_v47 = vpop.f32.mrf.mxu0  ;;  %v749_v58 = vsub.f32 0.0, %v525_v19  ;;  %v2175_v35 = vmul.f32 0.5, %v430_v37  ;;  %v764_v18 = vmul.f32 %v748_v1, %v524_v5 }
 0x212   :  { %1586 = vrcp.f32 %v559_v31  ;;  %v546_v39 = vmul.f32 0.3275911, %v2143_v34  ;;  %v2152_v0 = vmul.f32 0.70710677, %v2148_v20  ;;  %v767_v31 = vmul.f32 %v751_v52, %v527_v17 }
 0x213   :  { %v557_v21 = vadd.f32 1.0, %v541_v32  ;;  %v1486_v43 = vpop.f32.mrf.mxu0  ;;  %v446_v5 = vadd.f32 %v2112_v53, %v445_v15  ;;  %v2191_v1 = vmul.f32 0.5, %v2122_v2  ;;  %vm850_vm6 = vcmp.lt.f32.partialorder %v2140_v33, 0.0 }
 0x214   :  { %v562_v42 = vadd.f32 1.0, %v546_v39  ;;  %v2155_v46 = vand.u32 2147483647, %v2152_v0  ;;  %v2161_v51 = vadd.f32 %v1486_v43, %v2112_v53  ;;  %v765_v39 = vmul.f32 %v749_v58, %v525_v19 }
 0x215   :  { %1588 = vrcp.f32 %v557_v21  ;;  %v461_v12 = vpop.f32.mrf.mxu0  ;;  %v784_v21 = vmul.f32 1.442695, %v766_v44  ;;  %v2201_v2 = vmul.f32 0.70710677, %v446_v5  ;;  %vm851_vm5 = vcmp.lt.f32.partialorder %v2152_v0, 0.0 }
 0x216   :  { %1590 = vrcp.f32 %v562_v42  ;;  %v547_v30 = vmul.f32 0.3275911, %v2155_v46  ;;  %v2170_v4 = vmul.f32 0.70710677, %v2161_v51  ;;  %v2182_v42 = vadd.f32 %v2112_v53, %v461_v12 }
 0x217   :  { %vm848_vm9 = vcmp.lt.f32.partialorder %v2201_v2, 0.0 }
 0x218   :  { %v563_v28 = vadd.f32 1.0, %v547_v30  ;;  %v2179_v57 = vand.u32 2147483647, %v2170_v4  ;;  %v2196_v15 = vmul.f32 0.70710677, %v2182_v42  ;;  %v2321_v6 = vmul.f32 0.5, %v2182_v42 }
 0x219   :  { %vm854_vm12 = vcmp.lt.f32.partialorder %v2170_v4, 0.0 }
 0x21a   :  { %1592 = vrcp.f32 %v563_v28  ;;  %v550_v30 = vmul.f32 0.3275911, %v2179_v57  ;;  %vm852_vm7 = vcmp.lt.f32.partialorder %v2196_v15, 0.0 }
 0x21b   :  { %v2157_v50 = vpop.eup %1582  ;;  %1594 = vpow2.f32 %v784_v21 }
 0x21c   :  { %v606_v56 = vmul.f32 1.0614054, %v2157_v50  ;;  %v566_v44 = vadd.f32 1.0, %v550_v30 }
 0x21d   :  { %v2164_v29 = vpop.eup %1584 }
 0x21e   :  { %v1405_v10 = vadd.f32 -1.4531521, %v606_v56  ;;  %v604_v23 = vmul.f32 1.0614054, %v2164_v29  ;;  %v780_v56 = vmul.f32 1.442695, %v764_v18  ;;  %1596 = vrcp.f32 %v566_v44 }
 0x21f   :  { %v2172_v13 = vpop.eup %1586  ;;  %v449_v44 = vadd.f32 %v2112_v53, %v2145_v47 }
 0x220   :  { %v638_v54 = vmul.f32 %v2157_v50, %v1405_v10  ;;  %v1403_v16 = vadd.f32 -1.4531521, %v604_v23  ;;  %v607_v11 = vmul.f32 1.0614054, %v2172_v13  ;;  %v786_v10 = vmul.f32 1.442695, %v767_v31 }
 0x221   :  { %v782_v23 = vmul.f32 1.442695, %v765_v39  ;;  %1598 = vpow2.f32 %v780_v56  ;;  %v2234_v25 = vmul.f32 0.70710677, %v449_v44 }
 0x222   :  { %v654_v32 = vadd.f32 1.4214138, %v638_v54  ;;  %v2184_v43 = vpop.eup %1588  ;;  %v636_v37 = vmul.f32 %v2164_v29, %v1403_v16  ;;  %v1406_v48 = vadd.f32 -1.4531521, %v607_v11 }
 0x223   :  { %v605_v19 = vmul.f32 1.0614054, %v2184_v43  ;;  %v2198_v12 = vpop.eup %1590  ;;  %1600 = vpow2.f32 %v782_v23  ;;  %vm849_vm10 = vcmp.lt.f32.partialorder %v2234_v25, 0.0 }
 0x224   :  { %v670_v17 = vmul.f32 %v2157_v50, %v654_v32  ;;  %v652_v52 = vadd.f32 1.4214138, %v636_v37  ;;  %v639_v28 = vmul.f32 %v2172_v13, %v1406_v48  ;;  %v610_v31 = vmul.f32 1.0614054, %v2198_v12 }
 0x225   :  { %v1404_v58 = vadd.f32 -1.4531521, %v605_v19  ;;  %v2206_v32 = vand.u32 2147483647, %v2196_v15  ;;  %v2210_v37 = vmul.f32 0.5, %v2129_v45  ;;  %v754_v19 = vsub.f32 0.0, %v2143_v34 }
 0x226   :  { %v668_v54 = vmul.f32 %v2164_v29, %v652_v52  ;;  %v655_v18 = vadd.f32 1.4214138, %v639_v28  ;;  %v1421_v16 = vadd.f32 -0.28449672, %v670_v17  ;;  %v1409_v30 = vadd.f32 -1.4531521, %v610_v31  ;;  %v1487_v17 = vpop.f32.mrf.mxu0 }
 0x227   :  { %v637_v11 = vmul.f32 %v2184_v43, %v1404_v58  ;;  %v528_v28 = vand.u32 2147483647, %v2201_v2  ;;  %v548_v58 = vmul.f32 0.3275911, %v2206_v32  ;;  %1602 = vpow2.f32 %v786_v10  ;;  %v2222_v23 = vpop.eup %1592 }
 0x228   :  { %v1419_v21 = vadd.f32 -0.28449672, %v668_v54  ;;  %v671_v39 = vmul.f32 %v2172_v13, %v655_v18  ;;  %v702_v56 = vmul.f32 %v2157_v50, %v1421_v16  ;;  %v2220_v54 = vmul.f32 0.5, %v2137_v22 }
 0x229   :  { %v653_v48 = vadd.f32 1.4214138, %v637_v11  ;;  %v642_v11 = vmul.f32 %v2198_v12, %v1409_v30  ;;  %v564_v31 = vadd.f32 1.0, %v548_v58  ;;  %v2230_v16 = vmul.f32 0.5, %v446_v5 }
 0x22a   :  { %v1422_v52 = vadd.f32 -0.28449672, %v671_v39  ;;  %v700_v18 = vmul.f32 %v2164_v29, %v1419_v21  ;;  %v2227_v39 = vadd.f32 %v1487_v17, %v2112_v53  ;;  %v611_v10 = vmul.f32 1.0614054, %v2222_v23 }
 0x22b   :  { %v669_v45 = vmul.f32 %v2184_v43, %v653_v48  ;;  %v770_v22 = vmul.f32 %v754_v19, %v2143_v34  ;;  %v544_v48 = vmul.f32 0.3275911, %v528_v28  ;;  %1604 = vrcp.f32 %v564_v31  ;;  %v1595_v19 = vpop.eup %1594 }
 0x22c   :  { %v703_v47 = vmul.f32 %v2172_v13, %v1422_v52  ;;  %v718_v21 = vadd.f32 0.2548296, %v702_v56  ;;  %v1410_v58 = vadd.f32 -1.4531521, %v611_v10  ;;  %v755_v17 = vsub.f32 0.0, %v2155_v46 }
 0x22d   :  { %v1420_v49 = vadd.f32 -0.28449672, %v669_v45  ;;  %v716_v41 = vadd.f32 0.2548296, %v700_v18  ;;  %v658_v40 = vadd.f32 1.4214138, %v642_v11 }
 0x22e   :  { %v2239_v52 = vmul.f32 0.70710677, %v2227_v39  ;;  %v719_v5 = vadd.f32 0.2548296, %v703_v47  ;;  %v752_v9 = vsub.f32 0.0, %v528_v28  ;;  %v643_v34 = vmul.f32 %v2222_v23, %v1410_v58 }
 0x22f   :  { %v701_v30 = vmul.f32 %v2184_v43, %v1420_v49  ;;  %v792_v8 = vmul.f32 1.442695, %v770_v22  ;;  %v529_v31 = vand.u32 2147483647, %v2234_v25  ;;  %v2246_v49 = vpop.eup %1596  ;;  %v560_v11 = vadd.f32 1.0, %v544_v48 }
 0x230   :  { %v2244_v56 = vand.u32 2147483647, %v2239_v52  ;;  %v659_v10 = vadd.f32 1.4214138, %v643_v34  ;;  %v771_v27 = vmul.f32 %v755_v17, %v2155_v46  ;;  %v734_v47 = vmul.f32 %v2157_v50, %v718_v21  ;;  %v1599_v26 = vpop.eup %1598 }
 0x231   :  { %v717_v45 = vadd.f32 0.2548296, %v701_v30  ;;  %v732_v30 = vmul.f32 %v2164_v29, %v716_v41  ;;  %v674_v58 = vmul.f32 %v2198_v12, %v658_v40  ;;  %v2254_v22 = vmul.f32 0.5, %v2148_v20  ;;  %v1601_v48 = vpop.eup %1600  ;;  %v464_v29 = vpop.f32.mrf.mxu0 }
 0x232   :  { %v735_v36 = vmul.f32 %v2172_v13, %v719_v5  ;;  %v768_v24 = vmul.f32 %v752_v9, %v528_v28  ;;  %v614_v60 = vmul.f32 1.0614054, %v2246_v49  ;;  %1606 = vpow2.f32 %v792_v8 }
 0x233   :  { %v733_v18 = vmul.f32 %v2184_v43, %v717_v45  ;;  %v551_v43 = vmul.f32 0.3275911, %v2244_v56  ;;  %v675_v46 = vmul.f32 %v2222_v23, %v659_v10  ;;  %v2260_v50 = vmul.f32 0.5, %v449_v44 }
 0x234   :  { %v545_v41 = vmul.f32 0.3275911, %v529_v31  ;;  %1608 = vrcp.f32 %v560_v11  ;;  %v794_v20 = vmul.f32 1.442695, %v771_v27  ;;  %v758_v21 = vsub.f32 0.0, %v2179_v57  ;;  %v1603_v17 = vpop.eup %1602 }
 0x235   :  { %v813_v40 = vmul.f32 %v1601_v48, %v733_v18  ;;  %v814_v13 = vmul.f32 %v1595_v19, %v734_v47  ;;  %v812_v9 = vmul.f32 %v1599_v26, %v732_v30  ;;  %v1425_v28 = vadd.f32 -0.28449672, %v674_v58 }
 0x236   :  { %v567_v5 = vadd.f32 1.0, %v551_v43  ;;  %v815_v45 = vmul.f32 %v1603_v17, %v735_v36  ;;  %v788_v34 = vmul.f32 1.442695, %v768_v24  ;;  %v1413_v59 = vadd.f32 -1.4531521, %v614_v60  ;;  %v1490_v60 = vpop.f32.mrf.mxu0 }
 0x237   :  { %v2264_v8 = vadd.f32 %v2112_v53, %v464_v29  ;;  %v1426_v44 = vadd.f32 -0.28449672, %v675_v46  ;;  %v561_v10 = vadd.f32 1.0, %v545_v41  ;;  %v753_v18 = vsub.f32 0.0, %v529_v31 }
 0x238   :  { %1610 = vrcp.f32 %v567_v5  ;;  %v2267_v27 = vpop.eup %1604  ;;  %v829_v26 = vsub.f32 1.0, %v813_v40  ;;  %v774_v24 = vmul.f32 %v758_v21, %v2179_v57  ;;  %v756_v36 = vsub.f32 0.0, %v2206_v32  ;;  %v477_v17 = vpop.f32.mrf.mxu0 }
 0x239   :  { %1612 = vpow2.f32 %v794_v20  ;;  %v830_v19 = vsub.f32 1.0, %v814_v13  ;;  %v828_v11 = vsub.f32 1.0, %v812_v9  ;;  %v706_v47 = vmul.f32 %v2198_v12, %v1425_v28 }
 0x23a   :  { %v612_v30 = vmul.f32 1.0614054, %v2267_v27  ;;  %v831_v58 = vsub.f32 1.0, %v815_v45  ;;  %1614 = vpow2.f32 %v788_v34  ;;  %v646_v43 = vmul.f32 %v2246_v49, %v1413_v59 }
 0x23b   :  { %v2278_v48 = vmul.f32 0.70710677, %v2264_v8  ;;  %v707_v57 = vmul.f32 %v2222_v23, %v1426_v44  ;;  %1616 = vrcp.f32 %v561_v10  ;;  %v769_v46 = vmul.f32 %v753_v18, %v529_v31 }
 0x23c   :  { %v1411_v41 = vadd.f32 -1.4531521, %v612_v30  ;;  %v861_v29 = vsub.f32 0.0, %v829_v26  ;;  %v800_v40 = vmul.f32 1.442695, %v774_v24  ;;  %v772_v20 = vmul.f32 %v756_v36, %v2206_v32 }
 0x23d   :  { %v2283_v21 = vand.u32 2147483647, %v2278_v48  ;;  %v862_v13 = vsub.f32 0.0, %v830_v19  ;;  %v860_v9 = vsub.f32 0.0, %v828_v11  ;;  %v722_v28 = vadd.f32 0.2548296, %v706_v47 }
 0x23e   :  { %v644_v59 = vmul.f32 %v2267_v27, %v1411_v41  ;;  %v863_v5 = vsub.f32 0.0, %v831_v58  ;;  %v662_v45 = vadd.f32 1.4214138, %v646_v43  ;;  %v2288_v31 = vadd.f32 %v1490_v60, %v2112_v53 }
 0x23f   :  { %v549_v34 = vmul.f32 0.3275911, %v2283_v21  ;;  %v723_v44 = vadd.f32 0.2548296, %v707_v57  ;;  %v2290_v10 = vmul.f32 1.442695, %v769_v46  ;;  %v2293_v18 = vadd.f32 %v2112_v53, %v477_v17  ;;  %v1607_v24 = vpop.eup %1606 }
 0x240   :  { %v660_v32 = vadd.f32 1.4214138, %v644_v59  ;;  %v877_v36 = vsel %vm845_vm1, %v861_v29, %v829_v26  ;;  %v796_v47 = vmul.f32 1.442695, %v772_v20  ;;  %v2298_v43 = vmul.f32 0.70710677, %v2288_v31 }
 0x241   :  { %v565_v30 = vadd.f32 1.0, %v549_v34  ;;  %v2300_v41 = vpop.eup %1608  ;;  %v878_v60 = vsel %vm846_vm2, %v862_v13, %v830_v19  ;;  %v876_v57 = vsel %vm844_vm3, %v860_v9, %v828_v11  ;;  %v738_v46 = vmul.f32 %v2198_v12, %v722_v28  ;;  %v1491_v28 = vpop.f32.mrf.mxu0 }
 0x242   :  { %1618 = vpow2.f32 %v800_v40  ;;  %v879_v14 = vsel %vm847_vm4, %v863_v5, %v831_v58  ;;  %v678_v26 = vmul.f32 %v2246_v49, %v662_v45  ;;  %v2311_v29 = vand.u32 2147483647, %v2298_v43 }
 0x243   :  { %1620 = vrcp.f32 %v565_v30  ;;  %v893_v20 = vadd.f32 1.0, %v877_v36  ;;  %v739_v17 = vmul.f32 %v2222_v23, %v723_v44  ;;  %v676_v61 = vmul.f32 %v2267_v27, %v660_v32 }
 0x244   :  { %v2316_v63 = vmul.f32 0.70710677, %v2293_v18  ;;  %v894_v12 = vadd.f32 1.0, %v878_v60  ;;  %1622 = vpow2.f32 %v796_v47  ;;  %v554_v11 = vmul.f32 0.3275911, %v2311_v29 }
 0x245   :  { %v2318_v19 = vpop.eup %1610  ;;  %v892_v40 = vadd.f32 1.0, %v876_v57  ;;  %v895_v13 = vadd.f32 1.0, %v879_v14  ;;  %v2328_v59 = vmul.f32 %v1607_v24, %v738_v46  ;;  %v1429_v5 = vadd.f32 -0.28449672, %v678_v26 }
 0x246   :  { %v1613_v58 = vpop.eup %1612  ;;  %v615_v9 = vmul.f32 1.0614054, %v2318_v19  ;;  %v2326_v23 = vand.u32 2147483647, %v2316_v63  ;;  %v759_v45 = vsub.f32 0.0, %v2244_v56  ;;  %v570_v34 = vadd.f32 1.0, %v554_v11 }
 0x247   :  { %v2331_v42 = vpop.eup %1614  ;;  %v909_v44 = vmul.f32 %v893_v20, %v2210_v37  ;;  %v819_v32 = vmul.f32 %v1613_v58, %v739_v17  ;;  %v1427_v36 = vadd.f32 -0.28449672, %v676_v61  ;;  %v757_v60 = vsub.f32 0.0, %v2283_v21  ;;  %v480_v20 = vpop.f32.mrf.mxu0 }
 0x248   :  { %v1414_v47 = vadd.f32 -1.4531521, %v615_v9  ;;  %v2334_v30 = vpop.eup %1616  ;;  %1624 = vrcp.f32 %v570_v34  ;;  %v552_v57 = vmul.f32 0.3275911, %v2326_v23  ;;  %v2339_v24 = vadd.f32 %v1491_v28, %v2112_v53 }
 0x249   :  { %v910_v46 = vmul.f32 %v894_v12, %v2166_v62  ;;  %v908_v14 = vmul.f32 %v892_v40, %v2175_v35  ;;  %v911_v26 = vmul.f32 %v895_v13, %v2191_v1  ;;  %v2811_v17 = vsub.f32 1.0, %v2328_v59 }
 0x24a   :  { %v647_v37 = vmul.f32 %v2318_v19, %v1414_v47  ;;  %v710_v61 = vmul.f32 %v2246_v49, %v1429_v5  ;;  %v775_v11 = vmul.f32 %v759_v45, %v2244_v56  ;;  %v568_v58 = vadd.f32 1.0, %v552_v57 }
 0x24b   :  { %v835_v9 = vsub.f32 1.0, %v819_v32  ;;  %v708_v28 = vmul.f32 %v2267_v27, %v1427_v36  ;;  %v2351_v35 = vmul.f32 0.70710677, %v2339_v24  ;;  %v773_v1 = vmul.f32 %v757_v60, %v2283_v21 }
 0x24c   :  { %v663_v62 = vadd.f32 1.4214138, %v647_v37  ;;  %1626 = vrcp.f32 %v568_v58  ;;  %v2355_v12 = vadd.f32 %v2112_v53, %v480_v20  ;;  %v924_v40 = vpack.c.bf16 %v909_v44, %v908_v14 }
 0x24d   :  { %v925_v13 = vpack.c.bf16 %v911_v26, %v910_v46  ;;  %v2358_v56 = vmul.f32 0.5, %v2264_v8  ;;  %v762_v5 = vsub.f32 0.0, %v2311_v29  ;;  %v2362_v45 = vand.u32 2147483647, %v2351_v35 }
 0x24e   :  { %v726_v32 = vadd.f32 0.2548296, %v710_v61  ;;  %v679_v36 = vmul.f32 %v2318_v19, %v663_v62  ;;  %v802_v47 = vmul.f32 1.442695, %v775_v11  ;;  %v2366_v21 = vmul.f32 0.70710677, %v2355_v12  ;;  %1508 = vmatprep.mubr.bf16.mxu0 %v924_v40 }
 0x24f   :  { %v1619_v34 = vpop.eup %1618  ;;  %v2372_v8 = vsub.f32 0.0, %v2811_v17  ;;  %v867_v44 = vsub.f32 0.0, %v835_v9  ;;  %v724_v60 = vadd.f32 0.2548296, %v708_v28  ;;  %v555_v57 = vmul.f32 0.3275911, %v2362_v45  ;;  %1509 = vmatmul.mubr.bf16.vlgmr.msra.gmra.mxu0 %v925_v13 }
 0x250   :  { %v2368_v53 = vpop.eup %1620  ;;  %1628 = vpow2.f32 %v2290_v10  ;;  %v798_v14 = vmul.f32 1.442695, %v773_v1  ;;  %v2378_v26 = vand.u32 2147483647, %v2366_v21  ;;  %v778_v20 = vmul.f32 %v762_v5, %v2311_v29 }
 0x251   :  { %v613_v46 = vmul.f32 1.0614054, %v2368_v53  ;;  %v1623_v37 = vpop.eup %1622  ;;  %v760_v61 = vsub.f32 0.0, %v2326_v23  ;;  %v571_v11 = vadd.f32 1.0, %v555_v57  ;;  %v608_v58 = vmul.f32 1.0614054, %v2300_v41 }
 0x252   :  { %v1430_v28 = vadd.f32 -0.28449672, %v679_v36  ;;  %1630 = vpow2.f32 %v802_v47  ;;  %v553_v40 = vmul.f32 0.3275911, %v2378_v26  ;;  %v742_v10 = vmul.f32 %v2246_v49, %v726_v32 }
 0x253   :  { %v1412_v62 = vadd.f32 -1.4531521, %v613_v46  ;;  %v740_v1 = vmul.f32 %v2267_v27, %v724_v60  ;;  %1632 = vrcp.f32 %v571_v11  ;;  %v609_v13 = vmul.f32 1.0614054, %v2334_v30 }
 0x254   :  { %v883_v29 = vsel %vm851_vm5, %v867_v44, %v835_v9  ;;  %1634 = vpow2.f32 %v798_v14  ;;  %v569_v57 = vadd.f32 1.0, %v553_v40  ;;  %v808_v36 = vmul.f32 1.442695, %v778_v20 }
 0x255   :  { %v645_v5 = vmul.f32 %v2368_v53, %v1412_v62  ;;  %v2390_v17 = vpop.eup %1624  ;;  %v776_v47 = vmul.f32 %v760_v61, %v2326_v23  ;;  %v1407_v46 = vadd.f32 -1.4531521, %v608_v58  ;;  %v1408_v7 = vadd.f32 -1.4531521, %v609_v13 }
 0x256   :  { %v711_v49 = vmul.f32 %v2318_v19, %v1430_v28  ;;  %v618_v32 = vmul.f32 1.0614054, %v2390_v17  ;;  %1636 = vrcp.f32 %v569_v57  ;;  %v820_v60 = vmul.f32 %v1623_v37, %v740_v1 }
 0x257   :  { %v661_v27 = vadd.f32 1.4214138, %v645_v5  ;;  %v763_v0 = vsub.f32 0.0, %v2362_v45  ;;  %v640_v9 = vmul.f32 %v2300_v41, %v1407_v46  ;;  %v641_v44 = vmul.f32 %v2334_v30, %v1408_v7 }
 0x258   :  { %v2399_v14 = vadd.f32 1.0, %v883_v29  ;;  %v2401_v23 = vmul.f32 %v1619_v34, %v742_v10  ;;  %v1417_v61 = vadd.f32 -1.4531521, %v618_v32  ;;  %1638 = vpow2.f32 %v808_v36 }
 0x259   :  { %v677_v20 = vmul.f32 %v2368_v53, %v661_v27  ;;  %v2404_v11 = vpop.eup %1626  ;;  %v804_v58 = vmul.f32 1.442695, %v776_v47  ;;  %v656_v37 = vadd.f32 1.4214138, %v640_v9  ;;  %v657_v28 = vadd.f32 1.4214138, %v641_v44 }
 0x25a   :  { %v727_v62 = vadd.f32 0.2548296, %v711_v49  ;;  %v650_v7 = vmul.f32 %v2390_v17, %v1417_v61  ;;  %v616_v1 = vmul.f32 1.0614054, %v2404_v11  ;;  %v836_v13 = vsub.f32 1.0, %v820_v60 }
 0x25b   :  { %v1428_v40 = vadd.f32 -0.28449672, %v677_v20  ;;  %v779_v34 = vmul.f32 %v763_v0, %v2362_v45  ;;  %v672_v10 = vmul.f32 %v2300_v41, %v656_v37  ;;  %v673_v29 = vmul.f32 %v2334_v30, %v657_v28 }
 0x25c   :  { %v666_v57 = vadd.f32 1.4214138, %v650_v7  ;;  %v1415_v36 = vadd.f32 -1.4531521, %v616_v1  ;;  %v761_v47 = vsub.f32 0.0, %v2378_v26  ;;  %v838_v49 = vsub.f32 1.0, %v2401_v23 }
 0x25d   :  { %v709_v5 = vmul.f32 %v2368_v53, %v1428_v40  ;;  %v1629_v46 = vpop.eup %1628  ;;  %1640 = vpow2.f32 %v804_v58  ;;  %v1423_v27 = vadd.f32 -0.28449672, %v672_v10  ;;  %v1424_v32 = vadd.f32 -0.28449672, %v673_v29 }
 0x25e   :  { %v743_v60 = vmul.f32 %v2318_v19, %v727_v62  ;;  %v682_v45 = vmul.f32 %v2390_v17, %v666_v57  ;;  %v648_v0 = vmul.f32 %v2404_v11, %v1415_v36  ;;  %v868_v20 = vsub.f32 0.0, %v836_v13 }
 0x25f   :  { %v725_v9 = vadd.f32 0.2548296, %v709_v5  ;;  %v1631_v44 = vpop.eup %1630  ;;  %vm853_vm8 = vcmp.lt.f32.partialorder %v2278_v48, 0.0  ;;  %v810_v61 = vmul.f32 1.442695, %v779_v34  ;;  %v704_v37 = vmul.f32 %v2300_v41, %v1423_v27 }
 0x260   :  { %v705_v28 = vmul.f32 %v2334_v30, %v1424_v32  ;;  %v2421_v40 = vpop.eup %1632  ;;  %v1433_v7 = vadd.f32 -0.28449672, %v682_v45  ;;  %v664_v19 = vadd.f32 1.4214138, %v648_v0  ;;  %v777_v62 = vmul.f32 %v761_v47, %v2378_v26 }
 0x261   :  { %v741_v58 = vmul.f32 %v2368_v53, %v725_v9  ;;  %v1635_v1 = vpop.eup %1634  ;;  %v2826_v10 = vsub.f32 1.0, %v2328_v59  ;;  %v619_v34 = vmul.f32 1.0614054, %v2421_v40  ;;  %v720_v5 = vadd.f32 0.2548296, %v704_v37 }
 0x262   :  { %v721_v57 = vadd.f32 0.2548296, %v705_v28  ;;  %v823_v36 = vmul.f32 %v1631_v44, %v743_v60  ;;  %v714_v53 = vmul.f32 %v2390_v17, %v1433_v7  ;;  %v680_v32 = vmul.f32 %v2404_v11, %v664_v19 }
 0x263   :  { %v882_v29 = vsel %vm850_vm6, %v2372_v8, %v2826_v10  ;;  %v821_v27 = vmul.f32 %v1635_v1, %v741_v58  ;;  %v2434_v26 = vpop.eup %1636  ;;  %v884_v33 = vsel %vm852_vm7, %v868_v20, %v836_v13  ;;  %v1418_v59 = vadd.f32 -1.4531521, %v619_v34 }
 0x264   :  { %v736_v8 = vmul.f32 %v2300_v41, %v720_v5  ;;  %v737_v47 = vmul.f32 %v2334_v30, %v721_v57  ;;  %v1431_v45 = vadd.f32 -0.28449672, %v680_v32  ;;  %1642 = vpow2.f32 %v810_v61 }
 0x265   :  { %v837_v9 = vsub.f32 1.0, %v821_v27  ;;  %v806_v60 = vmul.f32 1.442695, %v777_v62  ;;  %vm855_vm11 = vcmp.lt.f32.partialorder %v2239_v52, 0.0  ;;  %v651_v0 = vmul.f32 %v2421_v40, %v1418_v59  ;;  %v1639_v15 = vpop.eup %1638 }
 0x266   :  { %v617_v44 = vmul.f32 1.0614054, %v2434_v26  ;;  %v816_v37 = vmul.f32 %v2331_v42, %v736_v8  ;;  %v817_v28 = vmul.f32 %v1629_v46, %v737_v47  ;;  %v839_v13 = vsub.f32 1.0, %v823_v36 }
 0x267   :  { %v869_v20 = vsub.f32 0.0, %v837_v9  ;;  %v730_v58 = vadd.f32 0.2548296, %v714_v53  ;;  %v712_v41 = vmul.f32 %v2404_v11, %v1431_v45  ;;  %v667_v30 = vadd.f32 1.4214138, %v651_v0 }
 0x268   :  { %v1416_v61 = vadd.f32 -1.4531521, %v617_v44  ;;  %v832_v7 = vsub.f32 1.0, %v816_v37  ;;  %v833_v19 = vsub.f32 1.0, %v817_v28  ;;  %v900_v62 = vadd.f32 1.0, %v884_v33 }
 0x269   :  { %v885_v1 = vsel %vm853_vm8, %v869_v20, %v837_v9  ;;  %v728_v10 = vadd.f32 0.2548296, %v712_v41  ;;  %1644 = vpow2.f32 %v806_v60  ;;  %v683_v46 = vmul.f32 %v2421_v40, %v667_v30 }
 0x26a   :  { %v901_v42 = vadd.f32 1.0, %v885_v1  ;;  %v649_v34 = vmul.f32 %v2434_v26, %v1416_v61  ;;  %v864_v5 = vsub.f32 0.0, %v832_v7  ;;  %v1641_v57 = vpop.eup %1640  ;;  %v871_v36 = vsub.f32 0.0, %v839_v13 }
 0x26b   :  { %v746_v27 = vmul.f32 %v2390_v17, %v730_v58  ;;  %v744_v53 = vmul.f32 %v2404_v11, %v728_v10  ;;  %v865_v32 = vsub.f32 0.0, %v833_v19  ;;  %v898_v59 = vadd.f32 1.0, %v882_v29 }
 0x26c   :  { %v1434_v33 = vadd.f32 -0.28449672, %v683_v46  ;;  %v665_v8 = vadd.f32 1.4214138, %v649_v34  ;;  %v880_v48 = vsel %vm848_vm9, %v864_v5, %v832_v7  ;;  %v870_v47 = vsub.f32 0.0, %v838_v49 }
 0x26d   :  { %v917_v9 = vmul.f32 %v901_v42, %v2358_v56  ;;  %v881_v45 = vsel %vm849_vm10, %v865_v32, %v833_v19  ;;  %v896_v60 = vadd.f32 1.0, %v880_v48  ;;  %v824_v0 = vmul.f32 %v1641_v57, %v744_v53 }
 0x26e   :  { %v715_v17 = vmul.f32 %v2421_v40, %v1434_v33  ;;  %v681_v11 = vmul.f32 %v2434_v26, %v665_v8  ;;  %v897_v29 = vadd.f32 1.0, %v881_v45  ;;  %v915_v44 = vmul.f32 %v2399_v14, %v2254_v22 }
 0x26f   :  { %v916_v2 = vmul.f32 %v900_v62, %v2321_v6  ;;  %v887_v37 = vsel %vm855_vm11, %v871_v36, %v839_v13  ;;  %v826_v28 = vmul.f32 %v1639_v15, %v746_v27  ;;  %v912_v25 = vmul.f32 %v896_v60, %v2230_v16 }
 0x270   :  { %v731_v56 = vadd.f32 0.2548296, %v715_v17  ;;  %v1432_v20 = vadd.f32 -0.28449672, %v681_v11  ;;  %v913_v58 = vmul.f32 %v897_v29, %v2260_v50  ;;  %v914_v41 = vmul.f32 %v898_v59, %v2220_v54 }
 0x271   :  { %v886_v30 = vsel %vm854_vm12, %v870_v47, %v838_v49  ;;  %v928_v22 = vpack.c.bf16 %v917_v9, %v916_v2  ;;  %v1643_v14 = vpop.eup %1642  ;;  %v840_v6 = vsub.f32 1.0, %v824_v0  ;;  %v903_v61 = vadd.f32 1.0, %v887_v37 }
 0x272   :  { %v747_v52 = vmul.f32 %v2421_v40, %v731_v56  ;;  %v713_v15 = vmul.f32 %v2434_v26, %v1432_v20  ;;  %v926_v13 = vpack.c.bf16 %v913_v58, %v912_v25  ;;  %v842_v7 = vsub.f32 1.0, %v826_v28 }
 0x273   :  { %v927_v16 = vpack.c.bf16 %v915_v44, %v914_v41  ;;  %v902_v54 = vadd.f32 1.0, %v886_v30  ;;  %v503_v23 = vmul.f32 0.5, %v2227_v39  ;;  %v872_v49 = vsub.f32 0.0, %v840_v6 }
 0x274   :  { %v827_v19 = vmul.f32 %v1643_v14, %v747_v52  ;;  %v729_v50 = vadd.f32 0.2548296, %v713_v15  ;;  %1512 = vmatprep.mubr.bf16.mxu1 %v926_v13  ;;  %v502_v40 = vmul.f32 0.5, %v2161_v51  ;;  %v874_v42 = vsub.f32 0.0, %v842_v7 }
 0x275   :  { %1513 = vmatmul.mubr.bf16.vlgmr.msra.gmra.mxu1 %v927_v16  ;;  %v919_v10 = vmul.f32 %v903_v61, %v503_v23  ;;  %vm856_vm13 = vcmp.lt.f32.partialorder %v2316_v63, 0.0  ;;  %vm859_vm14 = vcmp.lt.f32.partialorder %v2351_v35, 0.0  ;;  %vm858_vm15 = vcmp.lt.f32.partialorder %v2298_v43, 0.0 }
 0x276   :  { %v1645_v4 = vpop.eup %1644  ;;  %v843_v62 = vsub.f32 1.0, %v827_v19  ;;  %v745_v1 = vmul.f32 %v2434_v26, %v729_v50  ;;  %1516 = vmatprep.mubr.bf16.mxu1 %v928_v22  ;;  %v918_v5 = vmul.f32 %v902_v54, %v502_v40  ;;  %v888_v39 = vsel %vm856_vm13, %v872_v49, %v840_v6 }
 0x277   :  { %v890_v27 = vsel %vm858_vm15, %v874_v42, %v842_v7  ;;  %v904_v59 = vadd.f32 1.0, %v888_v39  ;;  %vm857_vm1 = vcmp.lt.f32.partialorder %v2366_v21, 0.0  ;;  %v507_v33 = vmul.f32 0.5, %v2339_v24  ;;  %v1435_v24 = vld [vmem:[%s2795_s7] ss:$0 sm:$0xff] }
 0x278   :  { %v875_v46 = vsub.f32 0.0, %v843_v62  ;;  %v825_v34 = vmul.f32 %v1645_v4, %v745_v1  ;;  %v929_v53 = vpack.c.bf16 %v919_v10, %v918_v5  ;;  %v906_v51 = vadd.f32 1.0, %v890_v27 }
 0x279   :  { %v504_v63 = vmul.f32 0.5, %v2293_v18  ;;  %v505_v35 = vmul.f32 0.5, %v2355_v12  ;;  %v506_v48 = vmul.f32 0.5, %v2288_v31 }
 0x27a   :  { %v891_v57 = vsel %vm859_vm14, %v875_v46, %v843_v62  ;;  %v841_v36 = vsub.f32 1.0, %v825_v34 }
 0x27b   :  { %v907_v26 = vadd.f32 1.0, %v891_v57  ;;  %v920_v9 = vmul.f32 %v904_v59, %v504_v63  ;;  %v922_v60 = vmul.f32 %v906_v51, %v506_v48 }
 0x27c   :  { %v873_v32 = vsub.f32 0.0, %v841_v36 }
 0x27d   :  { %1517 = vmatmul.mubr.bf16.gmra.mxu1 %v929_v53  ;;  %v923_v47 = vmul.f32 %v907_v26, %v507_v33 }
 0x27e   :  { %v889_v8 = vsel %vm857_vm1, %v873_v32, %v841_v36 }
 0x27f   :  { %v905_v43 = vadd.f32 1.0, %v889_v8  ;;  %v931_v17 = vpack.c.bf16 %v923_v47, %v922_v60 }
 0x281   :  { %v921_v45 = vmul.f32 %v905_v43, %v505_v35 }
 0x283   :  { %v930_v0 = vpack.c.bf16 %v921_v45, %v920_v9 }
 0x285   :  { %1520 = vmatprep.mubr.bf16.mxu1 %v930_v0 }
 0x286   :  { %1521 = vmatmul.mubr.bf16.gmra.mxu1 %v931_v17 }
 0x30f   :  { %v1510_v21 = vpop.f32.mrf.mxu0 }
 0x310   :  { %v2490_v11 = vadd.f32 %v1510_v21, %v1435_v24 }
 0x311   :  { %v1037_v18 = vpop.f32.mrf.mxu0 }
 0x312   :  { %v2492_v12 = vadd.f32 %v1435_v24, %v1037_v18  ;;  %v1106_v31 = vsel %vm52_vm0, %v2490_v11, 0.0 }
 0x313   :  { %1107 = vadd.xlane.f32.xlu0 %v1106_v31  ;;  %v1511_v29 = vpop.f32.mrf.mxu0 }
 0x314   :  { %v2496_v44 = vadd.f32 %v1511_v29, %v1435_v24  ;;  %v1100_v56 = vsel %vm52_vm0, %v2492_v12, 0.0 }
 0x315   :  { %v1040_v2 = vpop.f32.mrf.mxu0 }
 0x316   :  { %v2498_v37 = vadd.f32 %v1435_v24, %v1040_v2  ;;  %v1109_v28 = vsel %vm52_vm0, %v2496_v44, 0.0 }
 0x317   :  { %1110 = vadd.xlane.f32.xlu1 %v1109_v28  ;;  %1101 = vadd.xlane.f32.xlu0 %v1100_v56 }
 0x318   :  { %v1103_v20 = vsel %vm52_vm0, %v2498_v37, 0.0 }
 0x31b   :  { %1104 = vadd.xlane.f32.xlu1 %v1103_v20 }
 0x335   :  { %v1514_v25 = vpop.f32.mrf.mxu1 }
 0x336   :  { %v2506_v58 = vadd.f32 %v1514_v25, %v1435_v24 }
 0x337   :  { %v1053_v41 = vpop.f32.mrf.mxu1 }
 0x338   :  { %v2508_v30 = vadd.f32 %v1435_v24, %v1053_v41  ;;  %v1118_v22 = vsel %vm52_vm0, %v2506_v58, 0.0 }
 0x339   :  { %v1515_v14 = vpop.f32.mrf.mxu1  ;;  %1119 = vadd.xlane.f32.xlu0 %v1118_v22 }
 0x33a   :  { %v2512_v6 = vadd.f32 %v1515_v14, %v1435_v24  ;;  %v1112_v61 = vsel %vm52_vm0, %v2508_v30, 0.0 }
 0x33b   :  { %v1056_v52 = vpop.f32.mrf.mxu1 }
 0x33c   :  { %v2514_v15 = vadd.f32 %v1435_v24, %v1056_v52  ;;  %v1121_v13 = vsel %vm52_vm0, %v2512_v6, 0.0 }
 0x33d   :  { %v1518_v7 = vpop.f32.mrf.mxu1  ;;  %1122 = vadd.xlane.f32.xlu1 %v1121_v13  ;;  %1113 = vadd.xlane.f32.xlu0 %v1112_v61 }
 0x33e   :  { %v2520_v16 = vadd.f32 %v1518_v7, %v1435_v24  ;;  %v1115_v54 = vsel %vm52_vm0, %v2514_v15, 0.0 }
 0x33f   :  { %v1069_v19 = vpop.f32.mrf.mxu1 }
 0x340   :  { %v2522_v50 = vadd.f32 %v1435_v24, %v1069_v19  ;;  %v1130_v23 = vsel %vm52_vm0, %v2520_v16, 0.0 }
 0x341   :  { %v1519_v4 = vpop.f32.mrf.mxu1  ;;  %1116 = vadd.xlane.f32.xlu1 %v1115_v54  ;;  %1131 = vadd.xlane.f32.xlu0 %v1130_v23 }
 0x342   :  { %v2528_v49 = vadd.f32 %v1519_v4, %v1435_v24  ;;  %v1124_v10 = vsel %vm52_vm0, %v2522_v50, 0.0 }
 0x343   :  { %v1072_v62 = vpop.f32.mrf.mxu1 }
 0x344   :  { %v2530_v1 = vadd.f32 %v1435_v24, %v1072_v62  ;;  %v1133_v40 = vsel %vm52_vm0, %v2528_v49, 0.0 }
 0x345   :  { %1134 = vadd.xlane.f32.xlu1 %v1133_v40  ;;  %1125 = vadd.xlane.f32.xlu0 %v1124_v10 }
 0x346   :  { %v1522_v42 = vpop.f32.mrf.mxu1  ;;  %v1127_v34 = vsel %vm52_vm0, %v2530_v1, 0.0 }
 0x347   :  { %v2540_v57 = vadd.f32 %v1522_v42, %v1435_v24 }
 0x348   :  { %v1085_v46 = vpop.f32.mrf.mxu1 }
 0x349   :  { %v2538_v5 = vadd.f32 %v1435_v24, %v1085_v46  ;;  %1128 = vadd.xlane.f32.xlu1 %v1127_v34  ;;  %v1142_v59 = vsel %vm52_vm0, %v2540_v57, 0.0 }
 0x34a   :  { %v1523_v39 = vpop.f32.mrf.mxu1 }
 0x34b   :  { %v1136_v36 = vsel %vm52_vm0, %v2538_v5, 0.0  ;;  %v2546_v26 = vadd.f32 %v1523_v39, %v1435_v24 }
 0x34c   :  { %v1088_v27 = vpop.f32.mrf.mxu1  ;;  %1137 = vadd.xlane.f32.xlu0 %v1136_v36 }
 0x34d   :  { %v2544_v53 = vadd.f32 %v1435_v24, %v1088_v27  ;;  %v1145_v51 = vsel %vm52_vm0, %v2546_v26, 0.0 }
 0x34f   :  { %v1139_v32 = vsel %vm52_vm0, %v2544_v53, 0.0 }
 0x350   :  { %1140 = vadd.xlane.f32.xlu1 %v1139_v32  ;;  %1143 = vadd.xlane.f32.xlu0 %v1142_v59 }
 0x354   :  { %1146 = vadd.xlane.f32.xlu1 %v1145_v51 }
 0x39c   :  { %v1108_v33 = vpop.xlane.xlu0 %1107 }
 0x39d   :  { %v1150_v8 = vmul.f32 0.03125, %v1108_v33 }
 0x39f   :  { %v2555_v63 = vsub.f32 %v2490_v11, %v1150_v8 }
 0x3a0   :  { %v1111_v35 = vpop.xlane.xlu1 %1110  ;;  %v1102_v43 = vpop.xlane.xlu0 %1101 }
 0x3a1   :  { %v1151_v48 = vmul.f32 0.03125, %v1111_v35  ;;  %v1148_v47 = vmul.f32 0.03125, %v1102_v43  ;;  %v1182_v9 = vmul.f32 %v2555_v63, %v2555_v63 }
 0x3a3   :  { %v2560_v45 = vsub.f32 %v2496_v44, %v1151_v48  ;;  %v2563_v60 = vsub.f32 %v2492_v12, %v1148_v47  ;;  %v1202_v0 = vsel %vm52_vm0, %v1182_v9, 0.0 }
 0x3a4   :  { %v1105_v17 = vpop.xlane.xlu1 %1104  ;;  %1203 = vadd.xlane.f32.xlu0 %v1202_v0 }
 0x3a5   :  { %v1149_v24 = vmul.f32 0.03125, %v1105_v17  ;;  %v1183_v21 = vmul.f32 %v2560_v45, %v2560_v45  ;;  %v1180_v11 = vmul.f32 %v2563_v60, %v2563_v60 }
 0x3a7   :  { %v2571_v18 = vsub.f32 %v2498_v37, %v1149_v24  ;;  %v1205_v31 = vsel %vm52_vm0, %v1183_v21, 0.0  ;;  %v1196_v29 = vsel %vm52_vm0, %v1180_v11, 0.0 }
 0x3a8   :  { %1206 = vadd.xlane.f32.xlu1 %v1205_v31  ;;  %1197 = vadd.xlane.f32.xlu0 %v1196_v29 }
 0x3a9   :  { %v1181_v12 = vmul.f32 %v2571_v18, %v2571_v18 }
 0x3ab   :  { %v1199_v44 = vsel %vm52_vm0, %v1181_v12, 0.0 }
 0x3ac   :  { %1200 = vadd.xlane.f32.xlu1 %v1199_v44 }
 0x3c2   :  { %v1120_v2 = vpop.xlane.xlu0 %1119 }
 0x3c3   :  { %v1154_v28 = vmul.f32 0.03125, %v1120_v2 }
 0x3c5   :  { %v2579_v56 = vsub.f32 %v2506_v58, %v1154_v28 }
 0x3c6   :  { %v1123_v20 = vpop.xlane.xlu1 %1122  ;;  %v1114_v37 = vpop.xlane.xlu0 %1113 }
 0x3c7   :  { %v1155_v25 = vmul.f32 0.03125, %v1123_v20  ;;  %v1152_v41 = vmul.f32 0.03125, %v1114_v37  ;;  %v1186_v22 = vmul.f32 %v2579_v56, %v2579_v56 }
 0x3c9   :  { %v2584_v14 = vsub.f32 %v2512_v6, %v1155_v25  ;;  %v2587_v52 = vsub.f32 %v2508_v30, %v1152_v41  ;;  %v1214_v13 = vsel %vm52_vm0, %v1186_v22, 0.0 }
 0x3ca   :  { %v1117_v61 = vpop.xlane.xlu1 %1116  ;;  %1215 = vadd.xlane.f32.xlu0 %v1214_v13  ;;  %v1132_v7 = vpop.xlane.xlu0 %1131 }
 0x3cb   :  { %v1153_v58 = vmul.f32 0.03125, %v1117_v61  ;;  %v1158_v19 = vmul.f32 0.03125, %v1132_v7  ;;  %v1187_v54 = vmul.f32 %v2584_v14, %v2584_v14  ;;  %v1184_v23 = vmul.f32 %v2587_v52, %v2587_v52 }
 0x3cd   :  { %v2595_v4 = vsub.f32 %v2514_v15, %v1153_v58  ;;  %v2598_v6 = vsub.f32 %v2520_v16, %v1158_v19  ;;  %v1217_v30 = vsel %vm52_vm0, %v1187_v54, 0.0  ;;  %v1208_v62 = vsel %vm52_vm0, %v1184_v23, 0.0 }
 0x3ce   :  { %1218 = vadd.xlane.f32.xlu1 %v1217_v30  ;;  %v1135_v40 = vpop.xlane.xlu1 %1134  ;;  %1209 = vadd.xlane.f32.xlu0 %v1208_v62  ;;  %v1126_v10 = vpop.xlane.xlu0 %1125 }
 0x3cf   :  { %v1159_v42 = vmul.f32 0.03125, %v1135_v40  ;;  %v1156_v46 = vmul.f32 0.03125, %v1126_v10  ;;  %v1185_v34 = vmul.f32 %v2595_v4, %v2595_v4  ;;  %v1190_v15 = vmul.f32 %v2598_v6, %v2598_v6  ;;  %v2653_v40 = vld [vmem:[%s2796_s8] ss:$0 sm:$0xff] }
 0x3d1   :  { %v2607_v39 = vsub.f32 %v2528_v49, %v1159_v42  ;;  %v2610_v16 = vsub.f32 %v2522_v50, %v1156_v46  ;;  %v1211_v36 = vsel %vm52_vm0, %v1185_v34, 0.0  ;;  %v1226_v27 = vsel %vm52_vm0, %v1190_v15, 0.0  ;;  %v2660_v34 = vld [vmem:[%s2797_s9] ss:$0 sm:$0xff] }
 0x3d2   :  { %1212 = vadd.xlane.f32.xlu1 %v1211_v36  ;;  %v1129_v32 = vpop.xlane.xlu1 %1128  ;;  %1227 = vadd.xlane.f32.xlu0 %v1226_v27 }
 0x3d3   :  { %v1157_v59 = vmul.f32 0.03125, %v1129_v32  ;;  %v1191_v51 = vmul.f32 %v2607_v39, %v2607_v39  ;;  %v1188_v33 = vmul.f32 %v2610_v16, %v2610_v16 }
 0x3d5   :  { %v2619_v49 = vsub.f32 %v2530_v1, %v1157_v59  ;;  %v1138_v8 = vpop.xlane.xlu0 %1137  ;;  %v1229_v50 = vsel %vm52_vm0, %v1191_v51, 0.0  ;;  %v1220_v35 = vsel %vm52_vm0, %v1188_v33, 0.0 }
 0x3d6   :  { %v1160_v43 = vmul.f32 0.03125, %v1138_v8  ;;  %1230 = vadd.xlane.f32.xlu1 %v1229_v50  ;;  %1221 = vadd.xlane.f32.xlu0 %v1220_v35 }
 0x3d7   :  { %v1189_v48 = vmul.f32 %v2619_v49, %v2619_v49 }
 0x3d8   :  { %v2626_v47 = vsub.f32 %v2538_v5, %v1160_v43  ;;  %v2827_v43 = vld [vmem:[#allocation2_spill] sm:$0xff] }
 0x3d9   :  { %v1141_v9 = vpop.xlane.xlu1 %1140  ;;  %v1144_v0 = vpop.xlane.xlu0 %1143  ;;  %v1223_v17 = vsel %vm52_vm0, %v1189_v48, 0.0 }
 0x3da   :  { %v1161_v1 = vmul.f32 0.03125, %v1141_v9  ;;  %v1162_v24 = vmul.f32 0.03125, %v1144_v0  ;;  %1224 = vadd.xlane.f32.xlu1 %v1223_v17  ;;  %v1192_v21 = vmul.f32 %v2626_v47, %v2626_v47 }
 0x3dc   :  { %v2632_v11 = vsub.f32 %v2544_v53, %v1161_v1  ;;  %v2635_v31 = vsub.f32 %v2540_v57, %v1162_v24  ;;  %v1232_v29 = vsel %vm52_vm0, %v1192_v21, 0.0 }
 0x3dd   :  { %v1147_v5 = vpop.xlane.xlu1 %1146  ;;  %1233 = vadd.xlane.f32.xlu0 %v1232_v29 }
 0x3de   :  { %v1163_v12 = vmul.f32 0.03125, %v1147_v5  ;;  %v1193_v44 = vmul.f32 %v2632_v11, %v2632_v11  ;;  %v1194_v2 = vmul.f32 %v2635_v31, %v2635_v31 }
 0x3e0   :  { %v2643_v28 = vsub.f32 %v2546_v26, %v1163_v12  ;;  %v1235_v53 = vsel %vm52_vm0, %v1193_v44, 0.0  ;;  %v1238_v20 = vsel %vm52_vm0, %v1194_v2, 0.0 }
 0x3e1   :  { %1236 = vadd.xlane.f32.xlu1 %v1235_v53  ;;  %1239 = vadd.xlane.f32.xlu0 %v1238_v20 }
 0x3e2   :  { %v1195_v57 = vmul.f32 %v2643_v28, %v2643_v28 }
 0x3e4   :  { %v1241_v37 = vsel %vm52_vm0, %v1195_v57, 0.0 }
 0x3e5   :  { %1242 = vadd.xlane.f32.xlu1 %v1241_v37 }
 0x42d   :  { %v1204_v25 = vpop.xlane.xlu0 %1203 }
 0x42e   :  { %v1246_v41 = vmul.f32 0.03125, %v1204_v25 }
 0x430   :  { %v1262_v22 = vadd.f32 1e-05, %v1246_v41 }
 0x431   :  { %v1207_v13 = vpop.xlane.xlu1 %1206  ;;  %v1198_v61 = vpop.xlane.xlu0 %1197 }
 0x432   :  { %1646 = vrsqrt.f32 %v1262_v22  ;;  %v1247_v26 = vmul.f32 0.03125, %v1207_v13  ;;  %v1244_v7 = vmul.f32 0.03125, %v1198_v61 }
 0x434   :  { %v1263_v58 = vadd.f32 1e-05, %v1247_v26  ;;  %v1260_v19 = vadd.f32 1e-05, %v1244_v7 }
 0x435   :  { %v1201_v54 = vpop.xlane.xlu1 %1200 }
 0x436   :  { %1648 = vrsqrt.f32 %v1263_v58  ;;  %v1245_v23 = vmul.f32 0.03125, %v1201_v54 }
 0x437   :  { %1650 = vrsqrt.f32 %v1260_v19 }
 0x438   :  { %v1261_v30 = vadd.f32 1e-05, %v1245_v23 }
 0x43a   :  { %1652 = vrsqrt.f32 %v1261_v30 }
 0x43f   :  { %v1647_v62 = vpop.eup %1646 }
 0x440   :  { %v1294_v10 = vmul.f32 %v1647_v62, %v2555_v63 }
 0x442   :  { %v1317_v42 = vmul.f32 %v2653_v40, %v1294_v10 }
 0x443   :  { %v1649_v46 = vpop.eup %1648 }
 0x444   :  { %v1651_v15 = vpop.eup %1650  ;;  %v1333_v36 = vadd.f32 %v1317_v42, %v1974_v38  ;;  %v1295_v27 = vmul.f32 %v1649_v46, %v2560_v45  ;;  %v2828_v46 = vld [vmem:[#allocation5_spill] sm:$0xff] }
 0x445   :  { %v1292_v32 = vmul.f32 %v1651_v15, %v2563_v60 }
 0x446   :  { %v1356_v59 = vadd.f32 %v2660_v34, %v1333_v36  ;;  %v1318_v51 = vmul.f32 %v2653_v40, %v1295_v27 }
 0x447   :  { %v1653_v63 = vpop.eup %1652  ;;  %v1315_v33 = vmul.f32 %v2653_v40, %v1292_v32 }
 0x448   :  { %1372 = vst.msk [vmem:[%s2798_s10 + $0x10] sm:$0xff] %vm52_vm0, %v1356_v59  ;;  %v1334_v8 = vadd.f32 %v1318_v51, %v1977_v55  ;;  %v1293_v38 = vmul.f32 %v1653_v63, %v2571_v18 }
 0x449   :  { %v1331_v45 = vadd.f32 %v1315_v33, %v1950_v3 }
 0x44a   :  { %v1357_v60 = vadd.f32 %v2660_v34, %v1334_v8  ;;  %v1316_v50 = vmul.f32 %v2653_v40, %v1293_v38 }
 0x44b   :  { %v1354_v35 = vadd.f32 %v2660_v34, %v1331_v45 }
 0x44c   :  { %1373 = vst.msk [vmem:[%s2798_s10 + $0x18] sm:$0xff] %vm52_vm0, %v1357_v60  ;;  %v1332_v48 = vadd.f32 %v1316_v50, %v2827_v43 }
 0x44d   :  { %1370 = vst.msk [vmem:[%s2798_s10] sm:$0xff] %vm52_vm0, %v1354_v35 }
 0x44e   :  { %v1355_v3 = vadd.f32 %v2660_v34, %v1332_v48  ;;  %v2830_v48 = vld [vmem:[#allocation3_spill] sm:$0xff] }
 0x450   :  { %1371 = vst.msk [vmem:[%s2798_s10 + $0x8] sm:$0xff] %vm52_vm0, %v1355_v3 }
 0x453   :  { %v1216_v55 = vpop.xlane.xlu0 %1215 }
 0x454   :  { %v1250_v18 = vmul.f32 0.03125, %v1216_v55 }
 0x456   :  { %v1266_v9 = vadd.f32 1e-05, %v1250_v18 }
 0x457   :  { %v1219_v0 = vpop.xlane.xlu1 %1218  ;;  %v1210_v17 = vpop.xlane.xlu0 %1209 }
 0x458   :  { %1654 = vrsqrt.f32 %v1266_v9  ;;  %v1251_v1 = vmul.f32 0.03125, %v1219_v0  ;;  %v1248_v24 = vmul.f32 0.03125, %v1210_v17 }
 0x45a   :  { %v1267_v21 = vadd.f32 1e-05, %v1251_v1  ;;  %v1264_v29 = vadd.f32 1e-05, %v1248_v24 }
 0x45b   :  { %v1213_v5 = vpop.xlane.xlu1 %1212  ;;  %v1228_v12 = vpop.xlane.xlu0 %1227 }
 0x45c   :  { %1656 = vrsqrt.f32 %v1267_v21  ;;  %v1249_v44 = vmul.f32 0.03125, %v1213_v5  ;;  %v1254_v2 = vmul.f32 0.03125, %v1228_v12  ;;  %v2832_v12 = vld [vmem:[#allocation9_spill] sm:$0xff] }
 0x45d   :  { %1658 = vrsqrt.f32 %v1264_v29 }
 0x45e   :  { %v1265_v53 = vadd.f32 1e-05, %v1249_v44  ;;  %v1270_v20 = vadd.f32 1e-05, %v1254_v2 }
 0x45f   :  { %v1231_v57 = vpop.xlane.xlu1 %1230  ;;  %v1222_v37 = vpop.xlane.xlu0 %1221 }
 0x460   :  { %1660 = vrsqrt.f32 %v1265_v53  ;;  %v1255_v25 = vmul.f32 0.03125, %v1231_v57  ;;  %v1252_v41 = vmul.f32 0.03125, %v1222_v37 }
 0x461   :  { %1662 = vrsqrt.f32 %v1270_v20 }
 0x462   :  { %v1271_v22 = vadd.f32 1e-05, %v1255_v25  ;;  %v1268_v13 = vadd.f32 1e-05, %v1252_v41 }
 0x463   :  { %v1225_v61 = vpop.xlane.xlu1 %1224 }
 0x464   :  { %1664 = vrsqrt.f32 %v1271_v22  ;;  %v1253_v26 = vmul.f32 0.03125, %v1225_v61 }
 0x465   :  { %v1655_v7 = vpop.eup %1654  ;;  %1666 = vrsqrt.f32 %v1268_v13 }
 0x466   :  { %v1298_v58 = vmul.f32 %v1655_v7, %v2579_v56  ;;  %v1269_v19 = vadd.f32 1e-05, %v1253_v26  ;;  %v1234_v54 = vpop.xlane.xlu0 %1233 }
 0x467   :  { %v1256_v23 = vmul.f32 0.03125, %v1234_v54 }
 0x468   :  { %v1321_v30 = vmul.f32 %v2653_v40, %v1298_v58  ;;  %1668 = vrsqrt.f32 %v1269_v19 }
 0x469   :  { %v1657_v62 = vpop.eup %1656  ;;  %v1272_v10 = vadd.f32 1e-05, %v1256_v23 }
 0x46a   :  { %v1659_v42 = vpop.eup %1658  ;;  %v1337_v15 = vadd.f32 %v1321_v30, %v2828_v46  ;;  %v1299_v36 = vmul.f32 %v1657_v62, %v2584_v14  ;;  %v1237_v27 = vpop.xlane.xlu1 %1236  ;;  %v2829_v14 = vld [vmem:[#allocation6_spill] sm:$0xff] }
 0x46b   :  { %v1240_v32 = vpop.xlane.xlu0 %1239  ;;  %v1296_v59 = vmul.f32 %v1659_v42, %v2587_v52  ;;  %1670 = vrsqrt.f32 %v1272_v10  ;;  %v1257_v51 = vmul.f32 0.03125, %v1237_v27  ;;  %v2836_v42 = vld [vmem:[#allocation11_spill] sm:$0xff] }
 0x46c   :  { %v1258_v56 = vmul.f32 0.03125, %v1240_v32  ;;  %v1360_v63 = vadd.f32 %v2660_v34, %v1337_v15  ;;  %v1322_v33 = vmul.f32 %v2653_v40, %v1299_v36 }
 0x46d   :  { %v1661_v8 = vpop.eup %1660  ;;  %v1319_v38 = vmul.f32 %v2653_v40, %v1296_v59  ;;  %v1273_v45 = vadd.f32 1e-05, %v1257_v51 }
 0x46e   :  { %v1274_v60 = vadd.f32 1e-05, %v1258_v56  ;;  %v1663_v50 = vpop.eup %1662  ;;  %1376 = vst.msk [vmem:[%s2798_s10 + $0x30] sm:$0xff] %vm52_vm0, %v1360_v63  ;;  %v1338_v52 = vadd.f32 %v1322_v33, %v2829_v14  ;;  %v1297_v35 = vmul.f32 %v1661_v8, %v2595_v4  ;;  %v1243_v43 = vpop.xlane.xlu1 %1242  ;;  %v2831_v4 = vld [vmem:[#allocation4_spill] sm:$0xff]  ;;  %v2838_v63 = vld [vmem:[#allocation13_spill] sm:$0xff] }
 0x46f   :  { %v1335_v3 = vadd.f32 %v1319_v38, %v2830_v48  ;;  %v1302_v55 = vmul.f32 %v1663_v50, %v2598_v6  ;;  %1672 = vrsqrt.f32 %v1273_v45  ;;  %v1259_v18 = vmul.f32 0.03125, %v1243_v43  ;;  %v2839_v45 = vld [vmem:[#allocation14_spill] sm:$0xff] }
 0x470   :  { %v1361_v9 = vadd.f32 %v2660_v34, %v1338_v52  ;;  %v1320_v0 = vmul.f32 %v2653_v40, %v1297_v35  ;;  %1674 = vrsqrt.f32 %v1274_v60 }
 0x471   :  { %v1665_v17 = vpop.eup %1664  ;;  %v1358_v1 = vadd.f32 %v2660_v34, %v1335_v3  ;;  %v1325_v24 = vmul.f32 %v2653_v40, %v1302_v55  ;;  %v1275_v21 = vadd.f32 1e-05, %v1259_v18 }
 0x472   :  { %v1667_v29 = vpop.eup %1666  ;;  %1377 = vst.msk [vmem:[%s2798_s10 + $0x38] sm:$0xff] %vm52_vm0, %v1361_v9  ;;  %v1336_v6 = vadd.f32 %v1320_v0, %v2831_v4  ;;  %v1303_v5 = vmul.f32 %v1665_v17, %v2607_v39  ;;  %v2833_v39 = vld [vmem:[#allocation10_spill] sm:$0xff] }
 0x473   :  { %1374 = vst.msk [vmem:[%s2798_s10 + $0x20] sm:$0xff] %vm52_vm0, %v1358_v1  ;;  %v1341_v44 = vadd.f32 %v1325_v24, %v2832_v12  ;;  %v1300_v2 = vmul.f32 %v1667_v29, %v2610_v16  ;;  %1676 = vrsqrt.f32 %v1275_v21  ;;  %v2834_v16 = vld [vmem:[#allocation7_spill] sm:$0xff] }
 0x474   :  { %v1359_v53 = vadd.f32 %v2660_v34, %v1336_v6  ;;  %v1326_v20 = vmul.f32 %v2653_v40, %v1303_v5 }
 0x475   :  { %v1669_v57 = vpop.eup %1668  ;;  %v1364_v37 = vadd.f32 %v2660_v34, %v1341_v44  ;;  %v1323_v25 = vmul.f32 %v2653_v40, %v1300_v2 }
 0x476   :  { %1375 = vst.msk [vmem:[%s2798_s10 + $0x28] sm:$0xff] %vm52_vm0, %v1359_v53  ;;  %v1342_v41 = vadd.f32 %v1326_v20, %v2833_v39  ;;  %v1301_v22 = vmul.f32 %v1669_v57, %v2619_v49  ;;  %v2835_v49 = vld [vmem:[#allocation8_spill] sm:$0xff] }
 0x477   :  { %1380 = vst.msk [vmem:[%s2798_s10 + $0x50] sm:$0xff] %vm52_vm0, %v1364_v37  ;;  %v1339_v13 = vadd.f32 %v1323_v25, %v2834_v16 }
 0x478   :  { %v1671_v61 = vpop.eup %1670  ;;  %v1365_v26 = vadd.f32 %v2660_v34, %v1342_v41  ;;  %v1324_v7 = vmul.f32 %v2653_v40, %v1301_v22 }
 0x479   :  { %v1362_v58 = vadd.f32 %v2660_v34, %v1339_v13  ;;  %v1304_v19 = vmul.f32 %v1671_v61, %v2626_v47 }
 0x47a   :  { %1381 = vst.msk [vmem:[%s2798_s10 + $0x58] sm:$0xff] %vm52_vm0, %v1365_v26  ;;  %v1340_v54 = vadd.f32 %v1324_v7, %v2835_v49 }
 0x47b   :  { %1378 = vst.msk [vmem:[%s2798_s10 + $0x40] sm:$0xff] %vm52_vm0, %v1362_v58  ;;  %v1327_v23 = vmul.f32 %v2653_v40, %v1304_v19 }
 0x47c   :  { %v1673_v30 = vpop.eup %1672  ;;  %v1363_v62 = vadd.f32 %v2660_v34, %v1340_v54 }
 0x47d   :  { %v1675_v10 = vpop.eup %1674  ;;  %v1343_v47 = vadd.f32 %v1327_v23, %v2836_v42  ;;  %v1305_v46 = vmul.f32 %v1673_v30, %v2632_v11  ;;  %v2837_v11 = vld [vmem:[#allocation12_spill] sm:$0xff] }
 0x47e   :  { %1379 = vst.msk [vmem:[%s2798_s10 + $0x48] sm:$0xff] %vm52_vm0, %v1363_v62  ;;  %v1306_v15 = vmul.f32 %v1675_v10, %v2635_v31 }
 0x47f   :  { %v1366_v36 = vadd.f32 %v2660_v34, %v1343_v47  ;;  %v1328_v27 = vmul.f32 %v2653_v40, %v1305_v46 }
 0x480   :  { %v1677_v32 = vpop.eup %1676  ;;  %v1329_v59 = vmul.f32 %v2653_v40, %v1306_v15 }
 0x481   :  { %1382 = vst.msk [vmem:[%s2798_s10 + $0x60] sm:$0xff] %vm52_vm0, %v1366_v36  ;;  %v1344_v51 = vadd.f32 %v1328_v27, %v2837_v11  ;;  %v1307_v56 = vmul.f32 %v1677_v32, %v2643_v28 }
 0x482   :  { %v1345_v33 = vadd.f32 %v1329_v59, %v2838_v63 }
 0x483   :  { %v1367_v31 = vadd.f32 %v2660_v34, %v1344_v51  ;;  %v1330_v8 = vmul.f32 %v2653_v40, %v1307_v56 }
 0x484   :  { %v1368_v38 = vadd.f32 %v2660_v34, %v1345_v33 }
 0x485   :  { %1383 = vst.msk [vmem:[%s2798_s10 + $0x68] sm:$0xff] %vm52_vm0, %v1367_v31  ;;  %v1346_v60 = vadd.f32 %v1330_v8, %v2839_v45 }
 0x486   :  { %1384 = vst.msk [vmem:[%s2798_s10 + $0x70] sm:$0xff] %vm52_vm0, %v1368_v38 }
 0x487   :  { %v1369_v28 = vadd.f32 %v2660_v34, %v1346_v60 }
 0x489   :  { %1385 = vst.msk [vmem:[%s2798_s10 + $0x78] sm:$0xff] %vm52_vm0, %v1369_v28 }

// kernel: swin_basic_layer_forward.6
= control target key start
LH: loop header
LB: loop body
LE: loop exit
PB: predicated region body
PF: predicated region fallthrough
CT: control target
= control target key end

     0   :  { %s4598_s27 = smov 0   ;;  %s6102_s0 = inlined_call_operand.vmem [shape: f32[128,32], index: 0, kind: input, shape index: {}]   ;;  %s6103_s1 = inlined_call_operand.vmem [shape: f32[4,16,16], index: 1, kind: input, shape index: {}]   ;;  %s6104_s2 = inlined_call_operand.vmem [shape: f32[4,16,16], index: 2, kind: input, shape index: {}]   ;;  %s6105_s3 = inlined_call_operand.vmem [shape: f32[1,32], index: 3, kind: input, shape index: {}]   ;;  %s6106_s4 = inlined_call_operand.vmem [shape: bf16[32,96], index: 4, kind: input, shape index: {}]   ;;  %s6107_s5 = inlined_call_operand.vmem [shape: f32[1,96], index: 5, kind: input, shape index: {}]   ;;  %s6108_s6 = inlined_call_operand.vmem [shape: bf16[32,32], index: 6, kind: input, shape index: {}]   ;;  %s6109_s7 = inlined_call_operand.vmem [shape: f32[1,32], index: 7, kind: input, shape index: {}]   ;;  %s6110_s8 = inlined_call_operand.vmem [shape: f32[128,32], index: 8, kind: output, shape index: {}]  }
   0x1 LB: > { %s3657_s28 = sadd.s32 4294967295, %s4538_s27   ;;  %p3661_p0 = scmp.ge.s32.totalorder %s4538_s27, 1  ;;  %s4538_s27 = sphi %s4598_s27, %s18_s27  }
   0x2   : > { %p263_p1 = scmp.lt.s32.totalorder %s4538_s27, 3 }
   0x4   : > { %p264_p2 = pnand %p3661_p0, %p263_p1 }
   0x6   : > { %267 = sbr.rel (%p264_p2) target bundleno = 2310 (0x906), region = 52 }
   0xb   : > { %v4272_v0 = vld [vmem:[%s6106_s4 + $0x8] sm:$0xff]   ;;  %s3662_s9 = sshll.u32 %s3657_s28, 3  ;;  %v4273_v1 = vld [vmem:[%s6106_s4] sm:$0xff]   ;;  %vm345_vm0 = vcmask 261120   ;;  %s4540_s18 = smov 88   ;;  %vm432_vm1 = vcmask 64512  }
   0xc   : > { %p298_p3 = scmp.lt.s32.totalorder %s3662_s9, 15  ;;  %3791 = vmatprep.subr.bf16.mxu0 %v4272_v0  ;;  %4007 = vmatprep.subr.bf16.mxu1 %v4272_v0  ;;  %v3666_v14 = vld [vmem:[%s6107_s5] ss:$0 sm:$0xff]  ;;  %s4541_s19 = smov 120   ;;  %vm4548_vm2 = vmmov 0   ;;  %vm2215_vm3 = vcmask 130048  }
   0xd   : > { %3792 = vmatpush3.bf16.msra.mxu0 %v4272_v0  ;;  %4009 = vmatpush3.bf16.msra.mxu1 %v4272_v0  ;;  %s4542_s20 = smov 80   ;;  %s4543_s21 = smov 112   ;;  %vm3480_vm4 = vcmask 195584  }
   0xe   : > { %s6133_s9 = smov (!%p298_p3, %s3662_s9), 15  ;;  %3793 = vmatprep.subr.bf16.mxu0 %v4273_v1  ;;  %4008 = vmatprep.subr.bf16.mxu1 %v4273_v1  ;;  %s4544_s22 = smov 72  }
   0xf   : > { %s3663_s12 = sshll.u32 %s6133_s9, 3  ;;  %s4545_s23 = smov 96  }
  0x10   : > { %s301_s15 = scalar_lea.vmem %s6102_s0, %s3663_s12  ;;  %s4546_s24 = smov 104  }
  0x11   : > { %3794 = vmatpush3.bf16.msra.mxu0 %v4273_v1  ;;  %4010 = vmatpush3.bf16.msra.mxu1 %v4273_v1  ;;  %v310_v2 = vld [vmem:[%s301_s15] sm:$0xff]  ;;  %v311_v3 = vld [vmem:[%s301_s15 + $0x8] sm:$0xff]  ;;  %v312_v7 = vld [vmem:[%s301_s15 + $0x10] sm:$0xff]  ;;  %s4550_s25 = smov 8   ;;  %s4551_s29 = smov 16  }
  0x12   : > { %v314_v4 = vld [vmem:[%s301_s15 + $0x20] sm:$0xff]  ;;  %v318_v5 = vpack.c.bf16 %v311_v3, %v310_v2  ;;  %v315_v6 = vld [vmem:[%s301_s15 + $0x28] sm:$0xff]  ;;  %v313_v8 = vld [vmem:[%s301_s15 + $0x18] sm:$0xff] }
  0x13   : > { %v320_v9 = vpack.c.bf16 %v315_v6, %v314_v4  ;;  %v319_v10 = vpack.c.bf16 %v313_v8, %v312_v7  ;;  %v316_v11 = vld [vmem:[%s301_s15 + $0x30] sm:$0xff]  ;;  %v317_v12 = vld [vmem:[%s301_s15 + $0x38] sm:$0xff]  ;;  %s307_s15 = scalar_lea.vmem %s6110_s8, %s3663_s12 }
  0x14   : > { %3795 = vmatprep.mubr.msk.bf16.mxu0 %vm345_vm0, %v318_v5  ;;  %v321_v13 = vpack.c.bf16 %v317_v12, %v316_v11 }
  0x15   : > { %3799 = vmatprep.mubr.msk.bf16.mxu1 %vm345_vm0, %v320_v9  ;;  %3796 = vmatmul.mubr.msk.bf16.vlgmr.msra.gmra.mxu0 %vm345_vm0, %v319_v10 }
  0x16   : > { %3800 = vmatmul.mubr.msk.bf16.vlgmr.msra.gmra.mxu1 %vm345_vm0, %v321_v13 }
  0xd5   : > { %v3797_v15 = vpop.f32.mrf.mxu0 }
  0xd6   : > { %v4627_v16 = vadd.f32 %v3797_v15, %v3666_v14  ;;  %v3801_v17 = vpop.f32.mrf.mxu1 }
  0xd7   : > { %v4629_v18 = vadd.f32 %v3801_v17, %v3666_v14  ;;  %v392_v21 = vpop.f32.mrf.mxu0 }
  0xd8   : > { %v4633_v19 = vmul.f32 %v4627_v16, %v4627_v16  ;;  %v4655_v22 = vadd.f32 %v3666_v14, %v392_v21  ;;  %v408_v23 = vpop.f32.mrf.mxu1 }
  0xd9   : > { %v4637_v20 = vmul.f32 %v4629_v18, %v4629_v18  ;;  %v4661_v24 = vadd.f32 %v3666_v14, %v408_v23  ;;  %v3798_v27 = vpop.f32.mrf.mxu0 }
  0xda   : > { %659 = vrot.lane.b32.xlu1 %v4633_v19, %s4540_s18  ;;  %v4665_v25 = vmul.f32 %v4655_v22, %v4655_v22  ;;  %v4683_v28 = vadd.f32 %v3798_v27, %v3666_v14  ;;  %v3802_v29 = vpop.f32.mrf.mxu1 }
  0xdb   : > { %667 = vrot.lane.b32.xlu0 %v4637_v20, %s4540_s18  ;;  %v4673_v26 = vmul.f32 %v4661_v24, %v4661_v24  ;;  %v4689_v30 = vadd.f32 %v3802_v29, %v3666_v14  ;;  %v395_v33 = vpop.f32.mrf.mxu0 }
  0xdc   : > { %v4693_v31 = vmul.f32 %v4683_v28, %v4683_v28  ;;  %v4719_v34 = vadd.f32 %v3666_v14, %v395_v33  ;;  %v411_v36 = vpop.f32.mrf.mxu1 }
  0xdd   : > { %v4701_v32 = vmul.f32 %v4689_v30, %v4689_v30  ;;  %v4733_v37 = vadd.f32 %v3666_v14, %v411_v36 }
  0xde   : > { %579 = vrot.lane.b32.xlu1 %v4633_v19, %s4541_s19  ;;  %v4727_v35 = vmul.f32 %v4719_v34, %v4719_v34 }
  0xdf   : > { %811 = vrot.lane.b32.xlu0 %v4633_v19, %s4542_s20  ;;  %v4741_v38 = vmul.f32 %v4733_v37, %v4733_v37 }
  0xe2   : > { %587 = vrot.lane.b32.xlu1 %v4637_v20, %s4541_s19 }
  0xe3   : > { %819 = vrot.lane.b32.xlu0 %v4637_v20, %s4542_s20 }
  0xe6   : > { %731 = vrot.lane.b32.xlu1 %v4633_v19, %s4543_s21 }
  0xe7   : > { %963 = vrot.lane.b32.xlu0 %v4633_v19, %s4544_s22 }
  0xea   : > { %739 = vrot.lane.b32.xlu1 %v4637_v20, %s4543_s21 }
  0xeb   : > { %971 = vrot.lane.b32.xlu0 %v4637_v20, %s4544_s22 }
  0xee   : > { %575 = vrot.lane.b32.xlu1 %v4665_v25, %s4541_s19 }
  0xef   : > { %507 = vrot.lane.b32.xlu0 %v4633_v19, %s4545_s23 }
  0xf2   : > { %583 = vrot.lane.b32.xlu1 %v4673_v26, %s4541_s19 }
  0xf3   : > { %515 = vrot.lane.b32.xlu0 %v4637_v20, %s4545_s23 }
  0xf6   : > { %727 = vrot.lane.b32.xlu1 %v4665_v25, %s4543_s21 }
  0xf7   : > { %655 = vrot.lane.b32.xlu0 %v4665_v25, %s4540_s18 }
  0xfa   : > { %735 = vrot.lane.b32.xlu1 %v4673_v26, %s4543_s21 }
  0xfb   : > { %663 = vrot.lane.b32.xlu0 %v4673_v26, %s4540_s18 }
  0xfe   : > { %661 = vrot.lane.b32.xlu1 %v4693_v31, %s4540_s18 }
  0xff   : > { %807 = vrot.lane.b32.xlu0 %v4665_v25, %s4542_s20 }
 0x102   : > { %669 = vrot.lane.b32.xlu1 %v4701_v32, %s4540_s18 }
 0x103   : > { %815 = vrot.lane.b32.xlu0 %v4673_v26, %s4542_s20 }
 0x106   : > { %813 = vrot.lane.b32.xlu1 %v4693_v31, %s4542_s20 }
 0x107   : > { %959 = vrot.lane.b32.xlu0 %v4665_v25, %s4544_s22 }
 0x10a   : > { %821 = vrot.lane.b32.xlu1 %v4701_v32, %s4542_s20 }
 0x10b   : > { %503 = vrot.lane.b32.xlu0 %v4665_v25, %s4545_s23 }
 0x10e   : > { %965 = vrot.lane.b32.xlu1 %v4693_v31, %s4544_s22 }
 0x10f   : > { %967 = vrot.lane.b32.xlu0 %v4673_v26, %s4544_s22 }
 0x112   : > { %973 = vrot.lane.b32.xlu1 %v4701_v32, %s4544_s22 }
 0x113   : > { %511 = vrot.lane.b32.xlu0 %v4673_v26, %s4545_s23 }
 0x116   : > { %509 = vrot.lane.b32.xlu1 %v4693_v31, %s4545_s23 }
 0x117   : > { %657 = vrot.lane.b32.xlu0 %v4727_v35, %s4540_s18 }
 0x11a   : > { %517 = vrot.lane.b32.xlu1 %v4701_v32, %s4545_s23 }
 0x11b   : > { %577 = vrot.lane.b32.xlu0 %v4727_v35, %s4541_s19 }
 0x11e   : > { %581 = vrot.lane.b32.xlu1 %v4693_v31, %s4541_s19 }
 0x11f   : > { %585 = vrot.lane.b32.xlu0 %v4741_v38, %s4541_s19 }
 0x122   : > { %589 = vrot.lane.b32.xlu1 %v4701_v32, %s4541_s19 }
 0x123   : > { %729 = vrot.lane.b32.xlu0 %v4727_v35, %s4543_s21 }
 0x126   : > { %733 = vrot.lane.b32.xlu1 %v4693_v31, %s4543_s21 }
 0x127   : > { %737 = vrot.lane.b32.xlu0 %v4741_v38, %s4543_s21 }
 0x12a   : > { %741 = vrot.lane.b32.xlu1 %v4701_v32, %s4543_s21 }
 0x12e   : > { %665 = vrot.lane.b32.xlu1 %v4741_v38, %s4540_s18 }
 0x132   : > { %809 = vrot.lane.b32.xlu1 %v4727_v35, %s4542_s20 }
 0x136   : > { %817 = vrot.lane.b32.xlu1 %v4741_v38, %s4542_s20 }
 0x13a   : > { %961 = vrot.lane.b32.xlu1 %v4727_v35, %s4544_s22 }
 0x13e   : > { %505 = vrot.lane.b32.xlu1 %v4727_v35, %s4545_s23 }
 0x142   : > { %969 = vrot.lane.b32.xlu1 %v4741_v38, %s4544_s22 }
 0x146   : > { %513 = vrot.lane.b32.xlu1 %v4741_v38, %s4545_s23 }
 0x14c   : > { %v660_v39 = vpop.permute.xlu1 %659 }
 0x14d   : > { %v668_v40 = vpop.permute.xlu0 %667  ;;  %v685_v41 = vsel %vm432_vm1, %v660_v39, 0.0 }
 0x14e   : > { %686 = vadd.xlane.f32.xlu0 %v685_v41  ;;  %v697_v42 = vsel %vm432_vm1, %v668_v40, 0.0 }
 0x150   : > { %v4773_v43 = vpop.permute.xlu1 %579 }
 0x151   : > { %v812_v44 = vpop.permute.xlu0 %811 }
 0x152   : > { %698 = vadd.xlane.f32.xlu0 %v697_v42  ;;  %v837_v47 = vsel %vm432_vm1, %v812_v44, 0.0 }
 0x154   : > { %v4775_v45 = vpop.permute.xlu1 %587 }
 0x155   : > { %v820_v46 = vpop.permute.xlu0 %819 }
 0x156   : > { %838 = vadd.xlane.f32.xlu0 %v837_v47  ;;  %v849_v50 = vsel %vm432_vm1, %v820_v46, 0.0 }
 0x158   : > { %v4778_v48 = vpop.permute.xlu1 %731 }
 0x159   : > { %v964_v49 = vpop.permute.xlu0 %963 }
 0x15a   : > { %850 = vadd.xlane.f32.xlu0 %v849_v50  ;;  %v989_v36 = vsel %vm432_vm1, %v964_v49, 0.0 }
 0x15c   : > { %v4781_v51 = vpop.permute.xlu1 %739 }
 0x15d   : > { %v4783_v52 = vpop.permute.xlu0 %971 }
 0x160   : > { %v4785_v53 = vpop.permute.xlu1 %575 }
 0x161   : > { %v4787_v54 = vpop.permute.xlu0 %507 }
 0x164   : > { %v4789_v55 = vpop.permute.xlu1 %583 }
 0x165   : > { %v4791_v56 = vpop.permute.xlu0 %515 }
 0x168   : > { %v4793_v57 = vpop.permute.xlu1 %727 }
 0x169   : > { %v656_v58 = vpop.permute.xlu0 %655 }
 0x16a   : > { %v679_v59 = vsel %vm432_vm1, %v656_v58, 0.0 }
 0x16b   : > { %680 = vadd.xlane.f32.xlu0 %v679_v59 }
 0x16c   : > { %v4796_v60 = vpop.permute.xlu1 %735 }
 0x16d   : > { %v664_v61 = vpop.permute.xlu0 %663 }
 0x16e   : > { %v691_v62 = vsel %vm432_vm1, %v664_v61, 0.0 }
 0x16f   : > { %692 = vadd.xlane.f32.xlu0 %v691_v62 }
 0x170   : > { %v662_v63 = vpop.permute.xlu1 %661 }
 0x171   : > { %v808_v0 = vpop.permute.xlu0 %807  ;;  %v688_v7 = vsel %vm432_vm1, %v662_v63, 0.0 }
 0x172   : > { %v831_v1 = vsel %vm432_vm1, %v808_v0, 0.0 }
 0x173   : > { %832 = vadd.xlane.f32.xlu0 %v831_v1 }
 0x174   : > { %v670_v2 = vpop.permute.xlu1 %669 }
 0x175   : > { %v816_v3 = vpop.permute.xlu0 %815  ;;  %v700_v10 = vsel %vm432_vm1, %v670_v2, 0.0 }
 0x176   : > { %v843_v4 = vsel %vm432_vm1, %v816_v3, 0.0  ;;  %v1001_v3 = vsel %vm432_vm1, %v4783_v52, 0.0 }
 0x177   : > { %844 = vadd.xlane.f32.xlu0 %v843_v4 }
 0x178   : > { %v814_v5 = vpop.permute.xlu1 %813 }
 0x179   : > { %v960_v6 = vpop.permute.xlu0 %959  ;;  %v840_v13 = vsel %vm432_vm1, %v814_v5, 0.0 }
 0x17a   : > { %v983_v27 = vsel %vm432_vm1, %v960_v6, 0.0 }
 0x17b   : > { %689 = vadd.xlane.f32.xlu0 %v688_v7 }
 0x17c   : > { %v822_v8 = vpop.permute.xlu1 %821 }
 0x17d   : > { %v504_v9 = vpop.permute.xlu0 %503  ;;  %v852_v17 = vsel %vm432_vm1, %v822_v8, 0.0  ;;  %v533_v8 = vsel %vm432_vm1, %v4787_v54, 0.0 }
 0x17e   : > { %v527_v1 = vsel %vm432_vm1, %v504_v9, 0.0 }
 0x17f   : > { %701 = vadd.xlane.f32.xlu0 %v700_v10 }
 0x180   : > { %v966_v11 = vpop.permute.xlu1 %965 }
 0x181   : > { %v968_v12 = vpop.permute.xlu0 %967  ;;  %v992_v40 = vsel %vm432_vm1, %v966_v11, 0.0 }
 0x182   : > { %v995_v2 = vsel %vm432_vm1, %v968_v12, 0.0 }
 0x183   : > { %841 = vadd.xlane.f32.xlu0 %v840_v13 }
 0x184   : > { %v974_v14 = vpop.permute.xlu1 %973 }
 0x185   : > { %v4804_v15 = vpop.permute.xlu0 %511  ;;  %v1004_v5 = vsel %vm432_vm1, %v974_v14, 0.0 }
 0x186   : > { %v539_v13 = vsel %vm432_vm1, %v4804_v15, 0.0 }
 0x187   : > { %853 = vadd.xlane.f32.xlu0 %v852_v17  ;;  %v545_v17 = vsel %vm432_vm1, %v4791_v56, 0.0  ;;  %v605_v56 = vsel %vm432_vm1, %v4773_v43, 0.0 }
 0x188   : > { %v510_v21 = vpop.permute.xlu1 %509 }
 0x189   : > { %v658_v23 = vpop.permute.xlu0 %657  ;;  %v536_v7 = vsel %vm432_vm1, %v510_v21, 0.0 }
 0x18a   : > { %v682_v29 = vsel %vm432_vm1, %v658_v23, 0.0 }
 0x18b   : > { %984 = vadd.xlane.f32.xlu0 %v983_v27  ;;  %683 = vadd.xlane.f32.xlu1 %v682_v29 }
 0x18c   : > { %v518_v33 = vpop.permute.xlu1 %517 }
 0x18d   : > { %v578_v52 = vpop.permute.xlu0 %577  ;;  %v548_v23 = vsel %vm432_vm1, %v518_v33, 0.0 }
 0x18e   : > { %v602_v15 = vsel %vm432_vm1, %v578_v52, 0.0 }
 0x18f   : > { %990 = vadd.xlane.f32.xlu0 %v989_v36  ;;  %v599_v36 = vsel %vm432_vm1, %v4785_v53, 0.0 }
 0x190   : > { %v4810_v39 = vpop.permute.xlu1 %581 }
 0x191   : > { %v586_v9 = vpop.permute.xlu0 %585  ;;  %v608_v33 = vsel %vm432_vm1, %v4810_v39, 0.0 }
 0x192   : > { %v614_v53 = vsel %vm432_vm1, %v586_v9, 0.0 }
 0x193   : > { %993 = vadd.xlane.f32.xlu0 %v992_v40 }
 0x194   : > { %v4813_v41 = vpop.permute.xlu1 %589 }
 0x195   : > { %v730_v10 = vpop.permute.xlu0 %729  ;;  %v620_v43 = vsel %vm432_vm1, %v4813_v41, 0.0 }
 0x198   : > { %v4815_v42 = vpop.permute.xlu1 %733 }
 0x199   : > { %v738_v11 = vpop.permute.xlu0 %737  ;;  %v760_v41 = vsel %vm432_vm1, %v4815_v42, 0.0 }
 0x19c   : > { %v4817_v44 = vpop.permute.xlu1 %741 }
 0x19d   : > { %v772_v42 = vsel %vm432_vm1, %v4817_v44, 0.0 }
 0x1a0   : > { %v666_v46 = vpop.permute.xlu1 %665 }
 0x1a1   : > { %v694_v47 = vsel %vm432_vm1, %v666_v46, 0.0 }
 0x1a2   : > { %695 = vadd.xlane.f32.xlu1 %v694_v47  ;;  %v611_v47 = vsel %vm432_vm1, %v4789_v55, 0.0  ;;  %v754_v55 = vsel %vm432_vm1, %v730_v10, 0.0 }
 0x1a4   : > { %v810_v50 = vpop.permute.xlu1 %809 }
 0x1a5   : > { %v834_v58 = vsel %vm432_vm1, %v810_v50, 0.0  ;;  %v617_v50 = vsel %vm432_vm1, %v4775_v45, 0.0  ;;  %v757_v45 = vsel %vm432_vm1, %v4778_v48, 0.0 }
 0x1a6   : > { %835 = vadd.xlane.f32.xlu1 %v834_v58 }
 0x1a8   : > { %v818_v49 = vpop.permute.xlu1 %817 }
 0x1a9   : > { %v846_v59 = vsel %vm432_vm1, %v818_v49, 0.0 }
 0x1aa   : > { %847 = vadd.xlane.f32.xlu1 %v846_v59  ;;  %v751_v59 = vsel %vm432_vm1, %v4793_v57, 0.0  ;;  %v763_v57 = vsel %vm432_vm1, %v4796_v60, 0.0 }
 0x1ac   : > { %v962_v61 = vpop.permute.xlu1 %961 }
 0x1ad   : > { %v986_v62 = vsel %vm432_vm1, %v962_v61, 0.0 }
 0x1ae   : > { %987 = vadd.xlane.f32.xlu1 %v986_v62 }
 0x1b0   : > { %v506_v63 = vpop.permute.xlu1 %505 }
 0x1b1   : > { %v530_v0 = vsel %vm432_vm1, %v506_v63, 0.0  ;;  %v766_v63 = vsel %vm432_vm1, %v738_v11, 0.0 }
 0x1b2   : > { %531 = vadd.xlane.f32.xlu0 %v530_v0  ;;  %528 = vadd.xlane.f32.xlu1 %v527_v1  ;;  %v769_v1 = vsel %vm432_vm1, %v4781_v51, 0.0 }
 0x1b4   : > { %v970_v4 = vpop.permute.xlu1 %969 }
 0x1b5   : > { %v998_v6 = vsel %vm432_vm1, %v970_v4, 0.0 }
 0x1b8   : > { %v514_v21 = vpop.permute.xlu1 %513 }
 0x1b9   : > { %v542_v27 = vsel %vm432_vm1, %v514_v21, 0.0 }
 0x1c3   : > { %879 = vrot.lane.b32.xlu1 %v4665_v25, %s4546_s24 }
 0x1c7   : > { %883 = vrot.lane.b32.xlu1 %v4633_v19, %s4546_s24 }
 0x1c8   : > { %881 = vrot.lane.b32.xlu0 %v4727_v35, %s4546_s24 }
 0x1cb   : > { %885 = vrot.lane.b32.xlu1 %v4693_v31, %s4546_s24 }
 0x1d7   : > { %v687_v12 = vpop.xlane.xlu0 %686 }
 0x1d8   : > { %v705_v48 = vmax.f32 %v687_v12, 1e-24 }
 0x1db   : > { %v4849_v54 = vpop.xlane.xlu0 %698 }
 0x1df   : > { %v4853_v14 = vpop.xlane.xlu0 %838 }
 0x1e3   : > { %v4859_v29 = vpop.xlane.xlu0 %850 }
 0x1e7   : > { %996 = vadd.xlane.f32.xlu0 %v995_v2 }
 0x1eb   : > { %1002 = vadd.xlane.f32.xlu0 %v1001_v3 }
 0x1ef   : > { %1005 = vadd.xlane.f32.xlu0 %v1004_v5  ;;  %999 = vadd.xlane.f32.xlu1 %v998_v6 }
 0x1f3   : > { %537 = vadd.xlane.f32.xlu0 %v536_v7  ;;  %534 = vadd.xlane.f32.xlu1 %v533_v8 }
 0x1f4   : > { %v681_v40 = vpop.xlane.xlu0 %680 }
 0x1f5   : > { %v703_v61 = vmax.f32 %v681_v40, 1e-24 }
 0x1f8   : > { %v4868_v46 = vpop.xlane.xlu0 %692 }
 0x1fc   : > { %v4877_v39 = vpop.xlane.xlu0 %832 }
 0x200   : > { %v4882_v62 = vpop.xlane.xlu0 %844 }
 0x204   : > { %887 = vrot.lane.b32.xlu1 %v4673_v26, %s4546_s24  ;;  %v690_v0 = vpop.xlane.xlu0 %689 }
 0x205   : > { %v706_v2 = vmax.f32 %v690_v0, 1e-24 }
 0x208   : > { %891 = vrot.lane.b32.xlu1 %v4637_v20, %s4546_s24  ;;  %v702_v4 = vpop.xlane.xlu0 %701 }
 0x209   : > { %889 = vrot.lane.b32.xlu0 %v4741_v38, %s4546_s24 }
 0x20c   : > { %893 = vrot.lane.b32.xlu1 %v4701_v32, %s4546_s24  ;;  %v4897_v7 = vpop.xlane.xlu0 %841 }
 0x210   : > { %v4900_v9 = vpop.xlane.xlu0 %853 }
 0x214   : > { %v684_v58 = vpop.xlane.xlu1 %683 }
 0x215   : > { %v704_v49 = vmax.f32 %v684_v58, 1e-24 }
 0x217   : > { %4276 = vrsqrt.f32 %v704_v49 }
 0x218   : > { %4278 = vrsqrt.f32 %v703_v61 }
 0x219   : > { %4280 = vrsqrt.f32 %v706_v2 }
 0x21a   : > { %4282 = vrsqrt.f32 %v705_v48 }
 0x224   : > { %v4277_v3 = vpop.eup %4276 }
 0x225   : > { %v4279_v5 = vpop.eup %4278  ;;  %v720_v60 = vmul.f32 %v4277_v3, %v4719_v34 }
 0x226   : > { %v719_v6 = vmul.f32 %v4279_v5, %v4655_v22  ;;  %v4281_v52 = vpop.eup %4280 }
 0x227   : > { %v4283_v10 = vpop.eup %4282  ;;  %v722_v11 = vmul.f32 %v4281_v52, %v4683_v28 }
 0x228   : > { %540 = vadd.xlane.f32.xlu0 %v539_v13  ;;  %v4032_v51 = vpack.i.bf16 %v720_v60, %v719_v6  ;;  %v721_v12 = vmul.f32 %v4283_v10, %v4627_v16  ;;  %v4904_v13 = vpop.xlane.xlu0 %984 }
 0x22a   : > { %v4037_v21 = vpack.i.bf16 %v722_v11, %v721_v12 }
 0x22b   : > { %v696_v8 = vpop.xlane.xlu1 %695 }
 0x22c   : > { %546 = vadd.xlane.f32.xlu0 %v545_v17 }
 0x22f   : > { %v836_v44 = vpop.xlane.xlu1 %835 }
 0x230   : > { %549 = vadd.xlane.f32.xlu0 %v548_v23  ;;  %543 = vadd.xlane.f32.xlu1 %v542_v27  ;;  %v4909_v23 = vpop.xlane.xlu0 %990  ;;  %v856_v11 = vmax.f32 %v836_v44, 1e-24  ;;  %v858_v44 = vmax.f32 %v4897_v7, 1e-24 }
 0x233   : > { %v4906_v17 = vpop.xlane.xlu1 %847 }
 0x234   : > { %600 = vadd.xlane.f32.xlu1 %v599_v36  ;;  %603 = vadd.xlane.f32.xlu0 %v602_v15  ;;  %v4913_v36 = vpop.xlane.xlu0 %993 }
 0x237   : > { %v4911_v27 = vpop.xlane.xlu1 %987 }
 0x238   : > { %606 = vadd.xlane.f32.xlu1 %v605_v56  ;;  %609 = vadd.xlane.f32.xlu0 %v608_v33  ;;  %v708_v56 = vmax.f32 %v696_v8, 1e-24  ;;  %v433_v8 = vsel %vm432_vm1, %v4665_v25, 0.0 }
 0x23a   : > { %4284 = vrsqrt.f32 %v708_v56 }
 0x23b   : > { %v4915_v15 = vpop.xlane.xlu1 %528  ;;  %v4917_v40 = vpop.xlane.xlu0 %531 }
 0x23c   : > { %612 = vadd.xlane.f32.xlu1 %v611_v47  ;;  %615 = vadd.xlane.f32.xlu0 %v614_v53  ;;  %v707_v47 = vmax.f32 %v4868_v46, 1e-24  ;;  %v710_v53 = vmax.f32 %v702_v4, 1e-24 }
 0x23e   : > { %4286 = vrsqrt.f32 %v707_v47 }
 0x23f   : > { %v880_v33 = vpop.permute.xlu1 %879  ;;  %4288 = vrsqrt.f32 %v710_v53 }
 0x240   : > { %618 = vadd.xlane.f32.xlu1 %v617_v50  ;;  %621 = vadd.xlane.f32.xlu0 %v620_v43  ;;  %v882_v50 = vpop.permute.xlu0 %881  ;;  %v709_v43 = vmax.f32 %v4849_v54, 1e-24  ;;  %v903_v49 = vsel %vm432_vm1, %v880_v33, 0.0 }
 0x242   : > { %4290 = vrsqrt.f32 %v709_v43 }
 0x243   : > { %v884_v58 = vpop.permute.xlu1 %883  ;;  %4292 = vrsqrt.f32 %v856_v11 }
 0x244   : > { %752 = vadd.xlane.f32.xlu1 %v751_v59  ;;  %755 = vadd.xlane.f32.xlu0 %v754_v55  ;;  %v909_v54 = vsel %vm432_vm1, %v884_v58, 0.0  ;;  %v857_v58 = vmax.f32 %v4853_v14, 1e-24 }
 0x247   : > { %v886_v55 = vpop.permute.xlu1 %885  ;;  %v4285_v46 = vpop.eup %4284 }
 0x248   : > { %758 = vadd.xlane.f32.xlu1 %v757_v45  ;;  %761 = vadd.xlane.f32.xlu0 %v760_v41  ;;  %v906_v45 = vsel %vm432_vm1, %v882_v50, 0.0  ;;  %v912_v3 = vsel %vm432_vm1, %v886_v55, 0.0 }
 0x24c   : > { %764 = vadd.xlane.f32.xlu1 %v763_v57  ;;  %767 = vadd.xlane.f32.xlu0 %v766_v63  ;;  %v4287_v57 = vpop.eup %4286  ;;  %v724_v63 = vmul.f32 %v4285_v46, %v4733_v37 }
 0x24d   : > { %v4289_v0 = vpop.eup %4288  ;;  %v723_v2 = vmul.f32 %v4287_v57, %v4661_v24 }
 0x24e   : > { %v726_v5 = vmul.f32 %v4289_v0, %v4689_v30  ;;  %v860_v0 = vmax.f32 %v4906_v17, 1e-24 }
 0x24f   : > { %v4291_v48 = vpop.eup %4290  ;;  %v4042_v4 = vpack.i.bf16 %v724_v63, %v723_v2 }
 0x250   : > { %770 = vadd.xlane.f32.xlu0 %v769_v1  ;;  %v725_v60 = vmul.f32 %v4291_v48, %v4629_v18  ;;  %v4293_v33 = vpop.eup %4292  ;;  %v859_v48 = vmax.f32 %v4882_v62, 1e-24 }
 0x251   : > { %v872_v25 = vmul.f32 %v4293_v33, %v4719_v34 }
 0x254   : > { %773 = vadd.xlane.f32.xlu0 %v772_v42 }
 0x25d   : > { %4033 = vrot.lane.b32.xlu1 %v4032_v51, %s4541_s19  ;;  %v4047_v51 = vpack.i.bf16 %v726_v5, %v725_v60  ;;  %v861_v5 = vmax.f32 %v4859_v29, 1e-24 }
 0x26a   : > { %4038 = vrot.lane.b32.xlu0 %v4037_v21, %s4541_s19  ;;  %v855_v21 = vmax.f32 %v4877_v39, 1e-24  ;;  %v436_v39 = vsel %vm432_vm1, %v4727_v35, 0.0 }
 0x26c   : > { %4294 = vrsqrt.f32 %v855_v21 }
 0x26d   : > { %4296 = vrsqrt.f32 %v858_v44  ;;  %v448_v44 = vsel %vm432_vm1, %v4741_v38, 0.0 }
 0x26e   : > { %4298 = vrsqrt.f32 %v857_v58 }
 0x26f   : > { %4300 = vrsqrt.f32 %v860_v0 }
 0x270   : > { %v4922_v59 = vpop.xlane.xlu0 %996  ;;  %4302 = vrsqrt.f32 %v859_v48 }
 0x274   : > { %v4924_v61 = vpop.xlane.xlu0 %1002 }
 0x278   : > { %v4927_v41 = vpop.xlane.xlu1 %999  ;;  %v4931_v1 = vpop.xlane.xlu0 %1005 }
 0x279   : > { %v4295_v47 = vpop.eup %4294  ;;  %v1012_v38 = vmax.f32 %v4927_v41, 1e-24 }
 0x27a   : > { %v871_v53 = vmul.f32 %v4295_v47, %v4655_v22 }
 0x27c   : > { %v4934_v42 = vpop.xlane.xlu1 %534  ;;  %v4940_v6 = vpop.xlane.xlu0 %537  ;;  %v4052_v50 = vpack.i.bf16 %v872_v25, %v871_v53  ;;  %v439_v53 = vsel %vm432_vm1, %v4633_v19, 0.0  ;;  %v1009_v19 = vmax.f32 %v4909_v23, 1e-24 }
 0x27d   : > { %v554_v41 = vmax.f32 %v4940_v6, 1e-24 }
 0x280   : > { %v888_v52 = vpop.permute.xlu1 %887  ;;  %v890_v12 = vpop.permute.xlu0 %889 }
 0x281   : > { %904 = vadd.xlane.f32.xlu1 %v903_v49  ;;  %v915_v10 = vsel %vm432_vm1, %v888_v52, 0.0  ;;  %v918_v56 = vsel %vm432_vm1, %v890_v12, 0.0 }
 0x284   : > { %v892_v43 = vpop.permute.xlu1 %891 }
 0x285   : > { %v921_v35 = vsel %vm432_vm1, %v892_v43, 0.0 }
 0x288   : > { %v894_v49 = vpop.permute.xlu1 %893 }
 0x289   : > { %907 = vadd.xlane.f32.xlu0 %v906_v45  ;;  %v924_v55 = vsel %vm432_vm1, %v894_v49, 0.0  ;;  %v4297_v45 = vpop.eup %4296  ;;  %v1010_v49 = vmax.f32 %v4913_v36, 1e-24  ;;  %v1011_v36 = vmax.f32 %v4922_v59, 1e-24 }
 0x28a   : > { %v4299_v57 = vpop.eup %4298 }
 0x28b   : > { %v873_v7 = vmul.f32 %v4299_v57, %v4627_v16 }
 0x28d   : > { %910 = vadd.xlane.f32.xlu0 %v909_v54  ;;  %v874_v54 = vmul.f32 %v4297_v45, %v4683_v28 }
 0x28f   : > { %v4057_v14 = vpack.i.bf16 %v874_v54, %v873_v7  ;;  %v1013_v54 = vmax.f32 %v4924_v61, 1e-24  ;;  %v553_v7 = vmax.f32 %v4934_v42, 1e-24 }
 0x291   : > { %913 = vadd.xlane.f32.xlu0 %v912_v3  ;;  %v442_v3 = vsel %vm432_vm1, %v4693_v31, 0.0 }
 0x292   : > { %4043 = vrot.lane.b32.xlu1 %v4042_v4, %s4541_s19  ;;  %v862_v4 = vmax.f32 %v4900_v9, 1e-24 }
 0x294   : > { %4304 = vrsqrt.f32 %v862_v4 }
 0x295   : > { %434 = vadd.xlane.f32.xlu0 %v433_v8  ;;  %4306 = vrsqrt.f32 %v861_v5  ;;  %v4301_v8 = vpop.eup %4300 }
 0x296   : > { %4048 = vrot.lane.b32.xlu1 %v4047_v51, %s4541_s19  ;;  %v4303_v62 = vpop.eup %4302  ;;  %v876_v52 = vmul.f32 %v4301_v8, %v4733_v37 }
 0x297   : > { %v875_v9 = vmul.f32 %v4303_v62, %v4661_v24 }
 0x299   : > { %916 = vadd.xlane.f32.xlu0 %v915_v10  ;;  %v4062_v29 = vpack.i.bf16 %v876_v52, %v875_v9 }
 0x29d   : > { %919 = vadd.xlane.f32.xlu0 %v918_v56 }
 0x2a1   : > { %v4305_v31 = vpop.eup %4304 }
 0x2a2   : > { %v4307_v10 = vpop.eup %4306  ;;  %v878_v12 = vmul.f32 %v4305_v31, %v4689_v30 }
 0x2a3   : > { %v877_v56 = vmul.f32 %v4307_v10, %v4629_v18 }
 0x2a5   : > { %v4067_v33 = vpack.i.bf16 %v878_v12, %v877_v56 }
 0x2b1   : > { %v4956_v46 = vpop.xlane.xlu0 %540 }
 0x2b3   : > { %4053 = vrot.lane.b32.xlu0 %v4052_v50, %s4543_s21  ;;  %v1008_v50 = vmax.f32 %v4911_v27, 1e-24 }
 0x2b5   : > { %v4960_v63 = vpop.xlane.xlu0 %546  ;;  %4308 = vrsqrt.f32 %v1008_v50 }
 0x2b6   : > { %v557_v6 = vmax.f32 %v4960_v63, 1e-24 }
 0x2b9   : > { %v4965_v2 = vpop.xlane.xlu0 %549  ;;  %v544_v21 = vpop.xlane.xlu1 %543 }
 0x2ba   : > { %437 = vadd.xlane.f32.xlu1 %v436_v39  ;;  %v1007_v39 = vmax.f32 %v4904_v13, 1e-24  ;;  %v454_v13 = vsel %vm432_vm1, %v4701_v32, 0.0  ;;  %v556_v48 = vmax.f32 %v544_v21, 1e-24 }
 0x2bb   : > { %v558_v5 = vmax.f32 %v4965_v2, 1e-24 }
 0x2bc   : > { %4310 = vrsqrt.f32 %v1007_v39 }
 0x2bd   : > { %v4972_v60 = vpop.xlane.xlu0 %603  ;;  %v4988_v25 = vpop.xlane.xlu1 %600  ;;  %4312 = vrsqrt.f32 %v1010_v49 }
 0x2be   : > { %925 = vadd.xlane.f32.xlu1 %v924_v55  ;;  %v451_v55 = vsel %vm432_vm1, %v4637_v20, 0.0  ;;  %4314 = vrsqrt.f32 %v1009_v19  ;;  %v1014_v20 = vmax.f32 %v4931_v1, 1e-24  ;;  %v552_v1 = vmax.f32 %v4917_v40, 1e-24 }
 0x2bf   : > { %4316 = vrsqrt.f32 %v1012_v38  ;;  %v445_v40 = vsel %vm432_vm1, %v4673_v26, 0.0  ;;  %v623_v8 = vmax.f32 %v4988_v25, 1e-24  ;;  %v624_v63 = vmax.f32 %v4972_v60, 1e-24 }
 0x2c0   : > { %4318 = vrsqrt.f32 %v1011_v36 }
 0x2c1   : > { %v4974_v17 = vpop.xlane.xlu0 %609  ;;  %v4997_v58 = vpop.xlane.xlu1 %606  ;;  %4320 = vrsqrt.f32 %v1014_v20 }
 0x2c2   : > { %v4309_v32 = vpop.eup %4308  ;;  %4322 = vrsqrt.f32 %v1013_v54  ;;  %v625_v2 = vmax.f32 %v4997_v58, 1e-24 }
 0x2c3   : > { %4324 = vrsqrt.f32 %v553_v7  ;;  %v1024_v61 = vmul.f32 %v4309_v32, %v4719_v34 }
 0x2c4   : > { %4326 = vrsqrt.f32 %v554_v41 }
 0x2c5   : > { %v4976_v51 = vpop.xlane.xlu0 %615  ;;  %v5006_v45 = vpop.xlane.xlu1 %612 }
 0x2c6   : > { %v628_v50 = vmax.f32 %v4976_v51, 1e-24 }
 0x2c9   : > { %v4980_v11 = vpop.xlane.xlu0 %621  ;;  %v5015_v23 = vpop.xlane.xlu1 %618 }
 0x2ca   : > { %v629_v38 = vmax.f32 %v5015_v23, 1e-24  ;;  %v630_v51 = vmax.f32 %v4980_v11, 1e-24 }
 0x2cd   : > { %v4985_v47 = vpop.xlane.xlu0 %755  ;;  %v5024_v0 = vpop.xlane.xlu1 %752 }
 0x2ce   : > { %v775_v11 = vmax.f32 %v5024_v0, 1e-24 }
 0x2cf   : > { %4058 = vrot.lane.b32.xlu1 %v4057_v14, %s4543_s21  ;;  %v551_v14 = vmax.f32 %v4915_v15, 1e-24 }
 0x2d1   : > { %v4993_v43 = vpop.xlane.xlu0 %761  ;;  %4328 = vrsqrt.f32 %v551_v14  ;;  %v5038_v9 = vpop.xlane.xlu1 %758 }
 0x2d2   : > { %922 = vadd.xlane.f32.xlu0 %v921_v35  ;;  %v4311_v35 = vpop.eup %4310  ;;  %4330 = vrsqrt.f32 %v552_v1 }
 0x2d3   : > { %v4313_v42 = vpop.eup %4312  ;;  %v1023_v15 = vmul.f32 %v4311_v35, %v4655_v22  ;;  %4332 = vrsqrt.f32 %v556_v48 }
 0x2d4   : > { %v4315_v4 = vpop.eup %4314 }
 0x2d5   : > { %v5004_v27 = vpop.xlane.xlu0 %767  ;;  %v4072_v52 = vpack.i.bf16 %v1024_v61, %v1023_v15  ;;  %v4317_v31 = vpop.eup %4316  ;;  %v1025_v26 = vmul.f32 %v4315_v4, %v4627_v16  ;;  %v776_v4 = vmax.f32 %v4985_v47, 1e-24 }
 0x2d6   : > { %443 = vadd.xlane.f32.xlu0 %v442_v3  ;;  %v555_v3 = vmax.f32 %v4956_v46, 1e-24  ;;  %v1026_v46 = vmul.f32 %v4313_v42, %v4683_v28  ;;  %v4319_v10 = vpop.eup %4318  ;;  %v1028_v60 = vmul.f32 %v4317_v31, %v4733_v37 }
 0x2d7   : > { %v4321_v56 = vpop.eup %4320  ;;  %v1027_v25 = vmul.f32 %v4319_v10, %v4661_v24 }
 0x2d8   : > { %4334 = vrsqrt.f32 %v555_v3  ;;  %v4077_v21 = vpack.i.bf16 %v1026_v46, %v1025_v26  ;;  %v1030_v49 = vmul.f32 %v4321_v56, %v4689_v30 }
 0x2d9   : > { %v5013_v57 = vpop.xlane.xlu0 %770  ;;  %4336 = vrsqrt.f32 %v557_v6  ;;  %v4082_v39 = vpack.i.bf16 %v1028_v60, %v1027_v25  ;;  %v6111_v6 = vmov 0.0   ;;  %v5092_v60 = vld [vmem:[%s6105_s3] ss:$0 sm:$0xff] }
 0x2da   : > { %4338 = vrsqrt.f32 %v558_v5  ;;  %3803 = vmatprep.subr.bf16.mxu1 %v6111_v6  ;;  %3815 = vmatprep.subr.bf16.mxu0 %v6111_v6 }
 0x2db   : > { %4340 = vrsqrt.f32 %v623_v8  ;;  %3805 = vmatprep.mubr.msk.bf16.mxu1 %vm4548_vm2, %v6111_v6  ;;  %3817 = vmatprep.mubr.msk.bf16.mxu0 %vm4548_vm2, %v6111_v6 }
 0x2dc   : > { %4342 = vrsqrt.f32 %v624_v63 }
 0x2dd   : > { %v5021_v59 = vpop.xlane.xlu0 %773  ;;  %4344 = vrsqrt.f32 %v625_v2 }
 0x2e1   : > { %v5034_v62 = vpop.permute.xlu0 %4038 }
 0x2ec   : > { %4063 = vrot.lane.b32.xlu0 %v4062_v29, %s4543_s21  ;;  %v626_v29 = vmax.f32 %v4974_v17, 1e-24  ;;  %v5051_v17 = vpop.xlane.xlu1 %764 }
 0x2ee   : > { %4346 = vrsqrt.f32 %v626_v29 }
 0x2f0   : > { %4068 = vrot.lane.b32.xlu0 %v4067_v33, %s4543_s21  ;;  %v627_v33 = vmax.f32 %v5006_v45, 1e-24  ;;  %v4034_v32 = vpop.permute.xlu1 %4033 }
 0x2f1   : > { %v4036_v26 = vunpack.i.h.bf16 %v4034_v32  ;;  %v4035_v10 = vunpack.i.l.bf16 %v4034_v32 }
 0x2f2   : > { %4348 = vrsqrt.f32 %v627_v33 }
 0x2f3   : > { %440 = vadd.xlane.f32.xlu1 %v439_v53  ;;  %v4323_v53 = vpop.eup %4322  ;;  %4350 = vrsqrt.f32 %v628_v50 }
 0x2f4   : > { %v1029_v19 = vmul.f32 %v4323_v53, %v4629_v18  ;;  %4352 = vrsqrt.f32 %v629_v38 }
 0x2f5   : > { %4354 = vrsqrt.f32 %v630_v51 }
 0x2f6   : > { %v4087_v20 = vpack.i.bf16 %v1030_v49, %v1029_v19 }
 0x2f7   : > { %449 = vadd.xlane.f32.xlu1 %v448_v44  ;;  %v4325_v44 = vpop.eup %4324  ;;  %4356 = vrsqrt.f32 %v775_v11 }
 0x2f8   : > { %v569_v54 = vmul.f32 %v4325_v44, %v4627_v16  ;;  %v4041_v44 = vunpack.i.h.bf16 %v5034_v62 }
 0x2fb   : > { %452 = vadd.xlane.f32.xlu1 %v451_v55  ;;  %v4327_v55 = vpop.eup %4326  ;;  %4358 = vrsqrt.f32 %v776_v4 }
 0x2fc   : > { %v4329_v45 = vpop.eup %4328  ;;  %v570_v7 = vmul.f32 %v4327_v55, %v4683_v28  ;;  %v1323_v55 = vpack.c.bf16 %v4036_v26, %v4035_v10 }
 0x2fd   : > { %v567_v1 = vmul.f32 %v4329_v45, %v4655_v22 }
 0x2fe   : > { %v1320_v42 = vpack.c.bf16 %v570_v7, %v569_v54 }
 0x2ff   : > { %455 = vadd.xlane.f32.xlu1 %v454_v13  ;;  %v4331_v13 = vpop.eup %4330 }
 0x300   : > { %v4333_v41 = vpop.eup %4332  ;;  %v568_v23 = vmul.f32 %v4331_v13, %v4719_v34 }
 0x301   : > { %v4335_v14 = vpop.eup %4334  ;;  %v572_v3 = vmul.f32 %v4333_v41, %v4733_v37 }
 0x302   : > { %v4337_v35 = vpop.eup %4336  ;;  %v571_v0 = vmul.f32 %v4335_v14, %v4661_v24 }
 0x303   : > { %v4339_v48 = vpop.eup %4338 }
 0x304   : > { %v4341_v15 = vpop.eup %4340  ;;  %v574_v46 = vmul.f32 %v4339_v48, %v4689_v30  ;;  %v1321_v63 = vpack.c.bf16 %v572_v3, %v571_v0 }
 0x305   : > { %v639_v2 = vmul.f32 %v4341_v15, %v4655_v22 }
 0x307   : > { %v647_v19 = vmul.f32 %v5092_v60, %v639_v2 }
 0x30a   : > { %v5074_v5 = vpop.xlane.xlu1 %904 }
 0x30e   : > { %v4044_v33 = vpop.permute.xlu1 %4043 }
 0x30f   : > { %446 = vadd.xlane.f32.xlu0 %v445_v40  ;;  %v4343_v40 = vpop.eup %4342  ;;  %v4046_v32 = vunpack.i.h.bf16 %v4044_v33  ;;  %v4045_v14 = vunpack.i.l.bf16 %v4044_v33  ;;  %v778_v33 = vmax.f32 %v4993_v43, 1e-24 }
 0x310   : > { %4073 = vrot.lane.b32.xlu1 %v4072_v52, %s4546_s24  ;;  %v4345_v8 = vpop.eup %4344  ;;  %v1319_v52 = vpack.c.bf16 %v568_v23, %v567_v1  ;;  %v640_v47 = vmul.f32 %v4343_v40, %v4719_v34 }
 0x311   : > { %v4347_v31 = vpop.eup %4346  ;;  %v641_v25 = vmul.f32 %v4345_v8, %v4627_v16  ;;  %v1325_v0 = vpack.c.bf16 %v4046_v32, %v4045_v14  ;;  %v782_v14 = vmax.f32 %v5021_v59, 1e-24 }
 0x312   : > { %v5044_v12 = vpop.xlane.xlu0 %907  ;;  %v4349_v56 = vpop.eup %4348  ;;  %v642_v53 = vmul.f32 %v4347_v31, %v4683_v28  ;;  %v648_v45 = vmul.f32 %v5092_v60, %v640_v47 }
 0x313   : > { %v4351_v50 = vpop.eup %4350  ;;  %v649_v38 = vmul.f32 %v5092_v60, %v641_v25  ;;  %v643_v51 = vmul.f32 %v4349_v56, %v4661_v24  ;;  %v777_v56 = vmax.f32 %v5038_v9, 1e-24 }
 0x314   : > { %4078 = vrot.lane.b32.xlu1 %v4077_v21, %s4546_s24  ;;  %v573_v21 = vmul.f32 %v4337_v35, %v4629_v18  ;;  %v650_v13 = vmul.f32 %v5092_v60, %v642_v53  ;;  %v4353_v54 = vpop.eup %4352  ;;  %v4049_v35 = vpop.permute.xlu1 %4048  ;;  %v4092_v1 = vpack.i.bf16 %v648_v45, %v647_v19 }
 0x315   : > { %v4355_v41 = vpop.eup %4354  ;;  %v651_v48 = vmul.f32 %v5092_v60, %v643_v51  ;;  %v4050_v3 = vunpack.i.l.bf16 %v4049_v35  ;;  %v645_v15 = vmul.f32 %v4353_v54, %v4629_v18  ;;  %4360 = vrsqrt.f32 %v777_v56 }
 0x316   : > { %v5053_v58 = vpop.xlane.xlu0 %910  ;;  %v1322_v49 = vpack.c.bf16 %v574_v46, %v573_v21  ;;  %v4097_v23 = vpack.i.bf16 %v650_v13, %v649_v38  ;;  %v646_v4 = vmul.f32 %v4355_v41, %v4689_v30  ;;  %v4357_v40 = vpop.eup %4356  ;;  %4362 = vrsqrt.f32 %v778_v33 }
 0x317   : > { %v4359_v8 = vpop.eup %4358  ;;  %v791_v47 = vmul.f32 %v4357_v40, %v4655_v22  ;;  %v780_v54 = vmax.f32 %v5004_v27, 1e-24  ;;  %v928_v33 = vmax.f32 %v5044_v12, 1e-24 }
 0x318   : > { %4083 = vrot.lane.b32.xlu1 %v4082_v39, %s4546_s24  ;;  %v4040_v39 = vunpack.i.l.bf16 %v5034_v62  ;;  %v654_v2 = vmul.f32 %v5092_v60, %v646_v4  ;;  %v792_v21 = vmul.f32 %v4359_v8, %v4719_v34 }
 0x31a   : > { %v5060_v36 = vpop.xlane.xlu0 %913  ;;  %v1324_v62 = vpack.c.bf16 %v4041_v44, %v4040_v39  ;;  %v800_v44 = vmul.f32 %v5092_v60, %v792_v21 }
 0x31c   : > { %4088 = vrot.lane.b32.xlu1 %v4087_v20, %s4546_s24  ;;  %v644_v20 = vmul.f32 %v4351_v50, %v4733_v37  ;;  %v799_v50 = vmul.f32 %v5092_v60, %v791_v47 }
 0x31e   : > { %v5068_v61 = vpop.xlane.xlu0 %434  ;;  %v652_v11 = vmul.f32 %v5092_v60, %v644_v20  ;;  %v4112_v39 = vpack.i.bf16 %v800_v44, %v799_v50  ;;  %v779_v20 = vmax.f32 %v5051_v17, 1e-24  ;;  %v929_v44 = vmax.f32 %v5053_v58, 1e-24 }
 0x320   : > { %1386 = vrot.lane.b32.xlu1 %v1320_v42, %s4545_s23  ;;  %v4051_v42 = vunpack.i.h.bf16 %v4049_v35  ;;  %v4102_v31 = vpack.i.bf16 %v652_v11, %v651_v48  ;;  %4364 = vrsqrt.f32 %v779_v20 }
 0x321   : > { %4366 = vrsqrt.f32 %v780_v54 }
 0x322   : > { %v5085_v29 = vpop.xlane.xlu0 %916  ;;  %v1326_v46 = vpack.c.bf16 %v4051_v42, %v4050_v3  ;;  %4368 = vrsqrt.f32 %v782_v14 }
 0x324   : > { %1436 = vrot.lane.b32.xlu1 %v1321_v63, %s4545_s23  ;;  %v653_v63 = vmul.f32 %v5092_v60, %v645_v15 }
 0x325   : > { %1336 = vrot.lane.b32.xlu0 %v1319_v52, %s4545_s23 }
 0x326   : > { %v5107_v7 = vpop.xlane.xlu0 %919  ;;  %v4107_v25 = vpack.i.bf16 %v654_v2, %v653_v63 }
 0x328   : > { %1486 = vrot.lane.b32.xlu1 %v1322_v49, %s4545_s23  ;;  %v4361_v49 = vpop.eup %4360 }
 0x329   : > { %1536 = vrot.lane.b32.xlu0 %v1323_v55, %s4545_s23  ;;  %v4363_v55 = vpop.eup %4362  ;;  %v793_v19 = vmul.f32 %v4361_v49, %v4627_v16  ;;  %v931_v49 = vmax.f32 %v5085_v29, 1e-24 }
 0x32a   : > { %v4054_v52 = vpop.permute.xlu0 %4053  ;;  %v794_v45 = vmul.f32 %v4363_v55, %v4683_v28 }
 0x32b   : > { %v4056_v26 = vunpack.i.h.bf16 %v4054_v52  ;;  %v4055_v10 = vunpack.i.l.bf16 %v4054_v52  ;;  %v801_v41 = vmul.f32 %v5092_v60, %v793_v19 }
 0x32c   : > { %1586 = vrot.lane.b32.xlu1 %v1324_v62, %s4545_s23  ;;  %v802_v32 = vmul.f32 %v5092_v60, %v794_v45 }
 0x32d   : > { %4093 = vrot.lane.b32.xlu0 %v4092_v1, %s4541_s19  ;;  %v1327_v53 = vpack.c.bf16 %v4056_v26, %v4055_v10  ;;  %v781_v1 = vmax.f32 %v5013_v57, 1e-24  ;;  %v4365_v27 = vpop.eup %4364 }
 0x32e   : > { %v4117_v35 = vpack.i.bf16 %v802_v32, %v801_v41  ;;  %v795_v11 = vmul.f32 %v4365_v27, %v4661_v24 }
 0x32f   : > { %4370 = vrsqrt.f32 %v781_v1 }
 0x330   : > { %4098 = vrot.lane.b32.xlu1 %v4097_v23, %s4541_s19  ;;  %v4367_v23 = vpop.eup %4366  ;;  %v803_v57 = vmul.f32 %v5092_v60, %v795_v11  ;;  %4372 = vrsqrt.f32 %v928_v33 }
 0x331   : > { %1636 = vrot.lane.b32.xlu0 %v1325_v0, %s4545_s23  ;;  %v796_v42 = vmul.f32 %v4367_v23, %v4733_v37  ;;  %v4369_v3 = vpop.eup %4368 }
 0x332   : > { %v798_v52 = vmul.f32 %v4369_v3, %v4689_v30 }
 0x333   : > { %v804_v8 = vmul.f32 %v5092_v60, %v796_v42 }
 0x334   : > { %1686 = vrot.lane.b32.xlu1 %v1326_v46, %s4545_s23  ;;  %v806_v47 = vmul.f32 %v5092_v60, %v798_v52 }
 0x335   : > { %4103 = vrot.lane.b32.xlu0 %v4102_v31, %s4541_s19  ;;  %v4122_v10 = vpack.i.bf16 %v804_v8, %v803_v57 }
 0x338   : > { %4108 = vrot.lane.b32.xlu1 %v4107_v25, %s4541_s19  ;;  %v927_v25 = vmax.f32 %v5074_v5, 1e-24 }
 0x339   : > { %1736 = vrot.lane.b32.xlu0 %v1327_v53, %s4545_s23  ;;  %v930_v53 = vmax.f32 %v5060_v36, 1e-24 }
 0x33a   : > { %4374 = vrsqrt.f32 %v927_v25 }
 0x33b   : > { %4376 = vrsqrt.f32 %v930_v53 }
 0x33c   : > { %v4371_v40 = vpop.eup %4370  ;;  %4378 = vrsqrt.f32 %v929_v44 }
 0x33d   : > { %4113 = vrot.lane.b32.xlu0 %v4112_v39, %s4543_s21  ;;  %v797_v2 = vmul.f32 %v4371_v40, %v4629_v18  ;;  %v932_v39 = vmax.f32 %v5107_v7, 1e-24  ;;  %v4373_v45 = vpop.eup %4372  ;;  %v457_v7 = vmax.f32 %v5068_v61, 1e-24 }
 0x33e   : > { %v944_v29 = vmul.f32 %v4373_v45, %v4719_v34 }
 0x33f   : > { %v805_v21 = vmul.f32 %v5092_v60, %v797_v2  ;;  %4380 = vrsqrt.f32 %v932_v39 }
 0x340   : > { %4382 = vrsqrt.f32 %v931_v49  ;;  %v952_v14 = vmul.f32 %v5092_v60, %v944_v29 }
 0x341   : > { %v4127_v56 = vpack.i.bf16 %v806_v47, %v805_v21 }
 0x343   : > { %v5130_v9 = vpop.xlane.xlu1 %437 }
 0x344   : > { %v458_v36 = vmax.f32 %v5130_v9, 1e-24 }
 0x347   : > { %v5132_v43 = vpop.xlane.xlu1 %925 }
 0x348   : > { %v934_v12 = vmax.f32 %v5132_v43, 1e-24 }
 0x34b   : > { %v4059_v38 = vpop.permute.xlu1 %4058 }
 0x34c   : > { %v4061_v13 = vunpack.i.h.bf16 %v4059_v38  ;;  %v4060_v51 = vunpack.i.l.bf16 %v4059_v38  ;;  %v4375_v38 = vpop.eup %4374 }
 0x34d   : > { %v943_v20 = vmul.f32 %v4375_v38, %v4655_v22 }
 0x34e   : > { %v1328_v62 = vpack.c.bf16 %v4061_v13, %v4060_v51  ;;  %v4377_v13 = vpop.eup %4376 }
 0x34f   : > { %v951_v61 = vmul.f32 %v5092_v60, %v943_v20 }
 0x350   : > { %1786 = vrot.lane.b32.xlu1 %v1328_v62, %s4545_s23  ;;  %v4379_v62 = vpop.eup %4378 }
 0x351   : > { %v4381_v41 = vpop.eup %4380  ;;  %v945_v42 = vmul.f32 %v4379_v62, %v4627_v16 }
 0x352   : > { %v948_v3 = vmul.f32 %v4381_v41, %v4733_v37 }
 0x354   : > { %4118 = vrot.lane.b32.xlu1 %v4117_v35, %s4543_s21  ;;  %v946_v35 = vmul.f32 %v4377_v13, %v4683_v28  ;;  %v956_v2 = vmul.f32 %v5092_v60, %v948_v3 }
 0x35b   : > { %v923_v17 = vpop.xlane.xlu0 %922 }
 0x35c   : > { %v933_v19 = vmax.f32 %v923_v17, 1e-24  ;;  %v4383_v17 = vpop.eup %4382 }
 0x35d   : > { %v947_v8 = vmul.f32 %v4383_v17, %v4661_v24 }
 0x35e   : > { %4384 = vrsqrt.f32 %v933_v19 }
 0x35f   : > { %v5144_v48 = vpop.xlane.xlu0 %443  ;;  %4386 = vrsqrt.f32 %v934_v12  ;;  %v955_v25 = vmul.f32 %v5092_v60, %v947_v8 }
 0x360   : > { %4388 = vrsqrt.f32 %v458_v36  ;;  %v460_v27 = vmax.f32 %v5144_v48, 1e-24 }
 0x361   : > { %4390 = vrsqrt.f32 %v457_v7  ;;  %v4142_v19 = vpack.i.bf16 %v956_v2, %v955_v25 }
 0x363   : > { %v4064_v15 = vpop.permute.xlu0 %4063 }
 0x364   : > { %v4066_v4 = vunpack.i.h.bf16 %v4064_v15  ;;  %v4065_v59 = vunpack.i.l.bf16 %v4064_v15 }
 0x366   : > { %v1329_v0 = vpack.c.bf16 %v4066_v4, %v4065_v59  ;;  %v4132_v4 = vpack.i.bf16 %v952_v14, %v951_v61  ;;  %v954_v59 = vmul.f32 %v5092_v60, %v946_v35 }
 0x367   : > { %v4069_v46 = vpop.permute.xlu0 %4068 }
 0x368   : > { %v4071_v31 = vunpack.i.h.bf16 %v4069_v46  ;;  %v4070_v63 = vunpack.i.l.bf16 %v4069_v46  ;;  %1836 = vrot.lane.b32.xlu0 %v1329_v0, %s4545_s23 }
 0x36a   : > { %v1330_v26 = vpack.c.bf16 %v4071_v31, %v4070_v63  ;;  %v953_v31 = vmul.f32 %v5092_v60, %v945_v42 }
 0x36b   : > { %v4385_v40 = vpop.eup %4384 }
 0x36c   : > { %1886 = vrot.lane.b32.xlu1 %v1330_v26, %s4545_s23  ;;  %4123 = vrot.lane.b32.xlu0 %v4122_v10, %s4543_s21  ;;  %v4387_v52 = vpop.eup %4386  ;;  %v4137_v10 = vpack.i.bf16 %v954_v59, %v953_v31  ;;  %v949_v47 = vmul.f32 %v4385_v40, %v4629_v18 }
 0x36d   : > { %v4389_v21 = vpop.eup %4388  ;;  %v950_v53 = vmul.f32 %v4387_v52, %v4689_v30 }
 0x36e   : > { %v957_v36 = vmul.f32 %v5092_v60, %v949_v47  ;;  %v474_v45 = vmul.f32 %v4389_v21, %v4719_v34 }
 0x36f   : > { %v958_v7 = vmul.f32 %v5092_v60, %v950_v53 }
 0x370   : > { %4128 = vrot.lane.b32.xlu1 %v4127_v56, %s4543_s21 }
 0x371   : > { %v4147_v13 = vpack.i.bf16 %v958_v7, %v957_v36 }
 0x37c   : > { %v441_v50 = vpop.xlane.xlu1 %440 }
 0x37d   : > { %v459_v9 = vmax.f32 %v441_v50, 1e-24 }
 0x37f   : > { %4392 = vrsqrt.f32 %v459_v9 }
 0x380   : > { %v450_v55 = vpop.xlane.xlu1 %449  ;;  %4394 = vrsqrt.f32 %v460_v27 }
 0x381   : > { %v462_v0 = vmax.f32 %v450_v55, 1e-24  ;;  %v4391_v55 = vpop.eup %4390 }
 0x382   : > { %v473_v29 = vmul.f32 %v4391_v55, %v4655_v22 }
 0x383   : > { %4396 = vrsqrt.f32 %v462_v0 }
 0x384   : > { %v5165_v5 = vpop.xlane.xlu1 %452  ;;  %v487_v41 = vmul.f32 %v5092_v60, %v473_v29 }
 0x385   : > { %v463_v50 = vmax.f32 %v5165_v5, 1e-24 }
 0x388   : > { %v456_v58 = vpop.xlane.xlu1 %455 }
 0x389   : > { %v464_v63 = vmax.f32 %v456_v58, 1e-24 }
 0x38b   : > { %4398 = vrsqrt.f32 %v464_v63 }
 0x38c   : > { %v4074_v51 = vpop.permute.xlu1 %4073  ;;  %v4393_v20 = vpop.eup %4392 }
 0x38d   : > { %v4076_v43 = vunpack.i.h.bf16 %v4074_v51  ;;  %v4075_v54 = vunpack.i.l.bf16 %v4074_v51  ;;  %v488_v51 = vmul.f32 %v5092_v60, %v474_v45  ;;  %v4395_v9 = vpop.eup %4394  ;;  %v475_v14 = vmul.f32 %v4393_v20, %v4627_v16 }
 0x38e   : > { %v476_v17 = vmul.f32 %v4395_v9, %v4683_v28 }
 0x38f   : > { %v1331_v32 = vpack.c.bf16 %v4076_v43, %v4075_v54 }
 0x390   : > { %v4079_v1 = vpop.permute.xlu1 %4078 }
 0x391   : > { %v4081_v23 = vunpack.i.h.bf16 %v4079_v1  ;;  %v4080_v11 = vunpack.i.l.bf16 %v4079_v1  ;;  %1936 = vrot.lane.b32.xlu0 %v1331_v32, %s4545_s23  ;;  %v1303_v32 = vpack.c.bf16 %v488_v51, %v487_v41  ;;  %v4397_v1 = vpop.eup %4396 }
 0x392   : > { %v478_v3 = vmul.f32 %v4397_v1, %v4733_v37 }
 0x393   : > { %v1332_v15 = vpack.c.bf16 %v4081_v23, %v4080_v11  ;;  %v489_v11 = vmul.f32 %v5092_v60, %v475_v14 }
 0x394   : > { %v4084_v57 = vpop.permute.xlu1 %4083  ;;  %v492_v52 = vmul.f32 %v5092_v60, %v478_v3 }
 0x395   : > { %v4086_v48 = vunpack.i.h.bf16 %v4084_v57  ;;  %v4085_v46 = vunpack.i.l.bf16 %v4084_v57  ;;  %1986 = vrot.lane.b32.xlu1 %v1332_v15, %s4545_s23  ;;  %4133 = vrot.lane.b32.xlu0 %v4132_v4, %s4546_s24  ;;  %v490_v15 = vmul.f32 %v5092_v60, %v476_v17 }
 0x397   : > { %v1333_v26 = vpack.c.bf16 %v4086_v48, %v4085_v46  ;;  %v1304_v0 = vpack.c.bf16 %v490_v15, %v489_v11 }
 0x398   : > { %v4089_v56 = vpop.permute.xlu1 %4088  ;;  %v447_v33 = vpop.xlane.xlu0 %446 }
 0x399   : > { %v4091_v44 = vunpack.i.h.bf16 %v4089_v56  ;;  %v4090_v39 = vunpack.i.l.bf16 %v4089_v56  ;;  %v461_v49 = vmax.f32 %v447_v33, 1e-24  ;;  %4138 = vrot.lane.b32.xlu1 %v4137_v10, %s4546_s24  ;;  %2036 = vrot.lane.b32.xlu0 %v1333_v26, %s4545_s23  ;;  %v4399_v27 = vpop.eup %4398 }
 0x39a   : > { %v480_v8 = vmul.f32 %v4399_v27, %v4689_v30 }
 0x39b   : > { %v1334_v12 = vpack.c.bf16 %v4091_v44, %v4090_v39  ;;  %4400 = vrsqrt.f32 %v461_v49 }
 0x39c   : > { %v1387_v58 = vpop.permute.xlu1 %1386  ;;  %v1337_v38 = vpop.permute.xlu0 %1336  ;;  %4402 = vrsqrt.f32 %v463_v50  ;;  %v494_v2 = vmul.f32 %v5092_v60, %v480_v8 }
 0x39d   : > { %v1342_v5 = vsel %vm432_vm1, %v1337_v38, 0  ;;  %2086 = vrot.lane.b32.xlu1 %v1334_v12, %s4545_s23  ;;  %4143 = vrot.lane.b32.xlu0 %v4142_v19, %s4546_s24  ;;  %v1392_v61 = vsel %vm432_vm1, %v1387_v58, 0 }
 0x39e   : > { %3804 = vmatpush3.bf16.xpose.msra.mxu1 %v1342_v5 }
 0x39f   : > { %3809 = vmatprep.subr.bf16.mxu1 %v6111_v6 }
 0x3a0   : > { %v1437_v43 = vpop.permute.xlu1 %1436  ;;  %v1537_v62 = vpop.permute.xlu0 %1536 }
 0x3a1   : > { %v1442_v54 = vsel %vm432_vm1, %v1437_v43, 0  ;;  %4148 = vrot.lane.b32.xlu1 %v4147_v13, %s4546_s24  ;;  %v1542_v26 = vsel %vm432_vm1, %v1537_v62, 0 }
 0x3a2   : > { %3816 = vmatpush3.bf16.xpose.msra.mxu0 %v1442_v54 }
 0x3a3   : > { %3827 = vmatprep.subr.bf16.mxu0 %v6111_v6 }
 0x3a4   : > { %v1487_v35 = vpop.permute.xlu1 %1486  ;;  %v4094_v23 = vpop.permute.xlu0 %4093 }
 0x3a5   : > { %3806 = vmatmul.mubr.msk.bf16.vlgmr.msra.gmra.mxu1 %vm432_vm1, %v1303_v32  ;;  %v1492_v48 = vsel %vm432_vm1, %v1487_v35, 0  ;;  %v4096_v21 = vunpack.i.h.bf16 %v4094_v23  ;;  %v4095_v56 = vunpack.i.l.bf16 %v4094_v23 }
 0x3a6   : > { %3810 = vmatpush3.bf16.xpose.msra.mxu1 %v1392_v61  ;;  %3811 = vmatprep.mubr.msk.bf16.mxu1 %vm4548_vm2, %v6111_v6 }
 0x3a7   : > { %3821 = vmatprep.subr.bf16.mxu1 %v6111_v6  ;;  %v1307_v50 = vpack.c.bf16 %v4096_v21, %v4095_v56 }
 0x3a8   : > { %v4401_v42 = vpop.eup %4400  ;;  %v1587_v40 = vpop.permute.xlu1 %1586 }
 0x3a9   : > { %v477_v4 = vmul.f32 %v4401_v42, %v4661_v24  ;;  %v4403_v59 = vpop.eup %4402  ;;  %v1637_v46 = vpop.permute.xlu0 %1636  ;;  %v1592_v53 = vsel %vm432_vm1, %v1587_v40, 0 }
 0x3aa   : > { %v479_v31 = vmul.f32 %v4403_v59, %v4629_v18  ;;  %v1642_v49 = vsel %vm432_vm1, %v1637_v46, 0 }
 0x3ab   : > { %v491_v57 = vmul.f32 %v5092_v60, %v477_v4 }
 0x3ac   : > { %v4099_v10 = vpop.permute.xlu1 %4098  ;;  %v493_v47 = vmul.f32 %v5092_v60, %v479_v31 }
 0x3ad   : > { %3812 = vmatmul.mubr.msk.bf16.vlgmr.msra.gmra.mxu1 %vm432_vm1, %v1304_v0  ;;  %v1305_v63 = vpack.c.bf16 %v492_v52, %v491_v57  ;;  %v4104_v33 = vpop.permute.xlu0 %4103  ;;  %v4101_v60 = vunpack.i.h.bf16 %v4099_v10  ;;  %v4100_v39 = vunpack.i.l.bf16 %v4099_v10 }
 0x3ae   : > { %3822 = vmatpush3.bf16.xpose.msra.mxu1 %v1492_v48  ;;  %3823 = vmatprep.mubr.msk.bf16.mxu1 %vm4548_vm2, %v6111_v6  ;;  %v1306_v25 = vpack.c.bf16 %v494_v2, %v493_v47  ;;  %v4106_v19 = vunpack.i.h.bf16 %v4104_v33  ;;  %v4105_v12 = vunpack.i.l.bf16 %v4104_v33 }
 0x3af   : > { %3833 = vmatprep.subr.bf16.mxu1 %v6111_v6  ;;  %3818 = vmatmul.mubr.msk.bf16.vlgmr.msra.gmra.mxu0 %vm432_vm1, %v1305_v63  ;;  %v1308_v36 = vpack.c.bf16 %v4101_v60, %v4100_v39 }
 0x3b0   : > { %3828 = vmatpush3.bf16.xpose.msra.mxu0 %v1542_v26  ;;  %3829 = vmatprep.mubr.msk.bf16.mxu0 %vm4548_vm2, %v6111_v6  ;;  %v1687_v44 = vpop.permute.xlu1 %1686  ;;  %v1309_v38 = vpack.c.bf16 %v4106_v19, %v4105_v12  ;;  %v2135_v12 = vld [vmem:[%s6103_s1] sm:$0xff] }
 0x3b1   : > { %3839 = vmatprep.subr.bf16.mxu0 %v6111_v6  ;;  %v1737_v55 = vpop.permute.xlu0 %1736  ;;  %v1692_v58 = vsel %vm432_vm1, %v1687_v44, 0 }
 0x3b2   : > { %v1742_v13 = vsel %vm432_vm1, %v1737_v55, 0 }
 0x3b4   : > { %v4109_v45 = vpop.permute.xlu1 %4108 }
 0x3b5   : > { %3824 = vmatmul.mubr.msk.bf16.vlgmr.msra.gmra.mxu1 %vm432_vm1, %v1306_v25  ;;  %v4111_v5 = vunpack.i.h.bf16 %v4109_v45  ;;  %v4110_v7 = vunpack.i.l.bf16 %v4109_v45  ;;  %v4114_v29 = vpop.permute.xlu0 %4113  ;;  %v5297_v45 = vld [vmem:[%s6104_s2] sm:$0xff] }
 0x3b6   : > { %3834 = vmatpush3.bf16.xpose.msra.mxu1 %v1592_v53  ;;  %3835 = vmatprep.mubr.msk.bf16.mxu1 %vm4548_vm2, %v6111_v6  ;;  %v4116_v51 = vunpack.i.h.bf16 %v4114_v29  ;;  %v4115_v20 = vunpack.i.l.bf16 %v4114_v29 }
 0x3b7   : > { %3845 = vmatprep.subr.bf16.mxu1 %v6111_v6  ;;  %3830 = vmatmul.mubr.msk.bf16.vlgmr.msra.gmra.mxu0 %vm432_vm1, %v1307_v50  ;;  %v1310_v54 = vpack.c.bf16 %v4111_v5, %v4110_v7 }
 0x3b8   : > { %3840 = vmatpush3.bf16.xpose.msra.mxu0 %v1642_v49  ;;  %3841 = vmatprep.mubr.msk.bf16.mxu0 %vm4548_vm2, %v6111_v6  ;;  %v1311_v41 = vpack.c.bf16 %v4116_v51, %v4115_v20  ;;  %v2136_v51 = vld [vmem:[%s6103_s1 + $0x8] sm:$0xff] }
 0x3b9   : > { %3851 = vmatprep.subr.bf16.mxu0 %v6111_v6 }
 0x3bd   : > { %3836 = vmatmul.mubr.msk.bf16.vlgmr.msra.gmra.mxu1 %vm432_vm1, %v1308_v36 }
 0x3be   : > { %3846 = vmatpush3.bf16.xpose.msra.mxu1 %v1692_v58  ;;  %3847 = vmatprep.mubr.msk.bf16.mxu1 %vm4548_vm2, %v6111_v6 }
 0x3bf   : > { %3857 = vmatprep.subr.bf16.mxu1 %v6111_v6  ;;  %3842 = vmatmul.mubr.msk.bf16.vlgmr.msra.gmra.mxu0 %vm432_vm1, %v1309_v38 }
 0x3c0   : > { %3852 = vmatpush3.bf16.xpose.msra.mxu0 %v1742_v13  ;;  %3853 = vmatprep.mubr.msk.bf16.mxu0 %vm4548_vm2, %v6111_v6 }
 0x3c1   : > { %3863 = vmatprep.subr.bf16.mxu0 %v6111_v6 }
 0x3c2   : > { %v1787_v43 = vpop.permute.xlu1 %1786 }
 0x3c3   : > { %v1792_v62 = vsel %vm432_vm1, %v1787_v43, 0 }
 0x3c5   : > { %3848 = vmatmul.mubr.msk.bf16.vlgmr.msra.gmra.mxu1 %vm432_vm1, %v1310_v54 }
 0x3c6   : > { %v4119_v9 = vpop.permute.xlu1 %4118  ;;  %3858 = vmatpush3.bf16.xpose.msra.mxu1 %v1792_v62  ;;  %3859 = vmatprep.mubr.msk.bf16.mxu1 %vm4548_vm2, %v6111_v6 }
 0x3c7   : > { %v4121_v32 = vunpack.i.h.bf16 %v4119_v9  ;;  %v4120_v14 = vunpack.i.l.bf16 %v4119_v9  ;;  %3869 = vmatprep.subr.bf16.mxu1 %v6111_v6  ;;  %3854 = vmatmul.mubr.msk.bf16.vlgmr.msra.gmra.mxu0 %vm432_vm1, %v1311_v41  ;;  %v5310_v41 = vld [vmem:[%s6104_s2 + $0x20] sm:$0xff]  ;;  %v5315_v9 = vld [vmem:[%s6104_s2 + $0x8] sm:$0xff] }
 0x3c8   : > { %3865 = vmatprep.mubr.msk.bf16.mxu0 %vm4548_vm2, %v6111_v6 }
 0x3c9   : > { %v1312_v35 = vpack.c.bf16 %v4121_v32, %v4120_v14 }
 0x3cd   : > { %3860 = vmatmul.mubr.msk.bf16.vlgmr.msra.gmra.mxu1 %vm432_vm1, %v1312_v35 }
 0x3ce   : > { %3871 = vmatprep.mubr.msk.bf16.mxu1 %vm4548_vm2, %v6111_v6 }
 0x3da   : > { %v1837_v1 = vpop.permute.xlu0 %1836 }
 0x3db   : > { %v1842_v61 = vsel %vm432_vm1, %v1837_v1, 0 }
 0x3dc   : > { %3864 = vmatpush3.bf16.xpose.msra.mxu0 %v1842_v61 }
 0x3dd   : > { %3875 = vmatprep.subr.bf16.mxu0 %v6111_v6 }
 0x3de   : > { %v1887_v17 = vpop.permute.xlu1 %1886  ;;  %v4124_v27 = vpop.permute.xlu0 %4123 }
 0x3df   : > { %v1892_v23 = vsel %vm432_vm1, %v1887_v17, 0  ;;  %v4126_v11 = vunpack.i.h.bf16 %v4124_v27  ;;  %v4125_v42 = vunpack.i.l.bf16 %v4124_v27 }
 0x3e0   : > { %3870 = vmatpush3.bf16.xpose.msra.mxu1 %v1892_v23  ;;  %v5326_v23 = vld [vmem:[%s6104_s2 + $0x28] sm:$0xff] }
 0x3e1   : > { %v1313_v3 = vpack.c.bf16 %v4126_v11, %v4125_v42  ;;  %3881 = vmatprep.subr.bf16.mxu1 %v6111_v6 }
 0x3e2   : > { %v4129_v15 = vpop.permute.xlu1 %4128 }
 0x3e3   : > { %v4131_v4 = vunpack.i.h.bf16 %v4129_v15  ;;  %v4130_v59 = vunpack.i.l.bf16 %v4129_v15  ;;  %3866 = vmatmul.mubr.msk.bf16.vlgmr.msra.gmra.mxu0 %vm432_vm1, %v1313_v3 }
 0x3e4   : > { %3877 = vmatprep.mubr.msk.bf16.mxu0 %vm4548_vm2, %v6111_v6 }
 0x3e5   : > { %v1314_v40 = vpack.c.bf16 %v4131_v4, %v4130_v59  ;;  %v5333_v4 = vld [vmem:[%s6104_s2 + $0x10] sm:$0xff] }
 0x3e7   : > { %3872 = vmatmul.mubr.msk.bf16.vlgmr.msra.gmra.mxu1 %vm432_vm1, %v1314_v40 }
 0x3e8   : > { %3883 = vmatprep.mubr.msk.bf16.mxu1 %vm4548_vm2, %v6111_v6 }
 0x403   : > { %v1937_v0 = vpop.permute.xlu0 %1936 }
 0x404   : > { %v1942_v57 = vsel %vm432_vm1, %v1937_v0, 0  ;;  %v5338_v0 = vld [vmem:[%s6104_s2 + $0x30] sm:$0xff] }
 0x405   : > { %3876 = vmatpush3.bf16.xpose.msra.mxu0 %v1942_v57 }
 0x406   : > { %3887 = vmatprep.subr.bf16.mxu0 %v6111_v6 }
 0x407   : > { %v1987_v8 = vpop.permute.xlu1 %1986  ;;  %v4134_v52 = vpop.permute.xlu0 %4133 }
 0x408   : > { %v1992_v48 = vsel %vm432_vm1, %v1987_v8, 0  ;;  %v4136_v46 = vunpack.i.h.bf16 %v4134_v52  ;;  %v4135_v31 = vunpack.i.l.bf16 %v4134_v52 }
 0x409   : > { %3882 = vmatpush3.bf16.xpose.msra.mxu1 %v1992_v48 }
 0x40a   : > { %v1315_v63 = vpack.c.bf16 %v4136_v46, %v4135_v31  ;;  %3893 = vmatprep.subr.bf16.mxu1 %v6111_v6 }
 0x40b   : > { %v4139_v2 = vpop.permute.xlu1 %4138  ;;  %v2037_v26 = vpop.permute.xlu0 %2036 }
 0x40c   : > { %v4141_v10 = vunpack.i.h.bf16 %v4139_v2  ;;  %v4140_v47 = vunpack.i.l.bf16 %v4139_v2  ;;  %v2042_v21 = vsel %vm432_vm1, %v2037_v26, 0  ;;  %3878 = vmatmul.mubr.msk.bf16.vlgmr.msra.gmra.mxu0 %vm432_vm1, %v1315_v63 }
 0x40d   : > { %3888 = vmatpush3.bf16.xpose.msra.mxu0 %v2042_v21  ;;  %3889 = vmatprep.mubr.msk.bf16.mxu0 %vm4548_vm2, %v6111_v6 }
 0x40e   : > { %v1316_v56 = vpack.c.bf16 %v4141_v10, %v4140_v47  ;;  %3899 = vmatprep.subr.bf16.mxu0 %v6111_v6  ;;  %v5358_v10 = vld [vmem:[%s6104_s2 + $0x18] sm:$0xff] }
 0x40f   : > { %v2087_v33 = vpop.permute.xlu1 %2086  ;;  %v4144_v25 = vpop.permute.xlu0 %4143 }
 0x410   : > { %v2092_v53 = vsel %vm432_vm1, %v2087_v33, 0  ;;  %v4146_v50 = vunpack.i.h.bf16 %v4144_v25  ;;  %v4145_v44 = vunpack.i.l.bf16 %v4144_v25  ;;  %3884 = vmatmul.mubr.msk.bf16.vlgmr.msra.gmra.mxu1 %vm432_vm1, %v1316_v56 }
 0x411   : > { %3894 = vmatpush3.bf16.xpose.msra.mxu1 %v2092_v53  ;;  %3895 = vmatprep.mubr.msk.bf16.mxu1 %vm4548_vm2, %v6111_v6 }
 0x412   : > { %v1317_v60 = vpack.c.bf16 %v4146_v50, %v4145_v44  ;;  %3905 = vmatprep.subr.bf16.mxu1 %v6111_v6 }
 0x413   : > { %v4149_v39 = vpop.permute.xlu1 %4148 }
 0x414   : > { %v4151_v49 = vunpack.i.h.bf16 %v4149_v39  ;;  %v4150_v55 = vunpack.i.l.bf16 %v4149_v39  ;;  %3890 = vmatmul.mubr.msk.bf16.vlgmr.msra.gmra.mxu0 %vm432_vm1, %v1317_v60  ;;  %v5370_v60 = vld [vmem:[%s6104_s2 + $0x38] sm:$0xff] }
 0x415   : > { %3901 = vmatprep.mubr.msk.bf16.mxu0 %vm4548_vm2, %v6111_v6 }
 0x416   : > { %v1318_v19 = vpack.c.bf16 %v4151_v49, %v4150_v55 }
 0x418   : > { %3896 = vmatmul.mubr.msk.bf16.vlgmr.msra.gmra.mxu1 %vm432_vm1, %v1318_v19 }
 0x419   : > { %3907 = vmatprep.mubr.msk.bf16.mxu1 %vm4548_vm2, %v6111_v6 }
 0x465   : > { %v1378_v36 = vpop.f32.mrf.mxu1 }
 0x466   : > { %v2143_v58 = vadd.f32 %v2135_v12, %v1378_v36 }
 0x467   : > { %v3807_v38 = vpop.f32.mrf.mxu1 }
 0x468   : > { %v5300_v5 = vadd.f32 %v5297_v45, %v2143_v58 }
 0x469   : > { %v1381_v7 = vpop.f32.mrf.mxu1 }
 0x46a   : > { %v2216_v29 = vsel %vm2215_vm3, %v5300_v5, -inf  ;;  %v2144_v54 = vadd.f32 %v2136_v51, %v1381_v7 }
 0x46b   : > { %v3808_v13 = vpop.f32.mrf.mxu1  ;;  %2217 = vmax.xlane.f32.xlu0 %v2216_v29 }
 0x46c   : > { %v5321_v17 = vadd.f32 %v5315_v9, %v2144_v54 }
 0x46d   : > { %v1428_v20 = vpop.f32.mrf.mxu1 }
 0x46e   : > { %v2145_v11 = vadd.f32 %v2135_v12, %v1428_v20  ;;  %v2219_v48 = vsel %vm2215_vm3, %v5321_v17, -inf }
 0x46f   : > { %v3813_v43 = vpop.f32.mrf.mxu1  ;;  %v1478_v62 = vpop.f32.mrf.mxu0 }
 0x470   : > { %v2147_v32 = vadd.f32 %v2135_v12, %v1478_v62  ;;  %v5348_v46 = vadd.f32 %v5333_v4, %v2145_v11 }
 0x471   : > { %v1431_v14 = vpop.f32.mrf.mxu1  ;;  %v3819_v35 = vpop.f32.mrf.mxu0 }
 0x472   : > { %v5318_v1 = vadd.f32 %v5310_v41, %v2147_v32  ;;  %v2146_v31 = vadd.f32 %v2136_v51, %v1431_v14  ;;  %v2222_v44 = vsel %vm2215_vm3, %v5348_v46, -inf }
 0x473   : > { %v3814_v61 = vpop.f32.mrf.mxu1  ;;  %v1481_v27 = vpop.f32.mrf.mxu0 }
 0x474   : > { %v2148_v42 = vadd.f32 %v2136_v51, %v1481_v27  ;;  %v2228_v15 = vsel %vm2215_vm3, %v5318_v1, -inf  ;;  %v5361_v33 = vadd.f32 %v5358_v10, %v2146_v31  ;;  %v5383_v61 = vpack.i.bf16 %v4719_v34, %v4655_v22 }
 0x475   : > { %v1528_v3 = vpop.f32.mrf.mxu1  ;;  %v3820_v59 = vpop.f32.mrf.mxu0  ;;  %2229 = vmax.xlane.f32.xlu1 %v2228_v15 }
 0x476   : > { %v2149_v40 = vadd.f32 %v2135_v12, %v1528_v3  ;;  %v5341_v57 = vadd.f32 %v5326_v23, %v2148_v42  ;;  %v2225_v36 = vsel %vm2215_vm3, %v5361_v33, -inf  ;;  %v5389_v3 = vpack.i.bf16 %v4733_v37, %v4661_v24 }
 0x477   : > { %v3825_v8 = vpop.f32.mrf.mxu1  ;;  %v5343_v52 = vpop.f32.mrf.mxu0  ;;  %v5395_v59 = vpack.i.bf16 %v4689_v30, %v4629_v18 }
 0x478   : > { %v5351_v63 = vadd.f32 %v5338_v0, %v2149_v40  ;;  %v2231_v26 = vsel %vm2215_vm3, %v5341_v57, -inf  ;;  %v5401_v40 = vpack.i.bf16 %v4683_v28, %v4627_v16 }
 0x479   : > { %v1531_v2 = vpop.f32.mrf.mxu1  ;;  %v3831_v47 = vpop.f32.mrf.mxu0  ;;  %2220 = vmax.xlane.f32.xlu1 %v2219_v48  ;;  %2232 = vmax.xlane.f32.xlu0 %v2231_v26 }
 0x47a   : > { %v2150_v25 = vadd.f32 %v2136_v51, %v1531_v2  ;;  %v2234_v50 = vsel %vm2215_vm3, %v5351_v63, -inf }
 0x47b   : > { %v3826_v21 = vpop.f32.mrf.mxu1  ;;  %v1581_v56 = vpop.f32.mrf.mxu0 }
 0x47c   : > { %v5373_v19 = vadd.f32 %v5370_v60, %v2150_v25 }
 0x47d   : > { %v1628_v53 = vpop.f32.mrf.mxu1  ;;  %v3832_v39 = vpop.f32.mrf.mxu0  ;;  %2235 = vmax.xlane.f32.xlu1 %v2234_v50  ;;  %2223 = vmax.xlane.f32.xlu0 %v2222_v44  ;;  %v2137_v50 = vld [vmem:[%s6103_s1 + $0x10] sm:$0xff]  ;;  %v2138_v44 = vld [vmem:[%s6103_s1 + $0x18] sm:$0xff] }
 0x47e   : > { %v2237_v13 = vsel %vm2215_vm3, %v5373_v19, -inf  ;;  %v2153_v39 = vadd.f32 %v2137_v50, %v1628_v53 }
 0x47f   : > { %v3837_v49 = vpop.f32.mrf.mxu1  ;;  %v1678_v55 = vpop.f32.mrf.mxu0 }
 0x481   : > { %v1631_v12 = vpop.f32.mrf.mxu1  ;;  %v3843_v58 = vpop.f32.mrf.mxu0  ;;  %2226 = vmax.xlane.f32.xlu0 %v2225_v36  ;;  %v2151_v36 = vadd.f32 %v2137_v50, %v5343_v52 }
 0x482   : > { %v2154_v49 = vadd.f32 %v2138_v44, %v1631_v12  ;;  %v2152_v58 = vadd.f32 %v2138_v44, %v1581_v56  ;;  %v2155_v56 = vadd.f32 %v2137_v50, %v1678_v55 }
 0x483   : > { %v3838_v38 = vpop.f32.mrf.mxu1  ;;  %v1681_v7 = vpop.f32.mrf.mxu0 }
 0x484   : > { %v5425_v38 = vadd.f32 %v5333_v4, %v2153_v39  ;;  %v2156_v12 = vadd.f32 %v2138_v44, %v1681_v7  ;;  %v2139_v7 = vld [vmem:[%s6103_s1 + $0x20] sm:$0xff] }
 0x485   : > { %v1728_v29 = vpop.f32.mrf.mxu1  ;;  %v3844_v51 = vpop.f32.mrf.mxu0  ;;  %2238 = vmax.xlane.f32.xlu0 %v2237_v13  ;;  %v5428_v13 = vadd.f32 %v5358_v10, %v2154_v49 }
 0x486   : > { %v5431_v51 = vadd.f32 %v5297_v45, %v2151_v36  ;;  %v2246_v53 = vsel %vm2215_vm3, %v5425_v38, -inf  ;;  %v5454_v55 = vadd.f32 %v5326_v23, %v2156_v12 }
 0x487   : > { %v3849_v20 = vpop.f32.mrf.mxu1  ;;  %v5379_v43 = vpop.f32.mrf.mxu0  ;;  %v2249_v52 = vsel %vm2215_vm3, %v5428_v13, -inf }
 0x488   : > { %v5434_v20 = vadd.f32 %v5315_v9, %v2152_v58  ;;  %v2159_v39 = vadd.f32 %v2139_v7, %v5379_v43 }
 0x489   : > { %v1731_v54 = vpop.f32.mrf.mxu1  ;;  %v3855_v62 = vpop.f32.mrf.mxu0 }
 0x48a   : > { %v2157_v62 = vadd.f32 %v2137_v50, %v1728_v29  ;;  %v2240_v29 = vsel %vm2215_vm3, %v5431_v51, -inf  ;;  %v5478_v43 = vadd.f32 %v5297_v45, %v2159_v39 }
 0x48b   : > { %v3850_v32 = vpop.f32.mrf.mxu1  ;;  %v1781_v14 = vpop.f32.mrf.mxu0 }
 0x48c   : > { %v2158_v32 = vadd.f32 %v2138_v44, %v1731_v54  ;;  %v2243_v54 = vsel %vm2215_vm3, %v5434_v20, -inf }
 0x48d   : > { %v1828_v35 = vpop.f32.mrf.mxu1  ;;  %v3856_v27 = vpop.f32.mrf.mxu0 }
 0x48e   : > { %4153 = vrot.lane.b32.xlu1 %v5383_v61, %s4541_s19  ;;  %v5441_v27 = vadd.f32 %v5338_v0, %v2157_v62 }
 0x48f   : > { %v3861_v11 = vpop.f32.mrf.mxu1 }
 0x490   : > { %v5444_v11 = vadd.f32 %v5370_v60, %v2158_v32 }
 0x491   : > { %v1831_v42 = vpop.f32.mrf.mxu1 }
 0x492   : > { %4163 = vrot.lane.b32.xlu1 %v5389_v3, %s4541_s19  ;;  %v2261_v50 = vsel %vm2215_vm3, %v5444_v11, -inf }
 0x493   : > { %v3862_v15 = vpop.f32.mrf.mxu1 }
 0x494   : > { %v5451_v15 = vadd.f32 %v5310_v41, %v2155_v56 }
 0x496   : > { %4168 = vrot.lane.b32.xlu1 %v5395_v59, %s4541_s19 }
 0x49a   : > { %4178 = vrot.lane.b32.xlu1 %v5401_v40, %s4543_s21 }
 0x49b   : > { %4158 = vrot.lane.b32.xlu0 %v5401_v40, %s4541_s19  ;;  %s4552_s19 = smov 24  }
 0x49e   : > { %4183 = vrot.lane.b32.xlu1 %v5389_v3, %s4543_s21 }
 0x49f   : > { %4173 = vrot.lane.b32.xlu0 %v5383_v61, %s4543_s21 }
 0x4a3   : > { %v5411_v8 = vpop.f32.mrf.mxu0  ;;  %4188 = vrot.lane.b32.xlu0 %v5395_v59, %s4543_s21 }
 0x4a5   : > { %v3867_v48 = vpop.f32.mrf.mxu0 }
 0x4a6   : > { %v2140_v48 = vld [vmem:[%s6103_s1 + $0x28] sm:$0xff] }
 0x4a7   : > { %v5415_v31 = vpop.f32.mrf.mxu0  ;;  %v1928_v2 = vpop.f32.mrf.mxu1  ;;  %v2160_v49 = vadd.f32 %v2140_v48, %v1781_v14 }
 0x4a8   : > { %v2164_v39 = vadd.f32 %v2140_v48, %v5415_v31 }
 0x4a9   : > { %v3868_v26 = vpop.f32.mrf.mxu0  ;;  %v3873_v47 = vpop.f32.mrf.mxu1  ;;  %v5481_v14 = vadd.f32 %v5315_v9, %v2160_v49 }
 0x4aa   : > { %v2161_v26 = vadd.f32 %v2139_v7, %v1828_v35  ;;  %v2162_v47 = vadd.f32 %v2140_v48, %v1831_v42  ;;  %v2252_v35 = vsel %vm2215_vm3, %v5451_v15, -inf  ;;  %v2255_v42 = vsel %vm2215_vm3, %v5454_v55, -inf }
 0x4ab   : > { %v1931_v21 = vpop.f32.mrf.mxu1 }
 0x4ac   : > { %v5468_v36 = vadd.f32 %v5333_v4, %v2161_v26  ;;  %v5471_v58 = vadd.f32 %v5358_v10, %v2162_v47  ;;  %v2166_v56 = vadd.f32 %v2140_v48, %v1931_v21  ;;  %v2141_v48 = vld [vmem:[%s6103_s1 + $0x30] sm:$0xff] }
 0x4ad   : > { %v3874_v25 = vpop.f32.mrf.mxu1 }
 0x4ae   : > { %v2258_v25 = vsel %vm2215_vm3, %v5441_v27, -inf  ;;  %v2270_v12 = vsel %vm2215_vm3, %v5468_v36, -inf }
 0x4c2   : > { %2247 = vmax.xlane.f32.xlu1 %v2246_v53  ;;  %2250 = vmax.xlane.f32.xlu0 %v2249_v52  ;;  %v2165_v52 = vadd.f32 %v2139_v7, %v1928_v2  ;;  %v5493_v2 = vadd.f32 %v5370_v60, %v2166_v56 }
 0x4c4   : > { %v5490_v49 = vadd.f32 %v5338_v0, %v2165_v52  ;;  %v2142_v52 = vld [vmem:[%s6103_s1 + $0x38] sm:$0xff] }
 0x4c6   : > { %2241 = vmax.xlane.f32.xlu1 %v2240_v29  ;;  %2244 = vmax.xlane.f32.xlu0 %v2243_v54  ;;  %v2273_v54 = vsel %vm2215_vm3, %v5471_v58, -inf }
 0x4ca   : > { %2259 = vmax.xlane.f32.xlu1 %v2258_v25  ;;  %2262 = vmax.xlane.f32.xlu0 %v2261_v50  ;;  %v2163_v50 = vadd.f32 %v2139_v7, %v5411_v8  ;;  %v5503_v7 = vadd.f32 %v5326_v23, %v2164_v39 }
 0x4cc   : > { %v1978_v44 = vpop.f32.mrf.mxu0  ;;  %v5500_v31 = vadd.f32 %v5310_v41, %v2163_v50  ;;  %v2285_v50 = vsel %vm2215_vm3, %v5493_v2, -inf }
 0x4ce   : > { %v3879_v62 = vpop.f32.mrf.mxu0  ;;  %2253 = vmax.xlane.f32.xlu1 %v2252_v35  ;;  %2256 = vmax.xlane.f32.xlu0 %v2255_v42  ;;  %v2264_v35 = vsel %vm2215_vm3, %v5478_v43, -inf  ;;  %v2267_v42 = vsel %vm2215_vm3, %v5481_v14, -inf }
 0x4d0   : > { %v1981_v32 = vpop.f32.mrf.mxu0  ;;  %v2028_v53 = vpop.f32.mrf.mxu1 }
 0x4d1   : > { %v2169_v56 = vadd.f32 %v2141_v48, %v2028_v53 }
 0x4d2   : > { %v3885_v29 = vpop.f32.mrf.mxu1  ;;  %v3880_v26 = vpop.f32.mrf.mxu0  ;;  %2271 = vmax.xlane.f32.xlu1 %v2270_v12  ;;  %2274 = vmax.xlane.f32.xlu0 %v2273_v54 }
 0x4d3   : > { %v2282_v26 = vsel %vm2215_vm3, %v5490_v49, -inf }
 0x4d4   : > { %v2031_v47 = vpop.f32.mrf.mxu1  ;;  %v2078_v25 = vpop.f32.mrf.mxu0 }
 0x4d5   : > { %v2170_v29 = vadd.f32 %v2142_v52, %v2031_v47  ;;  %v2276_v47 = vsel %vm2215_vm3, %v5500_v31, -inf }
 0x4d6   : > { %v3886_v21 = vpop.f32.mrf.mxu1  ;;  %v3891_v62 = vpop.f32.mrf.mxu0  ;;  %2265 = vmax.xlane.f32.xlu1 %v2264_v35  ;;  %2268 = vmax.xlane.f32.xlu0 %v2267_v42  ;;  %v2167_v35 = vadd.f32 %v2141_v48, %v1978_v44  ;;  %v2168_v42 = vadd.f32 %v2142_v52, %v1981_v32 }
 0x4d7   : > { %v5516_v62 = vadd.f32 %v5333_v4, %v2169_v56  ;;  %v5519_v6 = vadd.f32 %v5358_v10, %v2170_v29 }
 0x4d8   : > { %v2081_v12 = vpop.f32.mrf.mxu0  ;;  %v2128_v8 = vpop.f32.mrf.mxu1  ;;  %v5529_v44 = vadd.f32 %v5315_v9, %v2168_v42 }
 0x4d9   : > { %v2173_v4 = vadd.f32 %v2141_v48, %v2128_v8  ;;  %v2294_v10 = vsel %vm2215_vm3, %v5516_v62, -inf  ;;  %v2297_v56 = vsel %vm2215_vm3, %v5519_v6, -inf }
 0x4da   : > { %v3897_v54 = vpop.f32.mrf.mxu1  ;;  %v3892_v21 = vpop.f32.mrf.mxu0  ;;  %2283 = vmax.xlane.f32.xlu1 %v2282_v26  ;;  %2286 = vmax.xlane.f32.xlu0 %v2285_v50  ;;  %v5526_v26 = vadd.f32 %v5297_v45, %v2167_v35  ;;  %v2171_v50 = vadd.f32 %v2141_v48, %v2078_v25  ;;  %v2291_v8 = vsel %vm2215_vm3, %v5529_v44, -inf }
 0x4db   : > { %v2279_v54 = vsel %vm2215_vm3, %v5503_v7, -inf  ;;  %v5538_v45 = vadd.f32 %v5338_v0, %v2173_v4 }
 0x4dc   : > { %v2131_v39 = vpop.f32.mrf.mxu1  ;;  %v2288_v29 = vsel %vm2215_vm3, %v5526_v26, -inf  ;;  %v5546_v21 = vadd.f32 %v5310_v41, %v2171_v50 }
 0x4dd   : > { %v2174_v32 = vadd.f32 %v2142_v52, %v2131_v39  ;;  %v2306_v39 = vsel %vm2215_vm3, %v5538_v45, -inf }
 0x4de   : > { %v3898_v53 = vpop.f32.mrf.mxu1  ;;  %2277 = vmax.xlane.f32.xlu1 %v2276_v47  ;;  %2280 = vmax.xlane.f32.xlu0 %v2279_v54  ;;  %v2300_v0 = vsel %vm2215_vm3, %v5546_v21, -inf }
 0x4df   : > { %v5541_v9 = vadd.f32 %v5370_v60, %v2174_v32  ;;  %v2172_v53 = vadd.f32 %v2142_v52, %v2081_v12 }
 0x4e1   : > { %v2309_v25 = vsel %vm2215_vm3, %v5541_v9, -inf }
 0x4e2   : > { %2295 = vmax.xlane.f32.xlu1 %v2294_v10  ;;  %2298 = vmax.xlane.f32.xlu0 %v2297_v56 }
 0x4e6   : > { %2289 = vmax.xlane.f32.xlu1 %v2288_v29  ;;  %2292 = vmax.xlane.f32.xlu0 %v2291_v8  ;;  %v5560_v29 = vadd.f32 %v5326_v23, %v2172_v53 }
 0x4e8   : > { %v2303_v23 = vsel %vm2215_vm3, %v5560_v29, -inf }
 0x4ea   : > { %2307 = vmax.xlane.f32.xlu1 %v2306_v39  ;;  %2310 = vmax.xlane.f32.xlu0 %v2309_v25 }
 0x4ee   : > { %2301 = vmax.xlane.f32.xlu1 %v2300_v0 }
 0x4f4   : > { %v2218_v60 = vpop.xlane.xlu0 %2217 }
 0x4f5   : > { %v2312_v48 = vsub.f32 %v5300_v5, %v2218_v60 }
 0x4f7   : > { %v2344_v35 = vmul.f32 1.442695, %v2312_v48 }
 0x4f9   : > { %4404 = vpow2.f32 %v2344_v35 }
 0x4fe   : > { %v2230_v42 = vpop.xlane.xlu1 %2229 }
 0x4ff   : > { %v2316_v41 = vsub.f32 %v5318_v1, %v2230_v42 }
 0x501   : > { %v2352_v10 = vmul.f32 1.442695, %v2316_v41 }
 0x502   : > { %v2221_v47 = vpop.xlane.xlu1 %2220  ;;  %v2233_v54 = vpop.xlane.xlu0 %2232 }
 0x503   : > { %v2313_v4 = vsub.f32 %v5321_v17, %v2221_v47  ;;  %v2317_v39 = vsub.f32 %v5341_v57, %v2233_v54 }
 0x505   : > { %v2346_v56 = vmul.f32 1.442695, %v2313_v4  ;;  %v2354_v48 = vmul.f32 1.442695, %v2317_v39 }
 0x506   : > { %v5557_v32 = vpop.eup %4404  ;;  %v2236_v50 = vpop.xlane.xlu1 %2235 }
 0x507   : > { %v2224_v8 = vpop.xlane.xlu0 %2223  ;;  %v2408_v5 = vsel %vm2215_vm3, %v5557_v32, 0.0  ;;  %4406 = vpow2.f32 %v2346_v56  ;;  %v2318_v1 = vsub.f32 %v5351_v63, %v2236_v50 }
 0x508   : > { %v2314_v12 = vsub.f32 %v5348_v46, %v2224_v8  ;;  %2409 = vadd.xlane.f32.xlu0 %v2408_v5  ;;  %4408 = vpow2.f32 %v2352_v10 }
 0x509   : > { %v2356_v17 = vmul.f32 1.442695, %v2318_v1 }
 0x50a   : > { %v2348_v52 = vmul.f32 1.442695, %v2314_v12  ;;  %v5599_v1 = vpop.permute.xlu1 %4153 }
 0x50b   : > { %v2227_v25 = vpop.xlane.xlu0 %2226 }
 0x50c   : > { %v2315_v0 = vsub.f32 %v5361_v33, %v2227_v25  ;;  %2304 = vmax.xlane.f32.xlu0 %v2303_v23  ;;  %4410 = vpow2.f32 %v2348_v52 }
 0x50d   : > { %4412 = vpow2.f32 %v2356_v17 }
 0x50e   : > { %v2350_v60 = vmul.f32 1.442695, %v2315_v0  ;;  %v5605_v12 = vpop.permute.xlu1 %4163 }
 0x50f   : > { %v2239_v63 = vpop.xlane.xlu0 %2238 }
 0x510   : > { %4414 = vpow2.f32 %v2350_v60  ;;  %v2319_v46 = vsub.f32 %v5373_v19, %v2239_v63 }
 0x511   : > { %4416 = vpow2.f32 %v2354_v48 }
 0x512   : > { %v2358_v35 = vmul.f32 1.442695, %v2319_v46  ;;  %v5607_v17 = vpop.permute.xlu1 %4168 }
 0x513   : > { %v5609_v52 = vpop.permute.xlu0 %4158 }
 0x514   : > { %v5571_v42 = vpop.eup %4406  ;;  %4418 = vpow2.f32 %v2358_v35 }
 0x515   : > { %v2411_v57 = vsel %vm2215_vm3, %v5571_v42, 0.0  ;;  %v5575_v41 = vpop.eup %4408 }
 0x516   : > { %2412 = vadd.xlane.f32.xlu1 %v2411_v57  ;;  %v2420_v53 = vsel %vm2215_vm3, %v5575_v41, 0.0  ;;  %v5613_v39 = vpop.permute.xlu1 %4178 }
 0x517   : > { %6119 = vst [vmem:[#allocation2_spill] sm:$0xff] %v5613_v39  ;;  %v5615_v25 = vpop.permute.xlu0 %4173 }
 0x518   : > { %6120 = vst [vmem:[#allocation3_spill] sm:$0xff] %v5615_v25 }
 0x519   : > { %v5577_v33 = vpop.eup %4410 }
 0x51a   : > { %v5581_v47 = vpop.eup %4412  ;;  %2421 = vadd.xlane.f32.xlu1 %v2420_v53  ;;  %v2414_v19 = vsel %vm2215_vm3, %v5577_v33, 0.0 }
 0x51b   : > { %2415 = vadd.xlane.f32.xlu0 %v2414_v19  ;;  %v2426_v4 = vsel %vm2215_vm3, %v5581_v47, 0.0  ;;  %v5621_v23 = vpop.permute.xlu0 %4188 }
 0x51c   : > { %6122 = vst [vmem:[#allocation5_spill] sm:$0xff] %v5621_v23 }
 0x51d   : > { %v5585_v54 = vpop.eup %4414 }
 0x51e   : > { %v2417_v10 = vsel %vm2215_vm3, %v5585_v54, 0.0  ;;  %2427 = vadd.xlane.f32.xlu1 %v2426_v4  ;;  %v5591_v56 = vpop.eup %4416 }
 0x51f   : > { %2418 = vadd.xlane.f32.xlu0 %v2417_v10  ;;  %v2423_v50 = vsel %vm2215_vm3, %v5591_v56, 0.0 }
 0x521   : > { %v5595_v8 = vpop.eup %4418 }
 0x522   : > { %v2429_v5 = vsel %vm2215_vm3, %v5595_v8, 0.0 }
 0x523   : > { %2424 = vadd.xlane.f32.xlu0 %v2423_v50 }
 0x527   : > { %2430 = vadd.xlane.f32.xlu0 %v2429_v5 }
 0x52f   : > { %4193 = vrot.lane.b32.xlu1 %v5383_v61, %s4546_s24  ;;  %v5619_v61 = vpop.permute.xlu1 %4183 }
 0x530   : > { %6121 = vst [vmem:[#allocation4_spill] sm:$0xff] %v5619_v61 }
 0x533   : > { %4203 = vrot.lane.b32.xlu1 %v5389_v3, %s4546_s24 }
 0x53d   : > { %4198 = vrot.lane.b32.xlu0 %v5401_v40, %s4546_s24 }
 0x541   : > { %4208 = vrot.lane.b32.xlu0 %v5395_v59, %s4546_s24  ;;  %s4549_s24 = smov 64  }
 0x54b   : > { %v2248_v3 = vpop.xlane.xlu1 %2247  ;;  %v2251_v0 = vpop.xlane.xlu0 %2250 }
 0x54c   : > { %v2322_v60 = vsub.f32 %v5425_v38, %v2248_v3  ;;  %v2323_v48 = vsub.f32 %v5428_v13, %v2251_v0 }
 0x54e   : > { %v2364_v63 = vmul.f32 1.442695, %v2322_v60  ;;  %v2366_v46 = vmul.f32 1.442695, %v2323_v48 }
 0x54f   : > { %v2242_v40 = vpop.xlane.xlu1 %2241  ;;  %v2245_v35 = vpop.xlane.xlu0 %2244 }
 0x550   : > { %4420 = vpow2.f32 %v2364_v63  ;;  %v2320_v57 = vsub.f32 %v5431_v51, %v2242_v40  ;;  %v2321_v53 = vsub.f32 %v5434_v20, %v2245_v35 }
 0x551   : > { %4422 = vpow2.f32 %v2366_v46 }
 0x552   : > { %v2360_v59 = vmul.f32 1.442695, %v2320_v57  ;;  %v2362_v19 = vmul.f32 1.442695, %v2321_v53 }
 0x553   : > { %v2260_v4 = vpop.xlane.xlu1 %2259  ;;  %v2263_v10 = vpop.xlane.xlu0 %2262 }
 0x554   : > { %4424 = vpow2.f32 %v2360_v59  ;;  %v2326_v38 = vsub.f32 %v5441_v27, %v2260_v4  ;;  %v2327_v13 = vsub.f32 %v5444_v11, %v2263_v10 }
 0x555   : > { %4426 = vpow2.f32 %v2362_v19 }
 0x556   : > { %v2372_v51 = vmul.f32 1.442695, %v2326_v38  ;;  %v2374_v48 = vmul.f32 1.442695, %v2327_v13 }
 0x557   : > { %v2254_v50 = vpop.xlane.xlu1 %2253  ;;  %v2257_v5 = vpop.xlane.xlu0 %2256 }
 0x558   : > { %v2324_v3 = vsub.f32 %v5451_v15, %v2254_v50  ;;  %v2325_v0 = vsub.f32 %v5454_v55, %v2257_v5 }
 0x55a   : > { %v2368_v60 = vmul.f32 1.442695, %v2324_v3  ;;  %v2370_v20 = vmul.f32 1.442695, %v2325_v0 }
 0x55b   : > { %v2272_v50 = vpop.xlane.xlu1 %2271  ;;  %v2275_v5 = vpop.xlane.xlu0 %2274 }
 0x55c   : > { %4428 = vpow2.f32 %v2368_v60 }
 0x55d   : > { %v5631_v63 = vpop.eup %4420  ;;  %4430 = vpow2.f32 %v2370_v20  ;;  %v2584_v20 = vpack.c.bf16 %v4719_v34, %v4655_v22  ;;  %v2330_v34 = vsub.f32 %v5468_v36, %v2272_v50 }
 0x55e   : > { %v5633_v46 = vpop.eup %4422  ;;  %4432 = vpow2.f32 %v2372_v51  ;;  %v2438_v27 = vsel %vm2215_vm3, %v5631_v63, 0.0 }
 0x55f   : > { %4434 = vpow2.f32 %v2374_v48  ;;  %2439 = vadd.xlane.f32.xlu1 %v2438_v27  ;;  %v2441_v11 = vsel %vm2215_vm3, %v5633_v46, 0.0  ;;  %v2266_v3 = vpop.xlane.xlu1 %2265  ;;  %v2269_v0 = vpop.xlane.xlu0 %2268 }
 0x560   : > { %2442 = vadd.xlane.f32.xlu0 %v2441_v11  ;;  %v2585_v11 = vpack.c.bf16 %v4683_v28, %v4627_v16  ;;  %v2329_v22 = vsub.f32 %v5481_v14, %v2269_v0  ;;  %v2380_v16 = vmul.f32 1.442695, %v2330_v34 }
 0x561   : > { %v5639_v15 = vpop.eup %4424 }
 0x562   : > { %v5641_v55 = vpop.eup %4426  ;;  %v2432_v40 = vsel %vm2215_vm3, %v5639_v15, 0.0 }
 0x563   : > { %2433 = vadd.xlane.f32.xlu1 %v2432_v40  ;;  %v2435_v35 = vsel %vm2215_vm3, %v5641_v55, 0.0  ;;  %v5663_v51 = vpop.xlane.xlu1 %2283  ;;  %v5665_v60 = vpop.xlane.xlu0 %2286 }
 0x564   : > { %2436 = vadd.xlane.f32.xlu0 %v2435_v35 }
 0x567   : > { %v5670_v48 = vpop.xlane.xlu1 %2277  ;;  %v5672_v27 = vpop.xlane.xlu0 %2280 }
 0x569   : > { %v5647_v57 = vpop.eup %4428 }
 0x56a   : > { %v5649_v53 = vpop.eup %4430  ;;  %v2444_v59 = vsel %vm2215_vm3, %v5647_v57, 0.0 }
 0x56b   : > { %v5653_v19 = vpop.eup %4432  ;;  %2445 = vadd.xlane.f32.xlu1 %v2444_v59  ;;  %v2447_v4 = vsel %vm2215_vm3, %v5649_v53, 0.0  ;;  %v5677_v40 = vpop.xlane.xlu1 %2295  ;;  %v2328_v59 = vsub.f32 %v5478_v43, %v2266_v3 }
 0x56c   : > { %v5657_v10 = vpop.eup %4434  ;;  %2448 = vadd.xlane.f32.xlu0 %v2447_v4  ;;  %v2450_v38 = vsel %vm2215_vm3, %v5653_v19, 0.0  ;;  %v5679_v35 = vpop.xlane.xlu0 %2298 }
 0x56d   : > { %v2453_v13 = vsel %vm2215_vm3, %v5657_v10, 0.0  ;;  %v2376_v4 = vmul.f32 1.442695, %v2328_v59 }
 0x56f   : > { %2451 = vadd.xlane.f32.xlu1 %v2450_v38  ;;  %v2331_v38 = vsub.f32 %v5471_v58, %v2275_v5  ;;  %4436 = vpow2.f32 %v2376_v4 }
 0x570   : > { %2454 = vadd.xlane.f32.xlu0 %v2453_v13  ;;  %v2378_v13 = vmul.f32 1.442695, %v2329_v22  ;;  %v5687_v23 = vpop.xlane.xlu0 %2292 }
 0x571   : > { %v2382_v28 = vmul.f32 1.442695, %v2331_v38 }
 0x572   : > { %4438 = vpow2.f32 %v2378_v13 }
 0x573   : > { %4440 = vpow2.f32 %v2380_v16 }
 0x574   : > { %v5691_v39 = vpop.xlane.xlu0 %2310  ;;  %4442 = vpow2.f32 %v2382_v28 }
 0x57c   : > { %v5697_v58 = vpop.eup %4436 }
 0x57d   : > { %v2456_v3 = vsel %vm2215_vm3, %v5697_v58, 0.0 }
 0x57f   : > { %v5703_v5 = vpop.eup %4438 }
 0x580   : > { %2601 = vrot.lane.b32.xlu1 %v2584_v20, %s4549_s24  ;;  %v5685_v20 = vpop.xlane.xlu1 %2289  ;;  %v5707_v0 = vpop.eup %4440  ;;  %v2459_v22 = vsel %vm2215_vm3, %v5703_v5, 0.0 }
 0x581   : > { %6123 = vst [vmem:[#allocation6_spill] sm:$0xff] %v5707_v0  ;;  %v5713_v34 = vpop.eup %4442  ;;  %v2462_v38 = vsel %vm2215_vm3, %v5707_v0, 0.0 }
 0x582   : > { %6124 = vst [vmem:[#allocation7_spill] sm:$0xff] %v5713_v34  ;;  %v2465_v16 = vsel %vm2215_vm3, %v5713_v34, 0.0 }
 0x586   : > { %2649 = vrot.lane.b32.xlu0 %v2585_v11, %s4549_s24  ;;  %v5689_v11 = vpop.xlane.xlu1 %2307 }
 0x58a   : > { %v5695_v36 = vpop.xlane.xlu1 %2301 }
 0x591   : > { %v5693_v43 = vpop.xlane.xlu0 %2409 }
 0x595   : > { %v5699_v14 = vpop.xlane.xlu0 %2304 }
 0x59f   : > { %v5701_v50 = vpop.xlane.xlu1 %2412 }
 0x5a3   : > { %v2422_v4 = vpop.xlane.xlu1 %2421 }
 0x5a4   : > { %v5709_v59 = vpop.xlane.xlu0 %2415  ;;  %2457 = vadd.xlane.f32.xlu1 %v2456_v3  ;;  %4444 = vrcp.f32 %v2422_v4 }
 0x5a5   : > { %2460 = vadd.xlane.f32.xlu0 %v2459_v22  ;;  %v2586_v22 = vpack.c.bf16 %v4733_v37, %v4661_v24 }
 0x5a7   : > { %v2428_v28 = vpop.xlane.xlu1 %2427 }
 0x5a8   : > { %v2419_v13 = vpop.xlane.xlu0 %2418  ;;  %2463 = vadd.xlane.f32.xlu1 %v2462_v38 }
 0x5a9   : > { %2466 = vadd.xlane.f32.xlu0 %v2465_v16 }
 0x5ac   : > { %v2425_v61 = vpop.xlane.xlu0 %2424 }
 0x5ad   : > { %4446 = vrcp.f32 %v2425_v61  ;;  %v2587_v61 = vpack.c.bf16 %v4689_v30, %v4629_v18  ;;  %v2333_v18 = vsub.f32 %v5503_v7, %v5672_v27  ;;  %v2334_v30 = vsub.f32 %v5490_v49, %v5663_v51  ;;  %v5761_v51 = vpop.permute.xlu1 %4193 }
 0x5ae   : > { %4448 = vrcp.f32 %v2428_v28 }
 0x5b0   : > { %v2431_v3 = vpop.xlane.xlu0 %2430 }
 0x5b1   : > { %4450 = vrcp.f32 %v2431_v3  ;;  %v4445_v25 = vpop.eup %4444  ;;  %v2388_v3 = vmul.f32 1.442695, %v2334_v30  ;;  %v4156_v30 = vunpack.i.h.bf16 %v5599_v1 }
 0x5b2   : > { %v5723_v38 = vmul.f32 %v4445_v25, %v5575_v41 }
 0x5b9   : > { %2697 = vrot.lane.b32.xlu1 %v2586_v22, %s4549_s24 }
 0x5ba   : > { %v4447_v0 = vpop.eup %4446 }
 0x5bb   : > { %v5726_v34 = vmul.f32 %v4447_v0, %v5591_v56  ;;  %v4449_v4 = vpop.eup %4448  ;;  %v2332_v56 = vsub.f32 %v5500_v31, %v5670_v48  ;;  %v2386_v0 = vmul.f32 1.442695, %v2333_v18 }
 0x5bc   : > { %v5734_v24 = vmul.f32 %v4449_v4, %v5581_v47  ;;  %v2335_v47 = vsub.f32 %v5493_v2, %v5665_v60  ;;  %v5763_v60 = vpop.permute.xlu0 %4198 }
 0x5bd   : > { %v2570_v16 = vpack.c.bf16 %v5726_v34, %v5723_v38  ;;  %v2384_v25 = vmul.f32 1.442695, %v2332_v56 }
 0x5be   : > { %v4451_v28 = vpop.eup %4450 }
 0x5bf   : > { %2745 = vrot.lane.b32.xlu0 %v2587_v61, %s4549_s24  ;;  %v5737_v37 = vmul.f32 %v4451_v28, %v5595_v8  ;;  %4452 = vpow2.f32 %v2384_v25  ;;  %v2390_v8 = vmul.f32 1.442695, %v2335_v47  ;;  %v5769_v61 = vpop.permute.xlu1 %4203  ;;  %v4155_v25 = vunpack.i.l.bf16 %v5599_v1 }
 0x5c0   : > { %4454 = vpow2.f32 %v2386_v0  ;;  %v5771_v28 = vpop.permute.xlu0 %4208 }
 0x5c1   : > { %v2571_v41 = vpack.c.bf16 %v5737_v37, %v5734_v24  ;;  %4456 = vpow2.f32 %v2388_v3  ;;  %v2588_v3 = vpack.c.bf16 %v4156_v30, %v4155_v25 }
 0x5c2   : > { %4458 = vpow2.f32 %v2390_v8 }
 0x5c3   : > { %4460 = vrcp.f32 %v5693_v43  ;;  %v4161_v43 = vunpack.i.h.bf16 %v5609_v52 }
 0x5c4   : > { %4462 = vrcp.f32 %v5701_v50  ;;  %v4160_v50 = vunpack.i.l.bf16 %v5609_v52 }
 0x5c6   : > { %v2589_v1 = vpack.c.bf16 %v4161_v43, %v4160_v50 }
 0x5cc   : > { %v5749_v22 = vpop.eup %4452 }
 0x5cd   : > { %v5751_v31 = vpop.eup %4454  ;;  %v2468_v7 = vsel %vm2215_vm3, %v5749_v22, 0.0 }
 0x5ce   : > { %v5755_v48 = vpop.eup %4456  ;;  %v2471_v49 = vsel %vm2215_vm3, %v5751_v31, 0.0 }
 0x5cf   : > { %v5759_v2 = vpop.eup %4458  ;;  %v2474_v27 = vsel %vm2215_vm3, %v5755_v48, 0.0 }
 0x5d0   : > { %v2477_v4 = vsel %vm2215_vm3, %v5759_v2, 0.0  ;;  %v4461_v8 = vpop.eup %4460 }
 0x5dd   : > { %2469 = vadd.xlane.f32.xlu1 %v2468_v7 }
 0x5de   : > { %2472 = vadd.xlane.f32.xlu0 %v2471_v49 }
 0x5e1   : > { %2475 = vadd.xlane.f32.xlu1 %v2474_v27 }
 0x5e2   : > { %2478 = vadd.xlane.f32.xlu0 %v2477_v4 }
 0x5e8   : > { %v2440_v56 = vpop.xlane.xlu1 %2439 }
 0x5e9   : > { %4464 = vrcp.f32 %v2440_v56  ;;  %v2443_v18 = vpop.xlane.xlu0 %2442 }
 0x5ea   : > { %4466 = vrcp.f32 %v2443_v18 }
 0x5eb   : > { %4468 = vrcp.f32 %v2419_v13  ;;  %v4463_v13 = vpop.eup %4462 }
 0x5ec   : > { %4470 = vrcp.f32 %v5709_v59  ;;  %v2434_v47 = vpop.xlane.xlu1 %2433 }
 0x5ed   : > { %4472 = vrcp.f32 %v2434_v47  ;;  %v2437_v0 = vpop.xlane.xlu0 %2436 }
 0x5ee   : > { %4474 = vrcp.f32 %v2437_v0  ;;  %v2537_v0 = vmul.f32 %v4463_v13, %v5571_v42  ;;  %v2337_v13 = vsub.f32 %v5529_v44, %v5687_v23 }
 0x5f0   : > { %v2394_v23 = vmul.f32 1.442695, %v2337_v13  ;;  %v4170_v13 = vunpack.i.l.bf16 %v5607_v17 }
 0x5f2   : > { %2793 = vrot.lane.b32.xlu1 %v2588_v3, %s4549_s24 }
 0x5f4   : > { %v2446_v7 = vpop.xlane.xlu1 %2445 }
 0x5f5   : > { %4476 = vrcp.f32 %v2446_v7  ;;  %v2449_v49 = vpop.xlane.xlu0 %2448 }
 0x5f6   : > { %v4465_v27 = vpop.eup %4464  ;;  %4478 = vrcp.f32 %v2449_v49 }
 0x5f7   : > { %v4467_v59 = vpop.eup %4466  ;;  %v5782_v4 = vmul.f32 %v4465_v27, %v5631_v63  ;;  %v2336_v27 = vsub.f32 %v5526_v26, %v5685_v20  ;;  %v2338_v26 = vsub.f32 %v5516_v62, %v5677_v40 }
 0x5f8   : > { %v4469_v56 = vpop.eup %4468  ;;  %2841 = vrot.lane.b32.xlu0 %v2589_v1, %s4549_s24  ;;  %v2452_v18 = vpop.xlane.xlu1 %2451  ;;  %v5786_v52 = vmul.f32 %v4467_v59, %v5633_v46  ;;  %v2536_v46 = vmul.f32 %v4461_v8, %v5557_v32 }
 0x5f9   : > { %v4471_v30 = vpop.eup %4470  ;;  %4480 = vrcp.f32 %v2452_v18  ;;  %v2455_v25 = vpop.xlane.xlu0 %2454  ;;  %v2539_v63 = vmul.f32 %v4469_v56, %v5585_v54  ;;  %v2396_v40 = vmul.f32 1.442695, %v2338_v26 }
 0x5fa   : > { %v4473_v47 = vpop.eup %4472  ;;  %4482 = vrcp.f32 %v2455_v25  ;;  %v2573_v3 = vpack.c.bf16 %v5786_v52, %v5782_v4  ;;  %v2538_v42 = vmul.f32 %v4471_v30, %v5577_v33  ;;  %v2568_v54 = vpack.c.bf16 %v2537_v0, %v2536_v46 }
 0x5fb   : > { %v4475_v43 = vpop.eup %4474  ;;  %v5793_v50 = vmul.f32 %v4473_v47, %v5639_v15  ;;  %v6125_v15 = vmov 0.0   ;;  %v2339_v33 = vsub.f32 %v5519_v6, %v5679_v35  ;;  %v4166_v46 = vunpack.i.h.bf16 %v5605_v12 }
 0x5fc   : > { %v2602_v7 = vpop.permute.xlu1 %2601  ;;  %v5797_v49 = vmul.f32 %v4475_v43, %v5641_v55  ;;  %v2569_v8 = vpack.c.bf16 %v2539_v63, %v2538_v42  ;;  %v2392_v55 = vmul.f32 1.442695, %v2336_v27  ;;  %v4165_v27 = vunpack.i.l.bf16 %v5605_v12 }
 0x5fd   : > { %v2650_v1 = vpop.permute.xlu0 %2649  ;;  %3900 = vmatpush3.bf16.msra.mxu0 %v2602_v7  ;;  %v2398_v18 = vmul.f32 1.442695, %v2339_v33  ;;  %v4171_v42 = vunpack.i.h.bf16 %v5607_v17  ;;  %v2340_v12 = vsub.f32 %v5546_v21, %v5695_v36  ;;  %v2341_v17 = vsub.f32 %v5560_v29, %v5699_v14 }
 0x5fe   : > { %3906 = vmatpush3.bf16.msra.mxu1 %v2650_v1  ;;  %3911 = vmatprep.subr.bf16.mxu0 %v6125_v15  ;;  %v2572_v32 = vpack.c.bf16 %v5797_v49, %v5793_v50  ;;  %4484 = vpow2.f32 %v2392_v55  ;;  %v2590_v1 = vpack.c.bf16 %v4166_v46, %v4165_v27  ;;  %v2343_v29 = vsub.f32 %v5541_v9, %v5691_v39  ;;  %v6126_v39 = vld [vmem:[#allocation6_spill] sm:$0xff]  ;;  %v6128_v27 = vld [vmem:[#allocation3_spill] sm:$0xff] }
 0x5ff   : > { %3917 = vmatprep.subr.bf16.mxu1 %v6125_v15  ;;  %4486 = vpow2.f32 %v2394_v23  ;;  %v2591_v26 = vpack.c.bf16 %v4171_v42, %v4170_v13  ;;  %v2402_v36 = vmul.f32 1.442695, %v2341_v17  ;;  %v4175_v42 = vunpack.i.l.bf16 %v6128_v27 }
 0x600   : > { %3902 = vmatmul.mubr.msk.bf16.vlgmr.msra.gmra.mxu0 %vm2215_vm3, %v2568_v54  ;;  %4488 = vpow2.f32 %v2396_v40  ;;  %v2400_v40 = vmul.f32 1.442695, %v2340_v12 }
 0x601   : > { %3908 = vmatmul.mubr.msk.bf16.vlgmr.msra.gmra.mxu1 %vm2215_vm3, %v2569_v8  ;;  %3913 = vmatprep.mubr.msk.bf16.mxu0 %vm4548_vm2, %v6125_v15  ;;  %4490 = vpow2.f32 %v2398_v18 }
 0x602   : > { %v4477_v44 = vpop.eup %4476  ;;  %3919 = vmatprep.mubr.msk.bf16.mxu1 %vm4548_vm2, %v6125_v15 }
 0x603   : > { %v4479_v20 = vpop.eup %4478  ;;  %v5819_v59 = vmul.f32 %v4477_v44, %v5647_v57 }
 0x604   : > { %v5822_v62 = vmul.f32 %v4479_v20, %v5649_v53  ;;  %v2342_v20 = vsub.f32 %v5538_v45, %v5689_v11 }
 0x606   : > { %v4481_v56 = vpop.eup %4480  ;;  %v2574_v30 = vpack.c.bf16 %v5822_v62, %v5819_v59  ;;  %v2404_v34 = vmul.f32 1.442695, %v2342_v20 }
 0x607   : > { %v4483_v6 = vpop.eup %4482  ;;  %v5827_v35 = vmul.f32 %v4481_v56, %v5653_v19 }
 0x608   : > { %v5830_v25 = vmul.f32 %v4483_v6, %v5657_v10 }
 0x60a   : > { %v2575_v57 = vpack.c.bf16 %v5830_v25, %v5827_v35 }
 0x60b   : > { %v5834_v53 = vpop.eup %4484 }
 0x60c   : > { %v5836_v47 = vpop.eup %4486  ;;  %v2480_v0 = vsel %vm2215_vm3, %v5834_v53, 0.0 }
 0x60d   : > { %v5840_v43 = vpop.eup %4488  ;;  %v2483_v19 = vsel %vm2215_vm3, %v5836_v47, 0.0 }
 0x60e   : > { %v5844_v10 = vpop.eup %4490  ;;  %v2486_v63 = vsel %vm2215_vm3, %v5840_v43, 0.0 }
 0x60f   : > { %v2489_v7 = vsel %vm2215_vm3, %v5844_v10, 0.0 }
 0x616   : > { %2481 = vadd.xlane.f32.xlu1 %v2480_v0 }
 0x617   : > { %2484 = vadd.xlane.f32.xlu0 %v2483_v19 }
 0x61a   : > { %2487 = vadd.xlane.f32.xlu1 %v2486_v63 }
 0x61b   : > { %2490 = vadd.xlane.f32.xlu0 %v2489_v7 }
 0x62b   : > { %2889 = vrot.lane.b32.xlu1 %v2590_v1, %s4549_s24  ;;  %v4176_v1 = vunpack.i.h.bf16 %v6128_v27 }
 0x62d   : > { %v2458_v54 = vpop.xlane.xlu1 %2457  ;;  %v2592_v13 = vpack.c.bf16 %v4176_v1, %v4175_v42 }
 0x62e   : > { %4492 = vrcp.f32 %v2458_v54  ;;  %v2461_v8 = vpop.xlane.xlu0 %2460  ;;  %v6129_v54 = vld [vmem:[#allocation4_spill] sm:$0xff] }
 0x62f   : > { %4494 = vrcp.f32 %v2461_v8  ;;  %v4186_v8 = vunpack.i.h.bf16 %v6129_v54 }
 0x631   : > { %2937 = vrot.lane.b32.xlu0 %v2591_v26, %s4549_s24  ;;  %v2464_v55 = vpop.xlane.xlu1 %2463  ;;  %v4185_v26 = vunpack.i.l.bf16 %v6129_v54 }
 0x632   : > { %4496 = vrcp.f32 %v2464_v55  ;;  %v2467_v44 = vpop.xlane.xlu0 %2466  ;;  %v6130_v55 = vld [vmem:[#allocation2_spill] sm:$0xff] }
 0x633   : > { %4498 = vrcp.f32 %v2467_v44  ;;  %v4181_v44 = vunpack.i.h.bf16 %v6130_v55  ;;  %v2594_v12 = vpack.c.bf16 %v4186_v8, %v4185_v26 }
 0x634   : > { %4500 = vpow2.f32 %v2400_v40 }
 0x635   : > { %v2698_v33 = vpop.permute.xlu1 %2697  ;;  %4502 = vpow2.f32 %v2402_v36  ;;  %v4196_v36 = vunpack.i.h.bf16 %v5761_v51 }
 0x636   : > { %v2746_v23 = vpop.permute.xlu0 %2745  ;;  %3912 = vmatpush3.bf16.msra.mxu0 %v2698_v33  ;;  %4504 = vpow2.f32 %v2404_v34  ;;  %v4180_v33 = vunpack.i.l.bf16 %v6130_v55 }
 0x637   : > { %3918 = vmatpush3.bf16.msra.mxu1 %v2746_v23  ;;  %3923 = vmatprep.subr.bf16.mxu0 %v6125_v15  ;;  %v6131_v23 = vld [vmem:[#allocation5_spill] sm:$0xff] }
 0x638   : > { %3929 = vmatprep.subr.bf16.mxu1 %v6125_v15  ;;  %v4191_v17 = vunpack.i.h.bf16 %v6131_v23  ;;  %v4190_v20 = vunpack.i.l.bf16 %v6131_v23 }
 0x639   : > { %3914 = vmatmul.mubr.msk.bf16.vlgmr.msra.gmra.mxu0 %vm2215_vm3, %v2570_v16  ;;  %v2406_v16 = vmul.f32 1.442695, %v2343_v29  ;;  %v2593_v29 = vpack.c.bf16 %v4181_v44, %v4180_v33 }
 0x63a   : > { %3920 = vmatmul.mubr.msk.bf16.vlgmr.msra.gmra.mxu1 %vm2215_vm3, %v2571_v41  ;;  %3925 = vmatprep.mubr.msk.bf16.mxu0 %vm4548_vm2, %v6125_v15  ;;  %v6127_v41 = vld [vmem:[#allocation7_spill] sm:$0xff]  ;;  %v2595_v34 = vpack.c.bf16 %v4191_v17, %v4190_v20 }
 0x63b   : > { %v4493_v21 = vpop.eup %4492  ;;  %3931 = vmatprep.mubr.msk.bf16.mxu1 %vm4548_vm2, %v6125_v15  ;;  %4506 = vpow2.f32 %v2406_v16  ;;  %v4200_v16 = vunpack.i.l.bf16 %v5763_v60 }
 0x63c   : > { %v4495_v14 = vpop.eup %4494  ;;  %v5879_v45 = vmul.f32 %v4493_v21, %v5697_v58 }
 0x63d   : > { %v5882_v11 = vmul.f32 %v4495_v14, %v5703_v5  ;;  %v4195_v14 = vunpack.i.l.bf16 %v5761_v51 }
 0x63f   : > { %v4497_v38 = vpop.eup %4496  ;;  %v2576_v24 = vpack.c.bf16 %v5882_v11, %v5879_v45 }
 0x640   : > { %v4499_v9 = vpop.eup %4498  ;;  %v5887_v37 = vmul.f32 %v4497_v38, %v6126_v39  ;;  %v4201_v38 = vunpack.i.h.bf16 %v5763_v60 }
 0x641   : > { %v5890_v56 = vmul.f32 %v4499_v9, %v6127_v41  ;;  %v5894_v5 = vpop.eup %4500  ;;  %v2596_v41 = vpack.c.bf16 %v4196_v36, %v4195_v14 }
 0x642   : > { %v5896_v18 = vpop.eup %4502  ;;  %v2492_v6 = vsel %vm2215_vm3, %v5894_v5, 0.0  ;;  %v2597_v51 = vpack.c.bf16 %v4201_v38, %v4200_v16 }
 0x643   : > { %v2577_v58 = vpack.c.bf16 %v5890_v56, %v5887_v37  ;;  %v5900_v0 = vpop.eup %4504  ;;  %v2495_v19 = vsel %vm2215_vm3, %v5896_v18, 0.0 }
 0x644   : > { %v2498_v7 = vsel %vm2215_vm3, %v5900_v0, 0.0 }
 0x648   : > { %v5904_v63 = vpop.eup %4506 }
 0x649   : > { %v2501_v46 = vsel %vm2215_vm3, %v5904_v63, 0.0 }
 0x64f   : > { %2493 = vadd.xlane.f32.xlu1 %v2492_v6  ;;  %v4206_v6 = vunpack.i.h.bf16 %v5769_v61 }
 0x650   : > { %2496 = vadd.xlane.f32.xlu0 %v2495_v19  ;;  %v4205_v19 = vunpack.i.l.bf16 %v5769_v61 }
 0x652   : > { %v2598_v1 = vpack.c.bf16 %v4206_v6, %v4205_v19 }
 0x653   : > { %2499 = vadd.xlane.f32.xlu1 %v2498_v7  ;;  %v4211_v7 = vunpack.i.h.bf16 %v5771_v28 }
 0x654   : > { %2502 = vadd.xlane.f32.xlu0 %v2501_v46  ;;  %v4210_v46 = vunpack.i.l.bf16 %v5771_v28 }
 0x656   : > { %v2599_v61 = vpack.c.bf16 %v4211_v7, %v4210_v46 }
 0x664   : > { %2985 = vrot.lane.b32.xlu1 %v2592_v13, %s4549_s24 }
 0x666   : > { %v2470_v40 = vpop.xlane.xlu1 %2469 }
 0x667   : > { %4508 = vrcp.f32 %v2470_v40  ;;  %v2473_v21 = vpop.xlane.xlu0 %2472 }
 0x668   : > { %4510 = vrcp.f32 %v2473_v21  ;;  %3081 = vrot.lane.b32.xlu1 %v2594_v12, %s4549_s24 }
 0x66a   : > { %3033 = vrot.lane.b32.xlu0 %v2593_v29, %s4549_s24  ;;  %v2476_v9 = vpop.xlane.xlu1 %2475 }
 0x66b   : > { %4512 = vrcp.f32 %v2476_v9  ;;  %v2479_v39 = vpop.xlane.xlu0 %2478 }
 0x66c   : > { %4514 = vrcp.f32 %v2479_v39  ;;  %3129 = vrot.lane.b32.xlu1 %v2595_v34, %s4549_s24 }
 0x66e   : > { %3177 = vrot.lane.b32.xlu0 %v2596_v41, %s4549_s24  ;;  %v2794_v60 = vpop.permute.xlu1 %2793 }
 0x66f   : > { %v2842_v27 = vpop.permute.xlu0 %2841  ;;  %3924 = vmatpush3.bf16.msra.mxu0 %v2794_v60 }
 0x670   : > { %3930 = vmatpush3.bf16.msra.mxu1 %v2842_v27  ;;  %3225 = vrot.lane.b32.xlu1 %v2597_v51, %s4549_s24 }
 0x671   : > { %3935 = vmatprep.subr.bf16.mxu0 %v6125_v15  ;;  %3941 = vmatprep.subr.bf16.mxu1 %v6125_v15 }
 0x672   : > { %3273 = vrot.lane.b32.xlu0 %v2598_v1, %s4549_s24  ;;  %3926 = vmatmul.mubr.msk.bf16.vlgmr.msra.gmra.mxu0 %vm2215_vm3, %v2572_v32 }
 0x673   : > { %3932 = vmatmul.mubr.msk.bf16.vlgmr.msra.gmra.mxu1 %vm2215_vm3, %v2573_v3  ;;  %3937 = vmatprep.mubr.msk.bf16.mxu0 %vm4548_vm2, %v6125_v15 }
 0x674   : > { %v4509_v28 = vpop.eup %4508  ;;  %3321 = vrot.lane.b32.xlu1 %v2599_v61, %s4549_s24  ;;  %3943 = vmatprep.mubr.msk.bf16.mxu1 %vm4548_vm2, %v6125_v15 }
 0x675   : > { %v4511_v42 = vpop.eup %4510  ;;  %v5949_v13 = vmul.f32 %v4509_v28, %v5749_v22 }
 0x676   : > { %v5952_v50 = vmul.f32 %v4511_v42, %v5751_v31 }
 0x678   : > { %v4513_v49 = vpop.eup %4512  ;;  %v2578_v4 = vpack.c.bf16 %v5952_v50, %v5949_v13 }
 0x679   : > { %v4515_v52 = vpop.eup %4514  ;;  %v5957_v3 = vmul.f32 %v4513_v49, %v5755_v48 }
 0x67a   : > { %v5960_v32 = vmul.f32 %v4515_v52, %v5759_v2 }
 0x67c   : > { %v2579_v54 = vpack.c.bf16 %v5960_v32, %v5957_v3 }
 0x69f   : > { %v2482_v8 = vpop.xlane.xlu1 %2481 }
 0x6a0   : > { %4516 = vrcp.f32 %v2482_v8  ;;  %v2485_v22 = vpop.xlane.xlu0 %2484 }
 0x6a1   : > { %4518 = vrcp.f32 %v2485_v22 }
 0x6a3   : > { %v2488_v31 = vpop.xlane.xlu1 %2487 }
 0x6a4   : > { %v2491_v26 = vpop.xlane.xlu0 %2490  ;;  %4520 = vrcp.f32 %v2488_v31 }
 0x6a5   : > { %4522 = vrcp.f32 %v2491_v26 }
 0x6a7   : > { %v2890_v55 = vpop.permute.xlu1 %2889 }
 0x6a8   : > { %v2938_v44 = vpop.permute.xlu0 %2937  ;;  %3936 = vmatpush3.bf16.msra.mxu0 %v2890_v55 }
 0x6a9   : > { %3942 = vmatpush3.bf16.msra.mxu1 %v2938_v44  ;;  %3947 = vmatprep.subr.bf16.mxu0 %v6125_v15 }
 0x6aa   : > { %3953 = vmatprep.subr.bf16.mxu1 %v6125_v15 }
 0x6ab   : > { %3938 = vmatmul.mubr.msk.bf16.vlgmr.msra.gmra.mxu0 %vm2215_vm3, %v2574_v30 }
 0x6ac   : > { %3944 = vmatmul.mubr.msk.bf16.vlgmr.msra.gmra.mxu1 %vm2215_vm3, %v2575_v57  ;;  %3949 = vmatprep.mubr.msk.bf16.mxu0 %vm4548_vm2, %v6125_v15 }
 0x6ad   : > { %v4517_v48 = vpop.eup %4516  ;;  %3955 = vmatprep.mubr.msk.bf16.mxu1 %vm4548_vm2, %v6125_v15 }
 0x6ae   : > { %v4519_v2 = vpop.eup %4518  ;;  %v2560_v33 = vmul.f32 %v4517_v48, %v5834_v53 }
 0x6af   : > { %v2561_v12 = vmul.f32 %v4519_v2, %v5836_v47 }
 0x6b1   : > { %v2580_v59 = vpack.c.bf16 %v2561_v12, %v2560_v33  ;;  %v4521_v11 = vpop.eup %4520 }
 0x6c0   : > { %v5980_v62 = vpop.f32.mrf.mxu0 }
 0x6c1   : > { %v5982_v30 = vpop.f32.mrf.mxu1 }
 0x6c2   : > { %v3903_v35 = vpop.f32.mrf.mxu0 }
 0x6c3   : > { %v3909_v25 = vpop.f32.mrf.mxu1 }
 0x6c4   : > { %v5984_v57 = vpop.f32.mrf.mxu0 }
 0x6c5   : > { %v5986_v23 = vpop.f32.mrf.mxu1 }
 0x6c6   : > { %v3904_v17 = vpop.f32.mrf.mxu0 }
 0x6c7   : > { %v3910_v20 = vpop.f32.mrf.mxu1 }
 0x6d8   : > { %v2494_v40 = vpop.xlane.xlu1 %2493 }
 0x6d9   : > { %v2497_v21 = vpop.xlane.xlu0 %2496  ;;  %4524 = vrcp.f32 %v2494_v40 }
 0x6da   : > { %4526 = vrcp.f32 %v2497_v21 }
 0x6dc   : > { %v2500_v29 = vpop.xlane.xlu1 %2499 }
 0x6dd   : > { %v2503_v36 = vpop.xlane.xlu0 %2502  ;;  %4528 = vrcp.f32 %v2500_v29 }
 0x6de   : > { %4530 = vrcp.f32 %v2503_v36 }
 0x6e0   : > { %v2986_v53 = vpop.permute.xlu1 %2985 }
 0x6e1   : > { %v3034_v47 = vpop.permute.xlu0 %3033  ;;  %3948 = vmatpush3.bf16.msra.mxu0 %v2986_v53 }
 0x6e2   : > { %3954 = vmatpush3.bf16.msra.mxu1 %v3034_v47  ;;  %3959 = vmatprep.subr.bf16.mxu0 %v6125_v15 }
 0x6e3   : > { %3965 = vmatprep.subr.bf16.mxu1 %v6125_v15 }
 0x6e4   : > { %v3082_v14 = vpop.permute.xlu1 %3081  ;;  %3950 = vmatmul.mubr.msk.bf16.vlgmr.msra.gmra.mxu0 %vm2215_vm3, %v2576_v24  ;;  %v4523_v24 = vpop.eup %4522 }
 0x6e5   : > { %3956 = vmatmul.mubr.msk.bf16.vlgmr.msra.gmra.mxu1 %vm2215_vm3, %v2577_v58  ;;  %3960 = vmatpush3.bf16.msra.mxu0 %v3082_v14  ;;  %v3178_v37 = vpop.permute.xlu0 %3177  ;;  %v2562_v58 = vmul.f32 %v4521_v11, %v5840_v43  ;;  %v2563_v34 = vmul.f32 %v4523_v24, %v5844_v10 }
 0x6e6   : > { %3961 = vmatprep.mubr.msk.bf16.mxu0 %vm4548_vm2, %v6125_v15  ;;  %3967 = vmatprep.mubr.msk.bf16.mxu1 %vm4548_vm2, %v6125_v15  ;;  %v4525_v38 = vpop.eup %4524 }
 0x6e7   : > { %3971 = vmatprep.subr.bf16.mxu0 %v6125_v15  ;;  %v4527_v16 = vpop.eup %4526  ;;  %v2581_v39 = vpack.c.bf16 %v2563_v34, %v2562_v58  ;;  %v2564_v43 = vmul.f32 %v4525_v38, %v5894_v5  ;;  %v4275_v34 = vld [vmem:[%s6108_s6] sm:$0xff]  }
 0x6e8   : > { %v3130_v45 = vpop.permute.xlu1 %3129  ;;  %v2565_v10 = vmul.f32 %v4527_v16, %v5896_v18 }
 0x6e9   : > { %3966 = vmatpush3.bf16.msra.mxu1 %v3130_v45  ;;  %v3274_v6 = vpop.permute.xlu0 %3273 }
 0x6ea   : > { %3977 = vmatprep.subr.bf16.mxu1 %v6125_v15  ;;  %v4529_v9 = vpop.eup %4528  ;;  %v2582_v27 = vpack.c.bf16 %v2565_v10, %v2564_v43 }
 0x6eb   : > { %v4531_v41 = vpop.eup %4530  ;;  %v2566_v51 = vmul.f32 %v4529_v9, %v5900_v0 }
 0x6ec   : > { %3962 = vmatmul.mubr.msk.bf16.vlgmr.msra.gmra.mxu0 %vm2215_vm3, %v2578_v4  ;;  %v3226_v56 = vpop.permute.xlu1 %3225  ;;  %v2567_v7 = vmul.f32 %v4531_v41, %v5904_v63 }
 0x6ed   : > { %3968 = vmatmul.mubr.msk.bf16.vlgmr.msra.gmra.mxu1 %vm2215_vm3, %v2579_v54  ;;  %3972 = vmatpush3.bf16.msra.mxu0 %v3178_v37 }
 0x6ee   : > { %3978 = vmatpush3.bf16.msra.mxu1 %v3226_v56  ;;  %3973 = vmatprep.mubr.msk.bf16.mxu0 %vm4548_vm2, %v6125_v15  ;;  %v2583_v61 = vpack.c.bf16 %v2567_v7, %v2566_v51 }
 0x6ef   : > { %3979 = vmatprep.mubr.msk.bf16.mxu1 %vm4548_vm2, %v6125_v15  ;;  %3983 = vmatprep.subr.bf16.mxu0 %v6125_v15 }
 0x6f0   : > { %3989 = vmatprep.subr.bf16.mxu1 %v6125_v15  ;;  %v3322_v19 = vpop.permute.xlu1 %3321 }
 0x6f4   : > { %3974 = vmatmul.mubr.msk.bf16.vlgmr.msra.gmra.mxu0 %vm2215_vm3, %v2580_v59  ;;  %v4274_v59 = vld [vmem:[%s6108_s6 + $0x8] sm:$0xff]  }
 0x6f5   : > { %3980 = vmatmul.mubr.msk.bf16.vlgmr.msra.gmra.mxu1 %vm2215_vm3, %v2581_v39  ;;  %3984 = vmatpush3.bf16.msra.mxu0 %v3274_v6 }
 0x6f6   : > { %3990 = vmatpush3.bf16.msra.mxu1 %v3322_v19  ;;  %3985 = vmatprep.mubr.msk.bf16.mxu0 %vm4548_vm2, %v6125_v15 }
 0x6f7   : > { %3991 = vmatprep.mubr.msk.bf16.mxu1 %vm4548_vm2, %v6125_v15  ;;  %3995 = vmatprep.subr.bf16.mxu0 %v4274_v59 }
 0x6f9   : > { %v6027_v46 = vpop.f32.mrf.mxu0 }
 0x6fa   : > { %v6029_v60 = vpop.f32.mrf.mxu1 }
 0x6fb   : > { %v3915_v1 = vpop.f32.mrf.mxu0 }
 0x6fc   : > { %v3921_v28 = vpop.f32.mrf.mxu1  ;;  %3986 = vmatmul.mubr.msk.bf16.vlgmr.msra.gmra.mxu0 %vm2215_vm3, %v2582_v27 }
 0x6fd   : > { %3992 = vmatmul.mubr.msk.bf16.vlgmr.msra.gmra.mxu1 %vm2215_vm3, %v2583_v61  ;;  %v6033_v5 = vpop.f32.mrf.mxu0  ;;  %3996 = vmatpush3.bf16.msra.mxu0 %v4274_v59 }
 0x6fe   : > { %v6035_v18 = vpop.f32.mrf.mxu1  ;;  %3997 = vmatprep.subr.bf16.mxu0 %v4275_v34 }
 0x6ff   : > { %v3916_v15 = vpop.f32.mrf.mxu0 }
 0x700   : > { %v3922_v0 = vpop.f32.mrf.mxu1 }
 0x701   : > { %3998 = vmatpush3.bf16.msra.mxu0 %v4275_v34 }
 0x732   : > { %v2833_v42 = vpop.f32.mrf.mxu0 }
 0x733   : > { %v2881_v63 = vpop.f32.mrf.mxu1 }
 0x734   : > { %v3927_v13 = vpop.f32.mrf.mxu0 }
 0x735   : > { %v3933_v50 = vpop.f32.mrf.mxu1 }
 0x736   : > { %v2836_v49 = vpop.f32.mrf.mxu0 }
 0x737   : > { %v4217_v4 = vpack.i.bf16 %v2836_v49, %v2833_v42  ;;  %v2884_v52 = vpop.f32.mrf.mxu1 }
 0x738   : > { %v4212_v3 = vpack.i.bf16 %v2884_v52, %v2881_v63  ;;  %v3928_v32 = vpop.f32.mrf.mxu0 }
 0x739   : > { %v3934_v54 = vpop.f32.mrf.mxu1  ;;  %4218 = vrot.lane.b32.xlu0 %v4217_v4, %s4550_s25 }
 0x73a   : > { %4213 = vrot.lane.b32.xlu1 %v4212_v3, %s4550_s25 }
 0x76b   : > { %v2929_v8 = vpop.f32.mrf.mxu0 }
 0x76c   : > { %v2977_v22 = vpop.f32.mrf.mxu1 }
 0x76d   : > { %v3939_v31 = vpop.f32.mrf.mxu0 }
 0x76e   : > { %v3945_v26 = vpop.f32.mrf.mxu1 }
 0x76f   : > { %v2932_v55 = vpop.f32.mrf.mxu0 }
 0x770   : > { %v4227_v44 = vpack.i.bf16 %v2932_v55, %v2929_v8  ;;  %v2980_v48 = vpop.f32.mrf.mxu1 }
 0x771   : > { %v4222_v2 = vpack.i.bf16 %v2980_v48, %v2977_v22  ;;  %v3940_v33 = vpop.f32.mrf.mxu0 }
 0x772   : > { %v3946_v12 = vpop.f32.mrf.mxu1  ;;  %4228 = vrot.lane.b32.xlu0 %v4227_v44, %s4550_s25 }
 0x773   : > { %4223 = vrot.lane.b32.xlu1 %v4222_v2, %s4550_s25 }
 0x7a4   : > { %v3025_v35 = vpop.f32.mrf.mxu0 }
 0x7a5   : > { %v3073_v25 = vpop.f32.mrf.mxu1 }
 0x7a6   : > { %v3951_v17 = vpop.f32.mrf.mxu0 }
 0x7a7   : > { %v3957_v20 = vpop.f32.mrf.mxu1 }
 0x7a8   : > { %v3028_v40 = vpop.f32.mrf.mxu0 }
 0x7a9   : > { %v4237_v21 = vpack.i.bf16 %v3028_v40, %v3025_v35  ;;  %v3076_v29 = vpop.f32.mrf.mxu1 }
 0x7aa   : > { %v4232_v36 = vpack.i.bf16 %v3076_v29, %v3073_v25  ;;  %v3952_v53 = vpop.f32.mrf.mxu0 }
 0x7ab   : > { %v3958_v47 = vpop.f32.mrf.mxu1  ;;  %4238 = vrot.lane.b32.xlu0 %v4237_v21, %s4551_s29  ;;  %v4219_v52 = vpop.permute.xlu0 %4218 }
 0x7ac   : > { %4233 = vrot.lane.b32.xlu1 %v4232_v36, %s4551_s29  ;;  %v3121_v14 = vpop.f32.mrf.mxu0  ;;  %v4214_v3 = vpop.permute.xlu1 %4213  ;;  %v4221_v31 = vunpack.i.h.bf16 %v4219_v52  ;;  %v4220_v26 = vunpack.i.l.bf16 %v4219_v52  ;;  %v3706_v52 = vld [vmem:[%s6109_s7] ss:$0 sm:$0xff] }
 0x7ad   : > { %v3169_v45 = vpop.f32.mrf.mxu1  ;;  %v4216_v22 = vunpack.i.h.bf16 %v4214_v3  ;;  %v4215_v44 = vunpack.i.l.bf16 %v4214_v3 }
 0x7ae   : > { %v3963_v11 = vpop.f32.mrf.mxu0  ;;  %v3465_v35 = vsel %vm432_vm1, %v5984_v57, %v4221_v31  ;;  %v3464_v25 = vsel %vm432_vm1, %v5980_v62, %v4220_v26 }
 0x7af   : > { %v3969_v24 = vpop.f32.mrf.mxu1  ;;  %v3467_v59 = vsel %vm432_vm1, %v5986_v23, %v4216_v22  ;;  %v3466_v20 = vsel %vm432_vm1, %v5982_v30, %v4215_v44 }
 0x7b0   : > { %v3124_v37 = vpop.f32.mrf.mxu0 }
 0x7b1   : > { %v3172_v56 = vpop.f32.mrf.mxu1  ;;  %v4252_v1 = vpack.i.bf16 %v3124_v37, %v3121_v14 }
 0x7b2   : > { %v3964_v58 = vpop.f32.mrf.mxu0  ;;  %v4257_v28 = vpack.i.bf16 %v3172_v56, %v3169_v45 }
 0x7b3   : > { %v3970_v38 = vpop.f32.mrf.mxu1 }
 0x7b4   : > { %v3217_v16 = vpop.f32.mrf.mxu0 }
 0x7b5   : > { %v3265_v9 = vpop.f32.mrf.mxu1 }
 0x7b6   : > { %v3975_v39 = vpop.f32.mrf.mxu0 }
 0x7b7   : > { %v3981_v41 = vpop.f32.mrf.mxu1 }
 0x7b8   : > { %v3220_v6 = vpop.f32.mrf.mxu0 }
 0x7b9   : > { %v4247_v19 = vpack.i.bf16 %v3220_v6, %v3217_v16  ;;  %v3268_v43 = vpop.f32.mrf.mxu1 }
 0x7ba   : > { %v4242_v10 = vpack.i.bf16 %v3268_v43, %v3265_v9  ;;  %v3976_v51 = vpop.f32.mrf.mxu0 }
 0x7bb   : > { %v3982_v7 = vpop.f32.mrf.mxu1  ;;  %4248 = vrot.lane.b32.xlu0 %v4247_v19, %s4552_s19 }
 0x7bc   : > { %4243 = vrot.lane.b32.xlu1 %v4242_v10, %s4552_s19  ;;  %v3313_v27 = vpop.f32.mrf.mxu0 }
 0x7bd   : > { %v3361_v61 = vpop.f32.mrf.mxu1 }
 0x7be   : > { %v3987_v15 = vpop.f32.mrf.mxu0 }
 0x7bf   : > { %v3993_v0 = vpop.f32.mrf.mxu1  ;;  %4253 = vrot.lane.b32.xlu0 %v4252_v1, %s4551_s29 }
 0x7c0   : > { %4258 = vrot.lane.b32.xlu1 %v4257_v28, %s4551_s29  ;;  %v3316_v42 = vpop.f32.mrf.mxu0 }
 0x7c1   : > { %v4262_v63 = vpack.i.bf16 %v3316_v42, %v3313_v27  ;;  %v3364_v13 = vpop.f32.mrf.mxu1 }
 0x7c2   : > { %v4267_v50 = vpack.i.bf16 %v3364_v13, %v3361_v61  ;;  %v3988_v49 = vpop.f32.mrf.mxu0 }
 0x7c3   : > { %v3994_v4 = vpop.f32.mrf.mxu1  ;;  %4263 = vrot.lane.b32.xlu0 %v4262_v63, %s4552_s19 }
 0x7c4   : > { %4268 = vrot.lane.b32.xlu1 %v4267_v50, %s4552_s19 }
 0x7e4   : > { %v4229_v32 = vpop.permute.xlu0 %4228 }
 0x7e5   : > { %v4224_v54 = vpop.permute.xlu1 %4223  ;;  %v4231_v40 = vunpack.i.h.bf16 %v4229_v32  ;;  %v4230_v24 = vunpack.i.l.bf16 %v4229_v32 }
 0x7e6   : > { %v4226_v34 = vunpack.i.h.bf16 %v4224_v54  ;;  %v4225_v38 = vunpack.i.l.bf16 %v4224_v54 }
 0x7e7   : > { %v3469_v43 = vsel %vm432_vm1, %v6033_v5, %v4231_v40  ;;  %v3468_v10 = vsel %vm432_vm1, %v6027_v46, %v4230_v24 }
 0x7e8   : > { %v3471_v7 = vsel %vm432_vm1, %v6035_v18, %v4226_v34  ;;  %v3470_v27 = vsel %vm432_vm1, %v6029_v60, %v4225_v38 }
 0x81d   : > { %v4239_v8 = vpop.permute.xlu0 %4238 }
 0x81e   : > { %v4234_v55 = vpop.permute.xlu1 %4233  ;;  %v4241_v48 = vunpack.i.h.bf16 %v4239_v8  ;;  %v4240_v2 = vunpack.i.l.bf16 %v4239_v8 }
 0x81f   : > { %v4236_v33 = vunpack.i.h.bf16 %v4234_v55  ;;  %v4235_v12 = vunpack.i.l.bf16 %v4234_v55 }
 0x820   : > { %v3473_v53 = vsel %vm2215_vm3, %v3465_v35, %v4241_v48  ;;  %v3472_v47 = vsel %vm2215_vm3, %v3464_v25, %v4240_v2 }
 0x821   : > { %v3474_v57 = vsel %vm2215_vm3, %v3466_v20, %v4235_v12  ;;  %v3475_v45 = vsel %vm2215_vm3, %v3467_v59, %v4236_v33 }
 0x82d   : > { %v4249_v17 = vpop.permute.xlu0 %4248 }
 0x82e   : > { %v4244_v21 = vpop.permute.xlu1 %4243  ;;  %v4251_v29 = vunpack.i.h.bf16 %v4249_v17  ;;  %v4250_v36 = vunpack.i.l.bf16 %v4249_v17 }
 0x82f   : > { %v4246_v23 = vunpack.i.h.bf16 %v4244_v21  ;;  %v4245_v14 = vunpack.i.l.bf16 %v4244_v21 }
 0x830   : > { %v3482_v62 = vsel %vm3480_vm4, %v3473_v53, %v4251_v29  ;;  %v3481_v11 = vsel %vm3480_vm4, %v3472_v47, %v4250_v36 }
 0x831   : > { %v3483_v30 = vsel %vm3480_vm4, %v3474_v57, %v4245_v14  ;;  %v3484_v37 = vsel %vm3480_vm4, %v3475_v45, %v4246_v23  ;;  %v3489_v56 = vpack.c.bf16 %v3482_v62, %v3481_v11  ;;  %v4254_v58 = vpop.permute.xlu0 %4253 }
 0x832   : > { %v3490_v16 = vpack.c.bf16 %v3484_v37, %v3483_v30  ;;  %v4259_v9 = vpop.permute.xlu1 %4258  ;;  %v4256_v39 = vunpack.i.h.bf16 %v4254_v58  ;;  %v4255_v41 = vunpack.i.l.bf16 %v4254_v58 }
 0x833   : > { %3999 = vmatprep.mubr.msk.bf16.mxu0 %vm345_vm0, %v3489_v56  ;;  %v4261_v6 = vunpack.i.h.bf16 %v4259_v9  ;;  %v4260_v19 = vunpack.i.l.bf16 %v4259_v9 }
 0x834   : > { %4000 = vmatmul.mubr.msk.bf16.vlgmr.msra.gmra.mxu0 %vm345_vm0, %v3490_v16  ;;  %v3477_v15 = vsel %vm2215_vm3, %v3469_v43, %v4256_v39  ;;  %v3476_v0 = vsel %vm2215_vm3, %v3468_v10, %v4255_v41 }
 0x835   : > { %v4264_v51 = vpop.permute.xlu0 %4263  ;;  %v3478_v63 = vsel %vm2215_vm3, %v3470_v27, %v4260_v19  ;;  %v3479_v46 = vsel %vm2215_vm3, %v3471_v7, %v4261_v6 }
 0x836   : > { %v4269_v1 = vpop.permute.xlu1 %4268  ;;  %v4266_v61 = vunpack.i.h.bf16 %v4264_v51  ;;  %v4265_v28 = vunpack.i.l.bf16 %v4264_v51 }
 0x837   : > { %v4271_v42 = vunpack.i.h.bf16 %v4269_v1  ;;  %v4270_v5 = vunpack.i.l.bf16 %v4269_v1 }
 0x838   : > { %v3486_v13 = vsel %vm3480_vm4, %v3477_v15, %v4266_v61  ;;  %v3485_v18 = vsel %vm3480_vm4, %v3476_v0, %v4265_v28 }
 0x839   : > { %v3487_v60 = vsel %vm3480_vm4, %v3478_v63, %v4270_v5  ;;  %v3488_v50 = vsel %vm3480_vm4, %v3479_v46, %v4271_v42  ;;  %v3491_v49 = vpack.c.bf16 %v3486_v13, %v3485_v18 }
 0x83a   : > { %v3492_v4 = vpack.c.bf16 %v3488_v50, %v3487_v60 }
 0x83b   : > { %4003 = vmatprep.mubr.msk.bf16.mxu0 %vm345_vm0, %v3491_v49 }
 0x83c   : > { %4004 = vmatmul.mubr.msk.bf16.gmra.mxu0 %vm345_vm0, %v3492_v4 }
 0x8f4   : > { %v4001_v3 = vpop.f32.mrf.mxu0 }
 0x8f5   : > { %v3571_v32 = vadd.f32 %v4001_v3, %v3706_v52 }
 0x8f6   : > { %v3562_v54 = vpop.f32.mrf.mxu0 }
 0x8f7   : > { %3595 = vst.msk [vmem:[%s307_s15 + $0x10] sm:$0xff] %vm345_vm0, %v3571_v32  ;;  %v3563_v8 = vadd.f32 %v3706_v52, %v3562_v54 }
 0x8f8   : > { %v4002_v22 = vpop.f32.mrf.mxu0 }
 0x8f9   : > { %3593 = vst.msk [vmem:[%s307_s15] sm:$0xff] %vm345_vm0, %v3563_v8  ;;  %v3574_v31 = vadd.f32 %v4002_v22, %v3706_v52 }
 0x8fa   : > { %v3565_v26 = vpop.f32.mrf.mxu0 }
 0x8fb   : > { %3596 = vst.msk [vmem:[%s307_s15 + $0x18] sm:$0xff] %vm345_vm0, %v3574_v31  ;;  %v3566_v55 = vadd.f32 %v3706_v52, %v3565_v26 }
 0x8fc   : > { %v4005_v44 = vpop.f32.mrf.mxu0 }
 0x8fd   : > { %3594 = vst.msk [vmem:[%s307_s15 + $0x8] sm:$0xff] %vm345_vm0, %v3566_v55  ;;  %v3587_v48 = vadd.f32 %v4005_v44, %v3706_v52 }
 0x8fe   : > { %v3578_v2 = vpop.f32.mrf.mxu0 }
 0x8ff   : > { %3599 = vst.msk [vmem:[%s307_s15 + $0x30] sm:$0xff] %vm345_vm0, %v3587_v48  ;;  %v3579_v33 = vadd.f32 %v3706_v52, %v3578_v2 }
 0x900   : > { %v4006_v12 = vpop.f32.mrf.mxu0 }
 0x901   : > { %3597 = vst.msk [vmem:[%s307_s15 + $0x20] sm:$0xff] %vm345_vm0, %v3579_v33  ;;  %v3590_v59 = vadd.f32 %v4006_v12, %v3706_v52 }
 0x902   : > { %v3581_v35 = vpop.f32.mrf.mxu0 }
 0x903   : > { %3600 = vst.msk [vmem:[%s307_s15 + $0x38] sm:$0xff] %vm345_vm0, %v3590_v59  ;;  %v3582_v25 = vadd.f32 %v3706_v52, %v3581_v35 }
 0x905   : > { %3598 = vst.msk [vmem:[%s307_s15 + $0x28] sm:$0xff] %vm345_vm0, %v3582_v25 }
 0x906 PF: > { %s18_s27 = sadd.s32 1, %s4538_s27  }
 0x907   : > { %p15_p4 = scmp.ge.s32.totalorder %s18_s27, 4  }
 0x909   :  { %17 = sbr.rel (!%p15_p4) target bundleno = 1 (0x1), region = 82 }

// kernel: swin_basic_layer_forward.4
= control target key start
LH: loop header
LB: loop body
LE: loop exit
PB: predicated region body
PF: predicated region fallthrough
CT: control target
= control target key end

     0   :  { %vm74_vm0 = vcmask 261120   ;;  %s8077_s14 = smov 88   ;;  %vm213_vm1 = vcmask 64512   ;;  %s8078_s15 = smov 80   ;;  %vm8083_vm2 = vmmov 0   ;;  %vm3684_vm3 = vcmask 130048   ;;  %s11463_s3 = inlined_call_operand.vmem [shape: bf16[32,96], index: 3, kind: input, shape index: {}]   ;;  %s11464_s0 = inlined_call_operand.vmem [shape: f32[128,32], index: 0, kind: input, shape index: {}]   ;;  %s11465_s4 = inlined_call_operand.vmem [shape: f32[1,96], index: 4, kind: input, shape index: {}]   ;;  %s11466_s2 = inlined_call_operand.vmem [shape: f32[1,32], index: 2, kind: input, shape index: {}]   ;;  %s11467_s1 = inlined_call_operand.vmem [shape: f32[4,16,16], index: 1, kind: input, shape index: {}]   ;;  %s11468_s5 = inlined_call_operand.vmem [shape: bf16[32,32], index: 5, kind: input, shape index: {}]   ;;  %s11469_s6 = inlined_call_operand.vmem [shape: f32[1,32], index: 6, kind: input, shape index: {}]   ;;  %s11470_s7 = inlined_call_operand.vmem [shape: f32[128,32], index: 7, kind: output, shape index: {}]  }
   0x1   :  { %v7558_v0 = vld [vmem:[%s11463_s3 + $0x8] sm:$0xff]   ;;  %v7559_v1 = vld [vmem:[%s11463_s3] sm:$0xff]   ;;  %v29_v7 = vld [vmem:[%s11464_s0 + $0x10] sm:$0xff]  ;;  %s8079_s16 = smov 72   ;;  %s8080_s17 = smov 112   ;;  %vm6213_vm4 = vcmask 195584  }
   0x2   :  { %6637 = vmatprep.subr.bf16.mxu0 %v7558_v0  ;;  %7061 = vmatprep.subr.bf16.mxu1 %v7558_v0  ;;  %v27_v2 = vld [vmem:[%s11464_s0] sm:$0xff]  ;;  %v28_v3 = vld [vmem:[%s11464_s0 + $0x8] sm:$0xff]  ;;  %v30_v8 = vld [vmem:[%s11464_s0 + $0x18] sm:$0xff]  ;;  %s8081_s18 = smov 104  }
   0x3   :  { %v35_v4 = vld [vmem:[%s11464_s0 + $0x40] sm:$0xff]  ;;  %6638 = vmatpush3.bf16.msra.mxu0 %v7558_v0  ;;  %7063 = vmatpush3.bf16.msra.mxu1 %v7558_v0  ;;  %v43_v5 = vpack.c.bf16 %v28_v3, %v27_v2  ;;  %v36_v6 = vld [vmem:[%s11464_s0 + $0x48] sm:$0xff]  ;;  %v37_v10 = vld [vmem:[%s11464_s0 + $0x50] sm:$0xff]  ;;  %v44_v14 = vpack.c.bf16 %v30_v8, %v29_v7 }
   0x4   :  { %6639 = vmatprep.subr.bf16.mxu0 %v7559_v1  ;;  %7062 = vmatprep.subr.bf16.mxu1 %v7559_v1  ;;  %v47_v9 = vpack.c.bf16 %v36_v6, %v35_v4  ;;  %v38_v11 = vld [vmem:[%s11464_s0 + $0x58] sm:$0xff]  ;;  %v31_v12 = vld [vmem:[%s11464_s0 + $0x20] sm:$0xff]  ;;  %v32_v13 = vld [vmem:[%s11464_s0 + $0x28] sm:$0xff] }
   0x5   :  { %6641 = vmatprep.mubr.msk.bf16.mxu0 %vm74_vm0, %v43_v5  ;;  %v48_v15 = vpack.c.bf16 %v38_v11, %v37_v10  ;;  %v39_v16 = vld [vmem:[%s11464_s0 + $0x60] sm:$0xff]  ;;  %v40_v17 = vld [vmem:[%s11464_s0 + $0x68] sm:$0xff]  ;;  %v45_v18 = vpack.c.bf16 %v32_v13, %v31_v12  ;;  %v33_v20 = vld [vmem:[%s11464_s0 + $0x30] sm:$0xff] }
   0x6   :  { %6649 = vmatprep.mubr.msk.bf16.mxu1 %vm74_vm0, %v47_v9  ;;  %v49_v19 = vpack.c.bf16 %v40_v17, %v39_v16  ;;  %v34_v21 = vld [vmem:[%s11464_s0 + $0x38] sm:$0xff]  ;;  %v41_v22 = vld [vmem:[%s11464_s0 + $0x70] sm:$0xff]  ;;  %v8193_v26 = vld [vmem:[%s11465_s4] ss:$0 sm:$0xff]  ;;  %s8076_s4 = smov 120  }
   0x7   :  { %6640 = vmatpush3.bf16.msra.mxu0 %v7559_v1  ;;  %7064 = vmatpush3.bf16.msra.mxu1 %v7559_v1  ;;  %v42_v23 = vld [vmem:[%s11464_s0 + $0x78] sm:$0xff]  ;;  %v46_v24 = vpack.c.bf16 %v34_v21, %v33_v20  ;;  %s8075_s0 = smov 96  }
   0x8   :  { %v50_v25 = vpack.c.bf16 %v42_v23, %v41_v22 }
   0xa   :  { %6642 = vmatmul.mubr.msk.bf16.vlgmr.msra.gmra.mxu0 %vm74_vm0, %v44_v14  ;;  %6650 = vmatmul.mubr.msk.bf16.vlgmr.msra.gmra.mxu1 %vm74_vm0, %v48_v15 }
   0xb   :  { %6645 = vmatprep.mubr.msk.bf16.mxu0 %vm74_vm0, %v45_v18  ;;  %6653 = vmatprep.mubr.msk.bf16.mxu1 %vm74_vm0, %v49_v19 }
  0x12   :  { %6646 = vmatmul.mubr.msk.bf16.gmra.mxu0 %vm74_vm0, %v46_v24  ;;  %6654 = vmatmul.mubr.msk.bf16.gmra.mxu1 %vm74_vm0, %v50_v25 }
  0xca   :  { %v6643_v27 = vpop.f32.mrf.mxu0  ;;  %v6651_v28 = vpop.f32.mrf.mxu1 }
  0xcb   :  { %v8196_v29 = vadd.f32 %v6643_v27, %v8193_v26  ;;  %v8199_v30 = vadd.f32 %v6651_v28, %v8193_v26 }
  0xcc   :  { %v133_v35 = vpop.f32.mrf.mxu0  ;;  %v165_v37 = vpop.f32.mrf.mxu1 }
  0xcd   :  { %v8203_v31 = vmul.f32 %v8199_v30, %v8199_v30  ;;  %v8207_v32 = vmul.f32 %v8196_v29, %v8196_v29  ;;  %v8226_v38 = vadd.f32 %v8193_v26, %v133_v35  ;;  %v8232_v41 = vadd.f32 %v8193_v26, %v165_v37 }
  0xce   :  { %v6644_v36 = vpop.f32.mrf.mxu0  ;;  %v6652_v40 = vpop.f32.mrf.mxu1 }
  0xcf   :  { %368 = vrot.lane.b32.xlu0 %v8203_v31, %s8075_s0  ;;  %352 = vrot.lane.b32.xlu1 %v8207_v32, %s8075_s0  ;;  %v244_v33 = vsel %vm213_vm1, %v8203_v31, 0.0  ;;  %v220_v34 = vsel %vm213_vm1, %v8207_v32, 0.0  ;;  %v8229_v39 = vadd.f32 %v6644_v36, %v8193_v26  ;;  %v8235_v42 = vadd.f32 %v6652_v40, %v8193_v26 }
  0xd0   :  { %v8243_v44 = vmul.f32 %v8226_v38, %v8226_v38  ;;  %v8255_v46 = vmul.f32 %v8232_v41, %v8232_v41  ;;  %v136_v47 = vpop.f32.mrf.mxu0  ;;  %v168_v56 = vpop.f32.mrf.mxu1 }
  0xd1   :  { %v8239_v43 = vmul.f32 %v8229_v39, %v8229_v39  ;;  %v8251_v45 = vmul.f32 %v8235_v42, %v8235_v42  ;;  %v8278_v48 = vadd.f32 %v8193_v26, %v136_v47  ;;  %v8298_v59 = vadd.f32 %v8193_v26, %v168_v56 }
  0xd2   :  { %v214_v49 = vsel %vm213_vm1, %v8243_v44, 0.0  ;;  %v238_v50 = vsel %vm213_vm1, %v8255_v46, 0.0  ;;  %v6647_v55 = vpop.f32.mrf.mxu0  ;;  %v6655_v58 = vpop.f32.mrf.mxu1 }
  0xd3   :  { %512 = vrot.lane.b32.xlu0 %v8203_v31, %s8076_s4  ;;  %496 = vrot.lane.b32.xlu1 %v8207_v32, %s8076_s4  ;;  %v8286_v51 = vmul.f32 %v8278_v48, %v8278_v48  ;;  %v223_v52 = vsel %vm213_vm1, %v8239_v43, 0.0  ;;  %v247_v54 = vsel %vm213_vm1, %v8251_v45, 0.0  ;;  %v8295_v57 = vadd.f32 %v6647_v55, %v8193_v26 }
  0xd4   :  { %v8303_v60 = vadd.f32 %v6655_v58, %v8193_v26  ;;  %v8311_v62 = vmul.f32 %v8298_v59, %v8298_v59  ;;  %v149_v3 = vpop.f32.mrf.mxu0  ;;  %v181_v5 = vpop.f32.mrf.mxu1 }
  0xd5   :  { %v217_v53 = vsel %vm213_vm1, %v8286_v51, 0.0  ;;  %11544 = vst [vmem:[#allocation2_spill] sm:$0xff] %v8295_v57  ;;  %v8307_v61 = vmul.f32 %v8295_v57, %v8295_v57  ;;  %v8358_v10 = vadd.f32 %v8193_v26, %v149_v3  ;;  %v8367_v12 = vadd.f32 %v8193_v26, %v181_v5 }
  0xd6   :  { %v8319_v63 = vmul.f32 %v8303_v60, %v8303_v60  ;;  %v241_v1 = vsel %vm213_vm1, %v8311_v62, 0.0  ;;  %v6648_v4 = vpop.f32.mrf.mxu0  ;;  %v6656_v7 = vpop.f32.mrf.mxu1 }
  0xd7   :  { %672 = vrot.lane.b32.xlu0 %v8203_v31, %s8077_s14  ;;  %656 = vrot.lane.b32.xlu1 %v8207_v32, %s8077_s14  ;;  %v232_v0 = vsel %vm213_vm1, %v8307_v61, 0.0  ;;  %v8346_v6 = vadd.f32 %v6648_v4, %v8193_v26  ;;  %v8349_v8 = vadd.f32 %v6656_v7, %v8193_v26  ;;  %v8371_v13 = vmul.f32 %v8358_v10, %v8358_v10 }
  0xd8   :  { %v256_v2 = vsel %vm213_vm1, %v8319_v63, 0.0  ;;  %v8379_v15 = vmul.f32 %v8367_v12, %v8367_v12 }
  0xd9   :  { %11545 = vst [vmem:[#allocation3_spill] sm:$0xff] %v8346_v6  ;;  %v8353_v9 = vmul.f32 %v8346_v6, %v8346_v6  ;;  %v8362_v11 = vmul.f32 %v8349_v8, %v8349_v8  ;;  %v226_v28 = vsel %vm213_vm1, %v8371_v13, 0.0 }
  0xdb   :  { %v235_v24 = vsel %vm213_vm1, %v8353_v9, 0.0 }
  0xf6   :  { %245 = vadd.xlane.f32.xlu0 %v244_v33  ;;  %v259_v33 = vsel %vm213_vm1, %v8362_v11, 0.0 }
  0xfb   :  { %221 = vadd.xlane.f32.xlu1 %v220_v34  ;;  %v250_v34 = vsel %vm213_vm1, %v8379_v15, 0.0 }
 0x10c   :  { %354 = vrot.lane.b32.xlu1 %v8239_v43, %s8075_s0  ;;  %348 = vrot.lane.b32.xlu0 %v8243_v44, %s8075_s0 }
 0x110   :  { %370 = vrot.lane.b32.xlu1 %v8251_v45, %s8075_s0  ;;  %364 = vrot.lane.b32.xlu0 %v8255_v46, %s8075_s0 }
 0x114   :  { %498 = vrot.lane.b32.xlu1 %v8239_v43, %s8076_s4  ;;  %492 = vrot.lane.b32.xlu0 %v8243_v44, %s8076_s4 }
 0x118   :  { %514 = vrot.lane.b32.xlu1 %v8251_v45, %s8076_s4  ;;  %508 = vrot.lane.b32.xlu0 %v8255_v46, %s8076_s4 }
 0x11c   :  { %658 = vrot.lane.b32.xlu1 %v8239_v43, %s8077_s14  ;;  %652 = vrot.lane.b32.xlu0 %v8243_v44, %s8077_s14 }
 0x120   :  { %674 = vrot.lane.b32.xlu1 %v8251_v45, %s8077_s14  ;;  %668 = vrot.lane.b32.xlu0 %v8255_v46, %s8077_s14 }
 0x13f   :  { %215 = vadd.xlane.f32.xlu0 %v214_v49  ;;  %v152_v49 = vpop.f32.mrf.mxu0 }
 0x141   :  { %v369_v14 = vpop.permute.xlu0 %368  ;;  %v353_v22 = vpop.permute.xlu1 %352 }
 0x142   :  { %v402_v37 = vsel %vm213_vm1, %v353_v22, 0.0 }
 0x143   :  { %239 = vadd.xlane.f32.xlu0 %v238_v50  ;;  %v426_v50 = vsel %vm213_vm1, %v369_v14, 0.0 }
 0x144   :  { %224 = vadd.xlane.f32.xlu1 %v223_v52  ;;  %v8418_v52 = vadd.f32 %v8193_v26, %v152_v49 }
 0x145   :  { %v513_v16 = vpop.permute.xlu0 %512  ;;  %v497_v25 = vpop.permute.xlu1 %496 }
 0x146   :  { %v546_v56 = vsel %vm213_vm1, %v497_v25, 0.0 }
 0x147   :  { %218 = vadd.xlane.f32.xlu0 %v217_v53  ;;  %v184_v53 = vpop.f32.mrf.mxu1 }
 0x148   :  { %248 = vadd.xlane.f32.xlu1 %v247_v54  ;;  %v8424_v58 = vadd.f32 %v8193_v26, %v184_v53 }
 0x149   :  { %v8393_v17 = vpop.permute.xlu0 %672  ;;  %v657_v35 = vpop.permute.xlu1 %656 }
 0x14a   :  { %v8439_v4 = vmul.f32 %v8424_v58, %v8424_v58  ;;  %v706_v26 = vsel %vm213_vm1, %v657_v35, 0.0 }
 0x159   :  { %350 = vrot.lane.b32.xlu1 %v8286_v51, %s8075_s0 }
 0x15d   :  { %366 = vrot.lane.b32.xlu1 %v8311_v62, %s8075_s0  ;;  %360 = vrot.lane.b32.xlu0 %v8307_v61, %s8075_s0 }
 0x161   :  { %494 = vrot.lane.b32.xlu1 %v8286_v51, %s8076_s4  ;;  %376 = vrot.lane.b32.xlu0 %v8319_v63, %s8075_s0 }
 0x165   :  { %510 = vrot.lane.b32.xlu1 %v8311_v62, %s8076_s4  ;;  %504 = vrot.lane.b32.xlu0 %v8307_v61, %s8076_s4 }
 0x169   :  { %654 = vrot.lane.b32.xlu1 %v8286_v51, %s8077_s14  ;;  %520 = vrot.lane.b32.xlu0 %v8319_v63, %s8076_s4 }
 0x16d   :  { %670 = vrot.lane.b32.xlu1 %v8311_v62, %s8077_s14  ;;  %664 = vrot.lane.b32.xlu0 %v8307_v61, %s8077_s14 }
 0x171   :  { %680 = vrot.lane.b32.xlu0 %v8319_v63, %s8077_s14 }
 0x17f   :  { %v8397_v18 = vpop.xlane.xlu0 %245 }
 0x180   :  { %11546 = vst [vmem:[#allocation4_spill] sm:$0xff] %v8397_v18 }
 0x183   :  { %v349_v19 = vpop.permute.xlu0 %348 }
 0x184   :  { %v8412_v40 = vpop.xlane.xlu1 %221  ;;  %v396_v14 = vsel %vm213_vm1, %v349_v19, 0.0 }
 0x187   :  { %v365_v20 = vpop.permute.xlu0 %364 }
 0x188   :  { %v355_v54 = vpop.permute.xlu1 %354  ;;  %v420_v22 = vsel %vm213_vm1, %v365_v20, 0.0 }
 0x18b   :  { %v493_v21 = vpop.permute.xlu0 %492 }
 0x18c   :  { %v540_v25 = vsel %vm213_vm1, %v493_v21, 0.0 }
 0x18f   :  { %v509_v23 = vpop.permute.xlu0 %508 }
 0x190   :  { %233 = vadd.xlane.f32.xlu0 %v232_v0  ;;  %v8428_v0 = vmul.f32 %v8418_v52, %v8418_v52  ;;  %v564_v19 = vsel %vm213_vm1, %v509_v23, 0.0 }
 0x191   :  { %242 = vadd.xlane.f32.xlu1 %v241_v1  ;;  %v570_v1 = vsel %vm213_vm1, %v513_v16, 0.0 }
 0x193   :  { %v653_v27 = vpop.permute.xlu0 %652 }
 0x194   :  { %257 = vadd.xlane.f32.xlu0 %v256_v2  ;;  %v8433_v2 = vpop.permute.xlu1 %370  ;;  %v700_v35 = vsel %vm213_vm1, %v653_v27, 0.0 }
 0x197   :  { %v8409_v36 = vpop.permute.xlu0 %668 }
 0x198   :  { %v499_v7 = vpop.permute.xlu1 %498 }
 0x1a2   :  { %362 = vrot.lane.b32.xlu1 %v8353_v9, %s8075_s0 }
 0x1a6   :  { %378 = vrot.lane.b32.xlu1 %v8362_v11, %s8075_s0 }
 0x1aa   :  { %506 = vrot.lane.b32.xlu1 %v8353_v9, %s8076_s4  ;;  %356 = vrot.lane.b32.xlu0 %v8371_v13, %s8075_s0 }
 0x1ae   :  { %522 = vrot.lane.b32.xlu1 %v8362_v11, %s8076_s4  ;;  %372 = vrot.lane.b32.xlu0 %v8379_v15, %s8075_s0 }
 0x1b2   :  { %666 = vrot.lane.b32.xlu1 %v8353_v9, %s8077_s14  ;;  %500 = vrot.lane.b32.xlu0 %v8371_v13, %s8076_s4 }
 0x1b6   :  { %682 = vrot.lane.b32.xlu1 %v8362_v11, %s8077_s14  ;;  %516 = vrot.lane.b32.xlu0 %v8379_v15, %s8076_s4 }
 0x1ba   :  { %660 = vrot.lane.b32.xlu0 %v8371_v13, %s8077_s14 }
 0x1be   :  { %676 = vrot.lane.b32.xlu0 %v8379_v15, %s8077_s14 }
 0x1c8   :  { %v8414_v47 = vpop.xlane.xlu0 %215 }
 0x1cc   :  { %v8420_v55 = vpop.xlane.xlu0 %239 }
 0x1cd   :  { %11547 = vst [vmem:[#allocation5_spill] sm:$0xff] %v8420_v55 }
 0x1d0   :  { %v8435_v3 = vpop.xlane.xlu0 %218 }
 0x1d4   :  { %v361_v5 = vpop.permute.xlu0 %360 }
 0x1d5   :  { %v414_v27 = vsel %vm213_vm1, %v361_v5, 0.0  ;;  %v229_v5 = vsel %vm213_vm1, %v8428_v0, 0.0 }
 0x1d8   :  { %v377_v16 = vpop.permute.xlu0 %376 }
 0x1da   :  { %236 = vadd.xlane.f32.xlu1 %v235_v24  ;;  %v515_v24 = vpop.permute.xlu1 %514 }
 0x1dd   :  { %227 = vadd.xlane.f32.xlu0 %v226_v28  ;;  %v505_v28 = vpop.permute.xlu0 %504 }
 0x1de   :  { %260 = vadd.xlane.f32.xlu1 %v259_v33  ;;  %v659_v33 = vpop.permute.xlu1 %658 }
 0x1df   :  { %v709_v23 = vsel %vm213_vm1, %v659_v33, 0.0 }
 0x1e1   :  { %251 = vadd.xlane.f32.xlu0 %v250_v34  ;;  %v521_v34 = vpop.permute.xlu0 %520 }
 0x1e2   :  { %v8457_v20 = vpop.permute.xlu1 %674 }
 0x1e5   :  { %403 = vadd.xlane.f32.xlu0 %v402_v37  ;;  %v405_v37 = vsel %vm213_vm1, %v355_v54, 0.0  ;;  %v665_v21 = vpop.permute.xlu0 %664  ;;  %v438_v54 = vsel %vm213_vm1, %v377_v16, 0.0 }
 0x1e6   :  { %v8460_v49 = vpop.xlane.xlu1 %224 }
 0x1e9   :  { %427 = vadd.xlane.f32.xlu0 %v426_v50  ;;  %v549_v50 = vsel %vm213_vm1, %v499_v7, 0.0 }
 0x1ea   :  { %v8463_v53 = vpop.xlane.xlu1 %248 }
 0x1eb   :  { %11548 = vst [vmem:[#allocation6_spill] sm:$0xff] %v8463_v53 }
 0x1ed   :  { %547 = vadd.xlane.f32.xlu0 %v546_v56  ;;  %v8465_v56 = vpop.permute.xlu0 %680 }
 0x1ef   :  { %358 = vrot.lane.b32.xlu1 %v8428_v0, %s8075_s0 }
 0x1f1   :  { %571 = vadd.xlane.f32.xlu0 %v570_v1  ;;  %v351_v1 = vpop.permute.xlu1 %350 }
 0x1f3   :  { %374 = vrot.lane.b32.xlu1 %v8439_v4, %s8075_s0 }
 0x1f5   :  { %707 = vadd.xlane.f32.xlu0 %v706_v26  ;;  %v367_v7 = vpop.permute.xlu1 %366 }
 0x1f7   :  { %502 = vrot.lane.b32.xlu1 %v8428_v0, %s8076_s4 }
 0x1f9   :  { %397 = vadd.xlane.f32.xlu0 %v396_v14  ;;  %v495_v33 = vpop.permute.xlu1 %494 }
 0x1fb   :  { %518 = vrot.lane.b32.xlu1 %v8439_v4, %s8076_s4 }
 0x1fd   :  { %421 = vadd.xlane.f32.xlu0 %v420_v22  ;;  %v558_v22 = vsel %vm213_vm1, %v505_v28, 0.0 }
 0x1ff   :  { %662 = vrot.lane.b32.xlu1 %v8428_v0, %s8077_s14 }
 0x201   :  { %541 = vadd.xlane.f32.xlu0 %v540_v25 }
 0x203   :  { %678 = vrot.lane.b32.xlu1 %v8439_v4, %s8077_s14 }
 0x205   :  { %565 = vadd.xlane.f32.xlu0 %v564_v19  ;;  %v582_v19 = vsel %vm213_vm1, %v521_v34, 0.0  ;;  %v429_v34 = vsel %vm213_vm1, %v8433_v2, 0.0 }
 0x209   :  { %701 = vadd.xlane.f32.xlu0 %v700_v35 }
 0x20d   :  { %406 = vadd.xlane.f32.xlu0 %v405_v37 }
 0x211   :  { %550 = vadd.xlane.f32.xlu0 %v549_v50  ;;  %v253_v50 = vsel %vm213_vm1, %v8439_v4, 0.0 }
 0x215   :  { %710 = vadd.xlane.f32.xlu0 %v709_v23  ;;  %v511_v23 = vpop.permute.xlu1 %510 }
 0x219   :  { %415 = vadd.xlane.f32.xlu0 %v414_v27  ;;  %v8469_v26 = vpop.xlane.xlu0 %233 }
 0x21a   :  { %11549 = vst [vmem:[#allocation7_spill] sm:$0xff] %v8469_v26 }
 0x21d   :  { %439 = vadd.xlane.f32.xlu0 %v438_v54  ;;  %v8472_v14 = vpop.xlane.xlu0 %257 }
 0x21e   :  { %11550 = vst [vmem:[#allocation8_spill] sm:$0xff] %v8472_v14 }
 0x221   :  { %559 = vadd.xlane.f32.xlu0 %v558_v22  ;;  %v357_v25 = vpop.permute.xlu0 %356  ;;  %v655_v22 = vpop.permute.xlu1 %654 }
 0x222   :  { %v408_v37 = vsel %vm213_vm1, %v357_v25, 0.0  ;;  %v573_v25 = vsel %vm213_vm1, %v515_v24, 0.0  ;;  %v718_v24 = vsel %vm213_vm1, %v665_v21, 0.0 }
 0x225   :  { %583 = vadd.xlane.f32.xlu0 %v582_v19  ;;  %v373_v35 = vpop.permute.xlu0 %372 }
 0x226   :  { %v432_v28 = vsel %vm213_vm1, %v373_v35, 0.0  ;;  %v8488_v35 = vpop.permute.xlu1 %670 }
 0x227   :  { %230 = vadd.xlane.f32.xlu1 %v229_v5 }
 0x229   :  { %409 = vadd.xlane.f32.xlu0 %v408_v37  ;;  %v501_v16 = vpop.permute.xlu0 %500  ;;  %v399_v37 = vsel %vm213_vm1, %v351_v1, 0.0  ;;  %v567_v1 = vsel %vm213_vm1, %v511_v23, 0.0 }
 0x22a   :  { %v552_v54 = vsel %vm213_vm1, %v501_v16, 0.0  ;;  %v8492_v16 = vpop.xlane.xlu1 %242 }
 0x22b   :  { %254 = vadd.xlane.f32.xlu1 %v253_v50  ;;  %v423_v50 = vsel %vm213_vm1, %v367_v7, 0.0  ;;  %11551 = vst [vmem:[#allocation9_spill] sm:$0xff] %v8492_v16 }
 0x22d   :  { %433 = vadd.xlane.f32.xlu0 %v432_v28  ;;  %v517_v27 = vpop.permute.xlu0 %516  ;;  %v543_v28 = vsel %vm213_vm1, %v495_v33, 0.0 }
 0x22e   :  { %v576_v19 = vsel %vm213_vm1, %v517_v27, 0.0  ;;  %v703_v27 = vsel %vm213_vm1, %v655_v22, 0.0 }
 0x22f   :  { %430 = vadd.xlane.f32.xlu1 %v429_v34  ;;  %v363_v34 = vpop.permute.xlu1 %362 }
 0x231   :  { %553 = vadd.xlane.f32.xlu0 %v552_v54  ;;  %v661_v5 = vpop.permute.xlu0 %660 }
 0x232   :  { %v712_v2 = vsel %vm213_vm1, %v661_v5, 0.0 }
 0x233   :  { %574 = vadd.xlane.f32.xlu1 %v573_v25  ;;  %v379_v54 = vpop.permute.xlu1 %378  ;;  %v417_v25 = vsel %vm213_vm1, %v363_v34, 0.0 }
 0x235   :  { %577 = vadd.xlane.f32.xlu0 %v576_v19  ;;  %v441_v19 = vsel %vm213_vm1, %v379_v54, 0.0 }
 0x237   :  { %400 = vadd.xlane.f32.xlu1 %v399_v37  ;;  %v507_v7 = vpop.permute.xlu1 %506 }
 0x238   :  { %v561_v21 = vsel %vm213_vm1, %v507_v7, 0.0 }
 0x239   :  { %713 = vadd.xlane.f32.xlu0 %v712_v2 }
 0x23b   :  { %424 = vadd.xlane.f32.xlu1 %v423_v50  ;;  %v523_v5 = vpop.permute.xlu1 %522 }
 0x23c   :  { %v585_v33 = vsel %vm213_vm1, %v523_v5, 0.0 }
 0x23d   :  { %719 = vadd.xlane.f32.xlu0 %v718_v24 }
 0x23f   :  { %544 = vadd.xlane.f32.xlu1 %v543_v28  ;;  %v8506_v23 = vpop.permute.xlu1 %666 }
 0x243   :  { %568 = vadd.xlane.f32.xlu1 %v567_v1  ;;  %v8510_v22 = vpop.permute.xlu1 %682 }
 0x247   :  { %704 = vadd.xlane.f32.xlu1 %v703_v27 }
 0x24b   :  { %418 = vadd.xlane.f32.xlu1 %v417_v25 }
 0x24f   :  { %442 = vadd.xlane.f32.xlu1 %v441_v19 }
 0x253   :  { %562 = vadd.xlane.f32.xlu1 %v561_v21  ;;  %958 = vrot.lane.b32.xlu0 %v8286_v51, %s8078_s15  ;;  %v724_v21 = vsel %vm213_vm1, %v8409_v36, 0.0 }
 0x257   :  { %586 = vadd.xlane.f32.xlu1 %v585_v33  ;;  %966 = vrot.lane.b32.xlu0 %v8428_v0, %s8078_s15  ;;  %v677_v33 = vpop.permute.xlu0 %676 }
 0x25b   :  { %970 = vrot.lane.b32.xlu0 %v8353_v9, %s8078_s15 }
 0x25f   :  { %974 = vrot.lane.b32.xlu0 %v8311_v62, %s8078_s15 }
 0x263   :  { %v8514_v37 = vpop.xlane.xlu1 %236  ;;  %978 = vrot.lane.b32.xlu0 %v8251_v45, %s8078_s15 }
 0x264   :  { %11552 = vst [vmem:[#allocation10_spill] sm:$0xff] %v8514_v37 }
 0x266   :  { %v8567_v36 = vpop.xlane.xlu0 %227 }
 0x267   :  { %v8518_v2 = vpop.xlane.xlu1 %260  ;;  %982 = vrot.lane.b32.xlu0 %v8439_v4, %s8078_s15  ;;  %11555 = vst [vmem:[#allocation13_spill] sm:$0xff] %v8567_v36 }
 0x268   :  { %11553 = vst [vmem:[#allocation11_spill] sm:$0xff] %v8518_v2 }
 0x26b   :  { %v359_v50 = vpop.permute.xlu1 %358  ;;  %986 = vrot.lane.b32.xlu0 %v8362_v11, %s8078_s15 }
 0x26c   :  { %v411_v24 = vsel %vm213_vm1, %v359_v50, 0.0 }
 0x26d   :  { %412 = vadd.xlane.f32.xlu1 %v411_v24 }
 0x26f   :  { %v375_v28 = vpop.permute.xlu1 %374  ;;  %1262 = vrot.lane.b32.xlu0 %v8286_v51, %s8079_s16 }
 0x270   :  { %v435_v34 = vsel %vm213_vm1, %v375_v28, 0.0 }
 0x271   :  { %436 = vadd.xlane.f32.xlu1 %v435_v34  ;;  %v8577_v34 = vpop.xlane.xlu0 %251 }
 0x272   :  { %11557 = vst [vmem:[#allocation15_spill] sm:$0xff] %v8577_v34  ;;  %v736_v34 = vsel %vm213_vm1, %v677_v33, 0.0  ;;  %v745_v33 = vsel %vm213_vm1, %v8510_v22, 0.0 }
 0x273   :  { %v503_v1 = vpop.permute.xlu1 %502  ;;  %1266 = vrot.lane.b32.xlu0 %v8239_v43, %s8079_s16 }
 0x274   :  { %v555_v27 = vsel %vm213_vm1, %v503_v1, 0.0 }
 0x275   :  { %556 = vadd.xlane.f32.xlu1 %v555_v27  ;;  %v8581_v27 = vpop.xlane.xlu0 %403 }
 0x277   :  { %v519_v54 = vpop.permute.xlu1 %518  ;;  %1268 = vrot.lane.b32.xlu0 %v8371_v13, %s8079_s16 }
 0x278   :  { %v579_v25 = vsel %vm213_vm1, %v519_v54, 0.0 }
 0x279   :  { %580 = vadd.xlane.f32.xlu1 %v579_v25  ;;  %v8585_v25 = vpop.xlane.xlu0 %427 }
 0x27a   :  { %11559 = vst [vmem:[#allocation17_spill] sm:$0xff] %v8585_v25 }
 0x27b   :  { %v663_v7 = vpop.permute.xlu1 %662  ;;  %1270 = vrot.lane.b32.xlu0 %v8428_v0, %s8079_s16 }
 0x27c   :  { %v715_v19 = vsel %vm213_vm1, %v663_v7, 0.0 }
 0x27d   :  { %716 = vadd.xlane.f32.xlu1 %v715_v19  ;;  %v8589_v19 = vpop.xlane.xlu0 %547 }
 0x27e   :  { %11560 = vst [vmem:[#allocation18_spill] sm:$0xff] %v8589_v19  ;;  %v742_v19 = vsel %vm213_vm1, %v8465_v56, 0.0  ;;  %v733_v56 = vsel %vm213_vm1, %v8457_v20, 0.0 }
 0x27f   :  { %1272 = vrot.lane.b32.xlu0 %v8307_v61, %s8079_s16  ;;  %v8559_v5 = vpop.permute.xlu1 %678 }
 0x280   :  { %v739_v36 = vsel %vm213_vm1, %v8559_v5, 0.0 }
 0x281   :  { %v8593_v14 = vpop.xlane.xlu0 %571 }
 0x282   :  { %11562 = vst [vmem:[#allocation20_spill] sm:$0xff] %v8593_v14 }
 0x283   :  { %1274 = vrot.lane.b32.xlu0 %v8353_v9, %s8079_s16 }
 0x28e   :  { %956 = vrot.lane.b32.xlu1 %v8243_v44, %s8078_s15 }
 0x292   :  { %960 = vrot.lane.b32.xlu1 %v8207_v32, %s8078_s15 }
 0x296   :  { %962 = vrot.lane.b32.xlu1 %v8239_v43, %s8078_s15 }
 0x29a   :  { %964 = vrot.lane.b32.xlu1 %v8371_v13, %s8078_s15 }
 0x29e   :  { %968 = vrot.lane.b32.xlu1 %v8307_v61, %s8078_s15 }
 0x2a2   :  { %972 = vrot.lane.b32.xlu1 %v8255_v46, %s8078_s15  ;;  %725 = vadd.xlane.f32.xlu0 %v724_v21 }
 0x2a6   :  { %976 = vrot.lane.b32.xlu1 %v8203_v31, %s8078_s15 }
 0x2aa   :  { %980 = vrot.lane.b32.xlu1 %v8379_v15, %s8078_s15 }
 0x2ae   :  { %984 = vrot.lane.b32.xlu1 %v8319_v63, %s8078_s15 }
 0x2b0   :  { %v8563_v50 = vpop.xlane.xlu1 %230 }
 0x2b1   :  { %11554 = vst [vmem:[#allocation12_spill] sm:$0xff] %v8563_v50 }
 0x2b2   :  { %1260 = vrot.lane.b32.xlu1 %v8243_v44, %s8079_s16 }
 0x2b4   :  { %v8569_v24 = vpop.xlane.xlu1 %254 }
 0x2b5   :  { %11556 = vst [vmem:[#allocation14_spill] sm:$0xff] %v8569_v24  ;;  %v8598_v24 = vpop.xlane.xlu0 %707 }
 0x2b6   :  { %1264 = vrot.lane.b32.xlu1 %v8207_v32, %s8079_s16 }
 0x2b8   :  { %v8573_v28 = vpop.xlane.xlu1 %430  ;;  %1276 = vrot.lane.b32.xlu0 %v8255_v46, %s8079_s16 }
 0x2bc   :  { %v8579_v1 = vpop.xlane.xlu1 %574 }
 0x2bd   :  { %11558 = vst [vmem:[#allocation16_spill] sm:$0xff] %v8579_v1  ;;  %v721_v1 = vsel %vm213_vm1, %v8506_v23, 0.0  ;;  %v730_v23 = vsel %vm213_vm1, %v8393_v17, 0.0 }
 0x2c0   :  { %v8583_v54 = vpop.xlane.xlu1 %400 }
 0x2c4   :  { %v8587_v7 = vpop.xlane.xlu1 %424 }
 0x2c8   :  { %v8591_v21 = vpop.xlane.xlu1 %544 }
 0x2c9   :  { %11561 = vst [vmem:[#allocation19_spill] sm:$0xff] %v8591_v21  ;;  %v8606_v21 = vpop.xlane.xlu0 %397 }
 0x2cc   :  { %v8595_v2 = vpop.xlane.xlu1 %568 }
 0x2cd   :  { %11563 = vst [vmem:[#allocation21_spill] sm:$0xff] %v8595_v2  ;;  %v727_v2 = vsel %vm213_vm1, %v8488_v35, 0.0 }
 0x2d0   :  { %v8602_v18 = vpop.xlane.xlu1 %704 }
 0x2d7   :  { %737 = vadd.xlane.f32.xlu0 %v736_v34  ;;  %v8612_v34 = vpop.xlane.xlu1 %418 }
 0x2da   :  { %722 = vadd.xlane.f32.xlu1 %v721_v1  ;;  %v8616_v1 = vpop.xlane.xlu0 %421 }
 0x2db   :  { %743 = vadd.xlane.f32.xlu0 %v742_v19  ;;  %v8620_v19 = vpop.xlane.xlu1 %442 }
 0x2dc   :  { %11564 = vst [vmem:[#allocation22_spill] sm:$0xff] %v8620_v19 }
 0x2de   :  { %728 = vadd.xlane.f32.xlu1 %v727_v2  ;;  %v8622_v35 = vpop.xlane.xlu0 %541 }
 0x2df   :  { %746 = vadd.xlane.f32.xlu0 %v745_v33  ;;  %11565 = vst [vmem:[#allocation23_spill] sm:$0xff] %v8622_v35  ;;  %v8624_v2 = vpop.xlane.xlu1 %562 }
 0x2e0   :  { %11566 = vst [vmem:[#allocation24_spill] sm:$0xff] %v8624_v2 }
 0x2e2   :  { %731 = vadd.xlane.f32.xlu1 %v730_v23  ;;  %v8626_v22 = vpop.xlane.xlu0 %565 }
 0x2e3   :  { %11567 = vst [vmem:[#allocation25_spill] sm:$0xff] %v8626_v22  ;;  %v8628_v33 = vpop.xlane.xlu1 %586 }
 0x2e4   :  { %11568 = vst [vmem:[#allocation26_spill] sm:$0xff] %v8628_v33 }
 0x2e6   :  { %734 = vadd.xlane.f32.xlu1 %v733_v56  ;;  %v8630_v14 = vpop.xlane.xlu0 %701 }
 0x2ea   :  { %v8640_v23 = vpop.xlane.xlu0 %406 }
 0x2ee   :  { %v8648_v22 = vpop.xlane.xlu0 %550 }
 0x2ef   :  { %11571 = vst [vmem:[#allocation29_spill] sm:$0xff] %v8648_v22 }
 0x2f2   :  { %v8654_v35 = vpop.xlane.xlu0 %710 }
 0x2f5   :  { %1284 = vrot.lane.b32.xlu0 %v8379_v15, %s8079_s16 }
 0x2f6   :  { %v8634_v17 = vpop.xlane.xlu1 %412  ;;  %v8656_v55 = vpop.xlane.xlu0 %415 }
 0x2f7   :  { %1278 = vrot.lane.b32.xlu1 %v8311_v62, %s8079_s16 }
 0x2fa   :  { %v8638_v20 = vpop.xlane.xlu1 %436  ;;  %v8658_v26 = vpop.xlane.xlu0 %439 }
 0x2fb   :  { %11569 = vst [vmem:[#allocation27_spill] sm:$0xff] %v8638_v20  ;;  %1280 = vrot.lane.b32.xlu1 %v8203_v31, %s8079_s16  ;;  %11573 = vst [vmem:[#allocation31_spill] sm:$0xff] %v8658_v26 }
 0x2fe   :  { %v8644_v56 = vpop.xlane.xlu1 %556  ;;  %v8662_v22 = vpop.xlane.xlu0 %559 }
 0x2ff   :  { %11570 = vst [vmem:[#allocation28_spill] sm:$0xff] %v8644_v56  ;;  %1282 = vrot.lane.b32.xlu1 %v8251_v45, %s8079_s16  ;;  %11574 = vst [vmem:[#allocation32_spill] sm:$0xff] %v8662_v22 }
 0x302   :  { %v8650_v33 = vpop.xlane.xlu1 %580  ;;  %v8665_v20 = vpop.xlane.xlu0 %583 }
 0x303   :  { %11572 = vst [vmem:[#allocation30_spill] sm:$0xff] %v8650_v33  ;;  %11575 = vst [vmem:[#allocation33_spill] sm:$0xff] %v8665_v20 }
 0x306   :  { %v8652_v2 = vpop.xlane.xlu1 %716  ;;  %v8669_v50 = vpop.xlane.xlu0 %409 }
 0x30a   :  { %v957_v53 = vpop.permute.xlu1 %956  ;;  %v8671_v26 = vpop.xlane.xlu0 %433 }
 0x30b   :  { %v1004_v37 = vsel %vm213_vm1, %v957_v53, 0.0  ;;  %11576 = vst [vmem:[#allocation34_spill] sm:$0xff] %v8671_v26 }
 0x30e   :  { %v961_v16 = vpop.permute.xlu1 %960  ;;  %v8673_v53 = vpop.xlane.xlu0 %553 }
 0x30f   :  { %v1010_v56 = vsel %vm213_vm1, %v961_v16, 0.0  ;;  %11577 = vst [vmem:[#allocation35_spill] sm:$0xff] %v8673_v53 }
 0x312   :  { %v963_v19 = vpop.permute.xlu1 %962  ;;  %v8679_v16 = vpop.xlane.xlu0 %577 }
 0x313   :  { %v1013_v33 = vsel %vm213_vm1, %v963_v19, 0.0  ;;  %11578 = vst [vmem:[#allocation36_spill] sm:$0xff] %v8679_v16 }
 0x314   :  { %1005 = vadd.xlane.f32.xlu0 %v1004_v37 }
 0x316   :  { %v8685_v37 = vpop.xlane.xlu0 %713  ;;  %v965_v19 = vpop.permute.xlu1 %964 }
 0x318   :  { %1011 = vadd.xlane.f32.xlu0 %v1010_v56  ;;  %v1016_v56 = vsel %vm213_vm1, %v965_v19, 0.0 }
 0x31a   :  { %v8687_v5 = vpop.xlane.xlu0 %719  ;;  %v969_v53 = vpop.permute.xlu1 %968 }
 0x31b   :  { %v1022_v20 = vsel %vm213_vm1, %v969_v53, 0.0 }
 0x31c   :  { %1014 = vadd.xlane.f32.xlu0 %v1013_v33 }
 0x31e   :  { %v973_v53 = vpop.permute.xlu1 %972 }
 0x323   :  { %740 = vadd.xlane.f32.xlu1 %v739_v36  ;;  %v959_v36 = vpop.permute.xlu0 %958 }
 0x324   :  { %v1007_v26 = vsel %vm213_vm1, %v959_v36, 0.0 }
 0x327   :  { %v967_v33 = vpop.permute.xlu0 %966 }
 0x32b   :  { %v971_v16 = vpop.permute.xlu0 %970 }
 0x32c   :  { %v1025_v22 = vsel %vm213_vm1, %v971_v16, 0.0  ;;  %v1028_v16 = vsel %vm213_vm1, %v973_v53, 0.0 }
 0x332   :  { %796 = vrot.lane.b32.xlu0 %v8243_v44, %s8080_s17 }
 0x334   :  { %1286 = vrot.lane.b32.xlu1 %v8439_v4, %s8079_s16 }
 0x338   :  { %1288 = vrot.lane.b32.xlu1 %v8319_v63, %s8079_s16 }
 0x33c   :  { %1290 = vrot.lane.b32.xlu1 %v8362_v11, %s8079_s16 }
 0x351   :  { %1017 = vadd.xlane.f32.xlu0 %v1016_v56  ;;  %v1019_v56 = vsel %vm213_vm1, %v967_v33, 0.0 }
 0x355   :  { %1023 = vadd.xlane.f32.xlu0 %v1022_v20  ;;  %v975_v20 = vpop.permute.xlu0 %974 }
 0x359   :  { %1026 = vadd.xlane.f32.xlu0 %v1025_v22  ;;  %v977_v22 = vpop.permute.xlu1 %976  ;;  %v979_v36 = vpop.permute.xlu0 %978 }
 0x35a   :  { %v1037_v19 = vsel %vm213_vm1, %v979_v36, 0.0 }
 0x35d   :  { %v981_v53 = vpop.permute.xlu1 %980 }
 0x360   :  { %1008 = vadd.xlane.f32.xlu1 %v1007_v26  ;;  %v1034_v26 = vsel %vm213_vm1, %v977_v22, 0.0  ;;  %v1040_v22 = vsel %vm213_vm1, %v981_v53, 0.0 }
 0x36f   :  { %804 = vrot.lane.b32.xlu0 %v8371_v13, %s8080_s17 }
 0x371   :  { %798 = vrot.lane.b32.xlu1 %v8286_v51, %s8080_s17 }
 0x375   :  { %800 = vrot.lane.b32.xlu1 %v8207_v32, %s8080_s17 }
 0x379   :  { %802 = vrot.lane.b32.xlu1 %v8239_v43, %s8080_s17 }
 0x38e   :  { %1029 = vadd.xlane.f32.xlu0 %v1028_v16  ;;  %v983_v16 = vpop.permute.xlu0 %982 }
 0x392   :  { %1035 = vadd.xlane.f32.xlu0 %v1034_v26  ;;  %v985_v26 = vpop.permute.xlu1 %984  ;;  %v987_v36 = vpop.permute.xlu0 %986 }
 0x393   :  { %v1046_v33 = vsel %vm213_vm1, %v985_v26, 0.0 }
 0x396   :  { %1038 = vadd.xlane.f32.xlu0 %v1037_v19  ;;  %v1049_v19 = vsel %vm213_vm1, %v987_v36, 0.0  ;;  %v1261_v53 = vpop.permute.xlu1 %1260 }
 0x397   :  { %v1308_v26 = vsel %vm213_vm1, %v1261_v53, 0.0 }
 0x39d   :  { %1020 = vadd.xlane.f32.xlu1 %v1019_v56  ;;  %v1031_v56 = vsel %vm213_vm1, %v975_v20, 0.0 }
 0x3ac   :  { %812 = vrot.lane.b32.xlu0 %v8255_v46, %s8080_s17 }
 0x3ae   :  { %806 = vrot.lane.b32.xlu1 %v8428_v0, %s8080_s17 }
 0x3b2   :  { %808 = vrot.lane.b32.xlu1 %v8307_v61, %s8080_s17 }
 0x3b6   :  { %810 = vrot.lane.b32.xlu1 %v8353_v9, %s8080_s17 }
 0x3cb   :  { %1041 = vadd.xlane.f32.xlu0 %v1040_v22  ;;  %v1263_v22 = vpop.permute.xlu0 %1262 }
 0x3cf   :  { %1047 = vadd.xlane.f32.xlu0 %v1046_v33  ;;  %v1265_v33 = vpop.permute.xlu1 %1264  ;;  %v1267_v36 = vpop.permute.xlu0 %1266 }
 0x3d0   :  { %v1314_v20 = vsel %vm213_vm1, %v1265_v33, 0.0 }
 0x3d3   :  { %1050 = vadd.xlane.f32.xlu0 %v1049_v19  ;;  %v1317_v19 = vsel %vm213_vm1, %v1267_v36, 0.0  ;;  %v1269_v53 = vpop.permute.xlu0 %1268 }
 0x3da   :  { %1032 = vadd.xlane.f32.xlu1 %v1031_v56  ;;  %v1043_v56 = vsel %vm213_vm1, %v983_v16, 0.0 }
 0x3e9   :  { %820 = vrot.lane.b32.xlu0 %v8379_v15, %s8080_s17 }
 0x3eb   :  { %814 = vrot.lane.b32.xlu1 %v8311_v62, %s8080_s17 }
 0x3ef   :  { %816 = vrot.lane.b32.xlu1 %v8203_v31, %s8080_s17 }
 0x3f3   :  { %818 = vrot.lane.b32.xlu1 %v8251_v45, %s8080_s17 }
 0x408   :  { %1309 = vadd.xlane.f32.xlu0 %v1308_v26  ;;  %v1271_v26 = vpop.permute.xlu0 %1270 }
 0x40c   :  { %1315 = vadd.xlane.f32.xlu0 %v1314_v20  ;;  %v1273_v33 = vpop.permute.xlu0 %1272  ;;  %v1320_v20 = vsel %vm213_vm1, %v1269_v53, 0.0 }
 0x40d   :  { %v1326_v16 = vsel %vm213_vm1, %v1273_v33, 0.0 }
 0x410   :  { %1318 = vadd.xlane.f32.xlu0 %v1317_v19  ;;  %v1275_v36 = vpop.permute.xlu0 %1274  ;;  %v1311_v19 = vsel %vm213_vm1, %v1263_v22, 0.0 }
 0x417   :  { %1044 = vadd.xlane.f32.xlu1 %v1043_v56  ;;  %v8741_v56 = vpop.xlane.xlu1 %722 }
 0x41b   :  { %v8747_v53 = vpop.xlane.xlu1 %728 }
 0x41f   :  { %v8753_v33 = vpop.xlane.xlu1 %731 }
 0x423   :  { %v8755_v22 = vpop.xlane.xlu1 %734 }
 0x426   :  { %1100 = vrot.lane.b32.xlu0 %v8243_v44, %s8081_s18  ;;  %v1329_v44 = vsel %vm213_vm1, %v1275_v36, 0.0 }
 0x428   :  { %822 = vrot.lane.b32.xlu1 %v8439_v4, %s8080_s17 }
 0x42c   :  { %824 = vrot.lane.b32.xlu1 %v8319_v63, %s8080_s17 }
 0x430   :  { %826 = vrot.lane.b32.xlu1 %v8362_v11, %s8080_s17 }
 0x445   :  { %1321 = vadd.xlane.f32.xlu0 %v1320_v20  ;;  %v8757_v20 = vpop.xlane.xlu0 %725 }
 0x449   :  { %1327 = vadd.xlane.f32.xlu0 %v1326_v16  ;;  %v1279_v16 = vpop.permute.xlu1 %1278  ;;  %v1277_v36 = vpop.permute.xlu0 %1276 }
 0x44d   :  { %1330 = vadd.xlane.f32.xlu0 %v1329_v44  ;;  %v1332_v44 = vsel %vm213_vm1, %v1277_v36, 0.0  ;;  %v8769_v36 = vpop.xlane.xlu0 %737 }
 0x454   :  { %1312 = vadd.xlane.f32.xlu1 %v1311_v19 }
 0x463   :  { %1108 = vrot.lane.b32.xlu0 %v8371_v13, %s8081_s18  ;;  %v1281_v13 = vpop.permute.xlu1 %1280 }
 0x465   :  { %1102 = vrot.lane.b32.xlu1 %v8286_v51, %s8081_s18  ;;  %v1338_v51 = vsel %vm213_vm1, %v1281_v13, 0.0  ;;  %v8773_v13 = vpop.xlane.xlu0 %743 }
 0x467   :  { %v1283_v19 = vpop.permute.xlu1 %1282 }
 0x469   :  { %1104 = vrot.lane.b32.xlu1 %v8207_v32, %s8081_s18  ;;  %v1341_v32 = vsel %vm213_vm1, %v1283_v19, 0.0 }
 0x46d   :  { %1106 = vrot.lane.b32.xlu1 %v8239_v43, %s8081_s18  ;;  %v1323_v43 = vsel %vm213_vm1, %v1271_v26, 0.0  ;;  %v749_v26 = vmax.f32 %v8602_v18, 1e-24 }
 0x46f   :  { %7562 = vrsqrt.f32 %v749_v26 }
 0x482   :  { %1333 = vadd.xlane.f32.xlu0 %v1332_v44  ;;  %v8775_v44 = vpop.xlane.xlu0 %746 }
 0x486   :  { %1339 = vadd.xlane.f32.xlu0 %v1338_v51  ;;  %v1285_v51 = vpop.permute.xlu0 %1284 }
 0x487   :  { %v1344_v19 = vsel %vm213_vm1, %v1285_v51, 0.0 }
 0x48a   :  { %1342 = vadd.xlane.f32.xlu0 %v1341_v32  ;;  %v8783_v25 = vpop.xlane.xlu0 %1005 }
 0x491   :  { %1324 = vadd.xlane.f32.xlu1 %v1323_v43 }
 0x4a0   :  { %1116 = vrot.lane.b32.xlu0 %v8255_v46, %s8081_s18  ;;  %v748_v46 = vmax.f32 %v8630_v14, 1e-24  ;;  %v8786_v14 = vpop.xlane.xlu0 %1011 }
 0x4a2   :  { %1110 = vrot.lane.b32.xlu1 %v8428_v0, %s8081_s18  ;;  %7564 = vrsqrt.f32 %v748_v46  ;;  %v1335_v0 = vsel %vm213_vm1, %v1279_v16, 0.0 }
 0x4a4   :  { %v8792_v16 = vpop.xlane.xlu0 %1014 }
 0x4a6   :  { %1112 = vrot.lane.b32.xlu1 %v8307_v61, %s8081_s18  ;;  %v7563_v61 = vpop.eup %7562 }
 0x4a8   :  { %v797_v26 = vpop.permute.xlu0 %796 }
 0x4aa   :  { %1114 = vrot.lane.b32.xlu1 %v8353_v9, %s8081_s18  ;;  %v781_v9 = vmul.f32 %v7563_v61, %v8278_v48 }
 0x4ac   :  { %v8802_v51 = vpop.xlane.xlu0 %1017 }
 0x4af   :  { %v7565_v32 = vpop.eup %7564 }
 0x4b0   :  { %v780_v43 = vmul.f32 %v7565_v32, %v8226_v38 }
 0x4b2   :  { %v7078_v18 = vpack.i.bf16 %v781_v9, %v780_v43  ;;  %v751_v43 = vmax.f32 %v8654_v35, 1e-24 }
 0x4bf   :  { %1345 = vadd.xlane.f32.xlu0 %v1344_v19  ;;  %v8811_v19 = vpop.xlane.xlu1 %740 }
 0x4c3   :  { %v1287_v32 = vpop.permute.xlu1 %1286 }
 0x4ce   :  { %1336 = vadd.xlane.f32.xlu1 %v1335_v0  ;;  %v444_v0 = vmax.f32 %v8606_v21, 1e-24 }
 0x4d5   :  { %7079 = vrot.lane.b32.xlu0 %v7078_v18, %s8076_s4 }
 0x4d9   :  { %1124 = vrot.lane.b32.xlu0 %v8379_v15, %s8081_s18  ;;  %v8804_v15 = vpop.xlane.xlu0 %1023 }
 0x4dd   :  { %1126 = vrot.lane.b32.xlu0 %v8439_v4, %s8081_s18  ;;  %v8806_v4 = vpop.xlane.xlu0 %1026 }
 0x4df   :  { %1118 = vrot.lane.b32.xlu1 %v8311_v62, %s8081_s18  ;;  %v753_v62 = vmax.f32 %v8652_v2, 1e-24  ;;  %v1289_v2 = vpop.permute.xlu1 %1288 }
 0x4e0   :  { %v1350_v21 = vsel %vm213_vm1, %v1289_v2, 0.0 }
 0x4e1   :  { %1128 = vrot.lane.b32.xlu0 %v8319_v63, %s8081_s18  ;;  %v8808_v46 = vpop.permute.xlu0 %804  ;;  %v752_v63 = vmax.f32 %v8685_v37, 1e-24  ;;  %7566 = vrsqrt.f32 %v753_v62  ;;  %v1347_v37 = vsel %vm213_vm1, %v1287_v32, 0.0 }
 0x4e3   :  { %1120 = vrot.lane.b32.xlu1 %v8203_v31, %s8081_s18  ;;  %v844_v31 = vsel %vm213_vm1, %v797_v26, 0.0  ;;  %7568 = vrsqrt.f32 %v752_v63  ;;  %v1291_v63 = vpop.permute.xlu1 %1290 }
 0x4e4   :  { %v1353_v35 = vsel %vm213_vm1, %v1291_v63, 0.0 }
 0x4e5   :  { %v8814_v61 = vpop.xlane.xlu0 %1029 }
 0x4e7   :  { %1122 = vrot.lane.b32.xlu1 %v8251_v45, %s8081_s18  ;;  %v445_v45 = vmax.f32 %v8583_v54, 1e-24  ;;  %v750_v54 = vmax.f32 %v8598_v24, 1e-24  ;;  %v11471_v24 = vmov 0.0  }
 0x4e8   :  { %6657 = vmatprep.subr.bf16.mxu1 %v11471_v24  ;;  %6681 = vmatprep.subr.bf16.mxu0 %v11471_v24 }
 0x4e9   :  { %7570 = vrsqrt.f32 %v445_v45  ;;  %v8819_v9 = vpop.xlane.xlu0 %1035  ;;  %6659 = vmatprep.mubr.msk.bf16.mxu1 %vm8083_vm2, %v11471_v24  ;;  %6683 = vmatprep.mubr.msk.bf16.mxu0 %vm8083_vm2, %v11471_v24 }
 0x4ea   :  { %7572 = vrsqrt.f32 %v444_v0 }
 0x4eb   :  { %7574 = vrsqrt.f32 %v751_v43 }
 0x4ec   :  { %7576 = vrsqrt.f32 %v750_v54 }
 0x4ed   :  { %v8823_v18 = vpop.xlane.xlu0 %1038 }
 0x4ee   :  { %v7567_v26 = vpop.eup %7566 }
 0x4f0   :  { %v7569_v62 = vpop.eup %7568 }
 0x4f1   :  { %v8828_v0 = vpop.permute.xlu0 %812  ;;  %v784_v32 = vmul.f32 %v7569_v62, %v8358_v10 }
 0x4f5   :  { %v8835_v54 = vpop.xlane.xlu0 %1041 }
 0x4f6   :  { %v7571_v45 = vpop.eup %7570 }
 0x4f7   :  { %v477_v2 = vmul.f32 %v7571_v45, %v8278_v48 }
 0x4f9   :  { %v8842_v63 = vpop.xlane.xlu0 %1047 }
 0x4fa   :  { %11579 = vst [vmem:[#allocation37_spill] sm:$0xff] %v8842_v63 }
 0x500   :  { %845 = vadd.xlane.f32.xlu0 %v844_v31  ;;  %v785_v31 = vmul.f32 %v7567_v26, %v8418_v52 }
 0x502   :  { %v7088_v43 = vpack.i.bf16 %v785_v31, %v784_v32  ;;  %v8848_v32 = vpop.xlane.xlu0 %1050 }
 0x503   :  { %11580 = vst [vmem:[#allocation38_spill] sm:$0xff] %v8848_v32 }
 0x50b   :  { %1348 = vadd.xlane.f32.xlu1 %v1347_v37  ;;  %v7573_v37 = vpop.eup %7572 }
 0x50c   :  { %v476_v26 = vmul.f32 %v7573_v37, %v8226_v38  ;;  %v7575_v62 = vpop.eup %7574 }
 0x50d   :  { %v7577_v31 = vpop.eup %7576  ;;  %v783_v45 = vmul.f32 %v7575_v62, %v8229_v39  ;;  %v756_v62 = vmax.f32 %v8757_v20, 1e-24 }
 0x50f   :  { %1351 = vadd.xlane.f32.xlu1 %v1350_v21  ;;  %v1980_v21 = vpack.c.bf16 %v477_v2, %v476_v26 }
 0x513   :  { %1354 = vadd.xlane.f32.xlu1 %v1353_v35  ;;  %v782_v35 = vmul.f32 %v7577_v31, %v8196_v29  ;;  %v856_v31 = vsel %vm213_vm1, %v8808_v46, 0.0 }
 0x515   :  { %v7083_v37 = vpack.i.bf16 %v783_v45, %v782_v35  ;;  %v447_v45 = vmax.f32 %v8640_v23, 1e-24  ;;  %v446_v35 = vmax.f32 %v8581_v27, 1e-24  ;;  %v755_v27 = vmax.f32 %v8741_v56, 1e-24 }
 0x516   :  { %7089 = vrot.lane.b32.xlu0 %v7088_v43, %s8076_s4  ;;  %v8851_v43 = vpop.permute.xlu0 %820 }
 0x51a   :  { %2013 = vrot.lane.b32.xlu0 %v1980_v21, %s8075_s0  ;;  %v8855_v2 = vpop.xlane.xlu0 %1309  ;;  %v757_v21 = vmax.f32 %v8747_v53, 1e-24 }
 0x51b   :  { %11581 = vst [vmem:[#allocation39_spill] sm:$0xff] %v8855_v2 }
 0x51c   :  { %7578 = vrsqrt.f32 %v757_v21 }
 0x51d   :  { %7580 = vrsqrt.f32 %v756_v62 }
 0x51e   :  { %v8857_v26 = vpop.xlane.xlu0 %1315  ;;  %7582 = vrsqrt.f32 %v447_v45 }
 0x51f   :  { %11582 = vst [vmem:[#allocation40_spill] sm:$0xff] %v8857_v26  ;;  %7584 = vrsqrt.f32 %v446_v35  ;;  %v754_v35 = vmax.f32 %v8687_v5, 1e-24 }
 0x520   :  { %7586 = vrsqrt.f32 %v755_v27 }
 0x521   :  { %7588 = vrsqrt.f32 %v754_v35 }
 0x522   :  { %v8861_v24 = vpop.xlane.xlu0 %1318 }
 0x523   :  { %11583 = vst [vmem:[#allocation41_spill] sm:$0xff] %v8861_v24 }
 0x524   :  { %7084 = vrot.lane.b32.xlu1 %v7083_v37, %s8076_s4  ;;  %v8869_v37 = vpop.xlane.xlu1 %1008 }
 0x528   :  { %1130 = vrot.lane.b32.xlu1 %v8362_v11, %s8081_s18  ;;  %v8867_v11 = vpop.permute.xlu0 %1100  ;;  %v799_v20 = vpop.permute.xlu1 %798 }
 0x529   :  { %v7579_v26 = vpop.eup %7578  ;;  %v847_v62 = vsel %vm213_vm1, %v799_v20, 0.0 }
 0x52a   :  { %v7581_v46 = vpop.eup %7580  ;;  %v789_v23 = vmul.f32 %v7579_v26, %v8298_v59 }
 0x52b   :  { %v7583_v21 = vpop.eup %7582  ;;  %v788_v45 = vmul.f32 %v7581_v46, %v8232_v41 }
 0x52c   :  { %v8871_v53 = vpop.xlane.xlu0 %1321  ;;  %v7585_v2 = vpop.eup %7584 }
 0x52d   :  { %11584 = vst [vmem:[#allocation42_spill] sm:$0xff] %v8871_v53  ;;  %v7098_v63 = vpack.i.bf16 %v789_v23, %v788_v45  ;;  %v478_v56 = vmul.f32 %v7585_v2, %v8196_v29 }
 0x530   :  { %v8873_v24 = vpop.xlane.xlu0 %1327 }
 0x531   :  { %11585 = vst [vmem:[#allocation43_spill] sm:$0xff] %v8873_v24  ;;  %v479_v24 = vmul.f32 %v7583_v21, %v8229_v39  ;;  %v7587_v21 = vpop.eup %7586 }
 0x533   :  { %v1981_v20 = vpack.c.bf16 %v479_v24, %v478_v56  ;;  %v868_v56 = vsel %vm213_vm1, %v8828_v0, 0.0 }
 0x534   :  { %v8880_v53 = vpop.xlane.xlu0 %1330 }
 0x535   :  { %11586 = vst [vmem:[#allocation44_spill] sm:$0xff] %v8880_v53 }
 0x538   :  { %v8886_v46 = vpop.permute.xlu0 %1108 }
 0x539   :  { %857 = vadd.xlane.f32.xlu0 %v856_v31  ;;  %v801_v31 = vpop.permute.xlu1 %800 }
 0x53a   :  { %v850_v26 = vsel %vm213_vm1, %v801_v31, 0.0  ;;  %v787_v31 = vmul.f32 %v7587_v21, %v8346_v6  ;;  %v762_v21 = vmax.f32 %v8773_v13, 1e-24 }
 0x53c   :  { %v8890_v23 = vpop.xlane.xlu0 %1333 }
 0x53d   :  { %v803_v32 = vpop.permute.xlu1 %802  ;;  %11587 = vst [vmem:[#allocation45_spill] sm:$0xff] %v8890_v23 }
 0x53e   :  { %v853_v5 = vsel %vm213_vm1, %v803_v32, 0.0  ;;  %v761_v32 = vmax.f32 %v8811_v19, 1e-24  ;;  %v262_v19 = vmax.f32 %v8414_v47, 1e-24 }
 0x53f   :  { %v759_v47 = vmax.f32 %v8755_v22, 1e-24 }
 0x540   :  { %v8892_v27 = vpop.xlane.xlu0 %1339  ;;  %7590 = vrsqrt.f32 %v761_v32 }
 0x54c   :  { %848 = vadd.xlane.f32.xlu1 %v847_v62  ;;  %v8896_v62 = vpop.xlane.xlu0 %1342 }
 0x54f   :  { %7099 = vrot.lane.b32.xlu0 %v7098_v63, %s8076_s4  ;;  %v7589_v63 = vpop.eup %7588 }
 0x550   :  { %851 = vadd.xlane.f32.xlu1 %v850_v26  ;;  %v786_v2 = vmul.f32 %v7589_v63, %v8295_v57  ;;  %v8899_v45 = vpop.permute.xlu0 %1116  ;;  %v760_v26 = vmax.f32 %v8769_v36, 1e-24  ;;  %v263_v36 = vmax.f32 %v8435_v3, 1e-24  ;;  %v7591_v0 = vpop.eup %7590 }
 0x551   :  { %v793_v32 = vmul.f32 %v7591_v0, %v8424_v58 }
 0x552   :  { %v7093_v24 = vpack.i.bf16 %v787_v31, %v786_v2  ;;  %7592 = vrsqrt.f32 %v760_v26  ;;  %v8913_v31 = vpop.xlane.xlu1 %1020 }
 0x553   :  { %2063 = vrot.lane.b32.xlu0 %v1981_v20, %s8075_s0  ;;  %v763_v20 = vmax.f32 %v8775_v44, 1e-24 }
 0x554   :  { %854 = vadd.xlane.f32.xlu1 %v853_v5  ;;  %v8901_v35 = vpop.xlane.xlu0 %1345 }
 0x555   :  { %11588 = vst [vmem:[#allocation46_spill] sm:$0xff] %v8901_v35  ;;  %7594 = vrsqrt.f32 %v763_v20 }
 0x556   :  { %7596 = vrsqrt.f32 %v762_v21 }
 0x557   :  { %7598 = vrsqrt.f32 %v263_v36 }
 0x558   :  { %v8908_v5 = vpop.permute.xlu0 %7079  ;;  %7600 = vrsqrt.f32 %v262_v19 }
 0x559   :  { %7602 = vrsqrt.f32 %v759_v47  ;;  %v11591_v47 = vmov 0.0  }
 0x55c   :  { %v8911_v63 = vpop.permute.xlu0 %1124 }
 0x55f   :  { %v7593_v44 = vpop.eup %7592 }
 0x560   :  { %v8917_v2 = vpop.permute.xlu0 %1126  ;;  %v792_v26 = vmul.f32 %v7593_v44, %v8367_v12  ;;  %v758_v44 = vmax.f32 %v8753_v33, 1e-24 }
 0x562   :  { %v7595_v13 = vpop.eup %7594  ;;  %v7108_v21 = vpack.i.bf16 %v793_v32, %v792_v26  ;;  %7604 = vrsqrt.f32 %v758_v44 }
 0x563   :  { %v795_v3 = vmul.f32 %v7595_v13, %v8349_v8 }
 0x564   :  { %v8921_v20 = vpop.permute.xlu0 %1128 }
 0x565   :  { %7094 = vrot.lane.b32.xlu1 %v7093_v24, %s8076_s4  ;;  %v807_v24 = vpop.permute.xlu1 %806 }
 0x566   :  { %v859_v36 = vsel %vm213_vm1, %v807_v24, 0.0 }
 0x569   :  { %v809_v35 = vpop.permute.xlu1 %808 }
 0x56a   :  { %v862_v32 = vsel %vm213_vm1, %v809_v35, 0.0 }
 0x56d   :  { %v811_v26 = vpop.permute.xlu1 %810 }
 0x572   :  { %869 = vadd.xlane.f32.xlu0 %v868_v56  ;;  %v7597_v56 = vpop.eup %7596 }
 0x573   :  { %v794_v19 = vmul.f32 %v7597_v56, %v8303_v60  ;;  %v7599_v13 = vpop.eup %7598 }
 0x574   :  { %v7601_v24 = vpop.eup %7600  ;;  %v295_v56 = vmul.f32 %v7599_v13, %v8278_v48  ;;  %v8947_v13 = vpop.xlane.xlu1 %1032 }
 0x575   :  { %v7113_v23 = vpack.i.bf16 %v795_v3, %v794_v19  ;;  %v294_v33 = vmul.f32 %v7601_v24, %v8226_v38 }
 0x588   :  { %7109 = vrot.lane.b32.xlu0 %v7108_v21, %s8076_s4  ;;  %v865_v21 = vsel %vm213_vm1, %v811_v26, 0.0 }
 0x589   :  { %860 = vadd.xlane.f32.xlu1 %v859_v36  ;;  %v8928_v0 = vpop.xlane.xlu0 %845 }
 0x58a   :  { %11589 = vst [vmem:[#allocation47_spill] sm:$0xff] %v8928_v0 }
 0x58c   :  { %7114 = vrot.lane.b32.xlu0 %v7113_v23, %s8076_s4  ;;  %v8942_v23 = vld [vmem:[%s11466_s2] ss:$0 sm:$0xff] }
 0x58d   :  { %863 = vadd.xlane.f32.xlu1 %v862_v32  ;;  %v8933_v22 = vpop.permute.xlu0 %7089  ;;  %v317_v35 = vmul.f32 %v8942_v23, %v295_v56  ;;  %v316_v19 = vmul.f32 %v8942_v23, %v294_v33  ;;  %v7603_v32 = vpop.eup %7602  ;;  %v1053_v33 = vmax.f32 %v8869_v37, 1e-24 }
 0x58e   :  { %11590 = vst [vmem:[#allocation48_spill] sm:$0xff] %v8933_v22  ;;  %v7605_v26 = vpop.eup %7604  ;;  %v791_v24 = vmul.f32 %v7603_v32, %v8235_v42  ;;  %v265_v32 = vmax.f32 %v8460_v49, 1e-24  ;;  %v449_v49 = vmax.f32 %v8634_v17, 1e-24 }
 0x58f   :  { %v1948_v44 = vpack.c.bf16 %v317_v35, %v316_v19  ;;  %v1052_v35 = vmax.f32 %v8783_v25, 1e-24  ;;  %v880_v19 = vsel %vm213_vm1, %v8851_v43, 0.0  ;;  %7606 = vrsqrt.f32 %v1053_v33 }
 0x591   :  { %866 = vadd.xlane.f32.xlu1 %v865_v21  ;;  %v2014_v36 = vpop.permute.xlu0 %2013  ;;  %v790_v21 = vmul.f32 %v7605_v26, %v8199_v30  ;;  %7608 = vrsqrt.f32 %v1052_v35 }
 0x592   :  { %v2019_v3 = vsel %vm213_vm1, %v2014_v36, 0  ;;  %v815_v36 = vpop.permute.xlu1 %814  ;;  %7610 = vrsqrt.f32 %v265_v32 }
 0x593   :  { %6658 = vmatpush3.bf16.xpose.msra.mxu1 %v2019_v3  ;;  %v7103_v56 = vpack.i.bf16 %v791_v24, %v790_v21  ;;  %v264_v24 = vmax.f32 %v8412_v40, 1e-24  ;;  %v871_v40 = vsel %vm213_vm1, %v815_v36, 0.0 }
 0x594   :  { %6663 = vmatprep.subr.bf16.mxu1 %v11591_v47 }
 0x595   :  { %7612 = vrsqrt.f32 %v264_v24 }
 0x596   :  { %v817_v3 = vpop.permute.xlu1 %816  ;;  %7614 = vrsqrt.f32 %v449_v49 }
 0x59a   :  { %6660 = vmatmul.mubr.msk.bf16.vlgmr.msra.gmra.mxu1 %vm213_vm1, %v1948_v44  ;;  %v819_v44 = vpop.permute.xlu1 %818 }
 0x59b   :  { %6665 = vmatprep.mubr.msk.bf16.mxu1 %vm8083_vm2, %v11591_v47 }
 0x59c   :  { %v7607_v21 = vpop.eup %7606 }
 0x59d   :  { %v1085_v43 = vmul.f32 %v7607_v21, %v8278_v48  ;;  %v448_v21 = vmax.f32 %v8669_v50, 1e-24 }
 0x59e   :  { %v8959_v0 = vpop.xlane.xlu1 %1044  ;;  %v7609_v37 = vpop.eup %7608 }
 0x59f   :  { %v7611_v32 = vpop.eup %7610  ;;  %7616 = vrsqrt.f32 %v448_v21 }
 0x5a2   :  { %7104 = vrot.lane.b32.xlu1 %v7103_v56, %s8076_s4  ;;  %v8962_v26 = vpop.permute.xlu1 %822  ;;  %v1084_v56 = vmul.f32 %v7609_v37, %v8226_v38  ;;  %v7613_v53 = vpop.eup %7612  ;;  %v874_v37 = vsel %vm213_vm1, %v817_v3, 0.0 }
 0x5a3   :  { %v296_v36 = vmul.f32 %v7613_v53, %v8196_v29 }
 0x5a4   :  { %v7118_v33 = vpack.i.bf16 %v1085_v43, %v1084_v56  ;;  %v297_v43 = vmul.f32 %v7611_v32, %v8229_v39  ;;  %v7615_v32 = vpop.eup %7614 }
 0x5a5   :  { %v318_v50 = vmul.f32 %v8942_v23, %v296_v36 }
 0x5a6   :  { %v8965_v25 = vpop.permute.xlu1 %824 }
 0x5aa   :  { %v827_v35 = vpop.permute.xlu1 %826 }
 0x5ab   :  { %881 = vadd.xlane.f32.xlu0 %v880_v19 }
 0x5ac   :  { %v7617_v53 = vpop.eup %7616 }
 0x5ae   :  { %v8973_v22 = vpop.xlane.xlu1 %1312 }
 0x5b2   :  { %v1103_v17 = vpop.permute.xlu1 %1102 }
 0x5b6   :  { %v1105_v3 = vpop.permute.xlu1 %1104 }
 0x5ba   :  { %v8990_v21 = vpop.permute.xlu1 %1106 }
 0x5c1   :  { %7119 = vrot.lane.b32.xlu0 %v7118_v33, %s8080_s17 }
 0x5c2   :  { %v8970_v19 = vpop.xlane.xlu0 %857 }
 0x5c3   :  { %11592 = vst [vmem:[#allocation49_spill] sm:$0xff] %v8970_v19  ;;  %v319_v19 = vmul.f32 %v8942_v23, %v297_v43  ;;  %v480_v43 = vmul.f32 %v7617_v53, %v8358_v10 }
 0x5c5   :  { %v1949_v49 = vpack.c.bf16 %v319_v19, %v318_v50  ;;  %v889_v19 = vsel %vm213_vm1, %v827_v35, 0.0  ;;  %v1151_v50 = vsel %vm213_vm1, %v1103_v17, 0.0 }
 0x5c6   :  { %872 = vadd.xlane.f32.xlu1 %v871_v40  ;;  %v8976_v24 = vpop.permute.xlu0 %7099  ;;  %v877_v40 = vsel %vm213_vm1, %v819_v44, 0.0  ;;  %v481_v44 = vmul.f32 %v7615_v32, %v8418_v52 }
 0x5c7   :  { %11593 = vst [vmem:[#allocation50_spill] sm:$0xff] %v8976_v24 }
 0x5ca   :  { %875 = vadd.xlane.f32.xlu1 %v874_v37  ;;  %v2064_v56 = vpop.permute.xlu0 %2063  ;;  %v8993_v37 = vpop.xlane.xlu1 %1324 }
 0x5cb   :  { %v2069_v33 = vsel %vm213_vm1, %v2064_v56, 0  ;;  %v1982_v56 = vpack.c.bf16 %v481_v44, %v480_v43 }
 0x5cc   :  { %6664 = vmatpush3.bf16.xpose.msra.mxu1 %v2069_v33  ;;  %v1057_v33 = vmax.f32 %v8913_v31, 1e-24 }
 0x5cd   :  { %6669 = vmatprep.subr.bf16.mxu1 %v11591_v47 }
 0x5ce   :  { %878 = vadd.xlane.f32.xlu1 %v877_v40  ;;  %v8999_v36 = vpop.permute.xlu1 %1110  ;;  %v1056_v40 = vmax.f32 %v8802_v51, 1e-24  ;;  %7618 = vrsqrt.f32 %v1057_v33  ;;  %v1054_v33 = vmax.f32 %v8786_v14, 1e-24 }
 0x5d0   :  { %7620 = vrsqrt.f32 %v1056_v40  ;;  %v451_v40 = vmax.f32 %v8612_v34, 1e-24 }
 0x5d3   :  { %6666 = vmatmul.mubr.msk.bf16.vlgmr.msra.gmra.mxu1 %vm213_vm1, %v1949_v49  ;;  %v9003_v49 = vpop.permute.xlu1 %1112 }
 0x5d4   :  { %6671 = vmatprep.mubr.msk.bf16.mxu1 %vm8083_vm2, %v11591_v47 }
 0x5d7   :  { %v9005_v32 = vpop.permute.xlu1 %1114 }
 0x5db   :  { %v7619_v53 = vpop.eup %7618  ;;  %v9007_v44 = vpop.xlane.xlu1 %1336 }
 0x5dc   :  { %v1089_v31 = vmul.f32 %v7619_v53, %v8418_v52 }
 0x5dd   :  { %v7621_v35 = vpop.eup %7620 }
 0x5de   :  { %v1088_v43 = vmul.f32 %v7621_v35, %v8358_v10  ;;  %v450_v35 = vmax.f32 %v8656_v55, 1e-24 }
 0x5df   :  { %2113 = vrot.lane.b32.xlu1 %v1982_v56, %s8075_s0  ;;  %v9011_v56 = vpop.permute.xlu1 %1118 }
 0x5e0   :  { %890 = vadd.xlane.f32.xlu0 %v889_v19  ;;  %v7128_v51 = vpack.i.bf16 %v1089_v31, %v1088_v43  ;;  %v1055_v19 = vmax.f32 %v8792_v16, 1e-24  ;;  %v886_v31 = vsel %vm213_vm1, %v8965_v25, 0.0  ;;  %v1154_v25 = vsel %vm213_vm1, %v1105_v3, 0.0 }
 0x5e2   :  { %7622 = vrsqrt.f32 %v1055_v19 }
 0x5e3   :  { %v9014_v17 = vpop.permute.xlu1 %1120  ;;  %7624 = vrsqrt.f32 %v1054_v33 }
 0x5e4   :  { %1152 = vadd.xlane.f32.xlu0 %v1151_v50  ;;  %v883_v50 = vsel %vm213_vm1, %v8962_v26, 0.0  ;;  %7626 = vrsqrt.f32 %v451_v40 }
 0x5e5   :  { %7628 = vrsqrt.f32 %v450_v35 }
 0x5e7   :  { %v9021_v53 = vpop.permute.xlu1 %1122 }
 0x5eb   :  { %v9026_v43 = vpop.xlane.xlu1 %1348 }
 0x5ec   :  { %11594 = vst [vmem:[#allocation51_spill] sm:$0xff] %v9026_v43  ;;  %v1060_v43 = vmax.f32 %v8814_v61, 1e-24 }
 0x5ef   :  { %v9028_v14 = vpop.xlane.xlu1 %1351  ;;  %v7623_v34 = vpop.eup %7622 }
 0x5f0   :  { %v7625_v16 = vpop.eup %7624  ;;  %v1087_v26 = vmul.f32 %v7623_v34, %v8229_v39 }
 0x5f1   :  { %v1086_v55 = vmul.f32 %v7625_v16, %v8196_v29  ;;  %v1160_v16 = vsel %vm213_vm1, %v8886_v46, 0.0 }
 0x5f3   :  { %v9031_v19 = vpop.xlane.xlu1 %1354  ;;  %v7123_v40 = vpack.i.bf16 %v1087_v26, %v1086_v55 }
 0x5f7   :  { %v9039_v24 = vpop.permute.xlu1 %7084 }
 0x5fa   :  { %7129 = vrot.lane.b32.xlu0 %v7128_v51, %s8080_s17  ;;  %v7627_v51 = vpop.eup %7626 }
 0x5fb   :  { %v7629_v33 = vpop.eup %7628  ;;  %v9045_v26 = vpop.permute.xlu1 %1130 }
 0x5fc   :  { %v482_v35 = vmul.f32 %v7629_v33, %v8295_v57 }
 0x5ff   :  { %v9047_v3 = vpop.xlane.xlu1 %848 }
 0x600   :  { %11595 = vst [vmem:[#allocation52_spill] sm:$0xff] %v9047_v3 }
 0x603   :  { %884 = vadd.xlane.f32.xlu1 %v883_v50  ;;  %v483_v50 = vmul.f32 %v7627_v51, %v8346_v6  ;;  %v9049_v51 = vpop.xlane.xlu1 %851 }
 0x605   :  { %v1983_v34 = vpack.c.bf16 %v483_v50, %v482_v35  ;;  %v1058_v35 = vmax.f32 %v8804_v15, 1e-24  ;;  %v11598_v15 = vld [vmem:[#allocation17_spill] sm:$0xff] }
 0x607   :  { %887 = vadd.xlane.f32.xlu1 %v886_v31  ;;  %v1061_v31 = vmax.f32 %v8947_v13, 1e-24 }
 0x609   :  { %7630 = vrsqrt.f32 %v1061_v31  ;;  %v453_v31 = vmax.f32 %v8587_v7, 1e-24 }
 0x60a   :  { %7632 = vrsqrt.f32 %v1060_v43 }
 0x616   :  { %v7631_v13 = vpop.eup %7630 }
 0x617   :  { %v7633_v55 = vpop.eup %7632  ;;  %v1093_v33 = vmul.f32 %v7631_v13, %v8298_v59  ;;  %v452_v13 = vmax.f32 %v8616_v1, 1e-24 }
 0x618   :  { %7124 = vrot.lane.b32.xlu1 %v7123_v40, %s8080_s17  ;;  %v9052_v40 = vpop.xlane.xlu1 %854  ;;  %v1092_v61 = vmul.f32 %v7633_v55, %v8232_v41  ;;  %v455_v55 = vmax.f32 %v8573_v28, 1e-24 }
 0x619   :  { %1155 = vadd.xlane.f32.xlu0 %v1154_v25  ;;  %v1059_v25 = vmax.f32 %v8806_v4, 1e-24  ;;  %v1157_v4 = vsel %vm213_vm1, %v8990_v21, 0.0 }
 0x61a   :  { %v7138_v50 = vpack.i.bf16 %v1093_v33, %v1092_v61  ;;  %v454_v33 = vmax.f32 %v11598_v15, 1e-24  ;;  %v11599_v61 = vld [vmem:[#allocation12_spill] sm:$0xff]  ;;  %v11603_v15 = vld [vmem:[#allocation34_spill] sm:$0xff] }
 0x61b   :  { %7634 = vrsqrt.f32 %v1059_v25 }
 0x61c   :  { %2163 = vrot.lane.b32.xlu1 %v1983_v34, %s8075_s0  ;;  %v9056_v46 = vpop.permute.xlu1 %7094  ;;  %7636 = vrsqrt.f32 %v1058_v35 }
 0x61d   :  { %1161 = vadd.xlane.f32.xlu0 %v1160_v16  ;;  %11596 = vst [vmem:[#allocation53_spill] sm:$0xff] %v9056_v46  ;;  %v1148_v16 = vsel %vm213_vm1, %v8867_v11, 0.0  ;;  %7638 = vrsqrt.f32 %v453_v31  ;;  %v11600_v11 = vld [vmem:[#allocation13_spill] sm:$0xff]  ;;  %v11601_v31 = vld [vmem:[#allocation27_spill] sm:$0xff] }
 0x61e   :  { %7640 = vrsqrt.f32 %v452_v13  ;;  %v266_v25 = vmax.f32 %v11600_v11, 1e-24  ;;  %v457_v21 = vmax.f32 %v11601_v31, 1e-24 }
 0x61f   :  { %7642 = vrsqrt.f32 %v455_v55  ;;  %v1166_v55 = vsel %vm213_vm1, %v9003_v49, 0.0 }
 0x620   :  { %v9058_v43 = vpop.xlane.xlu1 %860  ;;  %7644 = vrsqrt.f32 %v454_v33 }
 0x621   :  { %11597 = vst [vmem:[#allocation54_spill] sm:$0xff] %v9058_v43  ;;  %v456_v43 = vmax.f32 %v11603_v15, 1e-24 }
 0x624   :  { %v9063_v34 = vpop.xlane.xlu1 %863 }
 0x628   :  { %v9072_v7 = vpop.xlane.xlu1 %866  ;;  %v7635_v28 = vpop.eup %7634 }
 0x629   :  { %v7637_v35 = vpop.eup %7636  ;;  %v1091_v13 = vmul.f32 %v7635_v28, %v8346_v6 }
 0x62a   :  { %v1090_v33 = vmul.f32 %v7637_v35, %v8295_v57 }
 0x62c   :  { %v9076_v1 = vpop.permute.xlu1 %7104  ;;  %v7133_v11 = vpack.i.bf16 %v1091_v13, %v1090_v33 }
 0x633   :  { %7139 = vrot.lane.b32.xlu0 %v7138_v50, %s8080_s17  ;;  %v267_v50 = vmax.f32 %v11599_v61, 1e-24 }
 0x635   :  { %7646 = vrsqrt.f32 %v267_v50 }
 0x636   :  { %7648 = vrsqrt.f32 %v266_v25 }
 0x637   :  { %7650 = vrsqrt.f32 %v457_v21 }
 0x638   :  { %7652 = vrsqrt.f32 %v456_v43 }
 0x640   :  { %1149 = vadd.xlane.f32.xlu1 %v1148_v16 }
 0x644   :  { %1158 = vadd.xlane.f32.xlu1 %v1157_v4  ;;  %v7639_v4 = vpop.eup %7638 }
 0x645   :  { %v7641_v61 = vpop.eup %7640  ;;  %v485_v25 = vmul.f32 %v7639_v4, %v8298_v59 }
 0x646   :  { %v7643_v31 = vpop.eup %7642  ;;  %v484_v28 = vmul.f32 %v7641_v61, %v8232_v41 }
 0x647   :  { %v7645_v15 = vpop.eup %7644  ;;  %v487_v35 = vmul.f32 %v7643_v31, %v8235_v42 }
 0x648   :  { %v1984_v49 = vpack.c.bf16 %v485_v25, %v484_v28  ;;  %v486_v13 = vmul.f32 %v7645_v15, %v8199_v30 }
 0x64a   :  { %v1985_v33 = vpack.c.bf16 %v487_v35, %v486_v13 }
 0x64f   :  { %v9079_v16 = vpop.xlane.xlu1 %872 }
 0x650   :  { %11602 = vst [vmem:[#allocation17_spill] sm:$0xff] %v9079_v16  ;;  %v7647_v16 = vpop.eup %7646 }
 0x651   :  { %v7649_v21 = vpop.eup %7648  ;;  %v299_v43 = vmul.f32 %v7647_v16, %v8418_v52 }
 0x652   :  { %1167 = vadd.xlane.f32.xlu0 %v1166_v55  ;;  %v298_v46 = vmul.f32 %v7649_v21, %v8358_v10  ;;  %v7651_v28 = vpop.eup %7650 }
 0x653   :  { %v9086_v50 = vpop.xlane.xlu1 %875  ;;  %v321_v31 = vmul.f32 %v8942_v23, %v299_v43  ;;  %v489_v13 = vmul.f32 %v7651_v28, %v8424_v58  ;;  %v1063_v43 = vmax.f32 %v8823_v18, 1e-24 }
 0x654   :  { %v320_v16 = vmul.f32 %v8942_v23, %v298_v46 }
 0x655   :  { %7134 = vrot.lane.b32.xlu1 %v7133_v11, %s8080_s17  ;;  %7654 = vrsqrt.f32 %v1063_v43 }
 0x656   :  { %v1950_v35 = vpack.c.bf16 %v321_v31, %v320_v16  ;;  %v11607_v31 = vld [vmem:[#allocation31_spill] sm:$0xff] }
 0x657   :  { %v9091_v3 = vpop.xlane.xlu1 %878  ;;  %v458_v28 = vmax.f32 %v11607_v31, 1e-24 }
 0x659   :  { %2213 = vrot.lane.b32.xlu1 %v1984_v49, %s8075_s0  ;;  %v7653_v49 = vpop.eup %7652 }
 0x65a   :  { %v9096_v55 = vpop.f32.mrf.mxu1  ;;  %v488_v21 = vmul.f32 %v7653_v49, %v8367_v12  ;;  %v1169_v49 = vsel %vm213_vm1, %v9005_v32, 0.0  ;;  %v1181_v32 = vsel %vm213_vm1, %v9021_v53, 0.0 }
 0x65b   :  { %11604 = vst [vmem:[#allocation12_spill] sm:$0xff] %v9096_v55  ;;  %v2114_v4 = vpop.permute.xlu1 %2113  ;;  %v11621_v55 = vld [vmem:[#allocation24_spill] sm:$0xff] }
 0x65c   :  { %v2119_v61 = vsel %vm213_vm1, %v2114_v4, 0  ;;  %v6661_v11 = vpop.f32.mrf.mxu1  ;;  %v1986_v4 = vpack.c.bf16 %v489_v13, %v488_v21 }
 0x65d   :  { %2263 = vrot.lane.b32.xlu1 %v1985_v33, %s8075_s0  ;;  %6670 = vmatpush3.bf16.xpose.msra.mxu1 %v2119_v61  ;;  %v1062_v33 = vmax.f32 %v8819_v9, 1e-24  ;;  %v11606_v61 = vld [vmem:[#allocation22_spill] sm:$0xff]  ;;  %v1163_v11 = vsel %vm213_vm1, %v8999_v36, 0.0  ;;  %v1175_v9 = vsel %vm213_vm1, %v9011_v56, 0.0  ;;  %v1178_v36 = vsel %vm213_vm1, %v9014_v17, 0.0 }
 0x65e   :  { %v9102_v25 = vpop.f32.mrf.mxu1  ;;  %6675 = vmatprep.subr.bf16.mxu1 %v11591_v47  ;;  %v459_v46 = vmax.f32 %v11606_v61, 1e-24 }
 0x65f   :  { %11605 = vst [vmem:[#allocation13_spill] sm:$0xff] %v9102_v25  ;;  %7656 = vrsqrt.f32 %v1062_v33 }
 0x660   :  { %v6662_v15 = vpop.f32.mrf.mxu1  ;;  %7658 = vrsqrt.f32 %v459_v46 }
 0x661   :  { %v11608_v15 = vld [vmem:[#allocation10_spill] sm:$0xff]  ;;  %7660 = vrsqrt.f32 %v458_v28 }
 0x662   :  { %v269_v16 = vmax.f32 %v11608_v15, 1e-24  ;;  %v7655_v21 = vpop.eup %7654 }
 0x663   :  { %v1095_v33 = vmul.f32 %v7655_v21, %v8235_v42 }
 0x664   :  { %6672 = vmatmul.mubr.msk.bf16.vlgmr.msra.gmra.mxu1 %vm213_vm1, %v1950_v35  ;;  %v11609_v35 = vld [vmem:[#allocation7_spill] sm:$0xff]  ;;  %7662 = vrsqrt.f32 %v269_v16 }
 0x665   :  { %6677 = vmatprep.mubr.msk.bf16.mxu1 %vm8083_vm2, %v11591_v47  ;;  %v268_v18 = vmax.f32 %v11609_v35, 1e-24 }
 0x667   :  { %7664 = vrsqrt.f32 %v268_v18 }
 0x668   :  { %2313 = vrot.lane.b32.xlu0 %v1986_v4, %s8075_s0 }
 0x66c   :  { %v7657_v4 = vpop.eup %7656 }
 0x66d   :  { %v7659_v56 = vpop.eup %7658  ;;  %v1094_v61 = vmul.f32 %v7657_v4, %v8199_v30 }
 0x66e   :  { %v7661_v46 = vpop.eup %7660  ;;  %v491_v15 = vmul.f32 %v7659_v56, %v8349_v8 }
 0x66f   :  { %v7143_v28 = vpack.i.bf16 %v1095_v33, %v1094_v61  ;;  %v7082_v61 = vunpack.i.h.bf16 %v8908_v5 }
 0x671   :  { %v7663_v17 = vpop.eup %7662 }
 0x672   :  { %v301_v18 = vmul.f32 %v7663_v17, %v8346_v6 }
 0x674   :  { %v7665_v53 = vpop.eup %7664  ;;  %v323_v33 = vmul.f32 %v8942_v23, %v301_v18  ;;  %v1065_v18 = vmax.f32 %v8959_v0, 1e-24 }
 0x675   :  { %v300_v4 = vmul.f32 %v7665_v53, %v8295_v57 }
 0x676   :  { %7666 = vrsqrt.f32 %v1065_v18  ;;  %v1187_v18 = vsel %vm213_vm1, %v8917_v2, 0.0  ;;  %v595_v2 = vmax.f32 %v11621_v55, 1e-24 }
 0x677   :  { %v322_v56 = vmul.f32 %v8942_v23, %v300_v4 }
 0x679   :  { %v1951_v17 = vpack.c.bf16 %v323_v33, %v322_v56  ;;  %v1172_v56 = vsel %vm213_vm1, %v8899_v45, 0.0 }
 0x681   :  { %1164 = vadd.xlane.f32.xlu1 %v1163_v11 }
 0x683   :  { %v7667_v45 = vpop.eup %7666 }
 0x685   :  { %1170 = vadd.xlane.f32.xlu1 %v1169_v49  ;;  %v490_v49 = vmul.f32 %v7661_v46, %v8303_v60  ;;  %v7081_v46 = vunpack.i.l.bf16 %v8908_v5  ;;  %v1064_v5 = vmax.f32 %v8835_v54, 1e-24  ;;  %v11616_v54 = vld [vmem:[#allocation5_spill] sm:$0xff] }
 0x687   :  { %1176 = vadd.xlane.f32.xlu0 %v1175_v9  ;;  %7668 = vrsqrt.f32 %v1064_v5  ;;  %v11618_v5 = vld [vmem:[#allocation19_spill] sm:$0xff] }
 0x68b   :  { %1179 = vadd.xlane.f32.xlu0 %v1178_v36  ;;  %v1987_v36 = vpack.c.bf16 %v491_v15, %v490_v49  ;;  %v1988_v15 = vpack.c.bf16 %v7082_v61, %v7081_v46  ;;  %v11614_v61 = vld [vmem:[#allocation9_spill] sm:$0xff] }
 0x68c   :  { %v9127_v13 = vpop.xlane.xlu1 %884  ;;  %v271_v0 = vmax.f32 %v11614_v61, 1e-24 }
 0x68f   :  { %1182 = vadd.xlane.f32.xlu0 %v1181_v32 }
 0x690   :  { %v9131_v43 = vpop.xlane.xlu1 %887 }
 0x693   :  { %v9135_v11 = vpop.f32.mrf.mxu1 }
 0x694   :  { %11610 = vst [vmem:[#allocation27_spill] sm:$0xff] %v9135_v11  ;;  %v9137_v31 = vpop.permute.xlu1 %7124  ;;  %v11624_v11 = vld [vmem:[#allocation15_spill] sm:$0xff] }
 0x695   :  { %v6667_v16 = vpop.f32.mrf.mxu1  ;;  %v274_v25 = vmax.f32 %v11624_v11, 1e-24 }
 0x696   :  { %7144 = vrot.lane.b32.xlu1 %v7143_v28, %s8080_s17  ;;  %v9153_v28 = vpop.xlane.xlu0 %869 }
 0x697   :  { %v9142_v35 = vpop.f32.mrf.mxu1 }
 0x698   :  { %11611 = vst [vmem:[#allocation34_spill] sm:$0xff] %v9142_v35  ;;  %v2164_v9 = vpop.permute.xlu1 %2163 }
 0x699   :  { %v2169_v21 = vsel %vm213_vm1, %v2164_v9, 0  ;;  %v6668_v32 = vpop.f32.mrf.mxu1 }
 0x69a   :  { %2363 = vrot.lane.b32.xlu1 %v1987_v36, %s8075_s0  ;;  %6676 = vmatpush3.bf16.xpose.msra.mxu1 %v2169_v21  ;;  %v9159_v16 = vpop.permute.xlu0 %7109  ;;  %v11612_v36 = vld [vmem:[#allocation38_spill] sm:$0xff]  ;;  %v11613_v32 = vld [vmem:[#allocation37_spill] sm:$0xff] }
 0x69b   :  { %6687 = vmatprep.subr.bf16.mxu1 %v11591_v47  ;;  %v1067_v21 = vmax.f32 %v11612_v36, 1e-24  ;;  %v1066_v4 = vmax.f32 %v11613_v32, 1e-24  ;;  %v589_v32 = vmax.f32 %v11618_v5, 1e-24 }
 0x69d   :  { %7670 = vrsqrt.f32 %v1067_v21  ;;  %v11619_v21 = vld [vmem:[#allocation4_spill] sm:$0xff] }
 0x69e   :  { %v9161_v53 = vpop.permute.xlu0 %7114  ;;  %7672 = vrsqrt.f32 %v1066_v4  ;;  %v272_v35 = vmax.f32 %v11619_v21, 1e-24  ;;  %v11620_v4 = vld [vmem:[#allocation23_spill] sm:$0xff] }
 0x69f   :  { %7674 = vrsqrt.f32 %v271_v0  ;;  %v11622_v0 = vld [vmem:[#allocation32_spill] sm:$0xff] }
 0x6a1   :  { %6678 = vmatmul.mubr.msk.bf16.vlgmr.msra.gmra.mxu1 %vm213_vm1, %v1951_v17  ;;  %v270_v17 = vmax.f32 %v11616_v54, 1e-24  ;;  %v1190_v54 = vsel %vm213_vm1, %v8921_v20, 0.0  ;;  %v1193_v20 = vsel %vm213_vm1, %v9045_v26, 0.0  ;;  %v7087_v26 = vunpack.i.h.bf16 %v9039_v24 }
 0x6a2   :  { %6689 = vmatprep.mubr.msk.bf16.mxu1 %vm8083_vm2, %v11591_v47  ;;  %v9163_v49 = vpop.xlane.xlu0 %881 }
 0x6a3   :  { %7676 = vrsqrt.f32 %v270_v17  ;;  %v1097_v17 = vmul.f32 %v7667_v45, %v8424_v58 }
 0x6a5   :  { %2413 = vrot.lane.b32.xlu0 %v1988_v15, %s8075_s0  ;;  %v11617_v15 = vld [vmem:[#allocation6_spill] sm:$0xff] }
 0x6a6   :  { %v9167_v9 = vpop.permute.xlu0 %7119  ;;  %v273_v36 = vmax.f32 %v11617_v15, 1e-24  ;;  %v7669_v15 = vpop.eup %7668 }
 0x6a7   :  { %v1096_v55 = vmul.f32 %v7669_v15, %v8367_v12  ;;  %v7086_v15 = vunpack.i.l.bf16 %v9039_v24 }
 0x6a8   :  { %7678 = vrsqrt.f32 %v273_v36  ;;  %v11623_v36 = vld [vmem:[#allocation14_spill] sm:$0xff] }
 0x6a9   :  { %7680 = vrsqrt.f32 %v589_v32  ;;  %v7148_v45 = vpack.i.bf16 %v1097_v17, %v1096_v55  ;;  %v11628_v17 = vld [vmem:[#allocation16_spill] sm:$0xff] }
 0x6aa   :  { %v9171_v33 = vpop.xlane.xlu0 %890  ;;  %7682 = vrsqrt.f32 %v272_v35  ;;  %v7671_v21 = vpop.eup %7670 }
 0x6ab   :  { %v7673_v35 = vpop.eup %7672 }
 0x6ac   :  { %v1098_v11 = vmul.f32 %v7673_v35, %v8303_v60  ;;  %v11629_v35 = vld [vmem:[#allocation20_spill] sm:$0xff] }
 0x6ae   :  { %v9176_v46 = vpop.xlane.xlu0 %1152 }
 0x6af   :  { %11615 = vst [vmem:[#allocation22_spill] sm:$0xff] %v9176_v46 }
 0x6b2   :  { %v9185_v61 = vpop.permute.xlu0 %7129 }
 0x6b6   :  { %v9196_v46 = vpop.xlane.xlu0 %1155 }
 0x6b7   :  { %11625 = vst [vmem:[#allocation31_spill] sm:$0xff] %v9196_v46  ;;  %v1989_v46 = vpack.c.bf16 %v7087_v26, %v7086_v15 }
 0x6be   :  { %1173 = vadd.xlane.f32.xlu1 %v1172_v56  ;;  %v588_v56 = vmax.f32 %v11620_v4, 1e-24  ;;  %v275_v4 = vmax.f32 %v11623_v36, 1e-24 }
 0x6c0   :  { %7684 = vrsqrt.f32 %v588_v56  ;;  %v1099_v56 = vmul.f32 %v7671_v21, %v8349_v8 }
 0x6c1   :  { %7686 = vrsqrt.f32 %v595_v2 }
 0x6c4   :  { %1188 = vadd.xlane.f32.xlu0 %v1187_v18  ;;  %v594_v18 = vmax.f32 %v11622_v0, 1e-24  ;;  %v9208_v0 = vpop.xlane.xlu0 %1161 }
 0x6c5   :  { %11627 = vst [vmem:[#allocation7_spill] sm:$0xff] %v9208_v0 }
 0x6c6   :  { %7688 = vrsqrt.f32 %v594_v18  ;;  %v7153_v18 = vpack.i.bf16 %v1099_v56, %v1098_v11  ;;  %v1366_v56 = vmax.f32 %v8892_v27, 1e-24 }
 0x6c7   :  { %7690 = vrsqrt.f32 %v275_v4  ;;  %v1367_v4 = vmax.f32 %v8896_v62, 1e-24 }
 0x6c8   :  { %1191 = vadd.xlane.f32.xlu0 %v1190_v54  ;;  %7692 = vrsqrt.f32 %v274_v25  ;;  %v7675_v54 = vpop.eup %7674 }
 0x6c9   :  { %v9191_v5 = vpop.xlane.xlu1 %1149  ;;  %v7677_v36 = vpop.eup %7676  ;;  %v303_v21 = vmul.f32 %v7675_v54, %v8298_v59 }
 0x6ca   :  { %v7679_v25 = vpop.eup %7678  ;;  %v302_v0 = vmul.f32 %v7677_v36, %v8232_v41 }
 0x6cb   :  { %v7681_v55 = vpop.eup %7680  ;;  %v305_v62 = vmul.f32 %v7679_v25, %v8235_v42  ;;  %v325_v54 = vmul.f32 %v8942_v23, %v303_v21 }
 0x6cc   :  { %1194 = vadd.xlane.f32.xlu0 %v1193_v20  ;;  %v599_v20 = vmax.f32 %v11628_v17, 1e-24  ;;  %v621_v26 = vmul.f32 %v7681_v55, %v8278_v48 }
 0x6cd   :  { %v9201_v32 = vpop.xlane.xlu1 %1158 }
 0x6ce   :  { %11626 = vst [vmem:[#allocation10_spill] sm:$0xff] %v9201_v32  ;;  %v7683_v32 = vpop.eup %7682  ;;  %7694 = vrsqrt.f32 %v599_v20 }
 0x6cf   :  { %7149 = vrot.lane.b32.xlu1 %v7148_v45, %s8080_s17  ;;  %v598_v45 = vmax.f32 %v11629_v35, 1e-24  ;;  %v7685_v17 = vpop.eup %7684  ;;  %7696 = vrsqrt.f32 %v1367_v4  ;;  %v304_v36 = vmul.f32 %v7683_v32, %v8199_v30  ;;  %v324_v35 = vmul.f32 %v8942_v23, %v302_v0 }
 0x6d0   :  { %v7687_v15 = vpop.eup %7686  ;;  %v620_v25 = vmul.f32 %v7685_v17, %v8226_v38  ;;  %v327_v4 = vmul.f32 %v8942_v23, %v305_v62 }
 0x6d1   :  { %v9210_v2 = vpop.permute.xlu1 %7134  ;;  %7698 = vrsqrt.f32 %v598_v45  ;;  %v637_v45 = vmul.f32 %v8942_v23, %v621_v26  ;;  %v627_v32 = vmul.f32 %v7687_v15, %v8346_v6  ;;  %v326_v0 = vmul.f32 %v8942_v23, %v304_v36 }
 0x6d2   :  { %7700 = vrsqrt.f32 %v1366_v56  ;;  %v636_v56 = vmul.f32 %v8942_v23, %v620_v25  ;;  %v1371_v15 = vmax.f32 %v9031_v19, 1e-24 }
 0x6d3   :  { %7154 = vrot.lane.b32.xlu1 %v7153_v18, %s8080_s17  ;;  %v9220_v18 = vpop.permute.xlu0 %7139  ;;  %v7689_v20 = vpop.eup %7688  ;;  %v643_v25 = vmul.f32 %v8942_v23, %v627_v32 }
 0x6d4   :  { %v626_v17 = vmul.f32 %v7689_v20, %v8295_v57 }
 0x6d5   :  { %v2214_v24 = vpop.permute.xlu1 %2213 }
 0x6d6   :  { %v2219_v11 = vsel %vm213_vm1, %v2214_v24, 0  ;;  %v7691_v24 = vpop.eup %7690 }
 0x6d7   :  { %6682 = vmatpush3.bf16.xpose.msra.mxu0 %v2219_v11  ;;  %2463 = vrot.lane.b32.xlu1 %v1989_v46, %s8075_s0  ;;  %v7693_v55 = vpop.eup %7692  ;;  %v1952_v11 = vpack.c.bf16 %v325_v54, %v324_v35  ;;  %v1953_v54 = vpack.c.bf16 %v327_v4, %v326_v0  ;;  %v7168_v35 = vpack.i.bf16 %v637_v45, %v636_v56  ;;  %v7106_v45 = vunpack.i.l.bf16 %v9076_v1 }
 0x6d8   :  { %6693 = vmatprep.subr.bf16.mxu0 %v11591_v47  ;;  %v306_v26 = vmul.f32 %v7693_v55, %v8367_v12  ;;  %v642_v4 = vmul.f32 %v8942_v23, %v626_v17 }
 0x6d9   :  { %v2264_v27 = vpop.permute.xlu1 %2263 }
 0x6da   :  { %v2269_v46 = vsel %vm213_vm1, %v2264_v27, 0  ;;  %v307_v27 = vmul.f32 %v7691_v24, %v8424_v58  ;;  %v1370_v24 = vmax.f32 %v9028_v14, 1e-24  ;;  %v328_v19 = vmul.f32 %v8942_v23, %v306_v26 }
 0x6db   :  { %6688 = vmatpush3.bf16.xpose.msra.mxu1 %v2269_v46  ;;  %v9231_v21 = vpop.xlane.xlu0 %1167  ;;  %v11631_v46 = vld [vmem:[#allocation26_spill] sm:$0xff]  ;;  %v7107_v14 = vunpack.i.h.bf16 %v9076_v1  ;;  %v7193_v32 = vpack.i.bf16 %v643_v25, %v642_v4  ;;  %v894_v1 = vmax.f32 %v9049_v51, 1e-24  ;;  %v7116_v51 = vunpack.i.l.bf16 %v9161_v53 }
 0x6dc   :  { %11630 = vst [vmem:[#allocation38_spill] sm:$0xff] %v9231_v21  ;;  %6699 = vmatprep.subr.bf16.mxu1 %v11591_v47  ;;  %v603_v62 = vmax.f32 %v11631_v46, 1e-24  ;;  %v329_v55 = vmul.f32 %v8942_v23, %v307_v27  ;;  %v895_v46 = vmax.f32 %v9052_v40, 1e-24 }
 0x6de   :  { %6684 = vmatmul.mubr.msk.bf16.vlgmr.msra.gmra.mxu0 %vm213_vm1, %v1952_v11  ;;  %v11632_v11 = vld [vmem:[#allocation33_spill] sm:$0xff]  ;;  %7702 = vrsqrt.f32 %v603_v62  ;;  %v1954_v17 = vpack.c.bf16 %v329_v55, %v328_v19  ;;  %v1993_v62 = vpack.c.bf16 %v7107_v14, %v7106_v45  ;;  %v1357_v19 = vmax.f32 %v8973_v22, 1e-24 }
 0x6df   :  { %v2314_v21 = vpop.permute.xlu0 %2313  ;;  %6695 = vmatprep.mubr.msk.bf16.mxu0 %vm8083_vm2, %v11591_v47  ;;  %v602_v20 = vmax.f32 %v11632_v11, 1e-24  ;;  %7704 = vrsqrt.f32 %v1371_v15  ;;  %v898_v14 = vmax.f32 %v9063_v34, 1e-24 }
 0x6e0   :  { %v2319_v36 = vsel %vm213_vm1, %v2314_v21, 0  ;;  %v7695_v21 = vpop.eup %7694 }
 0x6e1   :  { %6694 = vmatpush3.bf16.xpose.msra.mxu0 %v2319_v36  ;;  %v7697_v0 = vpop.eup %7696  ;;  %7706 = vrsqrt.f32 %v602_v20  ;;  %v631_v26 = vmul.f32 %v7695_v21, %v8235_v42  ;;  %v7117_v20 = vunpack.i.h.bf16 %v9161_v53  ;;  %v11635_v53 = vld [vmem:[#allocation41_spill] sm:$0xff] }
 0x6e2   :  { %6690 = vmatmul.mubr.msk.bf16.vlgmr.msra.gmra.mxu1 %vm213_vm1, %v1953_v54  ;;  %7169 = vrot.lane.b32.xlu0 %v7168_v35, %s8076_s4  ;;  %v7699_v56 = vpop.eup %7698  ;;  %7708 = vrsqrt.f32 %v1370_v24  ;;  %v1399_v54 = vmul.f32 %v7697_v0, %v8235_v42  ;;  %v899_v24 = vmax.f32 %v9072_v7, 1e-24 }
 0x6e3   :  { %6705 = vmatprep.subr.bf16.mxu0 %v11591_v47  ;;  %6701 = vmatprep.mubr.msk.bf16.mxu1 %vm8083_vm2, %v11591_v47  ;;  %v7701_v27 = vpop.eup %7700  ;;  %v630_v36 = vmul.f32 %v7699_v56, %v8199_v30  ;;  %7710 = vrsqrt.f32 %v895_v46  ;;  %v647_v35 = vmul.f32 %v8942_v23, %v631_v26  ;;  %v1995_v46 = vpack.c.bf16 %v7117_v20, %v7116_v51 }
 0x6e4   :  { %v1398_v15 = vmul.f32 %v7701_v27, %v8199_v30  ;;  %7712 = vrsqrt.f32 %v894_v1 }
 0x6e5   :  { %v646_v25 = vmul.f32 %v8942_v23, %v630_v36  ;;  %7714 = vrsqrt.f32 %v899_v24  ;;  %v7127_v24 = vunpack.i.h.bf16 %v9137_v31 }
 0x6e6   :  { %7194 = vrot.lane.b32.xlu0 %v7193_v32, %s8076_s4  ;;  %v7203_v40 = vpack.i.bf16 %v1399_v54, %v1398_v15  ;;  %v11633_v32 = vld [vmem:[#allocation29_spill] sm:$0xff]  ;;  %7716 = vrsqrt.f32 %v1357_v19  ;;  %v11636_v54 = vld [vmem:[#allocation18_spill] sm:$0xff]  ;;  %v11637_v15 = vld [vmem:[#allocation40_spill] sm:$0xff]  ;;  %v903_v19 = vmax.f32 %v9091_v3, 1e-24 }
 0x6e7   :  { %v7213_v4 = vpack.i.bf16 %v647_v35, %v646_v25  ;;  %v591_v0 = vmax.f32 %v11633_v32, 1e-24  ;;  %7718 = vrsqrt.f32 %v898_v14  ;;  %v590_v26 = vmax.f32 %v11636_v54, 1e-24  ;;  %v11639_v3 = vld [vmem:[#allocation8_spill] sm:$0xff] }
 0x6e8   :  { %6696 = vmatmul.mubr.msk.bf16.vlgmr.msra.gmra.mxu0 %vm213_vm1, %v1954_v17  ;;  %v11634_v17 = vld [vmem:[#allocation39_spill] sm:$0xff]  ;;  %v1358_v36 = vmax.f32 %v11637_v15, 1e-24  ;;  %v902_v14 = vmax.f32 %v9086_v50, 1e-24  ;;  %v7136_v50 = vunpack.i.l.bf16 %v9210_v2 }
 0x6e9   :  { %6707 = vmatprep.mubr.msk.bf16.mxu0 %vm8083_vm2, %v11591_v47  ;;  %v1356_v27 = vmax.f32 %v11634_v17, 1e-24  ;;  %7720 = vrsqrt.f32 %v591_v0  ;;  %v11638_v0 = vld [vmem:[#allocation11_spill] sm:$0xff] }
 0x6ea   :  { %2663 = vrot.lane.b32.xlu0 %v1993_v62, %s8075_s0  ;;  %v1359_v62 = vmax.f32 %v11635_v53, 1e-24  ;;  %v7137_v53 = vunpack.i.h.bf16 %v9210_v2 }
 0x6eb   :  { %v7703_v11 = vpop.eup %7702  ;;  %7722 = vrsqrt.f32 %v1356_v27 }
 0x6ec   :  { %v7705_v55 = vpop.eup %7704  ;;  %v635_v56 = vmul.f32 %v7703_v11, %v8349_v8  ;;  %7724 = vrsqrt.f32 %v1359_v62  ;;  %v1184_v11 = vsel %vm213_vm1, %v8911_v63, 0.0 }
 0x6ed   :  { %v1403_v7 = vmul.f32 %v7705_v55, %v8349_v8  ;;  %7726 = vrsqrt.f32 %v590_v26  ;;  %v1361_v26 = vmax.f32 %v8993_v37, 1e-24 }
 0x6ee   :  { %7204 = vrot.lane.b32.xlu0 %v7203_v40, %s8081_s18  ;;  %v7707_v21 = vpop.eup %7706  ;;  %v651_v1 = vmul.f32 %v8942_v23, %v635_v56  ;;  %7728 = vrsqrt.f32 %v1358_v36  ;;  %v277_v56 = vmax.f32 %v11638_v0, 1e-24 }
 0x6ef   :  { %v7709_v45 = vpop.eup %7708  ;;  %v634_v22 = vmul.f32 %v7707_v21, %v8303_v60  ;;  %7730 = vrsqrt.f32 %v903_v19 }
 0x6f0   :  { %v1402_v34 = vmul.f32 %v7709_v45, %v8303_v60  ;;  %v7711_v35 = vpop.eup %7710  ;;  %7732 = vrsqrt.f32 %v902_v14 }
 0x6f1   :  { %v650_v25 = vmul.f32 %v8942_v23, %v634_v22  ;;  %v7713_v20 = vpop.eup %7712  ;;  %v927_v55 = vmul.f32 %v7711_v35, %v8229_v39  ;;  %7734 = vrsqrt.f32 %v277_v56  ;;  %v11644_v56 = vld [vmem:[#allocation43_spill] sm:$0xff] }
 0x6f2   :  { %7214 = vrot.lane.b32.xlu0 %v7213_v4, %s8076_s4  ;;  %v7223_v40 = vpack.i.bf16 %v1403_v7, %v1402_v34  ;;  %v7126_v4 = vunpack.i.l.bf16 %v9137_v31  ;;  %v926_v21 = vmul.f32 %v7713_v20, %v8196_v29  ;;  %v7715_v32 = vpop.eup %7714 }
 0x6f3   :  { %v7233_v51 = vpack.i.bf16 %v651_v1, %v650_v25  ;;  %v943_v45 = vmul.f32 %v8942_v23, %v927_v55  ;;  %v7717_v17 = vpop.eup %7716  ;;  %v931_v22 = vmul.f32 %v7715_v32, %v8346_v6  ;;  %v1999_v25 = vpack.c.bf16 %v7137_v53, %v7136_v50  ;;  %v11642_v55 = vld [vmem:[#allocation44_spill] sm:$0xff] }
 0x6f4   :  { %v1997_v63 = vpack.c.bf16 %v7127_v24, %v7126_v4  ;;  %v942_v31 = vmul.f32 %v8942_v23, %v926_v21  ;;  %v7719_v27 = vpop.eup %7718  ;;  %v1389_v1 = vmul.f32 %v7717_v17, %v8278_v48  ;;  %v1363_v19 = vmax.f32 %v11642_v55, 1e-24 }
 0x6f5   :  { %v930_v15 = vmul.f32 %v7719_v27, %v8295_v57  ;;  %v1362_v17 = vmax.f32 %v11644_v56, 1e-24 }
 0x6f6   :  { %2763 = vrot.lane.b32.xlu0 %v1995_v46, %s8075_s0  ;;  %v276_v46 = vmax.f32 %v11639_v3, 1e-24  ;;  %v7721_v7 = vpop.eup %7720  ;;  %v7243_v62 = vpack.i.bf16 %v943_v45, %v942_v31  ;;  %v11643_v45 = vld [vmem:[#allocation35_spill] sm:$0xff] }
 0x6f7   :  { %v623_v4 = vmul.f32 %v7721_v7, %v8229_v39  ;;  %v592_v32 = vmax.f32 %v11643_v45, 1e-24 }
 0x6f8   :  { %v7723_v34 = vpop.eup %7722  ;;  %7736 = vrsqrt.f32 %v276_v46 }
 0x6f9   :  { %v7725_v54 = vpop.eup %7724  ;;  %v1388_v2 = vmul.f32 %v7723_v34, %v8226_v38  ;;  %7738 = vrsqrt.f32 %v1361_v26  ;;  %v11645_v26 = vld [vmem:[#allocation48_spill] sm:$0xff] }
 0x6fa   :  { %7224 = vrot.lane.b32.xlu0 %v7223_v40, %s8081_s18  ;;  %v7727_v36 = vpop.eup %7726  ;;  %v11640_v40 = vld [vmem:[#allocation42_spill] sm:$0xff]  ;;  %v1391_v37 = vmul.f32 %v7725_v54, %v8229_v39 }
 0x6fb   :  { %1185 = vadd.xlane.f32.xlu1 %v1184_v11  ;;  %v1360_v35 = vmax.f32 %v11640_v40, 1e-24  ;;  %v947_v11 = vmul.f32 %v8942_v23, %v931_v22  ;;  %v7729_v20 = vpop.eup %7728  ;;  %v7158_v14 = vpack.i.bf16 %v1389_v1, %v1388_v2  ;;  %v622_v0 = vmul.f32 %v7727_v36, %v8196_v29 }
 0x6fc   :  { %v1390_v27 = vmul.f32 %v7729_v20, %v8196_v29  ;;  %v7731_v3 = vpop.eup %7730  ;;  %v7092_v1 = vunpack.i.h.bf16 %v11645_v26 }
 0x6fd   :  { %7740 = vrsqrt.f32 %v1360_v35  ;;  %v7733_v50 = vpop.eup %7732  ;;  %v935_v34 = vmul.f32 %v7731_v3, %v8235_v42 }
 0x6fe   :  { %7234 = vrot.lane.b32.xlu0 %v7233_v51, %s8076_s4  ;;  %v11641_v51 = vld [vmem:[#allocation28_spill] sm:$0xff]  ;;  %v7163_v7 = vpack.i.bf16 %v1391_v37, %v1390_v27  ;;  %v7735_v54 = vpop.eup %7734  ;;  %v934_v2 = vmul.f32 %v7733_v50, %v8199_v30 }
 0x6ff   :  { %v593_v24 = vmax.f32 %v11641_v51, 1e-24  ;;  %v11646_v51 = vld [vmem:[#allocation21_spill] sm:$0xff]  ;;  %v309_v55 = vmul.f32 %v7735_v54, %v8349_v8 }
 0x701   :  { %7742 = vrsqrt.f32 %v593_v24  ;;  %v597_v24 = vmax.f32 %v11646_v51, 1e-24 }
 0x702   :  { %2863 = vrot.lane.b32.xlu0 %v1997_v63, %s8075_s0  ;;  %v9328_v63 = vld [vmem:[%s11466_s2] ss:$0 sm:$0xff]  ;;  %7744 = vrsqrt.f32 %v1363_v19  ;;  %v1365_v19 = vmax.f32 %v9007_v44, 1e-24 }
 0x703   :  { %v946_v23 = vmul.f32 %v9328_v63, %v930_v15  ;;  %v639_v53 = vmul.f32 %v9328_v63, %v623_v4  ;;  %7746 = vrsqrt.f32 %v592_v32  ;;  %v638_v22 = vmul.f32 %v9328_v63, %v622_v0 }
 0x704   :  { %7748 = vrsqrt.f32 %v1362_v17  ;;  %v7091_v15 = vunpack.i.l.bf16 %v11645_v26  ;;  %v951_v4 = vmul.f32 %v9328_v63, %v935_v34  ;;  %v11648_v17 = vld [vmem:[#allocation25_spill] sm:$0xff]  ;;  %v950_v3 = vmul.f32 %v9328_v63, %v934_v2 }
 0x705   :  { %v7253_v31 = vpack.i.bf16 %v947_v11, %v946_v23  ;;  %v7173_v40 = vpack.i.bf16 %v639_v53, %v638_v22  ;;  %v7737_v11 = vpop.eup %7736  ;;  %v11647_v23 = vld [vmem:[#allocation53_spill] sm:$0xff]  ;;  %7750 = vrsqrt.f32 %v597_v24  ;;  %v331_v54 = vmul.f32 %v9328_v63, %v309_v55 }
 0x706   :  { %7244 = vrot.lane.b32.xlu0 %v7243_v62, %s8080_s17  ;;  %v7097_v45 = vunpack.i.h.bf16 %v11647_v23  ;;  %v7096_v32 = vunpack.i.l.bf16 %v11647_v23  ;;  %v7739_v56 = vpop.eup %7738  ;;  %v11649_v53 = vld [vmem:[#allocation45_spill] sm:$0xff]  ;;  %v7263_v34 = vpack.i.bf16 %v951_v4, %v950_v3  ;;  %7752 = vrsqrt.f32 %v1365_v19  ;;  %v11650_v23 = vld [vmem:[#allocation30_spill] sm:$0xff] }
 0x707   :  { %v1364_v50 = vmax.f32 %v11649_v53, 1e-24  ;;  %v11653_v3 = vld [vmem:[#allocation46_spill] sm:$0xff] }
 0x70a   :  { %v9322_v21 = vpop.xlane.xlu1 %1164  ;;  %2963 = vrot.lane.b32.xlu0 %v1999_v25, %s8075_s0  ;;  %v7741_v22 = vpop.eup %7740 }
 0x70b   :  { %v1392_v2 = vmul.f32 %v7741_v22, %v8358_v10 }
 0x70c   :  { %7159 = vrot.lane.b32.xlu1 %v7158_v14, %s8081_s18  ;;  %v1990_v14 = vpack.c.bf16 %v7092_v1, %v7091_v15  ;;  %v1991_v1 = vpack.c.bf16 %v7097_v45, %v7096_v32  ;;  %v1393_v15 = vmul.f32 %v7739_v56, %v8418_v52  ;;  %v601_v45 = vmax.f32 %v11650_v23, 1e-24  ;;  %v11651_v32 = vld [vmem:[#allocation51_spill] sm:$0xff] }
 0x70e   :  { %v9336_v46 = vpop.xlane.xlu1 %1170  ;;  %7254 = vrot.lane.b32.xlu0 %v7253_v31, %s8080_s17  ;;  %v596_v31 = vmax.f32 %v11648_v17, 1e-24  ;;  %v7743_v26 = vpop.eup %7742 }
 0x70f   :  { %v625_v55 = vmul.f32 %v7743_v26, %v8418_v52 }
 0x710   :  { %7164 = vrot.lane.b32.xlu1 %v7163_v7, %s8081_s18  ;;  %v9341_v62 = vpop.xlane.xlu0 %1176  ;;  %v308_v7 = vmul.f32 %v7737_v11, %v8303_v60  ;;  %7754 = vrsqrt.f32 %v596_v31  ;;  %v11652_v31 = vld [vmem:[#allocation36_spill] sm:$0xff] }
 0x711   :  { %7756 = vrsqrt.f32 %v1364_v50  ;;  %v641_v17 = vmul.f32 %v9328_v63, %v625_v55  ;;  %v11656_v55 = vld [vmem:[#allocation47_spill] sm:$0xff] }
 0x712   :  { %v7145_v36 = vpop.permute.xlu1 %7144  ;;  %7758 = vrsqrt.f32 %v601_v45 }
 0x713   :  { %v7147_v35 = vunpack.i.h.bf16 %v7145_v36  ;;  %v7146_v25 = vunpack.i.l.bf16 %v7145_v36  ;;  %v7745_v36 = vpop.eup %7744 }
 0x714   :  { %7174 = vrot.lane.b32.xlu1 %v7173_v40, %s8076_s4  ;;  %v9349_v20 = vpop.xlane.xlu0 %1179  ;;  %v330_v40 = vmul.f32 %v9328_v63, %v308_v7  ;;  %v1395_v4 = vmul.f32 %v7745_v36, %v8346_v6  ;;  %v1368_v7 = vmax.f32 %v11653_v3, 1e-24 }
 0x715   :  { %v2001_v37 = vpack.c.bf16 %v7147_v35, %v7146_v25  ;;  %v7747_v35 = vpop.eup %7746 }
 0x716   :  { %v2364_v0 = vpop.permute.xlu1 %2363  ;;  %v7749_v11 = vpop.eup %7748  ;;  %v1955_v24 = vpack.c.bf16 %v331_v54, %v330_v40 }
 0x717   :  { %v2369_v27 = vsel %vm213_vm1, %v2364_v0, 0  ;;  %3063 = vrot.lane.b32.xlu0 %v2001_v37, %s8075_s0  ;;  %v7178_v37 = vpack.i.bf16 %v1393_v15, %v1392_v2  ;;  %v1394_v19 = vmul.f32 %v7749_v11, %v8295_v57  ;;  %v1369_v0 = vmax.f32 %v11651_v32, 1e-24  ;;  %v7751_v22 = vpop.eup %7750  ;;  %v11655_v2 = vld [vmem:[#allocation52_spill] sm:$0xff] }
 0x718   :  { %6700 = vmatpush3.bf16.xpose.msra.mxu1 %v2369_v27  ;;  %v9363_v44 = vpop.xlane.xlu0 %1182  ;;  %2513 = vrot.lane.b32.xlu1 %v1990_v14, %s8075_s0  ;;  %v624_v14 = vmul.f32 %v7747_v35, %v8358_v10  ;;  %v600_v27 = vmax.f32 %v11652_v31, 1e-24  ;;  %v7753_v36 = vpop.eup %7752  ;;  %v893_v11 = vmax.f32 %v11655_v2, 1e-24  ;;  %v7111_v31 = vunpack.i.l.bf16 %v9159_v16 }
 0x719   :  { %6711 = vmatprep.subr.bf16.mxu1 %v11591_v47  ;;  %v7183_v56 = vpack.i.bf16 %v1395_v4, %v1394_v19  ;;  %7760 = vrsqrt.f32 %v1369_v0  ;;  %v629_v4 = vmul.f32 %v7751_v22, %v8298_v59  ;;  %v892_v19 = vmax.f32 %v11656_v55, 1e-24 }
 0x71a   :  { %v640_v50 = vmul.f32 %v9328_v63, %v624_v14  ;;  %7762 = vrsqrt.f32 %v600_v27  ;;  %v11657_v27 = vld [vmem:[#allocation54_spill] sm:$0xff] }
 0x71b   :  { %7264 = vrot.lane.b32.xlu0 %v7263_v34, %s8080_s17  ;;  %v11654_v34 = vld [vmem:[#allocation50_spill] sm:$0xff]  ;;  %7764 = vrsqrt.f32 %v1368_v7  ;;  %v645_v32 = vmul.f32 %v9328_v63, %v629_v4  ;;  %v897_v3 = vmax.f32 %v11657_v27, 1e-24  ;;  %v900_v4 = vmax.f32 %v9153_v28, 1e-24 }
 0x71c   :  { %2563 = vrot.lane.b32.xlu1 %v1991_v1, %s8075_s0  ;;  %v2414_v25 = vpop.permute.xlu0 %2413  ;;  %v7102_v54 = vunpack.i.h.bf16 %v11654_v34  ;;  %v7101_v26 = vunpack.i.l.bf16 %v11654_v34  ;;  %v7188_v15 = vpack.i.bf16 %v641_v17, %v640_v50  ;;  %7766 = vrsqrt.f32 %v893_v11  ;;  %v11658_v34 = vld [vmem:[#allocation49_spill] sm:$0xff] }
 0x71d   :  { %v2419_v51 = vsel %vm213_vm1, %v2414_v25, 0  ;;  %v7755_v40 = vpop.eup %7754  ;;  %7768 = vrsqrt.f32 %v892_v19  ;;  %v7112_v17 = vunpack.i.h.bf16 %v9159_v16  ;;  %v907_v19 = vmax.f32 %v9171_v33, 1e-24 }
 0x71e   :  { %6706 = vmatpush3.bf16.xpose.msra.mxu0 %v2419_v51  ;;  %v7757_v25 = vpop.eup %7756  ;;  %v1992_v51 = vpack.c.bf16 %v7102_v54, %v7101_v26  ;;  %v628_v23 = vmul.f32 %v7755_v40, %v8232_v41  ;;  %v896_v54 = vmax.f32 %v11658_v34, 1e-24  ;;  %7770 = vrsqrt.f32 %v897_v3 }
 0x71f   :  { %6702 = vmatmul.mubr.msk.bf16.vlgmr.msra.gmra.mxu1 %vm213_vm1, %v1955_v24  ;;  %6717 = vmatprep.subr.bf16.mxu0 %v11591_v47  ;;  %v1396_v14 = vmul.f32 %v7757_v25, %v8232_v41  ;;  %v11659_v25 = vld [vmem:[#allocation17_spill] sm:$0xff]  ;;  %v904_v27 = vmax.f32 %v9163_v49, 1e-24 }
 0x720   :  { %7179 = vrot.lane.b32.xlu1 %v7178_v37, %s8081_s18  ;;  %6713 = vmatprep.mubr.msk.bf16.mxu1 %vm8083_vm2, %v11591_v47  ;;  %v1397_v37 = vmul.f32 %v7753_v36, %v8298_v59  ;;  %v644_v0 = vmul.f32 %v9328_v63, %v628_v23  ;;  %7772 = vrsqrt.f32 %v896_v54  ;;  %v901_v2 = vmax.f32 %v11659_v25, 1e-24 }
 0x722   :  { %v7198_v45 = vpack.i.bf16 %v1397_v37, %v1396_v14  ;;  %v7208_v7 = vpack.i.bf16 %v645_v32, %v644_v0  ;;  %7774 = vrsqrt.f32 %v901_v2  ;;  %v7121_v32 = vunpack.i.l.bf16 %v9167_v9 }
 0x723   :  { %v7142_v2 = vunpack.i.h.bf16 %v9220_v18 }
 0x724   :  { %v9388_v53 = vpop.f32.mrf.mxu1  ;;  %7184 = vrot.lane.b32.xlu1 %v7183_v56, %s8081_s18  ;;  %v7759_v56 = vpop.eup %7758 }
 0x725   :  { %v633_v36 = vmul.f32 %v7759_v56, %v8424_v58  ;;  %v905_v56 = vmax.f32 %v9127_v13, 1e-24 }
 0x726   :  { %v6673_v1 = vpop.f32.mrf.mxu1  ;;  %v7761_v50 = vpop.eup %7760 }
 0x727   :  { %v7763_v22 = vpop.eup %7762  ;;  %v1994_v1 = vpack.c.bf16 %v7112_v17, %v7111_v31  ;;  %v649_v37 = vmul.f32 %v9328_v63, %v633_v36 }
 0x728   :  { %v9394_v35 = vpop.f32.mrf.mxu1  ;;  %7189 = vrot.lane.b32.xlu1 %v7188_v15, %s8076_s4  ;;  %v7765_v26 = vpop.eup %7764  ;;  %v1401_v15 = vmul.f32 %v7761_v50, %v8424_v58  ;;  %v632_v40 = vmul.f32 %v7763_v22, %v8367_v12  ;;  %v7131_v50 = vunpack.i.l.bf16 %v9185_v61 }
 0x729   :  { %v1400_v16 = vmul.f32 %v7765_v26, %v8367_v12  ;;  %v7767_v11 = vpop.eup %7766 }
 0x72a   :  { %v6674_v24 = vpop.f32.mrf.mxu1  ;;  %v7769_v55 = vpop.eup %7768  ;;  %v648_v14 = vmul.f32 %v9328_v63, %v632_v40  ;;  %v925_v23 = vmul.f32 %v7767_v11, %v8278_v48  ;;  %v7141_v11 = vunpack.i.l.bf16 %v9220_v18 }
 0x72b   :  { %v7218_v24 = vpack.i.bf16 %v1401_v15, %v1400_v16  ;;  %v924_v0 = vmul.f32 %v7769_v55, %v8226_v38  ;;  %v7771_v17 = vpop.eup %7770 }
 0x72c   :  { %2613 = vrot.lane.b32.xlu1 %v1992_v51, %s8075_s0  ;;  %v906_v51 = vmax.f32 %v9131_v43, 1e-24  ;;  %v7228_v43 = vpack.i.bf16 %v649_v37, %v648_v14  ;;  %v941_v28 = vmul.f32 %v9328_v63, %v925_v23  ;;  %v929_v22 = vmul.f32 %v7771_v17, %v8418_v52 }
 0x72d   :  { %v940_v31 = vmul.f32 %v9328_v63, %v924_v0 }
 0x72e   :  { %7776 = vrsqrt.f32 %v906_v51  ;;  %v945_v26 = vmul.f32 %v9328_v63, %v929_v22 }
 0x72f   :  { %7778 = vrsqrt.f32 %v900_v4  ;;  %v7238_v3 = vpack.i.bf16 %v941_v28, %v940_v31 }
 0x730   :  { %7199 = vrot.lane.b32.xlu1 %v7198_v45, %s8081_s18  ;;  %v7122_v45 = vunpack.i.h.bf16 %v9167_v9  ;;  %7780 = vrsqrt.f32 %v907_v19  ;;  %v7773_v9 = vpop.eup %7772 }
 0x731   :  { %7782 = vrsqrt.f32 %v905_v56  ;;  %v928_v13 = vmul.f32 %v7773_v9, %v8358_v10  ;;  %v7775_v54 = vpop.eup %7774 }
 0x732   :  { %v1996_v33 = vpack.c.bf16 %v7122_v45, %v7121_v32  ;;  %7784 = vrsqrt.f32 %v904_v27  ;;  %v933_v25 = vmul.f32 %v7775_v54, %v8298_v59  ;;  %v2000_v32 = vpack.c.bf16 %v7142_v2, %v7141_v11 }
 0x734   :  { %7209 = vrot.lane.b32.xlu1 %v7208_v7, %s8076_s4  ;;  %v7132_v7 = vunpack.i.h.bf16 %v9185_v61  ;;  %v944_v61 = vmul.f32 %v9328_v63, %v928_v13  ;;  %v949_v45 = vmul.f32 %v9328_v63, %v933_v25 }
 0x736   :  { %v1998_v49 = vpack.c.bf16 %v7132_v7, %v7131_v50  ;;  %v7248_v51 = vpack.i.bf16 %v945_v26, %v944_v61 }
 0x738   :  { %2713 = vrot.lane.b32.xlu1 %v1994_v1, %s8075_s0 }
 0x73b   :  { %v7777_v1 = vpop.eup %7776 }
 0x73c   :  { %7219 = vrot.lane.b32.xlu1 %v7218_v24, %s8081_s18  ;;  %v7779_v36 = vpop.eup %7778  ;;  %v938_v24 = vmul.f32 %v7777_v1, %v8303_v60 }
 0x73d   :  { %v7781_v16 = vpop.eup %7780  ;;  %v932_v4 = vmul.f32 %v7779_v36, %v8232_v41 }
 0x73e   :  { %v939_v14 = vmul.f32 %v7781_v16, %v8349_v8  ;;  %v954_v18 = vmul.f32 %v9328_v63, %v938_v24  ;;  %v7783_v0 = vpop.eup %7782  ;;  %v1196_v24 = vmax.f32 %v9191_v5, 1e-24 }
 0x73f   :  { %v7785_v31 = vpop.eup %7784  ;;  %v937_v22 = vmul.f32 %v7783_v0, %v8424_v58 }
 0x740   :  { %7229 = vrot.lane.b32.xlu1 %v7228_v43, %s8076_s4  ;;  %v955_v17 = vmul.f32 %v9328_v63, %v939_v14  ;;  %v936_v13 = vmul.f32 %v7785_v31, %v8367_v12  ;;  %7786 = vrsqrt.f32 %v1196_v24  ;;  %v11662_v14 = vld [vmem:[#allocation31_spill] sm:$0xff] }
 0x741   :  { %v953_v36 = vmul.f32 %v9328_v63, %v937_v22  ;;  %v11663_v31 = vld [vmem:[#allocation7_spill] sm:$0xff] }
 0x742   :  { %v7273_v50 = vpack.i.bf16 %v955_v17, %v954_v18 }
 0x744   :  { %2813 = vrot.lane.b32.xlu1 %v1996_v33, %s8075_s0  ;;  %v948_v33 = vmul.f32 %v9328_v63, %v932_v4 }
 0x746   :  { %v7258_v9 = vpack.i.bf16 %v949_v45, %v948_v33  ;;  %v1198_v45 = vmax.f32 %v11662_v14, 1e-24  ;;  %v1201_v33 = vmax.f32 %v9322_v21, 1e-24 }
 0x747   :  { %v9437_v34 = vpop.xlane.xlu1 %1173 }
 0x748   :  { %7239 = vrot.lane.b32.xlu1 %v7238_v3, %s8080_s17 }
 0x74b   :  { %v7150_v15 = vpop.permute.xlu1 %7149 }
 0x74c   :  { %2913 = vrot.lane.b32.xlu1 %v1998_v49, %s8075_s0  ;;  %v7152_v3 = vunpack.i.h.bf16 %v7150_v15  ;;  %v7151_v7 = vunpack.i.l.bf16 %v7150_v15  ;;  %v952_v15 = vmul.f32 %v9328_v63, %v936_v13 }
 0x74d   :  { %v9444_v40 = vpop.xlane.xlu0 %1188  ;;  %v7787_v18 = vpop.eup %7786 }
 0x74e   :  { %v2002_v49 = vpack.c.bf16 %v7152_v3, %v7151_v7  ;;  %v7268_v16 = vpack.i.bf16 %v953_v36, %v952_v15  ;;  %v11664_v36 = vld [vmem:[#allocation38_spill] sm:$0xff] }
 0x74f   :  { %v7155_v37 = vpop.permute.xlu1 %7154 }
 0x750   :  { %v7157_v55 = vunpack.i.h.bf16 %v7155_v37  ;;  %v7156_v19 = vunpack.i.l.bf16 %v7155_v37  ;;  %7249 = vrot.lane.b32.xlu1 %v7248_v51, %s8080_s17  ;;  %v11660_v37 = vld [vmem:[#allocation22_spill] sm:$0xff] }
 0x751   :  { %v9453_v23 = vpop.xlane.xlu0 %1191  ;;  %v1197_v4 = vmax.f32 %v11660_v37, 1e-24 }
 0x752   :  { %v2003_v43 = vpack.c.bf16 %v7157_v55, %v7156_v19  ;;  %v11661_v55 = vld [vmem:[#allocation10_spill] sm:$0xff] }
 0x753   :  { %v2464_v28 = vpop.permute.xlu1 %2463  ;;  %v1199_v19 = vmax.f32 %v11661_v55, 1e-24  ;;  %7788 = vrsqrt.f32 %v1197_v4 }
 0x754   :  { %v2469_v56 = vsel %vm213_vm1, %v2464_v28, 0  ;;  %3013 = vrot.lane.b32.xlu1 %v2000_v32, %s8075_s0  ;;  %3163 = vrot.lane.b32.xlu0 %v2003_v43, %s8075_s0 }
 0x755   :  { %6712 = vmatpush3.bf16.xpose.msra.mxu1 %v2469_v56  ;;  %v9462_v27 = vpop.xlane.xlu0 %1194  ;;  %7790 = vrsqrt.f32 %v1199_v19  ;;  %v1228_v56 = vmul.f32 %v7787_v18, %v8226_v38 }
 0x756   :  { %6723 = vmatprep.subr.bf16.mxu1 %v11591_v47  ;;  %7792 = vrsqrt.f32 %v1198_v45 }
 0x757   :  { %7794 = vrsqrt.f32 %v1201_v33 }
 0x758   :  { %7259 = vrot.lane.b32.xlu1 %v7258_v9, %s8080_s17  ;;  %7274 = vrot.lane.b32.xlu0 %v7273_v50, %s8080_s17  ;;  %v1200_v9 = vmax.f32 %v11663_v31, 1e-24 }
 0x759   :  { %v7170_v54 = vpop.permute.xlu0 %7169 }
 0x75a   :  { %v7172_v26 = vunpack.i.h.bf16 %v7170_v54  ;;  %v7171_v1 = vunpack.i.l.bf16 %v7170_v54  ;;  %v1203_v54 = vmax.f32 %v9336_v46, 1e-24  ;;  %7796 = vrsqrt.f32 %v1200_v9 }
 0x75c   :  { %v1956_v61 = vpack.c.bf16 %v7172_v26, %v7171_v1  ;;  %3113 = vrot.lane.b32.xlu1 %v2002_v49, %s8075_s0  ;;  %v1244_v1 = vmul.f32 %v9328_v63, %v1228_v56  ;;  %7798 = vrsqrt.f32 %v1203_v54 }
 0x75d   :  { %v9484_v32 = vpop.permute.xlu0 %7194 }
 0x75e   :  { %6708 = vmatmul.mubr.msk.bf16.vlgmr.msra.gmra.mxu0 %vm213_vm1, %v1956_v61  ;;  %v1202_v61 = vmax.f32 %v11664_v36, 1e-24 }
 0x75f   :  { %6719 = vmatprep.mubr.msk.bf16.mxu0 %vm8083_vm2, %v11591_v47 }
 0x760   :  { %7269 = vrot.lane.b32.xlu1 %v7268_v16, %s8080_s17  ;;  %v7789_v5 = vpop.eup %7788  ;;  %7800 = vrsqrt.f32 %v1202_v61 }
 0x761   :  { %v9476_v25 = vpop.f32.mrf.mxu1  ;;  %v9486_v43 = vpop.permute.xlu0 %2663  ;;  %v1229_v22 = vmul.f32 %v7789_v5, %v8278_v48  ;;  %v1207_v5 = vmax.f32 %v9363_v44, 1e-24 }
 0x762   :  { %v7791_v17 = vpop.eup %7790 }
 0x763   :  { %v6679_v2 = vpop.f32.mrf.mxu1  ;;  %v7793_v13 = vpop.eup %7792  ;;  %v1231_v21 = vmul.f32 %v7791_v17, %v8229_v39  ;;  %v1206_v17 = vmax.f32 %v9349_v20, 1e-24  ;;  %7802 = vrsqrt.f32 %v1207_v5  ;;  %v1204_v20 = vmax.f32 %v9437_v34, 1e-24 }
 0x764   :  { %v1230_v24 = vmul.f32 %v7793_v13, %v8196_v29  ;;  %v1205_v13 = vmax.f32 %v9341_v62, 1e-24 }
 0x765   :  { %v9478_v11 = vpop.f32.mrf.mxu1  ;;  %v9490_v28 = vpop.permute.xlu0 %7204  ;;  %v1247_v4 = vmul.f32 %v9328_v63, %v1231_v21  ;;  %7804 = vrsqrt.f32 %v1206_v17  ;;  %v7196_v21 = vunpack.i.l.bf16 %v9484_v32 }
 0x766   :  { %v1246_v18 = vmul.f32 %v9328_v63, %v1230_v24  ;;  %7806 = vrsqrt.f32 %v1204_v20 }
 0x767   :  { %v6680_v51 = vpop.f32.mrf.mxu1  ;;  %7808 = vrsqrt.f32 %v1205_v13 }
 0x768   :  { %v1245_v51 = vmul.f32 %v9328_v63, %v1229_v22  ;;  %v7283_v56 = vpack.i.bf16 %v1247_v4, %v1246_v18 }
 0x769   :  { %v9497_v49 = vpop.permute.xlu0 %7214 }
 0x76a   :  { %v7278_v37 = vpack.i.bf16 %v1245_v51, %v1244_v1  ;;  %v7197_v1 = vunpack.i.h.bf16 %v9484_v32 }
 0x76c   :  { %v1959_v32 = vpack.c.bf16 %v7197_v1, %v7196_v21 }
 0x76d   :  { %v9506_v19 = vpop.permute.xlu0 %2763 }
 0x784   :  { %v9488_v0 = vpop.xlane.xlu1 %1185 }
 0x788   :  { %v7160_v3 = vpop.permute.xlu1 %7159 }
 0x789   :  { %v7162_v7 = vunpack.i.h.bf16 %v7160_v3  ;;  %v7161_v50 = vunpack.i.l.bf16 %v7160_v3  ;;  %v7795_v3 = vpop.eup %7794 }
 0x78a   :  { %v1233_v54 = vmul.f32 %v7795_v3, %v8418_v52 }
 0x78b   :  { %v2004_v26 = vpack.c.bf16 %v7162_v7, %v7161_v50  ;;  %v9518_v7 = vpop.permute.xlu0 %7224  ;;  %v7797_v50 = vpop.eup %7796 }
 0x78c   :  { %v7165_v15 = vpop.permute.xlu1 %7164  ;;  %v7799_v36 = vpop.eup %7798  ;;  %v1232_v61 = vmul.f32 %v7797_v50, %v8358_v10  ;;  %v1249_v24 = vmul.f32 %v9328_v63, %v1233_v54  ;;  %v1208_v50 = vmax.f32 %v9488_v0, 1e-24  ;;  %v7207_v0 = vunpack.i.h.bf16 %v9490_v28 }
 0x78d   :  { %v7167_v16 = vunpack.i.h.bf16 %v7165_v15  ;;  %v7166_v2 = vunpack.i.l.bf16 %v7165_v15  ;;  %3213 = vrot.lane.b32.xlu1 %v2004_v26, %s8075_s0  ;;  %v1211_v26 = vmax.f32 %v9462_v27, 1e-24  ;;  %v7801_v15 = vpop.eup %7800 }
 0x78f   :  { %v2005_v46 = vpack.c.bf16 %v7167_v16, %v7166_v2  ;;  %v1210_v16 = vmax.f32 %v9453_v23, 1e-24  ;;  %v9531_v62 = vpop.permute.xlu0 %7234  ;;  %7810 = vrsqrt.f32 %v1211_v26  ;;  %v1234_v23 = vmul.f32 %v7801_v15, %v8295_v57 }
 0x790   :  { %v7175_v55 = vpop.permute.xlu1 %7174  ;;  %v7206_v15 = vunpack.i.l.bf16 %v9490_v28 }
 0x791   :  { %v7177_v14 = vunpack.i.h.bf16 %v7175_v55  ;;  %v7176_v45 = vunpack.i.l.bf16 %v7175_v55  ;;  %7279 = vrot.lane.b32.xlu1 %v7278_v37, %s8081_s18  ;;  %3263 = vrot.lane.b32.xlu0 %v2005_v46, %s8075_s0  ;;  %v1235_v37 = vmul.f32 %v7799_v36, %v8346_v6  ;;  %7812 = vrsqrt.f32 %v1210_v16 }
 0x792   :  { %v1250_v1 = vmul.f32 %v9328_v63, %v1234_v23  ;;  %7814 = vrsqrt.f32 %v1208_v50 }
 0x793   :  { %v1957_v33 = vpack.c.bf16 %v7177_v14, %v7176_v45  ;;  %v1248_v14 = vmul.f32 %v9328_v63, %v1232_v61  ;;  %v2669_v45 = vsel %vm213_vm1, %v9486_v43, 0  ;;  %v7216_v43 = vunpack.i.l.bf16 %v9497_v49  ;;  %v9551_v3 = vpop.permute.xlu0 %2863 }
 0x794   :  { %v2514_v31 = vpop.permute.xlu1 %2513 }
 0x795   :  { %v2519_v9 = vsel %vm213_vm1, %v2514_v31, 0  ;;  %6714 = vmatmul.mubr.msk.bf16.vlgmr.msra.gmra.mxu1 %vm213_vm1, %v1957_v33  ;;  %7284 = vrot.lane.b32.xlu0 %v7283_v56, %s8081_s18  ;;  %v7288_v17 = vpack.i.bf16 %v1249_v24, %v1248_v14  ;;  %v7803_v31 = vpop.eup %7802 }
 0x796   :  { %6718 = vmatpush3.bf16.xpose.msra.mxu0 %v2519_v9  ;;  %6725 = vmatprep.mubr.msk.bf16.mxu1 %vm8083_vm2, %v11591_v47  ;;  %v7217_v9 = vunpack.i.h.bf16 %v9497_v49  ;;  %v7805_v54 = vpop.eup %7804  ;;  %v1209_v49 = vmax.f32 %v9444_v40, 1e-24  ;;  %v1239_v61 = vmul.f32 %v7803_v31, %v8235_v42 }
 0x797   :  { %6729 = vmatprep.subr.bf16.mxu0 %v11591_v47  ;;  %v7807_v40 = vpop.eup %7806 }
 0x798   :  { %v2564_v44 = vpop.permute.xlu1 %2563  ;;  %v1961_v16 = vpack.c.bf16 %v7217_v9, %v7216_v43  ;;  %7816 = vrsqrt.f32 %v1209_v49  ;;  %v1255_v23 = vmul.f32 %v9328_v63, %v1239_v61  ;;  %v1236_v43 = vmul.f32 %v7807_v40, %v8232_v41 }
 0x799   :  { %v2569_v22 = vsel %vm213_vm1, %v2564_v44, 0  ;;  %v1251_v44 = vmul.f32 %v9328_v63, %v1235_v37  ;;  %v2769_v37 = vsel %vm213_vm1, %v9506_v19, 0  ;;  %v7237_v19 = vunpack.i.h.bf16 %v9531_v62 }
 0x79a   :  { %6724 = vmatpush3.bf16.xpose.msra.mxu1 %v2569_v22 }
 0x79b   :  { %6735 = vmatprep.subr.bf16.mxu1 %v11591_v47 }
 0x79c   :  { %v7180_v34 = vpop.permute.xlu1 %7179 }
 0x79d   :  { %v7182_v2 = vunpack.i.h.bf16 %v7180_v34  ;;  %v7181_v51 = vunpack.i.l.bf16 %v7180_v34 }
 0x79e   :  { %v9533_v27 = vpop.f32.mrf.mxu0 }
 0x79f   :  { %v2006_v46 = vpack.c.bf16 %v7182_v2, %v7181_v51  ;;  %v7293_v2 = vpack.i.bf16 %v1251_v44, %v1250_v1  ;;  %v7226_v1 = vunpack.i.l.bf16 %v9518_v7 }
 0x7a0   :  { %v6685_v4 = vpop.f32.mrf.mxu0  ;;  %v7185_v55 = vpop.permute.xlu1 %7184 }
 0x7a1   :  { %v7187_v18 = vunpack.i.h.bf16 %v7185_v55  ;;  %v7186_v5 = vunpack.i.l.bf16 %v7185_v55  ;;  %3313 = vrot.lane.b32.xlu1 %v2006_v46, %s8075_s0  ;;  %6726 = vmatmul.mubr.msk.bf16.vlgmr.msra.gmra.mxu1 %vm213_vm1, %v1959_v32  ;;  %v1238_v46 = vmul.f32 %v7805_v54, %v8199_v30  ;;  %v9570_v4 = vpop.permute.xlu0 %7244 }
 0x7a2   :  { %v9543_v33 = vpop.f32.mrf.mxu0  ;;  %v9545_v56 = vpop.f32.mrf.mxu1  ;;  %6736 = vmatpush3.bf16.xpose.msra.mxu1 %v2669_v45  ;;  %6737 = vmatprep.mubr.msk.bf16.mxu1 %vm8083_vm2, %v11591_v47  ;;  %v7247_v40 = vunpack.i.h.bf16 %v9570_v4 }
 0x7a3   :  { %v2007_v20 = vpack.c.bf16 %v7187_v18, %v7186_v5  ;;  %6747 = vmatprep.subr.bf16.mxu1 %v11591_v47  ;;  %v7809_v45 = vpop.eup %7808  ;;  %v2009_v18 = vpack.c.bf16 %v7207_v0, %v7206_v15  ;;  %v7236_v5 = vunpack.i.l.bf16 %v9531_v62  ;;  %v1254_v9 = vmul.f32 %v9328_v63, %v1238_v46 }
 0x7a4   :  { %v6686_v22 = vpop.f32.mrf.mxu0  ;;  %v6691_v13 = vpop.f32.mrf.mxu1  ;;  %v1237_v54 = vmul.f32 %v7809_v45, %v8298_v59  ;;  %v1252_v0 = vmul.f32 %v9328_v63, %v1236_v43  ;;  %v2869_v15 = vsel %vm213_vm1, %v9551_v3, 0 }
 0x7a5   :  { %v7190_v26 = vpop.permute.xlu1 %7189  ;;  %7289 = vrot.lane.b32.xlu1 %v7288_v17, %s8081_s18  ;;  %3363 = vrot.lane.b32.xlu0 %v2007_v20, %s8075_s0  ;;  %v7811_v17 = vpop.eup %7810  ;;  %v7303_v13 = vpack.i.bf16 %v1255_v23, %v1254_v9  ;;  %v1963_v49 = vpack.c.bf16 %v7237_v19, %v7236_v5 }
 0x7a6   :  { %v7192_v21 = vunpack.i.h.bf16 %v7190_v26  ;;  %v7191_v36 = vunpack.i.l.bf16 %v7190_v26  ;;  %v9560_v34 = vpop.f32.mrf.mxu1  ;;  %v7813_v62 = vpop.eup %7812  ;;  %v7227_v26 = vunpack.i.h.bf16 %v9518_v7  ;;  %v1253_v7 = vmul.f32 %v9328_v63, %v1237_v54 }
 0x7a8   :  { %v1958_v51 = vpack.c.bf16 %v7192_v21, %v7191_v36  ;;  %v6692_v24 = vpop.f32.mrf.mxu1  ;;  %v9565_v32 = vpop.f32.mrf.mxu0  ;;  %v1243_v36 = vmul.f32 %v7811_v17, %v8349_v8  ;;  %v2011_v46 = vpack.c.bf16 %v7227_v26, %v7226_v1 }
 0x7a9   :  { %v2614_v55 = vpop.permute.xlu1 %2613  ;;  %7294 = vrot.lane.b32.xlu0 %v7293_v2, %s8081_s18  ;;  %6738 = vmatmul.mubr.msk.bf16.vlgmr.msra.gmra.mxu1 %vm213_vm1, %v1961_v16  ;;  %v2964_v21 = vpop.permute.xlu0 %2963  ;;  %v1242_v2 = vmul.f32 %v7813_v62, %v8303_v60 }
 0x7aa   :  { %v2619_v28 = vsel %vm213_vm1, %v2614_v55, 0  ;;  %6720 = vmatmul.mubr.msk.bf16.vlgmr.msra.gmra.mxu0 %vm213_vm1, %v1958_v51  ;;  %v6697_v14 = vpop.f32.mrf.mxu0  ;;  %6748 = vmatpush3.bf16.xpose.msra.mxu1 %v2769_v37  ;;  %v7246_v37 = vunpack.i.l.bf16 %v9570_v4  ;;  %v1259_v3 = vmul.f32 %v9328_v63, %v1243_v36  ;;  %v2969_v43 = vsel %vm213_vm1, %v2964_v21, 0 }
 0x7ab   :  { %6730 = vmatpush3.bf16.xpose.msra.mxu0 %v2619_v28  ;;  %6749 = vmatprep.mubr.msk.bf16.mxu1 %vm8083_vm2, %v11591_v47  ;;  %v7298_v28 = vpack.i.bf16 %v1253_v7, %v1252_v0  ;;  %v7815_v14 = vpop.eup %7814 }
 0x7ac   :  { %v9581_v31 = vpop.f32.mrf.mxu0  ;;  %6759 = vmatprep.subr.bf16.mxu1 %v11591_v47  ;;  %6731 = vmatprep.mubr.msk.bf16.mxu0 %vm8083_vm2, %v11591_v47  ;;  %v7817_v4 = vpop.eup %7816  ;;  %v1965_v5 = vpack.c.bf16 %v7247_v40, %v7246_v37  ;;  %v1240_v9 = vmul.f32 %v7815_v14, %v8367_v12 }
 0x7ad   :  { %v7200_v20 = vpop.permute.xlu1 %7199  ;;  %3463 = vrot.lane.b32.xlu0 %v2009_v18, %s8075_s0  ;;  %6741 = vmatprep.subr.bf16.mxu0 %v11591_v47  ;;  %v7255_v23 = vpop.permute.xlu0 %7254  ;;  %v1258_v18 = vmul.f32 %v9328_v63, %v1242_v2 }
 0x7ae   :  { %v7202_v44 = vunpack.i.h.bf16 %v7200_v20  ;;  %v7201_v50 = vunpack.i.l.bf16 %v7200_v20  ;;  %v6698_v22 = vpop.f32.mrf.mxu0  ;;  %v1256_v1 = vmul.f32 %v9328_v63, %v1240_v9 }
 0x7af   :  { %v7313_v17 = vpack.i.bf16 %v1259_v3, %v1258_v18  ;;  %v7257_v22 = vunpack.i.h.bf16 %v7255_v23 }
 0x7b0   :  { %v2008_v61 = vpack.c.bf16 %v7202_v44, %v7201_v50  ;;  %v1241_v50 = vmul.f32 %v7817_v4, %v8424_v58 }
 0x7b1   :  { %v7210_v16 = vpop.permute.xlu1 %7209  ;;  %7304 = vrot.lane.b32.xlu0 %v7303_v13, %s8081_s18  ;;  %6750 = vmatmul.mubr.msk.bf16.vlgmr.msra.gmra.mxu1 %vm213_vm1, %v1963_v49  ;;  %v7256_v13 = vunpack.i.l.bf16 %v7255_v23  ;;  %v3064_v54 = vpop.permute.xlu0 %3063 }
 0x7b2   :  { %v7212_v51 = vunpack.i.h.bf16 %v7210_v16  ;;  %v7211_v24 = vunpack.i.l.bf16 %v7210_v16  ;;  %3413 = vrot.lane.b32.xlu1 %v2008_v61, %s8075_s0  ;;  %6760 = vmatpush3.bf16.xpose.msra.mxu1 %v2869_v15  ;;  %v1257_v61 = vmul.f32 %v9328_v63, %v1241_v50 }
 0x7b3   :  { %6761 = vmatprep.mubr.msk.bf16.mxu1 %vm8083_vm2, %v11591_v47  ;;  %6771 = vmatprep.subr.bf16.mxu1 %v11591_v47  ;;  %v1967_v0 = vpack.c.bf16 %v7257_v22, %v7256_v13  ;;  %v11665_v13 = vld [vmem:[#allocation13_spill] sm:$0xff] }
 0x7b4   :  { %v1960_v55 = vpack.c.bf16 %v7212_v51, %v7211_v24  ;;  %v7308_v16 = vpack.i.bf16 %v1257_v61, %v1256_v1  ;;  %v3069_v24 = vsel %vm213_vm1, %v3064_v54, 0  ;;  %v3612_v1 = vld [vmem:[%s11467_s1] sm:$0xff] }
 0x7b5   :  { %v2714_v45 = vpop.permute.xlu1 %2713  ;;  %3563 = vrot.lane.b32.xlu0 %v2011_v46, %s8075_s0  ;;  %v7265_v2 = vpop.permute.xlu0 %7264 }
 0x7b6   :  { %v2719_v19 = vsel %vm213_vm1, %v2714_v45, 0  ;;  %7299 = vrot.lane.b32.xlu1 %v7298_v28, %s8081_s18  ;;  %6732 = vmatmul.mubr.msk.bf16.vlgmr.msra.gmra.mxu0 %vm213_vm1, %v1960_v55  ;;  %v7267_v46 = vunpack.i.h.bf16 %v7265_v2  ;;  %v7266_v40 = vunpack.i.l.bf16 %v7265_v2 }
 0x7b7   :  { %6742 = vmatpush3.bf16.xpose.msra.mxu0 %v2719_v19  ;;  %6743 = vmatprep.mubr.msk.bf16.mxu0 %vm8083_vm2, %v11591_v47 }
 0x7b8   :  { %6753 = vmatprep.subr.bf16.mxu0 %v11591_v47  ;;  %v1969_v28 = vpack.c.bf16 %v7267_v46, %v7266_v40 }
 0x7b9   :  { %v7220_v20 = vpop.permute.xlu1 %7219  ;;  %7314 = vrot.lane.b32.xlu0 %v7313_v17, %s8081_s18  ;;  %6762 = vmatmul.mubr.msk.bf16.vlgmr.msra.gmra.mxu1 %vm213_vm1, %v1965_v5 }
 0x7ba   :  { %v7222_v62 = vunpack.i.h.bf16 %v7220_v20  ;;  %v7221_v44 = vunpack.i.l.bf16 %v7220_v20  ;;  %6772 = vmatpush3.bf16.xpose.msra.mxu1 %v2969_v43  ;;  %6773 = vmatprep.mubr.msk.bf16.mxu1 %vm8083_vm2, %v11591_v47  ;;  %v9651_v20 = vld [vmem:[%s11467_s1 + $0x8] sm:$0xff] }
 0x7bb   :  { %6783 = vmatprep.subr.bf16.mxu1 %v11591_v47  ;;  %v9658_v54 = vadd.f32 %v9651_v20, %v11665_v13 }
 0x7bc   :  { %v2010_v26 = vpack.c.bf16 %v7222_v62, %v7221_v44 }
 0x7bd   :  { %v7230_v49 = vpop.permute.xlu1 %7229 }
 0x7be   :  { %v7232_v21 = vunpack.i.h.bf16 %v7230_v49  ;;  %v7231_v36 = vunpack.i.l.bf16 %v7230_v49  ;;  %3513 = vrot.lane.b32.xlu1 %v2010_v26, %s8075_s0  ;;  %s8085_s0 = smov 8  }
 0x7c0   :  { %v1962_v15 = vpack.c.bf16 %v7232_v21, %v7231_v36  ;;  %v11666_v36 = vld [vmem:[#allocation27_spill] sm:$0xff] }
 0x7c1   :  { %v2814_v51 = vpop.permute.xlu1 %2813  ;;  %6774 = vmatmul.mubr.msk.bf16.vlgmr.msra.gmra.mxu1 %vm213_vm1, %v1967_v0  ;;  %v9669_v61 = vadd.f32 %v3612_v1, %v11666_v36  ;;  %v3688_v0 = vsel %vm3684_vm3, %v9658_v54, -inf }
 0x7c2   :  { %v2819_v7 = vsel %vm213_vm1, %v2814_v51, 0  ;;  %7309 = vrot.lane.b32.xlu1 %v7308_v16, %s8081_s18  ;;  %6744 = vmatmul.mubr.msk.bf16.vlgmr.msra.gmra.mxu0 %vm213_vm1, %v1962_v15  ;;  %v9676_v51 = vadd.f32 %v3612_v1, %v9388_v53 }
 0x7c3   :  { %6754 = vmatpush3.bf16.xpose.msra.mxu0 %v2819_v7  ;;  %6784 = vmatpush3.bf16.xpose.msra.mxu1 %v3069_v24  ;;  %v3691_v24 = vsel %vm3684_vm3, %v9669_v61, -inf }
 0x7c4   :  { %6755 = vmatprep.mubr.msk.bf16.mxu0 %vm8083_vm2, %v11591_v47  ;;  %6785 = vmatprep.mubr.msk.bf16.mxu1 %vm8083_vm2, %v11591_v47  ;;  %v3697_v53 = vsel %vm3684_vm3, %v9676_v51, -inf }
 0x7c5   :  { %v7240_v63 = vpop.permute.xlu1 %7239  ;;  %6765 = vmatprep.subr.bf16.mxu0 %v11591_v47  ;;  %6795 = vmatprep.subr.bf16.mxu1 %v11591_v47 }
 0x7c6   :  { %v7242_v37 = vunpack.i.h.bf16 %v7240_v63  ;;  %v7241_v3 = vunpack.i.l.bf16 %v7240_v63  ;;  %v3164_v55 = vpop.permute.xlu0 %3163  ;;  %v9684_v63 = vadd.f32 %v3612_v1, %v9476_v25 }
 0x7c7   :  { %v3169_v45 = vsel %vm213_vm1, %v3164_v55, 0  ;;  %v11667_v55 = vld [vmem:[#allocation12_spill] sm:$0xff] }
 0x7c8   :  { %v1964_v14 = vpack.c.bf16 %v7242_v37, %v7241_v3  ;;  %v3703_v25 = vsel %vm3684_vm3, %v9684_v63, -inf }
 0x7c9   :  { %v2914_v23 = vpop.permute.xlu1 %2913 }
 0x7ca   :  { %v2919_v18 = vsel %vm213_vm1, %v2914_v23, 0  ;;  %6756 = vmatmul.mubr.msk.bf16.vlgmr.msra.gmra.mxu0 %vm213_vm1, %v1964_v14  ;;  %6786 = vmatmul.mubr.msk.bf16.vlgmr.msra.gmra.mxu1 %vm213_vm1, %v1969_v28  ;;  %v7275_v19 = vpop.permute.xlu0 %7274  ;;  %v9689_v28 = vadd.f32 %v3612_v1, %v11667_v55  ;;  %v9693_v23 = vadd.f32 %v3612_v1, %v9533_v27  ;;  %v9706_v27 = vadd.f32 %v3612_v1, %v9545_v56 }
 0x7cb   :  { %6766 = vmatpush3.bf16.xpose.msra.mxu0 %v2919_v18  ;;  %6796 = vmatpush3.bf16.xpose.msra.mxu1 %v3169_v45  ;;  %v7277_v4 = vunpack.i.h.bf16 %v7275_v19  ;;  %v7276_v5 = vunpack.i.l.bf16 %v7275_v19  ;;  %v11668_v18 = vld [vmem:[#allocation34_spill] sm:$0xff]  ;;  %v9723_v56 = vadd.f32 %v9651_v20, %v9478_v11 }
 0x7cc   :  { %6767 = vmatprep.mubr.msk.bf16.mxu0 %vm8083_vm2, %v11591_v47  ;;  %6797 = vmatprep.mubr.msk.bf16.mxu1 %vm8083_vm2, %v11591_v47  ;;  %v9701_v19 = vadd.f32 %v9651_v20, %v11668_v18 }
 0x7cd   :  { %v7250_v17 = vpop.permute.xlu1 %7249  ;;  %6777 = vmatprep.subr.bf16.mxu0 %v11591_v47  ;;  %6807 = vmatprep.subr.bf16.mxu1 %v11591_v47  ;;  %v1971_v62 = vpack.c.bf16 %v7277_v4, %v7276_v5  ;;  %v3685_v5 = vsel %vm3684_vm3, %v9689_v28, -inf  ;;  %v3706_v13 = vsel %vm3684_vm3, %v9723_v56, -inf }
 0x7ce   :  { %v7252_v9 = vunpack.i.h.bf16 %v7250_v17  ;;  %v7251_v43 = vunpack.i.l.bf16 %v7250_v17  ;;  %v3709_v17 = vsel %vm3684_vm3, %v9693_v23, -inf }
 0x7d0   :  { %v1966_v44 = vpack.c.bf16 %v7252_v9, %v7251_v43  ;;  %v9712_v9 = vadd.f32 %v9651_v20, %v9394_v35  ;;  %v3694_v43 = vsel %vm3684_vm3, %v9701_v19, -inf }
 0x7d1   :  { %v3014_v50 = vpop.permute.xlu1 %3013 }
 0x7d2   :  { %v3019_v22 = vsel %vm213_vm1, %v3014_v50, 0  ;;  %6768 = vmatmul.mubr.msk.bf16.vlgmr.msra.gmra.mxu0 %vm213_vm1, %v1966_v44  ;;  %6798 = vmatmul.mubr.msk.bf16.vlgmr.msra.gmra.mxu1 %vm213_vm1, %v1971_v62  ;;  %v9717_v62 = vadd.f32 %v3612_v1, %v9565_v32  ;;  %v3715_v44 = vsel %vm3684_vm3, %v9706_v27, -inf  ;;  %v3700_v50 = vsel %vm3684_vm3, %v9712_v9, -inf }
 0x7d3   :  { %6778 = vmatpush3.bf16.xpose.msra.mxu0 %v3019_v22  ;;  %6779 = vmatprep.mubr.msk.bf16.mxu0 %vm8083_vm2, %v11591_v47  ;;  %v9733_v32 = vadd.f32 %v9651_v20, %v9543_v33  ;;  %v9747_v33 = vadd.f32 %v9651_v20, %v9581_v31 }
 0x7d4   :  { %6789 = vmatprep.subr.bf16.mxu0 %v11591_v47  ;;  %6809 = vmatprep.mubr.msk.bf16.mxu1 %vm8083_vm2, %v11591_v47  ;;  %v3721_v22 = vsel %vm3684_vm3, %v9717_v62, -inf }
 0x7d5   :  { %v7260_v26 = vpop.permute.xlu1 %7259  ;;  %v3724_v36 = vsel %vm3684_vm3, %v9747_v33, -inf }
 0x7d6   :  { %v7262_v49 = vunpack.i.h.bf16 %v7260_v26  ;;  %v7261_v21 = vunpack.i.l.bf16 %v7260_v26  ;;  %v9741_v26 = vadd.f32 %v9651_v20, %v9560_v34 }
 0x7d8   :  { %v1968_v15 = vpack.c.bf16 %v7262_v49, %v7261_v21  ;;  %3689 = vmax.xlane.f32.xlu0 %v3688_v0  ;;  %v3718_v49 = vsel %vm3684_vm3, %v9741_v26, -inf }
 0x7d9   :  { %v3114_v16 = vpop.permute.xlu1 %3113 }
 0x7da   :  { %v3119_v2 = vsel %vm213_vm1, %v3114_v16, 0  ;;  %6780 = vmatmul.mubr.msk.bf16.vlgmr.msra.gmra.mxu0 %vm213_vm1, %v1968_v15 }
 0x7db   :  { %6790 = vmatpush3.bf16.xpose.msra.mxu0 %v3119_v2  ;;  %6791 = vmatprep.mubr.msk.bf16.mxu0 %vm8083_vm2, %v11591_v47 }
 0x7dc   :  { %3692 = vmax.xlane.f32.xlu0 %v3691_v24  ;;  %6801 = vmatprep.subr.bf16.mxu0 %v11591_v47 }
 0x7dd   :  { %v7270_v7 = vpop.permute.xlu1 %7269 }
 0x7de   :  { %v7272_v46 = vunpack.i.h.bf16 %v7270_v7  ;;  %v7271_v40 = vunpack.i.l.bf16 %v7270_v7 }
 0x7df   :  { %v2405_v37 = vpop.f32.mrf.mxu1 }
 0x7e0   :  { %v1970_v3 = vpack.c.bf16 %v7272_v46, %v7271_v40  ;;  %3698 = vmax.xlane.f32.xlu0 %v3697_v53  ;;  %v9727_v35 = vadd.f32 %v3612_v1, %v2405_v37  ;;  %v3712_v1 = vsel %vm3684_vm3, %v9733_v32, -inf }
 0x7e1   :  { %v6703_v14 = vpop.f32.mrf.mxu1 }
 0x7e2   :  { %6792 = vmatmul.mubr.msk.bf16.vlgmr.msra.gmra.mxu0 %vm213_vm1, %v1970_v3  ;;  %v3727_v11 = vsel %vm3684_vm3, %v9727_v35, -inf }
 0x7e3   :  { %v2408_v45 = vpop.f32.mrf.mxu1  ;;  %6803 = vmatprep.mubr.msk.bf16.mxu0 %vm8083_vm2, %v11591_v47 }
 0x7e4   :  { %3704 = vmax.xlane.f32.xlu0 %v3703_v25  ;;  %v9752_v21 = vadd.f32 %v9651_v20, %v2408_v45 }
 0x7e5   :  { %v6704_v4 = vpop.f32.mrf.mxu1 }
 0x7e6   :  { %3686 = vmax.xlane.f32.xlu1 %v3685_v5  ;;  %v3730_v15 = vsel %vm3684_vm3, %v9752_v21, -inf }
 0x7e8   :  { %3710 = vmax.xlane.f32.xlu0 %v3709_v17 }
 0x7ea   :  { %3695 = vmax.xlane.f32.xlu1 %v3694_v43 }
 0x7ec   :  { %3716 = vmax.xlane.f32.xlu0 %v3715_v44 }
 0x7ee   :  { %3701 = vmax.xlane.f32.xlu1 %v3700_v50  ;;  %v9776_v50 = vld [vmem:[%s11467_s1 + $0x10] sm:$0xff] }
 0x7f0   :  { %3722 = vmax.xlane.f32.xlu0 %v3721_v22 }
 0x7f2   :  { %3707 = vmax.xlane.f32.xlu1 %v3706_v13 }
 0x7f4   :  { %3728 = vmax.xlane.f32.xlu0 %v3727_v11 }
 0x7f6   :  { %3713 = vmax.xlane.f32.xlu1 %v3712_v1 }
 0x7fa   :  { %3719 = vmax.xlane.f32.xlu1 %v3718_v49 }
 0x7fe   :  { %3725 = vmax.xlane.f32.xlu1 %v3724_v36 }
 0x7ff   :  { %v3214_v34 = vpop.permute.xlu1 %3213 }
 0x800   :  { %v3219_v0 = vsel %vm213_vm1, %v3214_v34, 0  ;;  %v9788_v34 = vld [vmem:[%s11467_s1 + $0x18] sm:$0xff] }
 0x801   :  { %6802 = vmatpush3.bf16.xpose.msra.mxu0 %v3219_v0 }
 0x802   :  { %3731 = vmax.xlane.f32.xlu1 %v3730_v15  ;;  %6813 = vmatprep.subr.bf16.mxu0 %v11591_v47 }
 0x803   :  { %v7280_v31 = vpop.permute.xlu1 %7279  ;;  %v3264_v16 = vpop.permute.xlu0 %3263 }
 0x804   :  { %v7282_v2 = vunpack.i.h.bf16 %v7280_v31  ;;  %v7281_v24 = vunpack.i.l.bf16 %v7280_v31  ;;  %v3269_v20 = vsel %vm213_vm1, %v3264_v16, 0 }
 0x805   :  { %6808 = vmatpush3.bf16.xpose.msra.mxu1 %v3269_v20 }
 0x806   :  { %v1972_v7 = vpack.c.bf16 %v7282_v2, %v7281_v24  ;;  %6819 = vmatprep.subr.bf16.mxu1 %v11591_v47 }
 0x807   :  { %v7285_v46 = vpop.permute.xlu0 %7284 }
 0x808   :  { %v7287_v40 = vunpack.i.h.bf16 %v7285_v46  ;;  %v7286_v37 = vunpack.i.l.bf16 %v7285_v46  ;;  %6804 = vmatmul.mubr.msk.bf16.vlgmr.msra.gmra.mxu0 %vm213_vm1, %v1972_v7 }
 0x809   :  { %6815 = vmatprep.mubr.msk.bf16.mxu0 %vm8083_vm2, %v11591_v47 }
 0x80a   :  { %v1973_v53 = vpack.c.bf16 %v7287_v40, %v7286_v37 }
 0x80c   :  { %6810 = vmatmul.mubr.msk.bf16.vlgmr.msra.gmra.mxu1 %vm213_vm1, %v1973_v53 }
 0x80d   :  { %6821 = vmatprep.mubr.msk.bf16.mxu1 %vm8083_vm2, %v11591_v47 }
 0x813   :  { %v3314_v3 = vpop.permute.xlu1 %3313 }
 0x814   :  { %v3319_v55 = vsel %vm213_vm1, %v3314_v3, 0 }
 0x815   :  { %6814 = vmatpush3.bf16.xpose.msra.mxu0 %v3319_v55 }
 0x816   :  { %6825 = vmatprep.subr.bf16.mxu0 %v11591_v47 }
 0x817   :  { %v7290_v14 = vpop.permute.xlu1 %7289  ;;  %v3364_v45 = vpop.permute.xlu0 %3363 }
 0x818   :  { %v7292_v25 = vunpack.i.h.bf16 %v7290_v14  ;;  %v7291_v18 = vunpack.i.l.bf16 %v7290_v14  ;;  %v3369_v4 = vsel %vm213_vm1, %v3364_v45, 0 }
 0x819   :  { %6820 = vmatpush3.bf16.xpose.msra.mxu1 %v3369_v4 }
 0x81a   :  { %v1974_v5 = vpack.c.bf16 %v7292_v25, %v7291_v18  ;;  %6831 = vmatprep.subr.bf16.mxu1 %v11591_v47 }
 0x81b   :  { %v7295_v17 = vpop.permute.xlu0 %7294 }
 0x81c   :  { %v7297_v43 = vunpack.i.h.bf16 %v7295_v17  ;;  %v7296_v44 = vunpack.i.l.bf16 %v7295_v17  ;;  %6816 = vmatmul.mubr.msk.bf16.vlgmr.msra.gmra.mxu0 %vm213_vm1, %v1974_v5 }
 0x81d   :  { %6827 = vmatprep.mubr.msk.bf16.mxu0 %vm8083_vm2, %v11591_v47 }
 0x81e   :  { %v1975_v22 = vpack.c.bf16 %v7297_v43, %v7296_v44  ;;  %v2455_v13 = vpop.f32.mrf.mxu0 }
 0x81f   :  { %v9781_v11 = vadd.f32 %v9776_v50, %v2455_v13  ;;  %v3464_v1 = vpop.permute.xlu0 %3463 }
 0x820   :  { %v3469_v49 = vsel %vm213_vm1, %v3464_v1, 0  ;;  %v6709_v36 = vpop.f32.mrf.mxu0  ;;  %6822 = vmatmul.mubr.msk.bf16.vlgmr.msra.gmra.mxu1 %vm213_vm1, %v1975_v22 }
 0x821   :  { %6832 = vmatpush3.bf16.xpose.msra.mxu1 %v3469_v49  ;;  %v3733_v0 = vsel %vm3684_vm3, %v9781_v11, -inf  ;;  %6833 = vmatprep.mubr.msk.bf16.mxu1 %vm8083_vm2, %v11591_v47 }
 0x822   :  { %3734 = vmax.xlane.f32.xlu0 %v3733_v0  ;;  %v2458_v15 = vpop.f32.mrf.mxu0  ;;  %6843 = vmatprep.subr.bf16.mxu1 %v11591_v47 }
 0x823   :  { %v9796_v31 = vadd.f32 %v9788_v34, %v2458_v15  ;;  %v7305_v16 = vpop.permute.xlu0 %7304 }
 0x824   :  { %v3414_v2 = vpop.permute.xlu1 %3413  ;;  %v7307_v24 = vunpack.i.h.bf16 %v7305_v16  ;;  %v7306_v20 = vunpack.i.l.bf16 %v7305_v16  ;;  %v6710_v7 = vpop.f32.mrf.mxu0 }
 0x825   :  { %v3419_v46 = vsel %vm213_vm1, %v3414_v2, 0  ;;  %v3736_v40 = vsel %vm3684_vm3, %v9796_v31, -inf }
 0x826   :  { %v1977_v37 = vpack.c.bf16 %v7307_v24, %v7306_v20  ;;  %6826 = vmatpush3.bf16.xpose.msra.mxu0 %v3419_v46  ;;  %3737 = vmax.xlane.f32.xlu1 %v3736_v40 }
 0x827   :  { %v3564_v53 = vpop.permute.xlu0 %3563  ;;  %6837 = vmatprep.subr.bf16.mxu0 %v11591_v47 }
 0x828   :  { %v7300_v3 = vpop.permute.xlu1 %7299  ;;  %v3569_v55 = vsel %vm213_vm1, %v3564_v53, 0  ;;  %6834 = vmatmul.mubr.msk.bf16.vlgmr.msra.gmra.mxu1 %vm213_vm1, %v1977_v37 }
 0x829   :  { %v7302_v14 = vunpack.i.h.bf16 %v7300_v3  ;;  %v7301_v45 = vunpack.i.l.bf16 %v7300_v3  ;;  %6844 = vmatpush3.bf16.xpose.msra.mxu1 %v3569_v55  ;;  %6845 = vmatprep.mubr.msk.bf16.mxu1 %vm8083_vm2, %v11591_v47 }
 0x82a   :  { %6855 = vmatprep.subr.bf16.mxu1 %v11591_v47 }
 0x82b   :  { %v1976_v25 = vpack.c.bf16 %v7302_v14, %v7301_v45  ;;  %v7315_v18 = vpop.permute.xlu0 %7314 }
 0x82c   :  { %v7317_v4 = vunpack.i.h.bf16 %v7315_v18  ;;  %v7316_v5 = vunpack.i.l.bf16 %v7315_v18 }
 0x82d   :  { %6828 = vmatmul.mubr.msk.bf16.vlgmr.msra.gmra.mxu0 %vm213_vm1, %v1976_v25 }
 0x82e   :  { %v1979_v17 = vpack.c.bf16 %v7317_v4, %v7316_v5  ;;  %6839 = vmatprep.mubr.msk.bf16.mxu0 %vm8083_vm2, %v11591_v47 }
 0x830   :  { %v3514_v43 = vpop.permute.xlu1 %3513  ;;  %6846 = vmatmul.mubr.msk.bf16.vlgmr.msra.gmra.mxu1 %vm213_vm1, %v1979_v17 }
 0x831   :  { %v3519_v44 = vsel %vm213_vm1, %v3514_v43, 0  ;;  %6857 = vmatprep.mubr.msk.bf16.mxu1 %vm8083_vm2, %v11591_v47 }
 0x832   :  { %6838 = vmatpush3.bf16.xpose.msra.mxu0 %v3519_v44 }
 0x833   :  { %6849 = vmatprep.subr.bf16.mxu0 %v11591_v47 }
 0x834   :  { %v7310_v22 = vpop.permute.xlu1 %7309 }
 0x835   :  { %v7312_v13 = vunpack.i.h.bf16 %v7310_v22  ;;  %v7311_v1 = vunpack.i.l.bf16 %v7310_v22 }
 0x837   :  { %v1978_v49 = vpack.c.bf16 %v7312_v13, %v7311_v1 }
 0x839   :  { %6840 = vmatmul.mubr.msk.bf16.vlgmr.msra.gmra.mxu0 %vm213_vm1, %v1978_v49 }
 0x83a   :  { %6851 = vmatprep.mubr.msk.bf16.mxu0 %vm8083_vm2, %v11591_v47 }
 0x855   :  { %v2505_v36 = vpop.f32.mrf.mxu1 }
 0x856   :  { %v9819_v0 = vadd.f32 %v9776_v50, %v2505_v36 }
 0x857   :  { %v6715_v15 = vpop.f32.mrf.mxu1 }
 0x858   :  { %v3739_v16 = vsel %vm3684_vm3, %v9819_v0, -inf }
 0x859   :  { %v2508_v2 = vpop.f32.mrf.mxu1  ;;  %3740 = vmax.xlane.f32.xlu0 %v3739_v16 }
 0x85a   :  { %v9824_v24 = vadd.f32 %v9788_v34, %v2508_v2 }
 0x85b   :  { %v6716_v20 = vpop.f32.mrf.mxu1 }
 0x85c   :  { %v3742_v7 = vsel %vm3684_vm3, %v9824_v24, -inf }
 0x85d   :  { %3743 = vmax.xlane.f32.xlu1 %v3742_v7 }
 0x861   :  { %v2605_v46 = vpop.f32.mrf.mxu1 }
 0x862   :  { %v9832_v18 = vadd.f32 %v9776_v50, %v2605_v46 }
 0x863   :  { %v6727_v40 = vpop.f32.mrf.mxu1 }
 0x864   :  { %v3751_v49 = vsel %vm3684_vm3, %v9832_v18, -inf }
 0x865   :  { %v2608_v37 = vpop.f32.mrf.mxu1 }
 0x866   :  { %v9840_v13 = vadd.f32 %v9788_v34, %v2608_v37 }
 0x867   :  { %v6728_v53 = vpop.f32.mrf.mxu1 }
 0x868   :  { %v3754_v2 = vsel %vm3684_vm3, %v9840_v13, -inf }
 0x869   :  { %v2705_v3 = vpop.f32.mrf.mxu1 }
 0x86a   :  { %v2555_v55 = vpop.f32.mrf.mxu0  ;;  %v9852_v37 = vadd.f32 %v9776_v50, %v2705_v3 }
 0x86b   :  { %v9829_v14 = vadd.f32 %v9776_v50, %v2555_v55  ;;  %v6739_v45 = vpop.f32.mrf.mxu1 }
 0x86c   :  { %v6721_v25 = vpop.f32.mrf.mxu0  ;;  %11671 = vst [vmem:[#allocation5_spill] sm:$0xff] %v9852_v37 }
 0x86d   :  { %v2708_v4 = vpop.f32.mrf.mxu1  ;;  %v3745_v5 = vsel %vm3684_vm3, %v9829_v14, -inf }
 0x86e   :  { %3746 = vmax.xlane.f32.xlu0 %v3745_v5  ;;  %v2558_v17 = vpop.f32.mrf.mxu0 }
 0x86f   :  { %v9837_v43 = vadd.f32 %v9788_v34, %v2558_v17  ;;  %v6740_v44 = vpop.f32.mrf.mxu1 }
 0x870   :  { %v6722_v22 = vpop.f32.mrf.mxu0  ;;  %v9860_v44 = vadd.f32 %v9788_v34, %v2708_v4 }
 0x871   :  { %11669 = vst [vmem:[#allocation37_spill] sm:$0xff] %v9837_v43  ;;  %v2805_v1 = vpop.f32.mrf.mxu1  ;;  %v3748_v36 = vsel %vm3684_vm3, %v9837_v43, -inf }
 0x872   :  { %3752 = vmax.xlane.f32.xlu0 %v3751_v49  ;;  %3749 = vmax.xlane.f32.xlu1 %v3748_v36  ;;  %11673 = vst [vmem:[#allocation19_spill] sm:$0xff] %v9860_v44  ;;  %v3763_v49 = vsel %vm3684_vm3, %v9852_v37, -inf }
 0x873   :  { %v6751_v15 = vpop.f32.mrf.mxu1 }
 0x875   :  { %v2808_v16 = vpop.f32.mrf.mxu1 }
 0x876   :  { %3755 = vmax.xlane.f32.xlu1 %v3754_v2  ;;  %v2655_v20 = vpop.f32.mrf.mxu0  ;;  %v3766_v2 = vsel %vm3684_vm3, %v9860_v44, -inf }
 0x877   :  { %v9849_v7 = vadd.f32 %v9776_v50, %v2655_v20  ;;  %v6752_v46 = vpop.f32.mrf.mxu1 }
 0x878   :  { %v6733_v40 = vpop.f32.mrf.mxu0 }
 0x879   :  { %11670 = vst [vmem:[#allocation9_spill] sm:$0xff] %v9849_v7  ;;  %v2905_v53 = vpop.f32.mrf.mxu1  ;;  %v3757_v55 = vsel %vm3684_vm3, %v9849_v7, -inf }
 0x87a   :  { %3758 = vmax.xlane.f32.xlu0 %v3757_v55  ;;  %v2658_v45 = vpop.f32.mrf.mxu0  ;;  %v9872_v55 = vadd.f32 %v9776_v50, %v2805_v1  ;;  %v9889_v1 = vld [vmem:[%s11467_s1 + $0x20] sm:$0xff] }
 0x87b   :  { %v9857_v25 = vadd.f32 %v9788_v34, %v2658_v45  ;;  %v6763_v5 = vpop.f32.mrf.mxu1 }
 0x87c   :  { %v6734_v17 = vpop.f32.mrf.mxu0  ;;  %11675 = vst [vmem:[#allocation23_spill] sm:$0xff] %v9872_v55 }
 0x87d   :  { %11672 = vst [vmem:[#allocation6_spill] sm:$0xff] %v9857_v25  ;;  %v2908_v22 = vpop.f32.mrf.mxu1  ;;  %v3760_v3 = vsel %vm3684_vm3, %v9857_v25, -inf }
 0x87e   :  { %3764 = vmax.xlane.f32.xlu0 %v3763_v49  ;;  %3761 = vmax.xlane.f32.xlu1 %v3760_v3 }
 0x87f   :  { %v6764_v36 = vpop.f32.mrf.mxu1 }
 0x881   :  { %v3005_v15 = vpop.f32.mrf.mxu1 }
 0x882   :  { %3767 = vmax.xlane.f32.xlu1 %v3766_v2  ;;  %v2755_v20 = vpop.f32.mrf.mxu0  ;;  %v9880_v2 = vadd.f32 %v9788_v34, %v2808_v16 }
 0x883   :  { %v9869_v46 = vadd.f32 %v9776_v50, %v2755_v20  ;;  %v6775_v4 = vpop.f32.mrf.mxu1  ;;  %v3775_v20 = vsel %vm3684_vm3, %v9872_v55, -inf }
 0x884   :  { %v6745_v40 = vpop.f32.mrf.mxu0  ;;  %11677 = vst [vmem:[#allocation32_spill] sm:$0xff] %v9880_v2 }
 0x885   :  { %11674 = vst [vmem:[#allocation4_spill] sm:$0xff] %v9869_v46  ;;  %v3008_v45 = vpop.f32.mrf.mxu1  ;;  %v3769_v5 = vsel %vm3684_vm3, %v9869_v46, -inf }
 0x886   :  { %3770 = vmax.xlane.f32.xlu0 %v3769_v5  ;;  %v2758_v17 = vpop.f32.mrf.mxu0 }
 0x887   :  { %v9877_v49 = vadd.f32 %v9788_v34, %v2758_v17  ;;  %v6776_v3 = vpop.f32.mrf.mxu1  ;;  %v9895_v17 = vadd.f32 %v9889_v1, %v2905_v53 }
 0x888   :  { %v6746_v36 = vpop.f32.mrf.mxu0  ;;  %v3778_v3 = vsel %vm3684_vm3, %v9880_v2, -inf }
 0x889   :  { %11676 = vst [vmem:[#allocation24_spill] sm:$0xff] %v9877_v49  ;;  %v3772_v50 = vsel %vm3684_vm3, %v9877_v49, -inf  ;;  %11679 = vst [vmem:[#allocation15_spill] sm:$0xff] %v9895_v17  ;;  %v3787_v2 = vsel %vm3684_vm3, %v9895_v17, -inf }
 0x88a   :  { %v3105_v4 = vpop.f32.mrf.mxu1  ;;  %3776 = vmax.xlane.f32.xlu0 %v3775_v20  ;;  %3773 = vmax.xlane.f32.xlu1 %v3772_v50  ;;  %v2855_v40 = vpop.f32.mrf.mxu0  ;;  %v3617_v20 = vld [vmem:[%s11467_s1 + $0x28] sm:$0xff] }
 0x88b   :  { %v9892_v5 = vadd.f32 %v9889_v1, %v2855_v40  ;;  %v9906_v53 = vadd.f32 %v3617_v20, %v2908_v22  ;;  %v9919_v22 = vadd.f32 %v9889_v1, %v3005_v15 }
 0x88c   :  { %v6757_v34 = vpop.f32.mrf.mxu0  ;;  %v6787_v16 = vpop.f32.mrf.mxu1 }
 0x88d   :  { %11678 = vst [vmem:[#allocation14_spill] sm:$0xff] %v9892_v5  ;;  %v3781_v36 = vsel %vm3684_vm3, %v9892_v5, -inf  ;;  %11681 = vst [vmem:[#allocation20_spill] sm:$0xff] %v9906_v53  ;;  %v3799_v15 = vsel %vm3684_vm3, %v9919_v22, -inf }
 0x88e   :  { %v3108_v50 = vpop.f32.mrf.mxu1  ;;  %3779 = vmax.xlane.f32.xlu1 %v3778_v3  ;;  %3782 = vmax.xlane.f32.xlu0 %v3781_v36  ;;  %v2858_v40 = vpop.f32.mrf.mxu0  ;;  %11684 = vst [vmem:[#allocation29_spill] sm:$0xff] %v9919_v22 }
 0x88f   :  { %v9904_v55 = vadd.f32 %v3617_v20, %v2858_v40 }
 0x890   :  { %v6758_v34 = vpop.f32.mrf.mxu0  ;;  %v6788_v16 = vpop.f32.mrf.mxu1 }
 0x891   :  { %11680 = vst [vmem:[#allocation16_spill] sm:$0xff] %v9904_v55  ;;  %v3784_v5 = vsel %vm3684_vm3, %v9904_v55, -inf  ;;  %v3790_v16 = vsel %vm3684_vm3, %v9906_v53, -inf }
 0x892   :  { %v3205_v46 = vpop.f32.mrf.mxu1  ;;  %3788 = vmax.xlane.f32.xlu0 %v3787_v2  ;;  %3785 = vmax.xlane.f32.xlu1 %v3784_v5  ;;  %v2955_v49 = vpop.f32.mrf.mxu0 }
 0x893   :  { %v9913_v3 = vadd.f32 %v9889_v1, %v3205_v46  ;;  %v9916_v36 = vadd.f32 %v9889_v1, %v2955_v49 }
 0x894   :  { %v6769_v40 = vpop.f32.mrf.mxu0  ;;  %v6799_v34 = vpop.f32.mrf.mxu1 }
 0x895   :  { %11682 = vst [vmem:[#allocation26_spill] sm:$0xff] %v9913_v3  ;;  %11683 = vst [vmem:[#allocation33_spill] sm:$0xff] %v9916_v36  ;;  %v3793_v17 = vsel %vm3684_vm3, %v9916_v36, -inf  ;;  %v9929_v34 = vadd.f32 %v3617_v20, %v3008_v45 }
 0x896   :  { %v3208_v2 = vpop.f32.mrf.mxu1  ;;  %3791 = vmax.xlane.f32.xlu1 %v3790_v16  ;;  %3794 = vmax.xlane.f32.xlu0 %v3793_v17  ;;  %v2958_v5 = vpop.f32.mrf.mxu0 }
 0x897   :  { %v9925_v46 = vadd.f32 %v3617_v20, %v3208_v2  ;;  %v9927_v55 = vadd.f32 %v3617_v20, %v2958_v5  ;;  %11687 = vst [vmem:[#allocation18_spill] sm:$0xff] %v9929_v34  ;;  %v9939_v2 = vadd.f32 %v9889_v1, %v3105_v4  ;;  %v3802_v45 = vsel %vm3684_vm3, %v9929_v34, -inf }
 0x898   :  { %v6770_v49 = vpop.f32.mrf.mxu0  ;;  %v6800_v40 = vpop.f32.mrf.mxu1 }
 0x899   :  { %11685 = vst [vmem:[#allocation39_spill] sm:$0xff] %v9925_v46  ;;  %11686 = vst [vmem:[#allocation41_spill] sm:$0xff] %v9927_v55  ;;  %v3796_v53 = vsel %vm3684_vm3, %v9927_v55, -inf }
 0x89a   :  { %3800 = vmax.xlane.f32.xlu0 %v3799_v15  ;;  %3797 = vmax.xlane.f32.xlu1 %v3796_v53  ;;  %v3055_v36 = vpop.f32.mrf.mxu0  ;;  %11689 = vst [vmem:[#allocation11_spill] sm:$0xff] %v9939_v2  ;;  %v9947_v15 = vadd.f32 %v3617_v20, %v3108_v50 }
 0x89b   :  { %v9936_v17 = vadd.f32 %v9889_v1, %v3055_v36  ;;  %v3811_v36 = vsel %vm3684_vm3, %v9939_v2, -inf }
 0x89c   :  { %v6781_v16 = vpop.f32.mrf.mxu0  ;;  %11691 = vst [vmem:[#allocation42_spill] sm:$0xff] %v9947_v15 }
 0x89d   :  { %11688 = vst [vmem:[#allocation40_spill] sm:$0xff] %v9936_v17  ;;  %v3805_v5 = vsel %vm3684_vm3, %v9936_v17, -inf }
 0x89e   :  { %3803 = vmax.xlane.f32.xlu1 %v3802_v45  ;;  %3806 = vmax.xlane.f32.xlu0 %v3805_v5  ;;  %v3058_v49 = vpop.f32.mrf.mxu0  ;;  %v3814_v45 = vsel %vm3684_vm3, %v9947_v15, -inf }
 0x89f   :  { %v9945_v40 = vadd.f32 %v3617_v20, %v3058_v49 }
 0x8a0   :  { %v6782_v53 = vpop.f32.mrf.mxu0 }
 0x8a1   :  { %11690 = vst [vmem:[#allocation8_spill] sm:$0xff] %v9945_v40  ;;  %v3808_v4 = vsel %vm3684_vm3, %v9945_v40, -inf }
 0x8a2   :  { %3812 = vmax.xlane.f32.xlu0 %v3811_v36  ;;  %3809 = vmax.xlane.f32.xlu1 %v3808_v4  ;;  %v3155_v16 = vpop.f32.mrf.mxu0  ;;  %v3690_v4 = vpop.xlane.xlu0 %3689 }
 0x8a3   :  { %v9954_v17 = vadd.f32 %v9889_v1, %v3155_v16  ;;  %v9966_v1 = vpack.i.bf16 %v8278_v48, %v8226_v38 }
 0x8a4   :  { %v6793_v34 = vpop.f32.mrf.mxu0 }
 0x8a5   :  { %11692 = vst [vmem:[#allocation28_spill] sm:$0xff] %v9954_v17  ;;  %v3817_v53 = vsel %vm3684_vm3, %v9954_v17, -inf  ;;  %v9972_v34 = vpack.i.bf16 %v8229_v39, %v8196_v29 }
 0x8a6   :  { %3815 = vmax.xlane.f32.xlu1 %v3814_v45  ;;  %v3158_v5 = vpop.f32.mrf.mxu0  ;;  %v3878_v45 = vsub.f32 %v9658_v54, %v3690_v4 }
 0x8a7   :  { %v9958_v49 = vadd.f32 %v3617_v20, %v3158_v5  ;;  %v3687_v20 = vpop.xlane.xlu1 %3686 }
 0x8a8   :  { %v6794_v50 = vpop.f32.mrf.mxu0  ;;  %v3877_v16 = vsub.f32 %v9689_v28, %v3687_v20 }
 0x8a9   :  { %11693 = vst [vmem:[#allocation44_spill] sm:$0xff] %v9958_v49  ;;  %v3820_v36 = vsel %vm3684_vm3, %v9958_v49, -inf  ;;  %v3693_v50 = vpop.xlane.xlu0 %3692 }
 0x8aa   :  { %3818 = vmax.xlane.f32.xlu1 %v3817_v53  ;;  %v3941_v5 = vmul.f32 1.442695, %v3877_v16  ;;  %v3879_v17 = vsub.f32 %v9669_v61, %v3693_v50  ;;  %v3823_v61 = vsel %vm3684_vm3, %v9913_v3, -inf }
 0x8ab   :  { %v3696_v15 = vpop.xlane.xlu1 %3695 }
 0x8ac   :  { %7818 = vpow2.f32 %v3941_v5  ;;  %v3945_v22 = vmul.f32 1.442695, %v3879_v17  ;;  %v3880_v55 = vsub.f32 %v9701_v19, %v3696_v15  ;;  %v9995_v19 = vld [vmem:[%s11467_s1 + $0x30] sm:$0xff]  ;;  %v10007_v5 = vld [vmem:[%s11467_s1 + $0x38] sm:$0xff]  ;;  %s8084_s1 = smov 64  }
 0x8ae   :  { %3821 = vmax.xlane.f32.xlu1 %v3820_v36  ;;  %v3943_v36 = vmul.f32 1.442695, %v3878_v45  ;;  %v3947_v54 = vmul.f32 1.442695, %v3880_v55 }
 0x8b0   :  { %7820 = vpow2.f32 %v3943_v36 }
 0x8b1   :  { %7822 = vpow2.f32 %v3945_v22 }
 0x8b2   :  { %7824 = vpow2.f32 %v3947_v54 }
 0x8b8   :  { %7319 = vrot.lane.b32.xlu0 %v9966_v1, %s8076_s4 }
 0x8bf   :  { %7324 = vrot.lane.b32.xlu1 %v9972_v34, %s8076_s4 }
 0x8c8   :  { %v3255_v53 = vpop.f32.mrf.mxu0 }
 0x8ca   :  { %v6805_v49 = vpop.f32.mrf.mxu0 }
 0x8cb   :  { %v9986_v49 = vpop.eup %7818 }
 0x8cc   :  { %v3258_v2 = vpop.f32.mrf.mxu0  ;;  %v9979_v40 = vpop.f32.mrf.mxu1  ;;  %11694 = vst [vmem:[#allocation35_spill] sm:$0xff] %v9986_v49  ;;  %v4069_v16 = vsel %vm3684_vm3, %v9986_v49, 0.0 }
 0x8cd   :  { %v9990_v17 = vpop.eup %7820  ;;  %v3702_v49 = vpop.xlane.xlu1 %3701 }
 0x8ce   :  { %v6806_v25 = vpop.f32.mrf.mxu0  ;;  %v6811_v28 = vpop.f32.mrf.mxu1  ;;  %11695 = vst [vmem:[#allocation43_spill] sm:$0xff] %v9990_v17  ;;  %v4072_v22 = vsel %vm3684_vm3, %v9990_v17, 0.0 }
 0x8cf   :  { %v10002_v45 = vpop.eup %7822 }
 0x8d0   :  { %v9982_v20 = vpop.f32.mrf.mxu1  ;;  %11697 = vst [vmem:[#allocation21_spill] sm:$0xff] %v10002_v45 }
 0x8d2   :  { %v6812_v4 = vpop.f32.mrf.mxu1 }
 0x8d7   :  { %3824 = vmax.xlane.f32.xlu0 %v3823_v61  ;;  %v4075_v61 = vsel %vm3684_vm3, %v10002_v45, 0.0 }
 0x8db   :  { %4070 = vadd.xlane.f32.xlu0 %v4069_v16  ;;  %v3826_v16 = vsel %vm3684_vm3, %v9925_v46, -inf }
 0x8dc   :  { %v3355_v25 = vpop.f32.mrf.mxu0 }
 0x8dd   :  { %v9998_v55 = vadd.f32 %v9995_v19, %v3355_v25  ;;  %v10019_v25 = vpop.eup %7824 }
 0x8de   :  { %v6817_v15 = vpop.f32.mrf.mxu0  ;;  %11700 = vst [vmem:[#allocation45_spill] sm:$0xff] %v10019_v25 }
 0x8df   :  { %11696 = vst [vmem:[#allocation48_spill] sm:$0xff] %v9998_v55  ;;  %4073 = vadd.xlane.f32.xlu0 %v4072_v22 }
 0x8e0   :  { %v3358_v50 = vpop.f32.mrf.mxu0  ;;  %v3405_v36 = vpop.f32.mrf.mxu1 }
 0x8e1   :  { %v10010_v28 = vadd.f32 %v10007_v5, %v3358_v50  ;;  %v10013_v54 = vadd.f32 %v9995_v19, %v3405_v36  ;;  %v10025_v50 = vadd.f32 %v9995_v19, %v3255_v53 }
 0x8e2   :  { %v6823_v4 = vpop.f32.mrf.mxu1  ;;  %v6818_v22 = vpop.f32.mrf.mxu0 }
 0x8e3   :  { %11698 = vst [vmem:[#allocation53_spill] sm:$0xff] %v10010_v28  ;;  %11699 = vst [vmem:[#allocation25_spill] sm:$0xff] %v10013_v54  ;;  %4076 = vadd.xlane.f32.xlu0 %v4075_v61  ;;  %3827 = vmax.xlane.f32.xlu1 %v3826_v16  ;;  %v4078_v4 = vsel %vm3684_vm3, %v10019_v25, 0.0  ;;  %v10033_v61 = vadd.f32 %v10007_v5, %v3258_v2  ;;  %v3829_v22 = vsel %vm3684_vm3, %v10025_v50, -inf }
 0x8e4   :  { %v3408_v15 = vpop.f32.mrf.mxu1  ;;  %11702 = vst [vmem:[#allocation51_spill] sm:$0xff] %v10025_v50 }
 0x8e5   :  { %v10022_v3 = vadd.f32 %v10007_v5, %v3408_v15  ;;  %11704 = vst [vmem:[#allocation46_spill] sm:$0xff] %v10033_v61 }
 0x8e6   :  { %v6824_v36 = vpop.f32.mrf.mxu1 }
 0x8e7   :  { %11701 = vst [vmem:[#allocation30_spill] sm:$0xff] %v10022_v3  ;;  %4079 = vadd.xlane.f32.xlu1 %v4078_v4 }
 0x8e8   :  { %v3505_v44 = vpop.f32.mrf.mxu1 }
 0x8e9   :  { %v10030_v46 = vadd.f32 %v9995_v19, %v3505_v44  ;;  %v3832_v44 = vsel %vm3684_vm3, %v10033_v61, -inf  ;;  %v10056_v61 = vpack.i.bf16 %v8418_v52, %v8358_v10 }
 0x8ea   :  { %v6835_v16 = vpop.f32.mrf.mxu1 }
 0x8eb   :  { %11703 = vst [vmem:[#allocation36_spill] sm:$0xff] %v10030_v46  ;;  %3830 = vmax.xlane.f32.xlu1 %v3829_v22  ;;  %11710 = vst [vmem:[#allocation17_spill] sm:$0xff] %v10056_v61 }
 0x8ec   :  { %v3508_v15 = vpop.f32.mrf.mxu1 }
 0x8ed   :  { %v3455_v53 = vpop.f32.mrf.mxu0  ;;  %v10038_v36 = vadd.f32 %v10007_v5, %v3508_v15 }
 0x8ee   :  { %v10041_v37 = vadd.f32 %v9995_v19, %v3455_v53  ;;  %v6836_v4 = vpop.f32.mrf.mxu1 }
 0x8ef   :  { %11705 = vst [vmem:[#allocation50_spill] sm:$0xff] %v10038_v36  ;;  %3833 = vmax.xlane.f32.xlu1 %v3832_v44  ;;  %v6829_v2 = vpop.f32.mrf.mxu0 }
 0x8f0   :  { %11706 = vst [vmem:[#allocation52_spill] sm:$0xff] %v10041_v37  ;;  %v3605_v7 = vpop.f32.mrf.mxu1 }
 0x8f1   :  { %v3458_v16 = vpop.f32.mrf.mxu0  ;;  %v10046_v45 = vadd.f32 %v9995_v19, %v3605_v7 }
 0x8f2   :  { %v10049_v22 = vadd.f32 %v10007_v5, %v3458_v16  ;;  %v6847_v50 = vpop.f32.mrf.mxu1 }
 0x8f3   :  { %11707 = vst [vmem:[#allocation47_spill] sm:$0xff] %v10046_v45  ;;  %v6830_v15 = vpop.f32.mrf.mxu0  ;;  %v10065_v50 = vpack.i.bf16 %v8346_v6, %v8295_v57  ;;  %v3708_v6 = vpop.xlane.xlu1 %3707 }
 0x8f4   :  { %11708 = vst [vmem:[#allocation54_spill] sm:$0xff] %v10049_v22  ;;  %v3608_v47 = vpop.f32.mrf.mxu1  ;;  %v3699_v15 = vpop.xlane.xlu0 %3698 }
 0x8f5   :  { %v10052_v53 = vadd.f32 %v10007_v5, %v3608_v47  ;;  %11712 = vst [vmem:[#allocation10_spill] sm:$0xff] %v10065_v50  ;;  %v3881_v25 = vsub.f32 %v9676_v51, %v3699_v15 }
 0x8f6   :  { %v6848_v4 = vpop.f32.mrf.mxu1 }
 0x8f7   :  { %11709 = vst [vmem:[#allocation49_spill] sm:$0xff] %v10052_v53  ;;  %v3949_v17 = vmul.f32 1.442695, %v3881_v25  ;;  %v10110_v25 = vpack.i.bf16 %v8298_v59, %v8232_v41 }
 0x8f9   :  { %7329 = vrot.lane.b32.xlu0 %v10056_v61, %s8076_s4  ;;  %v3555_v44 = vpop.f32.mrf.mxu0  ;;  %7826 = vpow2.f32 %v3949_v17 }
 0x8fa   :  { %v10061_v7 = vadd.f32 %v9995_v19, %v3555_v44  ;;  %v3882_v44 = vsub.f32 %v9712_v9, %v3702_v49 }
 0x8fb   :  { %v6841_v2 = vpop.f32.mrf.mxu0 }
 0x8fc   :  { %11711 = vst [vmem:[#allocation22_spill] sm:$0xff] %v10061_v7  ;;  %v3705_v2 = vpop.xlane.xlu0 %3704  ;;  %v3951_v61 = vmul.f32 1.442695, %v3882_v44 }
 0x8fd   :  { %v3558_v16 = vpop.f32.mrf.mxu0  ;;  %v3883_v43 = vsub.f32 %v9684_v63, %v3705_v2  ;;  %v3714_v2 = vpop.xlane.xlu1 %3713 }
 0x8fe   :  { %v10068_v47 = vadd.f32 %v10007_v5, %v3558_v16  ;;  %7828 = vpow2.f32 %v3951_v61  ;;  %v3884_v16 = vsub.f32 %v9723_v56, %v3708_v6  ;;  %v10116_v61 = vpack.i.bf16 %v8235_v42, %v8199_v30 }
 0x8ff   :  { %v6842_v4 = vpop.f32.mrf.mxu0  ;;  %v3953_v57 = vmul.f32 1.442695, %v3883_v43 }
 0x900   :  { %11713 = vst [vmem:[#allocation31_spill] sm:$0xff] %v10068_v47  ;;  %7334 = vrot.lane.b32.xlu1 %v10065_v50, %s8076_s4  ;;  %v3955_v4 = vmul.f32 1.442695, %v3884_v16  ;;  %v10078_v50 = vadd.f32 %v9995_v19, %v9979_v40  ;;  %v3841_v19 = vsel %vm3684_vm3, %v9998_v55, -inf  ;;  %v3711_v15 = vpop.xlane.xlu0 %3710 }
 0x901   :  { %7830 = vpow2.f32 %v3953_v57  ;;  %v10090_v57 = vadd.f32 %v10007_v5, %v9982_v20  ;;  %v3844_v5 = vsel %vm3684_vm3, %v10010_v28, -inf  ;;  %v3885_v44 = vsub.f32 %v9693_v23, %v3711_v15 }
 0x902   :  { %11714 = vst [vmem:[#allocation7_spill] sm:$0xff] %v10078_v50  ;;  %7832 = vpow2.f32 %v3955_v4  ;;  %v3835_v51 = vsel %vm3684_vm3, %v10078_v50, -inf  ;;  %v3886_v4 = vsub.f32 %v9733_v32, %v3714_v2  ;;  %v3847_v23 = vsel %vm3684_vm3, %v10013_v54, -inf }
 0x903   :  { %11715 = vst [vmem:[#allocation38_spill] sm:$0xff] %v10090_v57  ;;  %v3838_v49 = vsel %vm3684_vm3, %v10090_v57, -inf  ;;  %v3957_v16 = vmul.f32 1.442695, %v3885_v44  ;;  %v3850_v2 = vsel %vm3684_vm3, %v10022_v3, -inf }
 0x905   :  { %7834 = vpow2.f32 %v3957_v16 }
 0x906   :  { %v10082_v9 = vpop.eup %7826 }
 0x907   :  { %v4081_v63 = vsel %vm3684_vm3, %v10082_v9, 0.0 }
 0x90b   :  { %v10086_v43 = vpop.eup %7828 }
 0x90c   :  { %v4084_v6 = vsel %vm3684_vm3, %v10086_v43, 0.0 }
 0x90e   :  { %v10094_v56 = vpop.eup %7830 }
 0x90f   :  { %v4087_v40 = vsel %vm3684_vm3, %v10094_v56, 0.0  ;;  %v10100_v17 = vpop.eup %7832 }
 0x910   :  { %v4090_v20 = vsel %vm3684_vm3, %v10100_v17, 0.0 }
 0x918   :  { %3836 = vmax.xlane.f32.xlu0 %v3835_v51  ;;  %v3717_v51 = vpop.xlane.xlu0 %3716 }
 0x91c   :  { %4082 = vadd.xlane.f32.xlu0 %v4081_v63  ;;  %v3887_v63 = vsub.f32 %v9706_v27, %v3717_v51  ;;  %v3853_v51 = vsel %vm3684_vm3, %v10041_v37, -inf }
 0x920   :  { %4085 = vadd.xlane.f32.xlu0 %v4084_v6  ;;  %v3959_v6 = vmul.f32 1.442695, %v3886_v4 }
 0x922   :  { %7836 = vpow2.f32 %v3959_v6  ;;  %v3723_v6 = vpop.xlane.xlu0 %3722 }
 0x924   :  { %4088 = vadd.xlane.f32.xlu0 %v4087_v40  ;;  %3839 = vmax.xlane.f32.xlu1 %v3838_v49  ;;  %v3720_v40 = vpop.xlane.xlu1 %3719  ;;  %v3961_v49 = vmul.f32 1.442695, %v3887_v63  ;;  %v3856_v63 = vsel %vm3684_vm3, %v10049_v22, -inf }
 0x926   :  { %7838 = vpow2.f32 %v3961_v49  ;;  %v10150_v49 = vpack.i.bf16 %v8424_v58, %v8367_v12 }
 0x928   :  { %4091 = vadd.xlane.f32.xlu1 %v4090_v20  ;;  %v3888_v20 = vsub.f32 %v9741_v26, %v3720_v40  ;;  %v3726_v40 = vpop.xlane.xlu1 %3725 }
 0x929   :  { %v3890_v22 = vsub.f32 %v9747_v33, %v3726_v40 }
 0x92b   :  { %v3967_v54 = vmul.f32 1.442695, %v3890_v22 }
 0x92c   :  { %3842 = vmax.xlane.f32.xlu1 %v3841_v19  ;;  %v3963_v19 = vmul.f32 1.442695, %v3888_v20  ;;  %v3729_v20 = vpop.xlane.xlu0 %3728 }
 0x92d   :  { %v3891_v3 = vsub.f32 %v9727_v35, %v3729_v20  ;;  %v3859_v35 = vsel %vm3684_vm3, %v10030_v46, -inf }
 0x92e   :  { %7840 = vpow2.f32 %v3963_v19  ;;  %v3732_v19 = vpop.xlane.xlu1 %3731 }
 0x92f   :  { %v3969_v57 = vmul.f32 1.442695, %v3891_v3  ;;  %v3892_v50 = vsub.f32 %v9752_v21, %v3732_v19 }
 0x930   :  { %3845 = vmax.xlane.f32.xlu1 %v3844_v5  ;;  %v10126_v5 = vpop.eup %7834 }
 0x931   :  { %v4093_v32 = vsel %vm3684_vm3, %v10126_v5, 0.0  ;;  %v10130_v15 = vpop.eup %7836 }
 0x932   :  { %v4096_v27 = vsel %vm3684_vm3, %v10130_v15, 0.0 }
 0x933   :  { %v10134_v44 = vpop.eup %7838 }
 0x934   :  { %11716 = vst [vmem:[#allocation13_spill] sm:$0xff] %v10134_v44  ;;  %v4099_v26 = vsel %vm3684_vm3, %v10134_v44, 0.0 }
 0x93a   :  { %7339 = vrot.lane.b32.xlu0 %v10110_v25, %s8076_s4 }
 0x93b   :  { %v10140_v16 = vpop.eup %7840 }
 0x93c   :  { %11717 = vst [vmem:[#allocation27_spill] sm:$0xff] %v10140_v16  ;;  %v4102_v4 = vsel %vm3684_vm3, %v10140_v16, 0.0 }
 0x941   :  { %7344 = vrot.lane.b32.xlu1 %v10116_v61, %s8076_s4 }
 0x959   :  { %3848 = vmax.xlane.f32.xlu0 %v3847_v23  ;;  %v10154_v23 = vpop.xlane.xlu0 %3734 }
 0x95d   :  { %4094 = vadd.xlane.f32.xlu0 %v4093_v32  ;;  %v10156_v32 = vpop.xlane.xlu1 %3737 }
 0x961   :  { %4097 = vadd.xlane.f32.xlu0 %v4096_v27  ;;  %v10160_v27 = vpack.i.bf16 %v8349_v8, %v8303_v60 }
 0x965   :  { %4100 = vadd.xlane.f32.xlu0 %v4099_v26  ;;  %3851 = vmax.xlane.f32.xlu1 %v3850_v2  ;;  %v10164_v26 = vpop.xlane.xlu0 %3740  ;;  %v10166_v2 = vpop.xlane.xlu1 %3743 }
 0x969   :  { %4103 = vadd.xlane.f32.xlu1 %v4102_v4  ;;  %v3889_v4 = vsub.f32 %v9717_v62, %v3723_v6 }
 0x96b   :  { %v3965_v37 = vmul.f32 1.442695, %v3889_v4  ;;  %v3971_v4 = vmul.f32 1.442695, %v3892_v50 }
 0x96d   :  { %3854 = vmax.xlane.f32.xlu1 %v3853_v51  ;;  %v10169_v51 = vpop.xlane.xlu0 %3746  ;;  %7842 = vpow2.f32 %v3965_v37 }
 0x96e   :  { %7844 = vpow2.f32 %v3967_v54 }
 0x96f   :  { %7846 = vpow2.f32 %v3969_v57 }
 0x970   :  { %7848 = vpow2.f32 %v3971_v4  ;;  %v3862_v4 = vsel %vm3684_vm3, %v10038_v36, -inf }
 0x971   :  { %3857 = vmax.xlane.f32.xlu1 %v3856_v63  ;;  %v10171_v63 = vpop.xlane.xlu1 %3749  ;;  %v10175_v55 = vpop.xlane.xlu0 %3752 }
 0x975   :  { %v10177_v28 = vpop.xlane.xlu1 %3755  ;;  %v10180_v62 = vpop.xlane.xlu0 %3758 }
 0x979   :  { %v10182_v6 = vpop.xlane.xlu1 %3761  ;;  %v10184_v44 = vpop.xlane.xlu0 %3764 }
 0x97a   :  { %v10190_v37 = vpop.eup %7842 }
 0x97b   :  { %7349 = vrot.lane.b32.xlu0 %v10150_v49, %s8076_s4  ;;  %11718 = vst [vmem:[#allocation12_spill] sm:$0xff] %v10190_v37  ;;  %v4105_v54 = vsel %vm3684_vm3, %v10190_v37, 0.0  ;;  %v10198_v22 = vpop.eup %7844 }
 0x97c   :  { %11719 = vst [vmem:[#allocation34_spill] sm:$0xff] %v10198_v22  ;;  %v4108_v40 = vsel %vm3684_vm3, %v10198_v22, 0.0  ;;  %v10206_v20 = vpop.eup %7846 }
 0x97d   :  { %v10186_v33 = vpop.xlane.xlu1 %3767  ;;  %v10192_v3 = vpop.xlane.xlu0 %3770  ;;  %11720 = vst [vmem:[#allocation55_spill] sm:$0xff] %v10206_v20  ;;  %v4111_v19 = vsel %vm3684_vm3, %v10206_v20, 0.0 }
 0x981   :  { %v10194_v21 = vpop.xlane.xlu1 %3773  ;;  %v10200_v50 = vpop.xlane.xlu0 %3776 }
 0x982   :  { %7354 = vrot.lane.b32.xlu1 %v10160_v27, %s8076_s4  ;;  %s8086_s4 = smov 16  }
 0x985   :  { %v10202_v57 = vpop.xlane.xlu1 %3779 }
 0x989   :  { %v10216_v46 = vpop.xlane.xlu1 %3785 }
 0x99a   :  { %3860 = vmax.xlane.f32.xlu0 %v3859_v35  ;;  %v10212_v35 = vpop.eup %7848 }
 0x99b   :  { %v4114_v37 = vsel %vm3684_vm3, %v10212_v35, 0.0 }
 0x99e   :  { %4106 = vadd.xlane.f32.xlu0 %v4105_v54  ;;  %v10214_v54 = vpop.xlane.xlu0 %3782 }
 0x99f   :  { %11721 = vst [vmem:[#allocation56_spill] sm:$0xff] %v10214_v54  ;;  %v4421_v54 = vpack.c.bf16 %v8278_v48, %v8226_v38 }
 0x9a2   :  { %4109 = vadd.xlane.f32.xlu0 %v4108_v40  ;;  %v10220_v22 = vpop.xlane.xlu0 %3788  ;;  %v10222_v40 = vpop.xlane.xlu1 %3791 }
 0x9a6   :  { %4112 = vadd.xlane.f32.xlu0 %v4111_v19  ;;  %3863 = vmax.xlane.f32.xlu1 %v3862_v4  ;;  %v10224_v20 = vpop.xlane.xlu0 %3794  ;;  %v10226_v16 = vpop.xlane.xlu1 %3797  ;;  %v4422_v4 = vpack.c.bf16 %v8229_v39, %v8196_v29 }
 0x9a7   :  { %11722 = vst [vmem:[#allocation57_spill] sm:$0xff] %v10224_v20  ;;  %11723 = vst [vmem:[#allocation58_spill] sm:$0xff] %v10226_v16 }
 0x9aa   :  { %4115 = vadd.xlane.f32.xlu1 %v4114_v37  ;;  %v10228_v36 = vpop.xlane.xlu0 %3800  ;;  %v10230_v19 = vpop.xlane.xlu1 %3803 }
 0x9ab   :  { %11724 = vst [vmem:[#allocation59_spill] sm:$0xff] %v10228_v36  ;;  %11725 = vst [vmem:[#allocation60_spill] sm:$0xff] %v10230_v19 }
 0x9ae   :  { %v10238_v37 = vpop.xlane.xlu0 %3806  ;;  %v10240_v20 = vpop.xlane.xlu1 %3809 }
 0x9af   :  { %11726 = vst [vmem:[#allocation61_spill] sm:$0xff] %v10238_v37  ;;  %11727 = vst [vmem:[#allocation62_spill] sm:$0xff] %v10240_v20 }
 0x9b2   :  { %v10244_v36 = vpop.xlane.xlu0 %3812  ;;  %v10246_v19 = vpop.xlane.xlu1 %3815 }
 0x9b3   :  { %11728 = vst [vmem:[#allocation63_spill] sm:$0xff] %v10244_v36  ;;  %11729 = vst [vmem:[#allocation64_spill] sm:$0xff] %v10246_v19  ;;  %v3894_v36 = vsub.f32 %v9796_v31, %v10156_v32  ;;  %v3865_v19 = vsel %vm3684_vm3, %v10061_v7, -inf  ;;  %v3868_v31 = vsel %vm3684_vm3, %v10068_v47, -inf  ;;  %v3871_v32 = vsel %vm3684_vm3, %v10046_v45, -inf }
 0x9b4   :  { %v3895_v7 = vsub.f32 %v9819_v0, %v10164_v26  ;;  %v3900_v26 = vsub.f32 %v9840_v13, %v10177_v28 }
 0x9b6   :  { %v10248_v29 = vpop.permute.xlu0 %7319  ;;  %v10250_v39 = vpop.xlane.xlu1 %3818 }
 0x9b7   :  { %11730 = vst [vmem:[#allocation65_spill] sm:$0xff] %v10250_v39 }
 0x9ba   :  { %v10252_v38 = vpop.xlane.xlu0 %3824  ;;  %v10254_v48 = vpop.xlane.xlu1 %3821 }
 0x9bb   :  { %4502 = vrot.lane.b32.xlu1 %v4422_v4, %s8084_s1  ;;  %11731 = vst [vmem:[#allocation66_spill] sm:$0xff] %v10252_v38  ;;  %11732 = vst [vmem:[#allocation67_spill] sm:$0xff] %v10254_v48  ;;  %v3893_v4 = vsub.f32 %v9781_v11, %v10154_v23  ;;  %v3975_v38 = vmul.f32 1.442695, %v3894_v36  ;;  %v3896_v48 = vsub.f32 %v9824_v24, %v10166_v2  ;;  %v3874_v24 = vsel %vm3684_vm3, %v10052_v53, -inf }
 0x9bc   :  { %4454 = vrot.lane.b32.xlu0 %v4421_v54, %s8084_s1 }
 0x9bd   :  { %v3973_v20 = vmul.f32 1.442695, %v3893_v4  ;;  %v3979_v4 = vmul.f32 1.442695, %v3896_v48 }
 0x9be   :  { %v10256_v54 = vpop.xlane.xlu0 %4070  ;;  %v10260_v37 = vpop.permute.xlu1 %7324 }
 0x9bf   :  { %7359 = vrot.lane.b32.xlu1 %v9966_v1, %s8080_s17  ;;  %7850 = vpow2.f32 %v3973_v20 }
 0x9c0   :  { %7852 = vpow2.f32 %v3975_v38 }
 0x9c1   :  { %7854 = vpow2.f32 %v3979_v4 }
 0x9c2   :  { %v10266_v16 = vpop.xlane.xlu0 %4073  ;;  %v10268_v39 = vpop.xlane.xlu1 %3827 }
 0x9c3   :  { %11733 = vst [vmem:[#allocation68_spill] sm:$0xff] %v10268_v39 }
 0x9c6   :  { %v10272_v11 = vpop.xlane.xlu0 %4076  ;;  %v10274_v23 = vpop.xlane.xlu1 %4079 }
 0x9ca   :  { %v10282_v36 = vpop.xlane.xlu1 %3830 }
 0x9cb   :  { %11734 = vst [vmem:[#allocation69_spill] sm:$0xff] %v10282_v36  ;;  %v3897_v36 = vsub.f32 %v9829_v14, %v10169_v51  ;;  %v4423_v14 = vpack.c.bf16 %v8418_v52, %v8358_v10  ;;  %v3987_v51 = vmul.f32 1.442695, %v3900_v26 }
 0x9cc   :  { %v10286_v2 = vpop.eup %7850 }
 0x9cd   :  { %11735 = vst [vmem:[#allocation70_spill] sm:$0xff] %v10286_v2  ;;  %v4117_v48 = vsel %vm3684_vm3, %v10286_v2, 0.0  ;;  %v10294_v4 = vpop.eup %7852 }
 0x9ce   :  { %v10290_v38 = vpop.xlane.xlu1 %3833  ;;  %11738 = vst [vmem:[#allocation73_spill] sm:$0xff] %v10294_v4  ;;  %v10302_v53 = vpop.eup %7854 }
 0x9cf   :  { %11737 = vst [vmem:[#allocation72_spill] sm:$0xff] %v10290_v38  ;;  %11739 = vst [vmem:[#allocation74_spill] sm:$0xff] %v10302_v53 }
 0x9d2   :  { %v10304_v45 = vpop.permute.xlu1 %7334 }
 0x9d6   :  { %v10312_v47 = vpop.xlane.xlu1 %3839 }
 0x9d7   :  { %11740 = vst [vmem:[#allocation75_spill] sm:$0xff] %v10312_v47 }
 0x9da   :  { %v10318_v39 = vpop.xlane.xlu1 %4091 }
 0x9db   :  { %3866 = vmax.xlane.f32.xlu0 %v3865_v19  ;;  %v10280_v19 = vpop.permute.xlu0 %7329 }
 0x9df   :  { %v10288_v20 = vpop.xlane.xlu0 %3836 }
 0x9e0   :  { %11736 = vst [vmem:[#allocation71_spill] sm:$0xff] %v10288_v20  ;;  %v3977_v20 = vmul.f32 1.442695, %v3895_v7  ;;  %v10326_v7 = vpop.xlane.xlu1 %3842 }
 0x9e1   :  { %11742 = vst [vmem:[#allocation77_spill] sm:$0xff] %v10326_v7  ;;  %v11755_v7 = vld [vmem:[#allocation37_spill] sm:$0xff] }
 0x9e2   :  { %7856 = vpow2.f32 %v3977_v20 }
 0x9e3   :  { %3869 = vmax.xlane.f32.xlu1 %v3868_v31  ;;  %v10296_v31 = vpop.xlane.xlu0 %4082 }
 0x9e7   :  { %3872 = vmax.xlane.f32.xlu1 %v3871_v32  ;;  %v4120_v32 = vsel %vm3684_vm3, %v10294_v4, 0.0 }
 0x9eb   :  { %3875 = vmax.xlane.f32.xlu1 %v3874_v24  ;;  %v4126_v24 = vsel %vm3684_vm3, %v10302_v53, 0.0  ;;  %v3899_v53 = vsub.f32 %v9832_v18, %v10175_v55  ;;  %v11745_v18 = vld [vmem:[#allocation2_spill] sm:$0xff]  ;;  %v11746_v55 = vld [vmem:[#allocation3_spill] sm:$0xff] }
 0x9ed   :  { %v3985_v0 = vmul.f32 1.442695, %v3899_v53  ;;  %v4424_v53 = vpack.c.bf16 %v11746_v55, %v11745_v18  ;;  %v11753_v18 = vld [vmem:[#allocation10_spill] sm:$0xff] }
 0x9ef   :  { %4118 = vadd.xlane.f32.xlu1 %v4117_v48  ;;  %v10310_v48 = vpop.xlane.xlu0 %4085  ;;  %v10337_v13 = vpop.eup %7856 }
 0x9f0   :  { %11747 = vst [vmem:[#allocation2_spill] sm:$0xff] %v10337_v13  ;;  %v4123_v10 = vsel %vm3684_vm3, %v10337_v13, 0.0 }
 0x9f1   :  { %7364 = vrot.lane.b32.xlu0 %v9972_v34, %s8080_s17 }
 0x9f3   :  { %4121 = vadd.xlane.f32.xlu1 %v4120_v32  ;;  %v10316_v38 = vpop.xlane.xlu0 %4088  ;;  %v3981_v32 = vmul.f32 1.442695, %v3897_v36  ;;  %v10333_v36 = vpop.xlane.xlu1 %3845 }
 0x9f4   :  { %11744 = vst [vmem:[#allocation79_spill] sm:$0xff] %v10333_v36 }
 0x9f5   :  { %7858 = vpow2.f32 %v3981_v32  ;;  %v11750_v32 = vld [vmem:[#allocation17_spill] sm:$0xff] }
 0x9f6   :  { %7860 = vpow2.f32 %v3985_v0 }
 0x9f7   :  { %4127 = vadd.xlane.f32.xlu1 %v4126_v24  ;;  %v10324_v47 = vpop.permute.xlu0 %7339  ;;  %7862 = vpow2.f32 %v3987_v51  ;;  %v10342_v20 = vpop.permute.xlu1 %7344 }
 0x9f8   :  { %11741 = vst [vmem:[#allocation76_spill] sm:$0xff] %v10324_v47  ;;  %11748 = vst [vmem:[#allocation3_spill] sm:$0xff] %v10342_v20  ;;  %7864 = vrcp.f32 %v10266_v16  ;;  %v11764_v20 = vld [vmem:[#allocation45_spill] sm:$0xff] }
 0x9f9   :  { %7866 = vrcp.f32 %v10256_v54 }
 0x9fa   :  { %7868 = vrcp.f32 %v10274_v23  ;;  %v4425_v23 = vpack.c.bf16 %v8298_v59, %v8232_v41  ;;  %v11765_v59 = vmov 0.0  }
 0x9fb   :  { %v10330_v24 = vpop.xlane.xlu0 %3848  ;;  %v10352_v26 = vpop.xlane.xlu1 %3851 }
 0x9fc   :  { %11743 = vst [vmem:[#allocation78_spill] sm:$0xff] %v10330_v24  ;;  %11751 = vst [vmem:[#allocation17_spill] sm:$0xff] %v10352_v26 }
 0x9ff   :  { %v10340_v28 = vpop.xlane.xlu0 %4094  ;;  %v10366_v24 = vpop.xlane.xlu1 %4103 }
 0xa02   :  { %v10346_v52 = vpop.eup %7858 }
 0xa03   :  { %11749 = vst [vmem:[#allocation80_spill] sm:$0xff] %v10346_v52  ;;  %v10350_v0 = vpop.xlane.xlu0 %4097  ;;  %v10356_v51 = vpop.eup %7860 }
 0xa04   :  { %11752 = vst [vmem:[#allocation81_spill] sm:$0xff] %v10356_v51  ;;  %v4135_v55 = vsel %vm3684_vm3, %v10356_v51, 0.0 }
 0xa08   :  { %4550 = vrot.lane.b32.xlu1 %v4423_v14, %s8084_s1  ;;  %v4129_v14 = vsel %vm3684_vm3, %v10346_v52, 0.0  ;;  %v10374_v52 = vpop.xlane.xlu1 %3854 }
 0xa09   :  { %11757 = vst [vmem:[#allocation82_spill] sm:$0xff] %v10374_v52 }
 0xa0c   :  { %4598 = vrot.lane.b32.xlu1 %v4424_v53, %s8084_s1  ;;  %v10362_v53 = vpop.eup %7862  ;;  %v10381_v13 = vpop.xlane.xlu1 %3857 }
 0xa0d   :  { %11754 = vst [vmem:[#allocation10_spill] sm:$0xff] %v10362_v53  ;;  %v4138_v26 = vsel %vm3684_vm3, %v10362_v53, 0.0  ;;  %11759 = vst [vmem:[#allocation84_spill] sm:$0xff] %v10381_v13  ;;  %v7865_v52 = vpop.eup %7864 }
 0xa0e   :  { %v7867_v54 = vpop.eup %7866 }
 0xa10   :  { %4124 = vadd.xlane.f32.xlu0 %v4123_v10  ;;  %7369 = vrot.lane.b32.xlu1 %v11750_v32, %s8080_s17  ;;  %v10364_v10 = vpop.xlane.xlu0 %4100 }
 0xa14   :  { %4130 = vadd.xlane.f32.xlu0 %v4129_v14  ;;  %7374 = vrot.lane.b32.xlu1 %v11753_v18, %s8080_s17  ;;  %v3898_v14 = vsub.f32 %v11755_v7, %v10171_v63  ;;  %v10372_v36 = vpop.permute.xlu0 %7349  ;;  %v10386_v63 = vpop.permute.xlu1 %7354 }
 0xa15   :  { %11756 = vst [vmem:[#allocation37_spill] sm:$0xff] %v10372_v36  ;;  %11760 = vst [vmem:[#allocation85_spill] sm:$0xff] %v10386_v63  ;;  %v11763_v63 = vld [vmem:[#allocation35_spill] sm:$0xff] }
 0xa16   :  { %v3983_v51 = vmul.f32 1.442695, %v3898_v14  ;;  %v4325_v2 = vmul.f32 %v7867_v54, %v11763_v63 }
 0xa18   :  { %4136 = vadd.xlane.f32.xlu0 %v4135_v55  ;;  %7870 = vpow2.f32 %v3983_v51  ;;  %v7869_v51 = vpop.eup %7868 }
 0xa19   :  { %7872 = vrcp.f32 %v10272_v11  ;;  %v4328_v41 = vmul.f32 %v7869_v51, %v11764_v20  ;;  %v11769_v20 = vld [vmem:[#allocation19_spill] sm:$0xff]  ;;  %v11770_v51 = vld [vmem:[#allocation6_spill] sm:$0xff] }
 0xa1c   :  { %4139 = vadd.xlane.f32.xlu0 %v4138_v26 }
 0xa23   :  { %v10378_v55 = vpop.xlane.xlu0 %3860 }
 0xa24   :  { %11758 = vst [vmem:[#allocation83_spill] sm:$0xff] %v10378_v55  ;;  %v11762_v55 = vld [vmem:[#allocation43_spill] sm:$0xff] }
 0xa25   :  { %v4326_v13 = vmul.f32 %v7865_v52, %v11762_v55  ;;  %v10398_v11 = vpop.eup %7870 }
 0xa26   :  { %v7873_v4 = vpop.eup %7872  ;;  %v4132_v55 = vsel %vm3684_vm3, %v10398_v11, 0.0 }
 0xa27   :  { %v10384_v26 = vpop.xlane.xlu0 %4106  ;;  %v4389_v47 = vpack.c.bf16 %v4326_v13, %v4325_v2  ;;  %v11768_v2 = vld [vmem:[#allocation5_spill] sm:$0xff] }
 0xa2b   :  { %v10388_v7 = vpop.xlane.xlu0 %4109 }
 0xa2f   :  { %v10390_v16 = vpop.xlane.xlu0 %4112  ;;  %v10392_v14 = vpop.xlane.xlu1 %3863 }
 0xa30   :  { %11761 = vst [vmem:[#allocation86_spill] sm:$0xff] %v10392_v14  ;;  %v4426_v14 = vpack.c.bf16 %v8235_v42, %v8199_v30  ;;  %v11767_v30 = vld [vmem:[#allocation9_spill] sm:$0xff] }
 0xa31   :  { %v3901_v42 = vsub.f32 %v11767_v30, %v10180_v62 }
 0xa32   :  { %4646 = vrot.lane.b32.xlu0 %v4425_v23, %s8084_s1  ;;  %v11766_v23 = vld [vmem:[#allocation21_spill] sm:$0xff] }
 0xa33   :  { %v4455_v53 = vpop.permute.xlu0 %4454  ;;  %v10400_v36 = vpop.xlane.xlu1 %4115  ;;  %v4327_v63 = vmul.f32 %v7873_v4, %v11766_v23  ;;  %v3903_v4 = vsub.f32 %v11768_v2, %v10184_v44 }
 0xa34   :  { %6850 = vmatpush3.bf16.msra.mxu0 %v4455_v53 }
 0xa35   :  { %6861 = vmatprep.subr.bf16.mxu0 %v11765_v59  ;;  %v4390_v53 = vpack.c.bf16 %v4328_v41, %v4327_v63  ;;  %v3993_v13 = vmul.f32 1.442695, %v3903_v4  ;;  %v3902_v41 = vsub.f32 %v11770_v51, %v10182_v6  ;;  %v4427_v4 = vpack.c.bf16 %v8424_v58, %v8367_v12 }
 0xa36   :  { %4694 = vrot.lane.b32.xlu0 %v4426_v14, %s8084_s1  ;;  %v3904_v14 = vsub.f32 %v11769_v20, %v10186_v33 }
 0xa37   :  { %6852 = vmatmul.mubr.msk.bf16.vlgmr.msra.gmra.mxu0 %vm3684_vm3, %v4389_v47  ;;  %v4503_v52 = vpop.permute.xlu1 %4502  ;;  %v3989_v47 = vmul.f32 1.442695, %v3901_v42  ;;  %v3991_v62 = vmul.f32 1.442695, %v3902_v41  ;;  %v11771_v41 = vld [vmem:[#allocation24_spill] sm:$0xff] }
 0xa38   :  { %6856 = vmatpush3.bf16.msra.mxu1 %v4503_v52  ;;  %4133 = vadd.xlane.f32.xlu1 %v4132_v55  ;;  %v3995_v54 = vmul.f32 1.442695, %v3904_v14 }
 0xa39   :  { %6863 = vmatprep.mubr.msk.bf16.mxu0 %vm8083_vm2, %v11765_v59  ;;  %6867 = vmatprep.subr.bf16.mxu1 %v11765_v59  ;;  %7874 = vpow2.f32 %v3989_v47 }
 0xa3a   :  { %7379 = vrot.lane.b32.xlu0 %v10110_v25, %s8080_s17  ;;  %7876 = vpow2.f32 %v3993_v13 }
 0xa3b   :  { %6858 = vmatmul.mubr.msk.bf16.vlgmr.msra.gmra.mxu1 %vm3684_vm3, %v4390_v53  ;;  %7878 = vpow2.f32 %v3995_v54  ;;  %v10442_v6 = vpop.permute.xlu1 %7359 }
 0xa3c   :  { %6869 = vmatprep.mubr.msk.bf16.mxu1 %vm8083_vm2, %v11765_v59  ;;  %7880 = vpow2.f32 %v3991_v62  ;;  %v3906_v62 = vsub.f32 %v11771_v41, %v10194_v21 }
 0xa3d   :  { %7882 = vrcp.f32 %v10310_v48 }
 0xa3e   :  { %7884 = vrcp.f32 %v10296_v31  ;;  %v4428_v31 = vpack.c.bf16 %v8349_v8, %v8303_v60 }
 0xa3f   :  { %7886 = vrcp.f32 %v10318_v39 }
 0xa40   :  { %7888 = vrcp.f32 %v10316_v38 }
 0xa46   :  { %v10430_v52 = vpop.eup %7874 }
 0xa47   :  { %v4141_v44 = vsel %vm3684_vm3, %v10430_v52, 0.0  ;;  %v10434_v55 = vpop.eup %7876 }
 0xa48   :  { %v4147_v33 = vsel %vm3684_vm3, %v10434_v55, 0.0  ;;  %v10438_v23 = vpop.eup %7878 }
 0xa49   :  { %7384 = vrot.lane.b32.xlu1 %v10116_v61, %s8080_s17  ;;  %v4150_v63 = vsel %vm3684_vm3, %v10438_v23, 0.0  ;;  %v10444_v53 = vpop.eup %7880 }
 0xa4a   :  { %v4144_v42 = vsel %vm3684_vm3, %v10444_v53, 0.0  ;;  %v7883_v48 = vpop.eup %7882 }
 0xa4b   :  { %v7885_v58 = vpop.eup %7884  ;;  %v4330_v39 = vmul.f32 %v7883_v48, %v10086_v43 }
 0xa4c   :  { %v7887_v38 = vpop.eup %7886  ;;  %v4329_v54 = vmul.f32 %v7885_v58, %v10082_v9  ;;  %v11773_v9 = vld [vmem:[#allocation23_spill] sm:$0xff] }
 0xa4d   :  { %v7889_v51 = vpop.eup %7888  ;;  %v4332_v8 = vmul.f32 %v7887_v38, %v10100_v17 }
 0xa4e   :  { %v4391_v60 = vpack.c.bf16 %v4330_v39, %v4329_v54 }
 0xa59   :  { %4142 = vadd.xlane.f32.xlu0 %v4141_v44  ;;  %v11772_v44 = vld [vmem:[#allocation4_spill] sm:$0xff] }
 0xa5d   :  { %4148 = vadd.xlane.f32.xlu0 %v4147_v33  ;;  %v3905_v33 = vsub.f32 %v11772_v44, %v10192_v3 }
 0xa5f   :  { %v3997_v17 = vmul.f32 1.442695, %v3905_v33 }
 0xa61   :  { %4151 = vadd.xlane.f32.xlu0 %v4150_v63  ;;  %v4331_v63 = vmul.f32 %v7889_v51, %v10094_v56 }
 0xa63   :  { %v4392_v21 = vpack.c.bf16 %v4332_v8, %v4331_v63 }
 0xa64   :  { %v10494_v56 = vpop.xlane.xlu0 %3866 }
 0xa68   :  { %v10496_v58 = vpop.permute.xlu0 %7364 }
 0xa6c   :  { %v10446_v30 = vpop.xlane.xlu1 %3869 }
 0xa6d   :  { %4145 = vadd.xlane.f32.xlu1 %v4144_v42  ;;  %v3907_v42 = vsub.f32 %v11773_v9, %v10200_v50 }
 0xa6f   :  { %v4001_v3 = vmul.f32 1.442695, %v3907_v42 }
 0xa70   :  { %v10450_v47 = vpop.xlane.xlu1 %3872 }
 0xa74   :  { %v10454_v2 = vpop.xlane.xlu1 %3875 }
 0xa77   :  { %4742 = vrot.lane.b32.xlu0 %v4427_v4, %s8084_s1  ;;  %v3999_v4 = vmul.f32 1.442695, %v3906_v62 }
 0xa78   :  { %v10461_v13 = vpop.xlane.xlu1 %4118 }
 0xa79   :  { %7890 = vpow2.f32 %v3999_v4  ;;  %v11775_v4 = vld [vmem:[#allocation27_spill] sm:$0xff] }
 0xa7a   :  { %7892 = vpow2.f32 %v3997_v17 }
 0xa7b   :  { %7389 = vrot.lane.b32.xlu0 %v10150_v49, %s8080_s17  ;;  %7894 = vpow2.f32 %v4001_v3  ;;  %v11776_v3 = vld [vmem:[#allocation13_spill] sm:$0xff] }
 0xa7c   :  { %v10465_v20 = vpop.xlane.xlu1 %4121 }
 0xa7e   :  { %4790 = vrot.lane.b32.xlu1 %v4428_v31, %s8084_s1  ;;  %v11774_v31 = vld [vmem:[#allocation32_spill] sm:$0xff] }
 0xa7f   :  { %7394 = vrot.lane.b32.xlu0 %v10160_v27, %s8080_s17  ;;  %v3908_v48 = vsub.f32 %v11774_v31, %v10202_v57 }
 0xa80   :  { %v10472_v12 = vpop.xlane.xlu1 %4127 }
 0xa81   :  { %v4003_v50 = vmul.f32 1.442695, %v3908_v48  ;;  %v7326_v48 = vunpack.i.l.bf16 %v10260_v37 }
 0xa83   :  { %7896 = vpow2.f32 %v4003_v50  ;;  %v7322_v50 = vunpack.i.h.bf16 %v10248_v29 }
 0xa84   :  { %v4551_v14 = vpop.permute.xlu1 %4550  ;;  %7898 = vrcp.f32 %v10350_v0 }
 0xa85   :  { %6862 = vmatpush3.bf16.msra.mxu0 %v4551_v14  ;;  %7900 = vrcp.f32 %v10340_v28 }
 0xa86   :  { %6873 = vmatprep.subr.bf16.mxu0 %v11765_v59  ;;  %v10502_v38 = vpop.eup %7890  ;;  %7902 = vrcp.f32 %v10366_v24 }
 0xa87   :  { %v10505_v57 = vpop.eup %7892  ;;  %7904 = vrcp.f32 %v10364_v10  ;;  %v4156_v54 = vsel %vm3684_vm3, %v10502_v38, 0.0 }
 0xa88   :  { %6864 = vmatmul.mubr.msk.bf16.vlgmr.msra.gmra.mxu0 %vm3684_vm3, %v4391_v60  ;;  %v4599_v43 = vpop.permute.xlu1 %4598  ;;  %v10512_v51 = vpop.eup %7894  ;;  %v4153_v24 = vsel %vm3684_vm3, %v10505_v57, 0.0 }
 0xa89   :  { %6868 = vmatpush3.bf16.msra.mxu1 %v4599_v43  ;;  %6875 = vmatprep.mubr.msk.bf16.mxu0 %vm8083_vm2, %v11765_v59  ;;  %v4159_v28 = vsel %vm3684_vm3, %v10512_v51, 0.0 }
 0xa8a   :  { %6879 = vmatprep.subr.bf16.mxu1 %v11765_v59 }
 0xa8c   :  { %6870 = vmatmul.mubr.msk.bf16.vlgmr.msra.gmra.mxu1 %vm3684_vm3, %v4392_v21 }
 0xa8d   :  { %6881 = vmatprep.mubr.msk.bf16.mxu1 %vm8083_vm2, %v11765_v59 }
 0xa90   :  { %v10520_v41 = vpop.eup %7896 }
 0xa91   :  { %v7899_v10 = vpop.eup %7898  ;;  %v4162_v60 = vsel %vm3684_vm3, %v10520_v41, 0.0 }
 0xa92   :  { %v7901_v8 = vpop.eup %7900  ;;  %v4334_v44 = vmul.f32 %v7899_v10, %v10130_v15 }
 0xa93   :  { %v7903_v33 = vpop.eup %7902  ;;  %v4333_v63 = vmul.f32 %v7901_v8, %v10126_v5  ;;  %v7327_v5 = vunpack.i.h.bf16 %v10260_v37  ;;  %v11777_v37 = vld [vmem:[#allocation16_spill] sm:$0xff] }
 0xa94   :  { %v7905_v9 = vpop.eup %7904  ;;  %v4336_v21 = vmul.f32 %v7903_v33, %v11775_v4  ;;  %v3910_v10 = vsub.f32 %v11777_v37, %v10216_v46  ;;  %v11782_v37 = vld [vmem:[#allocation34_spill] sm:$0xff] }
 0xa95   :  { %v4393_v42 = vpack.c.bf16 %v4334_v44, %v4333_v63  ;;  %v4335_v31 = vmul.f32 %v7905_v9, %v11776_v3  ;;  %v11780_v44 = vld [vmem:[#allocation15_spill] sm:$0xff] }
 0xa96   :  { %v3911_v33 = vsub.f32 %v11780_v44, %v10220_v22  ;;  %v11783_v44 = vld [vmem:[#allocation12_spill] sm:$0xff] }
 0xa97   :  { %v4394_v15 = vpack.c.bf16 %v4336_v21, %v4335_v31 }
 0xa98   :  { %v4009_v9 = vmul.f32 1.442695, %v3911_v33 }
 0xa99   :  { %v10500_v39 = vpop.xlane.xlu0 %4124 }
 0xa9d   :  { %v10508_v14 = vpop.xlane.xlu0 %4130 }
 0xa9e   :  { %4157 = vadd.xlane.f32.xlu0 %v4156_v54  ;;  %v7321_v54 = vunpack.i.l.bf16 %v10248_v29  ;;  %v11779_v29 = vld [vmem:[#allocation14_spill] sm:$0xff] }
 0xaa1   :  { %v10514_v0 = vpop.xlane.xlu0 %4136 }
 0xaa2   :  { %4160 = vadd.xlane.f32.xlu0 %v4159_v28  ;;  %4154 = vadd.xlane.f32.xlu1 %v4153_v24  ;;  %v4430_v28 = vpack.c.bf16 %v7327_v5, %v7326_v48  ;;  %v4429_v24 = vpack.c.bf16 %v7322_v50, %v7321_v54 }
 0xaa5   :  { %v10522_v62 = vpop.xlane.xlu0 %4139 }
 0xaa6   :  { %4163 = vadd.xlane.f32.xlu1 %v4162_v60  ;;  %v11778_v60 = vld [vmem:[#allocation56_spill] sm:$0xff] }
 0xaa7   :  { %v3909_v8 = vsub.f32 %v11779_v29, %v11778_v60  ;;  %v7337_v60 = vunpack.i.h.bf16 %v10304_v45  ;;  %v7336_v29 = vunpack.i.l.bf16 %v10304_v45 }
 0xaa9   :  { %v4647_v43 = vpop.permute.xlu0 %4646  ;;  %v4005_v63 = vmul.f32 1.442695, %v3909_v8 }
 0xaaa   :  { %6874 = vmatpush3.bf16.msra.mxu0 %v4647_v43  ;;  %v4007_v43 = vmul.f32 1.442695, %v3910_v10 }
 0xaab   :  { %6885 = vmatprep.subr.bf16.mxu0 %v11765_v59 }
 0xaac   :  { %7906 = vpow2.f32 %v4007_v43  ;;  %v7331_v43 = vunpack.i.l.bf16 %v10280_v19 }
 0xaad   :  { %v4695_v17 = vpop.permute.xlu0 %4694  ;;  %6876 = vmatmul.mubr.msk.bf16.vlgmr.msra.gmra.mxu0 %vm3684_vm3, %v4393_v42  ;;  %v11781_v42 = vld [vmem:[#allocation20_spill] sm:$0xff]  ;;  %7908 = vpow2.f32 %v4005_v63  ;;  %v4432_v63 = vpack.c.bf16 %v7337_v60, %v7336_v29 }
 0xaae   :  { %6880 = vmatpush3.bf16.msra.mxu1 %v4695_v17  ;;  %6887 = vmatprep.mubr.msk.bf16.mxu0 %vm8083_vm2, %v11765_v59  ;;  %v3912_v4 = vsub.f32 %v11781_v42, %v10222_v40  ;;  %7910 = vpow2.f32 %v4009_v9 }
 0xaaf   :  { %6891 = vmatprep.subr.bf16.mxu1 %v11765_v59 }
 0xab1   :  { %6882 = vmatmul.mubr.msk.bf16.vlgmr.msra.gmra.mxu1 %vm3684_vm3, %v4394_v15  ;;  %v10566_v22 = vpop.permute.xlu0 %7379  ;;  %v10574_v15 = vpop.permute.xlu1 %7369 }
 0xab2   :  { %6893 = vmatprep.mubr.msk.bf16.mxu1 %vm8083_vm2, %v11765_v59 }
 0xab5   :  { %v10583_v48 = vpop.permute.xlu1 %7374 }
 0xab7   :  { %4886 = vrot.lane.b32.xlu1 %v4430_v28, %s8084_s1 }
 0xab8   :  { %4838 = vrot.lane.b32.xlu0 %v4429_v24, %s8084_s1 }
 0xabb   :  { %7399 = vrot.lane.b32.xlu1 %v9966_v1, %s8081_s18  ;;  %v4011_v1 = vmul.f32 1.442695, %v3912_v4 }
 0xabc   :  { %7404 = vrot.lane.b32.xlu0 %v9972_v34, %s8081_s18  ;;  %v10556_v34 = vpop.eup %7906 }
 0xabd   :  { %7912 = vpow2.f32 %v4011_v1  ;;  %v10558_v46 = vpop.eup %7908  ;;  %v4168_v21 = vsel %vm3684_vm3, %v10556_v34, 0.0 }
 0xabe   :  { %v10562_v17 = vpop.eup %7910  ;;  %7914 = vrcp.f32 %v10388_v7  ;;  %v4165_v3 = vsel %vm3684_vm3, %v10558_v46, 0.0 }
 0xabf   :  { %7916 = vrcp.f32 %v10384_v26  ;;  %v4171_v40 = vsel %vm3684_vm3, %v10562_v17, 0.0 }
 0xac0   :  { %7918 = vrcp.f32 %v10400_v36  ;;  %v7332_v36 = vunpack.i.h.bf16 %v10280_v19 }
 0xac1   :  { %7920 = vrcp.f32 %v10390_v16  ;;  %v10588_v24 = vpop.xlane.xlu1 %4133 }
 0xac2   :  { %v4431_v42 = vpack.c.bf16 %v7332_v36, %v7331_v43  ;;  %v11792_v36 = vld [vmem:[#allocation33_spill] sm:$0xff] }
 0xac5   :  { %v10597_v9 = vpop.permute.xlu1 %7384 }
 0xaca   :  { %v10572_v31 = vpop.eup %7912 }
 0xacb   :  { %v4174_v7 = vsel %vm3684_vm3, %v10572_v31, 0.0  ;;  %v7915_v50 = vpop.eup %7914 }
 0xacc   :  { %v7917_v28 = vpop.eup %7916  ;;  %v4338_v10 = vmul.f32 %v7915_v50, %v11782_v37 }
 0xacd   :  { %v4337_v33 = vmul.f32 %v7917_v28, %v11783_v44  ;;  %v7919_v45 = vpop.eup %7918 }
 0xace   :  { %v7921_v19 = vpop.eup %7920 }
 0xacf   :  { %v4395_v16 = vpack.c.bf16 %v4338_v10, %v4337_v33  ;;  %v11791_v33 = vld [vmem:[#allocation57_spill] sm:$0xff] }
 0xad0   :  { %v3913_v43 = vsub.f32 %v11792_v36, %v11791_v33 }
 0xadb   :  { %4169 = vadd.xlane.f32.xlu0 %v4168_v21  ;;  %v4340_v21 = vmul.f32 %v7919_v45, %v10212_v35  ;;  %v11788_v35 = vld [vmem:[#allocation58_spill] sm:$0xff] }
 0xadf   :  { %4172 = vadd.xlane.f32.xlu0 %v4171_v40  ;;  %4166 = vadd.xlane.f32.xlu1 %v4165_v3 }
 0xae2   :  { %v10576_v5 = vpop.xlane.xlu0 %4142 }
 0xae3   :  { %4175 = vadd.xlane.f32.xlu1 %v4174_v7  ;;  %v11785_v7 = vld [vmem:[#allocation55_spill] sm:$0xff] }
 0xae4   :  { %v4339_v50 = vmul.f32 %v7921_v19, %v11785_v7  ;;  %v4013_v19 = vmul.f32 1.442695, %v3913_v43 }
 0xae6   :  { %v10580_v26 = vpop.xlane.xlu0 %4148  ;;  %v4396_v10 = vpack.c.bf16 %v4340_v21, %v4339_v50 }
 0xaea   :  { %v10586_v54 = vpop.xlane.xlu0 %4151 }
 0xaee   :  { %v4743_v8 = vpop.permute.xlu0 %4742 }
 0xaef   :  { %6886 = vmatpush3.bf16.msra.mxu0 %v4743_v8 }
 0xaf0   :  { %6897 = vmatprep.subr.bf16.mxu0 %v11765_v59 }
 0xaf2   :  { %6888 = vmatmul.mubr.msk.bf16.vlgmr.msra.gmra.mxu0 %vm3684_vm3, %v4395_v16  ;;  %v11793_v16 = vld [vmem:[#allocation59_spill] sm:$0xff]  ;;  %v10647_v33 = vpop.permute.xlu0 %7389 }
 0xaf3   :  { %6899 = vmatprep.mubr.msk.bf16.mxu0 %vm8083_vm2, %v11765_v59 }
 0xaf4   :  { %4982 = vrot.lane.b32.xlu1 %v4432_v63, %s8084_s1  ;;  %v11794_v63 = vld [vmem:[#allocation29_spill] sm:$0xff] }
 0xaf5   :  { %4934 = vrot.lane.b32.xlu0 %v4431_v42, %s8084_s1  ;;  %v3915_v42 = vsub.f32 %v11794_v63, %v11793_v16 }
 0xaf6   :  { %v10604_v4 = vpop.xlane.xlu1 %4145  ;;  %v10654_v43 = vpop.permute.xlu0 %7394 }
 0xaf7   :  { %v10606_v1 = vpop.f32.mrf.mxu0  ;;  %v4017_v21 = vmul.f32 1.442695, %v3915_v42  ;;  %v11797_v42 = vld [vmem:[#allocation3_spill] sm:$0xff] }
 0xaf8   :  { %11784 = vst [vmem:[#allocation43_spill] sm:$0xff] %v10606_v1  ;;  %7409 = vrot.lane.b32.xlu1 %v11750_v32, %s8081_s18  ;;  %v11789_v32 = vld [vmem:[#allocation41_spill] sm:$0xff]  ;;  %v11801_v1 = vld [vmem:[#allocation2_spill] sm:$0xff] }
 0xaf9   :  { %7414 = vrot.lane.b32.xlu0 %v11753_v18, %s8081_s18  ;;  %v6853_v40 = vpop.f32.mrf.mxu0  ;;  %v3914_v8 = vsub.f32 %v11789_v32, %v11788_v35 }
 0xafa   :  { %v4791_v3 = vpop.permute.xlu1 %4790  ;;  %v11795_v40 = vld [vmem:[#allocation60_spill] sm:$0xff] }
 0xafb   :  { %v10614_v28 = vpop.f32.mrf.mxu0  ;;  %v10616_v37 = vpop.f32.mrf.mxu1  ;;  %6892 = vmatpush3.bf16.msra.mxu1 %v4791_v3  ;;  %v4015_v45 = vmul.f32 1.442695, %v3914_v8  ;;  %v11796_v3 = vld [vmem:[#allocation18_spill] sm:$0xff] }
 0xafc   :  { %11786 = vst [vmem:[#allocation35_spill] sm:$0xff] %v10614_v28  ;;  %11787 = vst [vmem:[#allocation45_spill] sm:$0xff] %v10616_v37  ;;  %6903 = vmatprep.subr.bf16.mxu1 %v11765_v59  ;;  %v3916_v7 = vsub.f32 %v11796_v3, %v11795_v40  ;;  %v11798_v40 = vld [vmem:[#allocation76_spill] sm:$0xff] }
 0xafd   :  { %v6854_v60 = vpop.f32.mrf.mxu0  ;;  %v6859_v29 = vpop.f32.mrf.mxu1  ;;  %7922 = vpow2.f32 %v4015_v45  ;;  %v7347_v45 = vunpack.i.h.bf16 %v11797_v42  ;;  %v7342_v3 = vunpack.i.h.bf16 %v11798_v40 }
 0xafe   :  { %6894 = vmatmul.mubr.msk.bf16.vlgmr.msra.gmra.mxu1 %vm3684_vm3, %v4396_v10  ;;  %7924 = vpow2.f32 %v4013_v19  ;;  %v4019_v50 = vmul.f32 1.442695, %v3916_v7  ;;  %v7341_v7 = vunpack.i.l.bf16 %v11798_v40 }
 0xaff   :  { %v10622_v18 = vpop.f32.mrf.mxu1  ;;  %6905 = vmatprep.mubr.msk.bf16.mxu1 %vm8083_vm2, %v11765_v59  ;;  %7926 = vpow2.f32 %v4017_v21 }
 0xb00   :  { %11790 = vst [vmem:[#allocation21_spill] sm:$0xff] %v10622_v18  ;;  %7928 = vpow2.f32 %v4019_v50 }
 0xb01   :  { %v6860_v44 = vpop.f32.mrf.mxu1  ;;  %7930 = vrcp.f32 %v10465_v20  ;;  %v7346_v20 = vunpack.i.l.bf16 %v11797_v42  ;;  %v4433_v42 = vpack.c.bf16 %v7342_v3, %v7341_v7 }
 0xb02   :  { %7932 = vrcp.f32 %v10461_v13 }
 0xb03   :  { %7934 = vrcp.f32 %v10500_v39  ;;  %v11799_v39 = vld [vmem:[#allocation73_spill] sm:$0xff] }
 0xb04   :  { %7936 = vrcp.f32 %v10472_v12 }
 0xb0a   :  { %v10632_v10 = vpop.eup %7922 }
 0xb0b   :  { %v10634_v60 = vpop.eup %7924  ;;  %v4180_v29 = vsel %vm3684_vm3, %v10632_v10, 0.0 }
 0xb0c   :  { %v10638_v35 = vpop.eup %7926  ;;  %v4177_v8 = vsel %vm3684_vm3, %v10634_v60, 0.0 }
 0xb0d   :  { %v4183_v32 = vsel %vm3684_vm3, %v10638_v35, 0.0  ;;  %v10644_v44 = vpop.eup %7928 }
 0xb0e   :  { %v4186_v36 = vsel %vm3684_vm3, %v10644_v44, 0.0  ;;  %v7931_v63 = vpop.eup %7930 }
 0xb0f   :  { %v7933_v13 = vpop.eup %7932  ;;  %v4342_v50 = vmul.f32 %v7931_v63, %v11799_v39 }
 0xb10   :  { %v7935_v12 = vpop.eup %7934 }
 0xb11   :  { %v7937_v18 = vpop.eup %7936  ;;  %v4343_v28 = vmul.f32 %v7935_v12, %v11801_v1  ;;  %v11806_v12 = vld [vmem:[#allocation40_spill] sm:$0xff] }
 0xb18   :  { %4181 = vadd.xlane.f32.xlu0 %v4180_v29  ;;  %v4434_v29 = vpack.c.bf16 %v7347_v45, %v7346_v20  ;;  %v11802_v45 = vld [vmem:[#allocation74_spill] sm:$0xff] }
 0xb19   :  { %v4344_v20 = vmul.f32 %v7937_v18, %v11802_v45  ;;  %v11810_v45 = vld [vmem:[#allocation42_spill] sm:$0xff] }
 0xb1c   :  { %4184 = vadd.xlane.f32.xlu0 %v4183_v32  ;;  %4178 = vadd.xlane.f32.xlu1 %v4177_v8 }
 0xb20   :  { %4187 = vadd.xlane.f32.xlu1 %v4186_v36  ;;  %v11800_v36 = vld [vmem:[#allocation70_spill] sm:$0xff] }
 0xb21   :  { %v4341_v37 = vmul.f32 %v7933_v13, %v11800_v36  ;;  %v11815_v36 = vld [vmem:[#allocation80_spill] sm:$0xff] }
 0xb27   :  { %v4158_v16 = vpop.xlane.xlu0 %4157 }
 0xb28   :  { %7938 = vrcp.f32 %v4158_v16  ;;  %v4397_v16 = vpack.c.bf16 %v4342_v50, %v4341_v37  ;;  %v11805_v50 = vld [vmem:[#allocation61_spill] sm:$0xff] }
 0xb2b   :  { %v4161_v19 = vpop.xlane.xlu0 %4160  ;;  %v4155_v21 = vpop.xlane.xlu1 %4154 }
 0xb2c   :  { %7940 = vrcp.f32 %v4155_v21 }
 0xb2d   :  { %7942 = vrcp.f32 %v4161_v19  ;;  %v4398_v19 = vpack.c.bf16 %v4344_v20, %v4343_v28  ;;  %v11804_v28 = vld [vmem:[#allocation8_spill] sm:$0xff] }
 0xb2f   :  { %v4839_v32 = vpop.permute.xlu0 %4838  ;;  %v4164_v8 = vpop.xlane.xlu1 %4163 }
 0xb30   :  { %7944 = vrcp.f32 %v4164_v8  ;;  %6898 = vmatpush3.bf16.msra.mxu0 %v4839_v32  ;;  %v11808_v32 = vld [vmem:[#allocation11_spill] sm:$0xff] }
 0xb31   :  { %5078 = vrot.lane.b32.xlu1 %v4434_v29, %s8084_s1  ;;  %6909 = vmatprep.subr.bf16.mxu0 %v11765_v59  ;;  %v11807_v29 = vld [vmem:[#allocation63_spill] sm:$0xff] }
 0xb32   :  { %5030 = vrot.lane.b32.xlu0 %v4433_v42, %s8084_s1 }
 0xb33   :  { %6900 = vmatmul.mubr.msk.bf16.vlgmr.msra.gmra.mxu0 %vm3684_vm3, %v4397_v16  ;;  %v4887_v63 = vpop.permute.xlu1 %4886 }
 0xb34   :  { %6904 = vmatpush3.bf16.msra.mxu1 %v4887_v63  ;;  %6911 = vmatprep.mubr.msk.bf16.mxu0 %vm8083_vm2, %v11765_v59  ;;  %v11809_v63 = vld [vmem:[#allocation64_spill] sm:$0xff] }
 0xb35   :  { %7419 = vrot.lane.b32.xlu1 %v10110_v25, %s8081_s18  ;;  %6915 = vmatprep.subr.bf16.mxu1 %v11765_v59  ;;  %v7939_v1 = vpop.eup %7938  ;;  %v11803_v25 = vld [vmem:[#allocation62_spill] sm:$0xff] }
 0xb36   :  { %7424 = vrot.lane.b32.xlu0 %v10116_v61, %s8081_s18  ;;  %v10682_v13 = vmul.f32 %v7939_v1, %v10502_v38  ;;  %v3918_v40 = vsub.f32 %v11804_v28, %v11803_v25  ;;  %v3919_v38 = vsub.f32 %v11808_v32, %v11807_v29 }
 0xb37   :  { %6906 = vmatmul.mubr.msk.bf16.vlgmr.msra.gmra.mxu1 %vm3684_vm3, %v4398_v19 }
 0xb38   :  { %6917 = vmatprep.mubr.msk.bf16.mxu1 %vm8083_vm2, %v11765_v59  ;;  %v4023_v8 = vmul.f32 1.442695, %v3918_v40  ;;  %v4025_v16 = vmul.f32 1.442695, %v3919_v38 }
 0xb39   :  { %v7941_v37 = vpop.eup %7940 }
 0xb3a   :  { %v7943_v18 = vpop.eup %7942  ;;  %v10679_v21 = vmul.f32 %v7941_v37, %v10505_v57  ;;  %v3917_v57 = vsub.f32 %v11806_v12, %v11805_v50  ;;  %7946 = vpow2.f32 %v4023_v8 }
 0xb3b   :  { %v10689_v7 = vmul.f32 %v7943_v18, %v10512_v51  ;;  %v3920_v51 = vsub.f32 %v11810_v45, %v11809_v63 }
 0xb3c   :  { %v4021_v42 = vmul.f32 1.442695, %v3917_v57 }
 0xb3d   :  { %v7945_v3 = vpop.eup %7944 }
 0xb3e   :  { %v10692_v39 = vmul.f32 %v7945_v3, %v10520_v41  ;;  %7948 = vpow2.f32 %v4021_v42  ;;  %v4027_v41 = vmul.f32 1.442695, %v3920_v51  ;;  %v10730_v42 = vpop.permute.xlu0 %7404  ;;  %v11813_v51 = vld [vmem:[#allocation85_spill] sm:$0xff] }
 0xb3f   :  { %7950 = vpow2.f32 %v4025_v16  ;;  %v10732_v16 = vpop.permute.xlu1 %7399 }
 0xb40   :  { %7952 = vpow2.f32 %v4027_v41  ;;  %v7357_v41 = vunpack.i.h.bf16 %v11813_v51 }
 0xb41   :  { %7954 = vrcp.f32 %v10588_v24  ;;  %v7356_v24 = vunpack.i.l.bf16 %v11813_v51 }
 0xb42   :  { %7956 = vrcp.f32 %v10508_v14 }
 0xb43   :  { %7958 = vrcp.f32 %v10522_v62 }
 0xb44   :  { %7960 = vrcp.f32 %v10514_v0 }
 0xb47   :  { %v10710_v40 = vpop.eup %7946 }
 0xb48   :  { %v10702_v20 = vpop.f32.mrf.mxu0  ;;  %v4192_v12 = vsel %vm3684_vm3, %v10710_v40, 0.0 }
 0xb4a   :  { %v6865_v19 = vpop.f32.mrf.mxu0 }
 0xb4b   :  { %v10712_v50 = vpop.eup %7948 }
 0xb4c   :  { %v10704_v1 = vpop.f32.mrf.mxu0  ;;  %v10706_v37 = vpop.f32.mrf.mxu1  ;;  %v4189_v32 = vsel %vm3684_vm3, %v10712_v50, 0.0 }
 0xb4d   :  { %11811 = vst [vmem:[#allocation9_spill] sm:$0xff] %v10706_v37  ;;  %v10716_v57 = vpop.eup %7950 }
 0xb4e   :  { %v6866_v18 = vpop.f32.mrf.mxu0  ;;  %v6871_v25 = vpop.f32.mrf.mxu1  ;;  %v4195_v29 = vsel %vm3684_vm3, %v10716_v57, 0.0 }
 0xb4f   :  { %v10722_v38 = vpop.eup %7952  ;;  %v11814_v25 = vld [vmem:[#allocation37_spill] sm:$0xff] }
 0xb50   :  { %v10708_v28 = vpop.f32.mrf.mxu1  ;;  %v4198_v8 = vsel %vm3684_vm3, %v10722_v38, 0.0  ;;  %v7955_v45 = vpop.eup %7954  ;;  %v7351_v62 = vunpack.i.l.bf16 %v11814_v25 }
 0xb51   :  { %11812 = vst [vmem:[#allocation5_spill] sm:$0xff] %v10708_v28  ;;  %v7957_v18 = vpop.eup %7956  ;;  %v4346_v0 = vmul.f32 %v7955_v45, %v10398_v11 }
 0xb52   :  { %v6872_v3 = vpop.f32.mrf.mxu1  ;;  %v4345_v61 = vmul.f32 %v7957_v18, %v11815_v36  ;;  %v11817_v36 = vld [vmem:[#allocation81_spill] sm:$0xff] }
 0xb53   :  { %v7352_v3 = vunpack.i.h.bf16 %v11814_v25  ;;  %v11816_v25 = vld [vmem:[#allocation10_spill] sm:$0xff] }
 0xb54   :  { %v4399_v28 = vpack.c.bf16 %v4346_v0, %v4345_v61 }
 0xb55   :  { %4193 = vadd.xlane.f32.xlu0 %v4192_v12  ;;  %v7959_v12 = vpop.eup %7958  ;;  %v4435_v51 = vpack.c.bf16 %v7352_v3, %v7351_v62 }
 0xb56   :  { %v7961_v37 = vpop.eup %7960 }
 0xb59   :  { %4196 = vadd.xlane.f32.xlu0 %v4195_v29  ;;  %4190 = vadd.xlane.f32.xlu1 %v4189_v32  ;;  %v4436_v29 = vpack.c.bf16 %v7357_v41, %v7356_v24  ;;  %v4347_v41 = vmul.f32 %v7961_v37, %v11817_v36  ;;  %v11822_v36 = vld [vmem:[#allocation28_spill] sm:$0xff] }
 0xb5d   :  { %4199 = vadd.xlane.f32.xlu1 %v4198_v8 }
 0xb64   :  { %v4170_v63 = vpop.xlane.xlu0 %4169 }
 0xb65   :  { %7962 = vrcp.f32 %v4170_v63 }
 0xb68   :  { %v4173_v14 = vpop.xlane.xlu0 %4172  ;;  %v4167_v19 = vpop.xlane.xlu1 %4166 }
 0xb69   :  { %7964 = vrcp.f32 %v4167_v19  ;;  %v4348_v19 = vmul.f32 %v7959_v12, %v11816_v25 }
 0xb6a   :  { %7966 = vrcp.f32 %v4173_v14 }
 0xb6b   :  { %v4400_v61 = vpack.c.bf16 %v4348_v19, %v4347_v41 }
 0xb6c   :  { %v4935_v32 = vpop.permute.xlu0 %4934  ;;  %v4176_v8 = vpop.xlane.xlu1 %4175 }
 0xb6d   :  { %7968 = vrcp.f32 %v4176_v8  ;;  %v10740_v63 = vpop.f32.mrf.mxu0  ;;  %6910 = vmatpush3.bf16.msra.mxu0 %v4935_v32  ;;  %v11820_v32 = vld [vmem:[#allocation44_spill] sm:$0xff] }
 0xb6e   :  { %5174 = vrot.lane.b32.xlu1 %v4436_v29, %s8084_s1  ;;  %6921 = vmatprep.subr.bf16.mxu0 %v11765_v59 }
 0xb6f   :  { %5126 = vrot.lane.b32.xlu0 %v4435_v51, %s8084_s1  ;;  %v6877_v11 = vpop.f32.mrf.mxu0 }
 0xb70   :  { %6912 = vmatmul.mubr.msk.bf16.vlgmr.msra.gmra.mxu0 %vm3684_vm3, %v4399_v28  ;;  %v4983_v45 = vpop.permute.xlu1 %4982 }
 0xb71   :  { %v10748_v24 = vpop.f32.mrf.mxu0  ;;  %v10750_v14 = vpop.f32.mrf.mxu1  ;;  %6916 = vmatpush3.bf16.msra.mxu1 %v4983_v45  ;;  %6923 = vmatprep.mubr.msk.bf16.mxu0 %vm8083_vm2, %v11765_v59  ;;  %v11821_v45 = vld [vmem:[#allocation65_spill] sm:$0xff] }
 0xb72   :  { %11818 = vst [vmem:[#allocation19_spill] sm:$0xff] %v10750_v14  ;;  %7429 = vrot.lane.b32.xlu1 %v10150_v49, %s8081_s18  ;;  %6927 = vmatprep.subr.bf16.mxu1 %v11765_v59  ;;  %v7963_v37 = vpop.eup %7962 }
 0xb73   :  { %7434 = vrot.lane.b32.xlu0 %v10160_v27, %s8081_s18  ;;  %v6878_v28 = vpop.f32.mrf.mxu0  ;;  %v6883_v18 = vpop.f32.mrf.mxu1  ;;  %v10768_v29 = vmul.f32 %v7963_v37, %v10556_v34  ;;  %v11819_v27 = vld [vmem:[#allocation67_spill] sm:$0xff]  ;;  %v11824_v34 = vld [vmem:[#allocation26_spill] sm:$0xff]  ;;  %s8087_s18 = smov 24  }
 0xb74   :  { %6918 = vmatmul.mubr.msk.bf16.vlgmr.msra.gmra.mxu1 %vm3684_vm3, %v4400_v61  ;;  %v3922_v8 = vsub.f32 %v11820_v32, %v11819_v27  ;;  %v11823_v61 = vld [vmem:[#allocation66_spill] sm:$0xff]  ;;  %v11826_v27 = vld [vmem:[#allocation39_spill] sm:$0xff] }
 0xb75   :  { %v10760_v3 = vpop.f32.mrf.mxu1  ;;  %6929 = vmatprep.mubr.msk.bf16.mxu1 %vm8083_vm2, %v11765_v59  ;;  %v3923_v28 = vsub.f32 %v11824_v34, %v11823_v61  ;;  %v10808_v61 = vpop.permute.xlu0 %7414 }
 0xb76   :  { %v7965_v62 = vpop.eup %7964  ;;  %v4031_v41 = vmul.f32 1.442695, %v3922_v8  ;;  %v10810_v34 = vpop.permute.xlu1 %7409 }
 0xb77   :  { %v6884_v0 = vpop.f32.mrf.mxu1  ;;  %v7967_v12 = vpop.eup %7966  ;;  %v10765_v49 = vmul.f32 %v7965_v62, %v10558_v46  ;;  %v3921_v46 = vsub.f32 %v11822_v36, %v11821_v45  ;;  %v4033_v62 = vmul.f32 1.442695, %v3923_v28 }
 0xb78   :  { %v10775_v19 = vmul.f32 %v7967_v12, %v10562_v17  ;;  %7970 = vpow2.f32 %v4031_v41  ;;  %v11825_v0 = vld [vmem:[#allocation68_spill] sm:$0xff] }
 0xb79   :  { %v4029_v37 = vmul.f32 1.442695, %v3921_v46  ;;  %v3924_v17 = vsub.f32 %v11826_v27, %v11825_v0 }
 0xb7a   :  { %v7969_v51 = vpop.eup %7968 }
 0xb7b   :  { %v10778_v11 = vmul.f32 %v7969_v51, %v10572_v31  ;;  %7972 = vpow2.f32 %v4029_v37  ;;  %v4035_v31 = vmul.f32 1.442695, %v3924_v17  ;;  %v7362_v17 = vunpack.i.h.bf16 %v10442_v6 }
 0xb7c   :  { %7974 = vpow2.f32 %v4033_v62  ;;  %v7367_v62 = vunpack.i.h.bf16 %v10496_v58 }
 0xb7d   :  { %7976 = vpow2.f32 %v4035_v31 }
 0xb7e   :  { %7978 = vrcp.f32 %v10604_v4  ;;  %v7366_v4 = vunpack.i.l.bf16 %v10496_v58 }
 0xb7f   :  { %7980 = vrcp.f32 %v10576_v5 }
 0xb80   :  { %7982 = vrcp.f32 %v10586_v54  ;;  %v7361_v54 = vunpack.i.l.bf16 %v10442_v6 }
 0xb81   :  { %7984 = vrcp.f32 %v10580_v26 }
 0xb82   :  { %v4437_v58 = vpack.c.bf16 %v7362_v17, %v7361_v54  ;;  %v11831_v17 = vld [vmem:[#allocation51_spill] sm:$0xff] }
 0xb85   :  { %v10788_v12 = vpop.eup %7970 }
 0xb86   :  { %v4204_v8 = vsel %vm3684_vm3, %v10788_v12, 0.0 }
 0xb88   :  { %v10790_v32 = vpop.eup %7972 }
 0xb89   :  { %v10794_v51 = vpop.eup %7974  ;;  %v4201_v36 = vsel %vm3684_vm3, %v10790_v32, 0.0 }
 0xb8a   :  { %v4207_v45 = vsel %vm3684_vm3, %v10794_v51, 0.0  ;;  %v10800_v46 = vpop.eup %7976 }
 0xb8b   :  { %v4210_v41 = vsel %vm3684_vm3, %v10800_v46, 0.0  ;;  %v7979_v37 = vpop.eup %7978 }
 0xb8c   :  { %v7981_v27 = vpop.eup %7980  ;;  %v4350_v26 = vmul.f32 %v7979_v37, %v10444_v53 }
 0xb8d   :  { %v7983_v31 = vpop.eup %7982 }
 0xb8e   :  { %v7985_v18 = vpop.eup %7984  ;;  %v4352_v25 = vmul.f32 %v7983_v31, %v10438_v23  ;;  %v11827_v23 = vld [vmem:[#allocation72_spill] sm:$0xff] }
 0xb8f   :  { %v4351_v53 = vmul.f32 %v7985_v18, %v10434_v55 }
 0xb92   :  { %4205 = vadd.xlane.f32.xlu0 %v4204_v8  ;;  %v4438_v8 = vpack.c.bf16 %v7367_v62, %v7366_v4  ;;  %v11828_v62 = vld [vmem:[#allocation46_spill] sm:$0xff] }
 0xb93   :  { %v3926_v4 = vsub.f32 %v11828_v62, %v11827_v23  ;;  %v11836_v23 = vld [vmem:[#allocation38_spill] sm:$0xff] }
 0xb95   :  { %v4039_v31 = vmul.f32 1.442695, %v3926_v4 }
 0xb96   :  { %4208 = vadd.xlane.f32.xlu0 %v4207_v45  ;;  %4202 = vadd.xlane.f32.xlu1 %v4201_v36 }
 0xb9a   :  { %4211 = vadd.xlane.f32.xlu1 %v4210_v41  ;;  %v4349_v41 = vmul.f32 %v7981_v27, %v10430_v52  ;;  %v4402_v52 = vpack.c.bf16 %v4352_v25, %v4351_v53  ;;  %v11830_v27 = vld [vmem:[#allocation69_spill] sm:$0xff] }
 0xb9b   :  { %v3925_v54 = vsub.f32 %v11831_v17, %v11830_v27 }
 0xba1   :  { %v4182_v28 = vpop.xlane.xlu0 %4181 }
 0xba2   :  { %7986 = vrcp.f32 %v4182_v28  ;;  %v4401_v28 = vpack.c.bf16 %v4350_v26, %v4349_v41 }
 0xba5   :  { %v4185_v5 = vpop.xlane.xlu0 %4184  ;;  %v4179_v0 = vpop.xlane.xlu1 %4178 }
 0xba6   :  { %7988 = vrcp.f32 %v4179_v0 }
 0xba7   :  { %7990 = vrcp.f32 %v4185_v5 }
 0xba9   :  { %v5031_v45 = vpop.permute.xlu0 %5030  ;;  %v4188_v36 = vpop.xlane.xlu1 %4187 }
 0xbaa   :  { %7992 = vrcp.f32 %v4188_v36  ;;  %6922 = vmatpush3.bf16.msra.mxu0 %v5031_v45  ;;  %v11833_v45 = vld [vmem:[#allocation7_spill] sm:$0xff] }
 0xbab   :  { %5270 = vrot.lane.b32.xlu1 %v4438_v8, %s8084_s1  ;;  %6933 = vmatprep.subr.bf16.mxu0 %v11765_v59  ;;  %v11832_v8 = vld [vmem:[#allocation71_spill] sm:$0xff]  ;;  %7994 = vpow2.f32 %v4039_v31 }
 0xbac   :  { %5222 = vrot.lane.b32.xlu0 %v4437_v58, %s8084_s1  ;;  %v3927_v36 = vsub.f32 %v11833_v45, %v11832_v8 }
 0xbad   :  { %6924 = vmatmul.mubr.msk.bf16.vlgmr.msra.gmra.mxu0 %vm3684_vm3, %v4401_v28  ;;  %v5079_v6 = vpop.permute.xlu1 %5078 }
 0xbae   :  { %6928 = vmatpush3.bf16.msra.mxu1 %v5079_v6  ;;  %6935 = vmatprep.mubr.msk.bf16.mxu0 %vm8083_vm2, %v11765_v59 }
 0xbaf   :  { %6939 = vmatprep.subr.bf16.mxu1 %v11765_v59  ;;  %v7987_v37 = vpop.eup %7986 }
 0xbb0   :  { %v10840_v26 = vmul.f32 %v7987_v37, %v10632_v10  ;;  %v4041_v10 = vmul.f32 1.442695, %v3927_v36  ;;  %v11835_v37 = vld [vmem:[#allocation75_spill] sm:$0xff] }
 0xbb1   :  { %6930 = vmatmul.mubr.msk.bf16.vlgmr.msra.gmra.mxu1 %vm3684_vm3, %v4402_v52  ;;  %v4037_v52 = vmul.f32 1.442695, %v3925_v54  ;;  %v3928_v62 = vsub.f32 %v11836_v23, %v11835_v37  ;;  %v10882_v37 = vpop.permute.xlu1 %7419 }
 0xbb2   :  { %v10830_v5 = vpop.f32.mrf.mxu0  ;;  %6941 = vmatprep.mubr.msk.bf16.mxu1 %vm8083_vm2, %v11765_v59 }
 0xbb3   :  { %11829 = vst [vmem:[#allocation6_spill] sm:$0xff] %v10830_v5  ;;  %v7989_v0 = vpop.eup %7988  ;;  %7996 = vpow2.f32 %v4037_v52  ;;  %v7377_v52 = vunpack.i.h.bf16 %v10583_v48  ;;  %v11850_v5 = vld [vmem:[#allocation54_spill] sm:$0xff] }
 0xbb4   :  { %v6889_v55 = vpop.f32.mrf.mxu0  ;;  %v7991_v18 = vpop.eup %7990  ;;  %v10837_v25 = vmul.f32 %v7989_v0, %v10634_v60  ;;  %7998 = vpow2.f32 %v4041_v10  ;;  %v4043_v0 = vmul.f32 1.442695, %v3928_v62  ;;  %v7376_v10 = vunpack.i.l.bf16 %v10583_v48 }
 0xbb5   :  { %v10849_v6 = vmul.f32 %v7991_v18, %v10638_v35  ;;  %v7372_v62 = vunpack.i.h.bf16 %v10574_v15 }
 0xbb6   :  { %v10844_v41 = vpop.f32.mrf.mxu0  ;;  %8000 = vpow2.f32 %v4043_v0  ;;  %v7371_v0 = vunpack.i.l.bf16 %v10574_v15  ;;  %v11839_v15 = vpack.c.bf16 %v10682_v13, %v10679_v21 }
 0xbb7   :  { %11834 = vst [vmem:[#allocation24_spill] sm:$0xff] %v10844_v41  ;;  %v7993_v58 = vpop.eup %7992 }
 0xbb8   :  { %v10852_v53 = vmul.f32 %v7993_v58, %v10644_v44  ;;  %v6890_v60 = vpop.f32.mrf.mxu0  ;;  %v10862_v27 = vpop.eup %7994 }
 0xbb9   :  { %v4216_v54 = vsel %vm3684_vm3, %v10862_v27, 0.0  ;;  %v10878_v60 = vpop.permute.xlu0 %7424 }
 0xbbe   :  { %v10858_v55 = vpop.f32.mrf.mxu1 }
 0xbbf   :  { %11837 = vst [vmem:[#allocation4_spill] sm:$0xff] %v10858_v55 }
 0xbc0   :  { %v6895_v35 = vpop.f32.mrf.mxu1  ;;  %v10864_v17 = vpop.eup %7996 }
 0xbc1   :  { %v10868_v31 = vpop.eup %7998  ;;  %v4213_v45 = vsel %vm3684_vm3, %v10864_v17, 0.0  ;;  %v4440_v35 = vpack.c.bf16 %v7377_v52, %v7376_v10  ;;  %v11840_v52 = vld [vmem:[#allocation79_spill] sm:$0xff]  ;;  %v11841_v10 = vld [vmem:[#allocation53_spill] sm:$0xff] }
 0xbc2   :  { %v10860_v18 = vpop.f32.mrf.mxu1  ;;  %v4219_v8 = vsel %vm3684_vm3, %v10868_v31, 0.0 }
 0xbc3   :  { %11838 = vst [vmem:[#allocation23_spill] sm:$0xff] %v10860_v18  ;;  %v10874_v36 = vpop.eup %8000  ;;  %v11849_v18 = vld [vmem:[#allocation84_spill] sm:$0xff] }
 0xbc4   :  { %v6896_v44 = vpop.f32.mrf.mxu1  ;;  %v4222_v58 = vsel %vm3684_vm3, %v10874_v36, 0.0  ;;  %v3934_v41 = vsub.f32 %v11850_v5, %v11849_v18  ;;  %v11857_v18 = vld [vmem:[#allocation86_spill] sm:$0xff] }
 0xbcb   :  { %4217 = vadd.xlane.f32.xlu0 %v4216_v54 }
 0xbcf   :  { %4220 = vadd.xlane.f32.xlu0 %v4219_v8  ;;  %4214 = vadd.xlane.f32.xlu1 %v4213_v45  ;;  %v4439_v8 = vpack.c.bf16 %v7372_v62, %v7371_v0  ;;  %v11842_v62 = vld [vmem:[#allocation77_spill] sm:$0xff]  ;;  %v11843_v0 = vld [vmem:[#allocation48_spill] sm:$0xff] }
 0xbd3   :  { %4223 = vadd.xlane.f32.xlu1 %v4222_v58 }
 0xbde   :  { %v4194_v23 = vpop.xlane.xlu0 %4193 }
 0xbdf   :  { %8002 = vrcp.f32 %v4194_v23  ;;  %v3930_v23 = vsub.f32 %v11841_v10, %v11840_v52 }
 0xbe1   :  { %v4047_v13 = vmul.f32 1.442695, %v3930_v23 }
 0xbe2   :  { %v4197_v44 = vpop.xlane.xlu0 %4196  ;;  %v4191_v54 = vpop.xlane.xlu1 %4190 }
 0xbe3   :  { %8004 = vrcp.f32 %v4191_v54  ;;  %v11845_v54 = vld [vmem:[#allocation78_spill] sm:$0xff] }
 0xbe4   :  { %5366 = vrot.lane.b32.xlu1 %v4440_v35, %s8084_s1  ;;  %8006 = vrcp.f32 %v4197_v44  ;;  %v3929_v35 = vsub.f32 %v11843_v0, %v11842_v62  ;;  %v11844_v44 = vpack.c.bf16 %v10692_v39, %v10689_v7  ;;  %v11847_v39 = vld [vmem:[#allocation17_spill] sm:$0xff]  ;;  %v11848_v62 = vld [vmem:[#allocation30_spill] sm:$0xff] }
 0xbe5   :  { %5318 = vrot.lane.b32.xlu0 %v4439_v8, %s8084_s1  ;;  %v11846_v8 = vld [vmem:[#allocation25_spill] sm:$0xff]  ;;  %v3932_v23 = vsub.f32 %v11848_v62, %v11847_v39 }
 0xbe6   :  { %v5127_v45 = vpop.permute.xlu0 %5126  ;;  %v4200_v48 = vpop.xlane.xlu1 %4199 }
 0xbe7   :  { %8008 = vrcp.f32 %v4200_v48  ;;  %6934 = vmatpush3.bf16.msra.mxu0 %v5127_v45  ;;  %v3931_v45 = vsub.f32 %v11846_v8, %v11845_v54 }
 0xbe8   :  { %6945 = vmatprep.subr.bf16.mxu0 %v11765_v59  ;;  %8010 = vpow2.f32 %v4047_v13 }
 0xbe9   :  { %v4049_v7 = vmul.f32 1.442695, %v3931_v45 }
 0xbea   :  { %6936 = vmatmul.mubr.msk.bf16.vlgmr.msra.gmra.mxu0 %vm3684_vm3, %v11839_v15  ;;  %v5175_v58 = vpop.permute.xlu1 %5174 }
 0xbeb   :  { %6940 = vmatpush3.bf16.msra.mxu1 %v5175_v58  ;;  %6947 = vmatprep.mubr.msk.bf16.mxu0 %vm8083_vm2, %v11765_v59  ;;  %v4045_v58 = vmul.f32 1.442695, %v3929_v35 }
 0xbec   :  { %6951 = vmatprep.subr.bf16.mxu1 %v11765_v59  ;;  %v8003_v21 = vpop.eup %8002 }
 0xbed   :  { %v10912_v10 = vmul.f32 %v8003_v21, %v10710_v40  ;;  %8012 = vpow2.f32 %v4045_v58  ;;  %v4051_v40 = vmul.f32 1.442695, %v3932_v23  ;;  %v7381_v21 = vunpack.i.l.bf16 %v10566_v22 }
 0xbee   :  { %6942 = vmatmul.mubr.msk.bf16.vlgmr.msra.gmra.mxu1 %vm3684_vm3, %v11844_v44  ;;  %8014 = vpow2.f32 %v4049_v7  ;;  %v10960_v4 = vpop.permute.xlu1 %7429 }
 0xbef   :  { %6953 = vmatprep.mubr.msk.bf16.mxu1 %vm8083_vm2, %v11765_v59  ;;  %8016 = vpow2.f32 %v4051_v40 }
 0xbf0   :  { %v8005_v48 = vpop.eup %8004 }
 0xbf1   :  { %v8007_v15 = vpop.eup %8006  ;;  %v10909_v52 = vmul.f32 %v8005_v48, %v10712_v50  ;;  %v10956_v48 = vpop.permute.xlu0 %7434 }
 0xbf2   :  { %v10921_v8 = vmul.f32 %v8007_v15, %v10716_v57 }
 0xbf3   :  { %v10916_v0 = vpop.f32.mrf.mxu0 }
 0xbf4   :  { %v8009_v44 = vpop.eup %8008 }
 0xbf5   :  { %v10924_v50 = vmul.f32 %v8009_v44, %v10722_v38  ;;  %v6901_v35 = vpop.f32.mrf.mxu0  ;;  %v10938_v7 = vpop.eup %8010  ;;  %v7386_v38 = vunpack.i.l.bf16 %v10597_v9 }
 0xbf6   :  { %v4228_v23 = vsel %vm3684_vm3, %v10938_v7, 0.0 }
 0xbf7   :  { %v10928_v13 = vpop.f32.mrf.mxu0  ;;  %v10930_v45 = vpop.f32.mrf.mxu1 }
 0xbf9   :  { %v6902_v39 = vpop.f32.mrf.mxu0  ;;  %v6907_v57 = vpop.f32.mrf.mxu1 }
 0xbfa   :  { %v10940_v62 = vpop.eup %8012 }
 0xbfb   :  { %v10934_v15 = vpop.f32.mrf.mxu1  ;;  %v10944_v44 = vpop.eup %8014  ;;  %v4225_v35 = vsel %vm3684_vm3, %v10940_v62, 0.0 }
 0xbfc   :  { %v4231_v40 = vsel %vm3684_vm3, %v10944_v44, 0.0  ;;  %v10950_v39 = vpop.eup %8016 }
 0xbfd   :  { %v6908_v58 = vpop.f32.mrf.mxu1  ;;  %v4234_v57 = vsel %vm3684_vm3, %v10950_v39, 0.0 }
 0xbfe   :  { %v7387_v58 = vunpack.i.h.bf16 %v10597_v9 }
 0xc00   :  { %v4442_v54 = vpack.c.bf16 %v7387_v58, %v7386_v38  ;;  %v4055_v58 = vmul.f32 1.442695, %v3934_v41  ;;  %v11858_v41 = vld [vmem:[#allocation50_spill] sm:$0xff] }
 0xc04   :  { %4229 = vadd.xlane.f32.xlu0 %v4228_v23  ;;  %v7382_v23 = vunpack.i.h.bf16 %v10566_v22  ;;  %v11851_v22 = vld [vmem:[#allocation82_spill] sm:$0xff] }
 0xc08   :  { %4226 = vadd.xlane.f32.xlu1 %v4225_v35  ;;  %4232 = vadd.xlane.f32.xlu0 %v4231_v40  ;;  %v4441_v35 = vpack.c.bf16 %v7382_v23, %v7381_v21  ;;  %v11852_v21 = vld [vmem:[#allocation52_spill] sm:$0xff]  ;;  %v11854_v23 = vld [vmem:[#allocation83_spill] sm:$0xff] }
 0xc09   :  { %v3933_v38 = vsub.f32 %v11852_v21, %v11851_v22 }
 0xc0b   :  { %v4053_v5 = vmul.f32 1.442695, %v3933_v38 }
 0xc0c   :  { %4235 = vadd.xlane.f32.xlu1 %v4234_v57 }
 0xc1b   :  { %v4206_v28 = vpop.xlane.xlu0 %4205 }
 0xc1c   :  { %8018 = vrcp.f32 %v4206_v28 }
 0xc1d   :  { %5462 = vrot.lane.b32.xlu1 %v4442_v54, %s8084_s1  ;;  %v11853_v54 = vpack.c.bf16 %v10768_v29, %v10765_v49 }
 0xc1e   :  { %5414 = vrot.lane.b32.xlu0 %v4441_v35, %s8084_s1  ;;  %v11855_v35 = vld [vmem:[#allocation36_spill] sm:$0xff] }
 0xc1f   :  { %v4209_v40 = vpop.xlane.xlu0 %4208  ;;  %v4203_v57 = vpop.xlane.xlu1 %4202 }
 0xc20   :  { %8020 = vrcp.f32 %v4203_v57  ;;  %v3936_v57 = vsub.f32 %v11858_v41, %v11857_v18 }
 0xc21   :  { %8022 = vrcp.f32 %v4209_v40  ;;  %v3935_v40 = vsub.f32 %v11855_v35, %v11854_v23 }
 0xc23   :  { %v5223_v9 = vpop.permute.xlu0 %5222  ;;  %v4212_v55 = vpop.xlane.xlu1 %4211  ;;  %v4057_v29 = vmul.f32 1.442695, %v3935_v40 }
 0xc24   :  { %8024 = vrcp.f32 %v4212_v55  ;;  %6946 = vmatpush3.bf16.msra.mxu0 %v5223_v9  ;;  %v11856_v55 = vpack.c.bf16 %v10778_v11, %v10775_v19  ;;  %v4059_v19 = vmul.f32 1.442695, %v3936_v57 }
 0xc25   :  { %6957 = vmatprep.subr.bf16.mxu0 %v11765_v59  ;;  %8026 = vpow2.f32 %v4055_v58 }
 0xc26   :  { %8028 = vpow2.f32 %v4053_v5 }
 0xc27   :  { %6948 = vmatmul.mubr.msk.bf16.vlgmr.msra.gmra.mxu0 %vm3684_vm3, %v11853_v54  ;;  %v5271_v28 = vpop.permute.xlu1 %5270  ;;  %8030 = vpow2.f32 %v4057_v29 }
 0xc28   :  { %6952 = vmatpush3.bf16.msra.mxu1 %v5271_v28  ;;  %6959 = vmatprep.mubr.msk.bf16.mxu0 %vm8083_vm2, %v11765_v59  ;;  %8032 = vpow2.f32 %v4059_v19 }
 0xc29   :  { %6963 = vmatprep.subr.bf16.mxu1 %v11765_v59  ;;  %v8019_v49 = vpop.eup %8018 }
 0xc2a   :  { %v10990_v38 = vmul.f32 %v8019_v49, %v10788_v12 }
 0xc2b   :  { %6954 = vmatmul.mubr.msk.bf16.vlgmr.msra.gmra.mxu1 %vm3684_vm3, %v11856_v55 }
 0xc2c   :  { %6965 = vmatprep.mubr.msk.bf16.mxu1 %vm8083_vm2, %v11765_v59 }
 0xc2d   :  { %v8021_v9 = vpop.eup %8020 }
 0xc2e   :  { %v8023_v22 = vpop.eup %8022  ;;  %v10987_v21 = vmul.f32 %v8021_v9, %v10790_v32 }
 0xc2f   :  { %v10997_v58 = vmul.f32 %v8023_v22, %v10794_v51 }
 0xc30   :  { %v10992_v11 = vpop.f32.mrf.mxu0 }
 0xc31   :  { %v8025_v54 = vpop.eup %8024 }
 0xc32   :  { %v11000_v23 = vmul.f32 %v8025_v54, %v10800_v46  ;;  %v6913_v35 = vpop.f32.mrf.mxu0  ;;  %v11012_v51 = vpop.eup %8026 }
 0xc33   :  { %v11016_v41 = vpop.eup %8028  ;;  %v4240_v57 = vsel %vm3684_vm3, %v11012_v51, 0.0 }
 0xc34   :  { %v11004_v32 = vpop.f32.mrf.mxu0  ;;  %v11006_v40 = vpop.f32.mrf.mxu1  ;;  %v4237_v22 = vsel %vm3684_vm3, %v11016_v41, 0.0 }
 0xc35   :  { %v11020_v9 = vpop.eup %8030 }
 0xc36   :  { %v6914_v55 = vpop.f32.mrf.mxu0  ;;  %v6919_v49 = vpop.f32.mrf.mxu1  ;;  %v4243_v19 = vsel %vm3684_vm3, %v11020_v9, 0.0 }
 0xc37   :  { %v11026_v54 = vpop.eup %8032  ;;  %v7397_v55 = vunpack.i.h.bf16 %v10654_v43  ;;  %v7396_v49 = vunpack.i.l.bf16 %v10654_v43  ;;  %v11859_v43 = vld [vmem:[#allocation31_spill] sm:$0xff] }
 0xc38   :  { %v11010_v29 = vpop.f32.mrf.mxu1  ;;  %v4246_v35 = vsel %vm3684_vm3, %v11026_v54, 0.0  ;;  %v3938_v14 = vsub.f32 %v11859_v43, %v10446_v30 }
 0xc39   :  { %v4444_v46 = vpack.c.bf16 %v7397_v55, %v7396_v49  ;;  %v11862_v49 = vld [vmem:[#allocation47_spill] sm:$0xff] }
 0xc3a   :  { %v6920_v18 = vpop.f32.mrf.mxu1 }
 0xc3b   :  { %v7392_v18 = vunpack.i.h.bf16 %v10647_v33 }
 0xc3d   :  { %4241 = vadd.xlane.f32.xlu0 %v4240_v57  ;;  %v7391_v57 = vunpack.i.l.bf16 %v10647_v33  ;;  %v11860_v33 = vld [vmem:[#allocation22_spill] sm:$0xff] }
 0xc3e   :  { %v3937_v55 = vsub.f32 %v11860_v33, %v10494_v56  ;;  %v11863_v56 = vpack.c.bf16 %v10852_v53, %v10849_v6 }
 0xc3f   :  { %v4443_v12 = vpack.c.bf16 %v7392_v18, %v7391_v57  ;;  %v3939_v18 = vsub.f32 %v11862_v49, %v10450_v47 }
 0xc40   :  { %v4061_v30 = vmul.f32 1.442695, %v3937_v55 }
 0xc41   :  { %4238 = vadd.xlane.f32.xlu1 %v4237_v22  ;;  %4244 = vadd.xlane.f32.xlu0 %v4243_v19 }
 0xc45   :  { %4247 = vadd.xlane.f32.xlu1 %v4246_v35 }
 0xc54   :  { %v4218_v5 = vpop.xlane.xlu0 %4217 }
 0xc55   :  { %8034 = vrcp.f32 %v4218_v5  ;;  %v4063_v5 = vmul.f32 1.442695, %v3938_v14  ;;  %v11864_v14 = vld [vmem:[#allocation49_spill] sm:$0xff] }
 0xc56   :  { %5558 = vrot.lane.b32.xlu1 %v4444_v46, %s8084_s1 }
 0xc57   :  { %5510 = vrot.lane.b32.xlu0 %v4443_v12, %s8084_s1  ;;  %v11861_v12 = vpack.c.bf16 %v10840_v26, %v10837_v25  ;;  %v4065_v25 = vmul.f32 1.442695, %v3939_v18  ;;  %v3940_v26 = vsub.f32 %v11864_v14, %v10454_v2 }
 0xc58   :  { %v4221_v22 = vpop.xlane.xlu0 %4220  ;;  %v4215_v19 = vpop.xlane.xlu1 %4214 }
 0xc59   :  { %8036 = vrcp.f32 %v4215_v19  ;;  %v4067_v6 = vmul.f32 1.442695, %v3940_v26 }
 0xc5a   :  { %8038 = vrcp.f32 %v4221_v22 }
 0xc5c   :  { %v4224_v35 = vpop.xlane.xlu1 %4223  ;;  %v5319_v28 = vpop.permute.xlu0 %5318 }
 0xc5d   :  { %8040 = vrcp.f32 %v4224_v35  ;;  %6958 = vmatpush3.bf16.msra.mxu0 %v5319_v28 }
 0xc5e   :  { %6969 = vmatprep.subr.bf16.mxu0 %v11765_v59  ;;  %8042 = vpow2.f32 %v4063_v5 }
 0xc5f   :  { %8044 = vpow2.f32 %v4061_v30 }
 0xc60   :  { %v5367_v46 = vpop.permute.xlu1 %5366  ;;  %6960 = vmatmul.mubr.msk.bf16.vlgmr.msra.gmra.mxu0 %vm3684_vm3, %v11861_v12  ;;  %8046 = vpow2.f32 %v4065_v25 }
 0xc61   :  { %6964 = vmatpush3.bf16.msra.mxu1 %v5367_v46  ;;  %6971 = vmatprep.mubr.msk.bf16.mxu0 %vm8083_vm2, %v11765_v59  ;;  %8048 = vpow2.f32 %v4067_v6  ;;  %v7407_v6 = vunpack.i.h.bf16 %v10730_v42 }
 0xc62   :  { %6975 = vmatprep.subr.bf16.mxu1 %v11765_v59  ;;  %v8035_v28 = vpop.eup %8034 }
 0xc63   :  { %v11059_v22 = vmul.f32 %v8035_v28, %v10862_v27 }
 0xc64   :  { %6966 = vmatmul.mubr.msk.bf16.vlgmr.msra.gmra.mxu1 %vm3684_vm3, %v11863_v56 }
 0xc65   :  { %6977 = vmatprep.mubr.msk.bf16.mxu1 %vm8083_vm2, %v11765_v59 }
 0xc66   :  { %v8037_v47 = vpop.eup %8036 }
 0xc67   :  { %v8039_v57 = vpop.eup %8038  ;;  %v11062_v19 = vmul.f32 %v8037_v47, %v10864_v17 }
 0xc68   :  { %v11067_v2 = vmul.f32 %v8039_v57, %v10868_v31  ;;  %v7416_v31 = vunpack.i.l.bf16 %v10808_v61 }
 0xc69   :  { %v4413_v35 = vpack.c.bf16 %v11059_v22, %v11062_v19 }
 0xc6a   :  { %v8041_v53 = vpop.eup %8040 }
 0xc6b   :  { %v11070_v43 = vmul.f32 %v8041_v53, %v10874_v36  ;;  %v11080_v12 = vpop.eup %8042  ;;  %v7406_v53 = vunpack.i.l.bf16 %v10730_v42 }
 0xc6c   :  { %v11084_v36 = vpop.eup %8044  ;;  %v4252_v30 = vsel %vm3684_vm3, %v11080_v12, 0.0 }
 0xc6d   :  { %v11074_v33 = vpop.f32.mrf.mxu0  ;;  %v11090_v56 = vpop.eup %8046  ;;  %v4249_v14 = vsel %vm3684_vm3, %v11084_v36, 0.0 }
 0xc6e   :  { %v4255_v26 = vsel %vm3684_vm3, %v11090_v56, 0.0  ;;  %v11098_v47 = vpop.eup %8048 }
 0xc6f   :  { %v6925_v17 = vpop.f32.mrf.mxu0  ;;  %v4258_v57 = vsel %vm3684_vm3, %v11098_v47, 0.0 }
 0xc70   :  { %v7402_v17 = vunpack.i.h.bf16 %v10732_v16 }
 0xc71   :  { %v11076_v55 = vpop.f32.mrf.mxu0  ;;  %v11078_v46 = vpop.f32.mrf.mxu1 }
 0xc73   :  { %v6926_v5 = vpop.f32.mrf.mxu0  ;;  %v6931_v49 = vpop.f32.mrf.mxu1 }
 0xc74   :  { %v7401_v5 = vunpack.i.l.bf16 %v10732_v16  ;;  %v4446_v49 = vpack.c.bf16 %v7407_v6, %v7406_v53  ;;  %v7421_v16 = vunpack.i.l.bf16 %v10882_v37 }
 0xc75   :  { %v11086_v18 = vpop.f32.mrf.mxu1 }
 0xc76   :  { %4253 = vadd.xlane.f32.xlu0 %v4252_v30  ;;  %v7412_v30 = vunpack.i.h.bf16 %v10810_v34 }
 0xc77   :  { %v6932_v25 = vpop.f32.mrf.mxu1 }
 0xc78   :  { %v7411_v25 = vunpack.i.l.bf16 %v10810_v34  ;;  %v7427_v34 = vunpack.i.h.bf16 %v10878_v60 }
 0xc7a   :  { %4250 = vadd.xlane.f32.xlu1 %v4249_v14  ;;  %4256 = vadd.xlane.f32.xlu0 %v4255_v26  ;;  %v4445_v14 = vpack.c.bf16 %v7402_v17, %v7401_v5  ;;  %v7417_v26 = vunpack.i.h.bf16 %v10808_v61  ;;  %v4447_v42 = vpack.c.bf16 %v7412_v30, %v7411_v25  ;;  %v7426_v17 = vunpack.i.l.bf16 %v10878_v60 }
 0xc7b   :  { %v7431_v5 = vunpack.i.l.bf16 %v10960_v4  ;;  %v7436_v25 = vunpack.i.l.bf16 %v10956_v48 }
 0xc7c   :  { %v4448_v27 = vpack.c.bf16 %v7417_v26, %v7416_v31  ;;  %v4450_v30 = vpack.c.bf16 %v7427_v34, %v7426_v17  ;;  %v7437_v31 = vunpack.i.h.bf16 %v10956_v48  ;;  %v11866_v26 = vpack.c.bf16 %v10924_v50, %v10921_v8 }
 0xc7d   :  { %v11868_v8 = vpack.i.bf16 %v10934_v15, %v10930_v45 }
 0xc7e   :  { %4259 = vadd.xlane.f32.xlu1 %v4258_v57  ;;  %v7422_v57 = vunpack.i.h.bf16 %v10882_v37 }
 0xc80   :  { %v4449_v61 = vpack.c.bf16 %v7422_v57, %v7421_v16 }
 0xc8d   :  { %v4230_v28 = vpop.xlane.xlu0 %4229 }
 0xc8e   :  { %8050 = vrcp.f32 %v4230_v28  ;;  %v7432_v28 = vunpack.i.h.bf16 %v10960_v4  ;;  %v11865_v4 = vpack.c.bf16 %v10912_v10, %v10909_v52  ;;  %v11867_v10 = vpack.i.bf16 %v10928_v13, %v10916_v0 }
 0xc8f   :  { %5654 = vrot.lane.b32.xlu1 %v4446_v49, %s8084_s1 }
 0xc90   :  { %5606 = vrot.lane.b32.xlu0 %v4445_v14, %s8084_s1  ;;  %v4451_v60 = vpack.c.bf16 %v7432_v28, %v7431_v5  ;;  %v4452_v14 = vpack.c.bf16 %v7437_v31, %v7436_v25 }
 0xc91   :  { %v4227_v6 = vpop.xlane.xlu1 %4226  ;;  %v4233_v53 = vpop.xlane.xlu0 %4232 }
 0xc92   :  { %8052 = vrcp.f32 %v4227_v6 }
 0xc93   :  { %5702 = vrot.lane.b32.xlu1 %v4447_v42, %s8084_s1  ;;  %8054 = vrcp.f32 %v4233_v53 }
 0xc94   :  { %5750 = vrot.lane.b32.xlu0 %v4448_v27, %s8084_s1 }
 0xc95   :  { %v4236_v49 = vpop.xlane.xlu1 %4235  ;;  %v5415_v37 = vpop.permute.xlu0 %5414 }
 0xc96   :  { %8056 = vrcp.f32 %v4236_v49  ;;  %6970 = vmatpush3.bf16.msra.mxu0 %v5415_v37 }
 0xc97   :  { %5798 = vrot.lane.b32.xlu1 %v4449_v61, %s8084_s1  ;;  %6981 = vmatprep.subr.bf16.mxu0 %v11765_v59 }
 0xc98   :  { %5846 = vrot.lane.b32.xlu0 %v4450_v30, %s8084_s1 }
 0xc99   :  { %v5463_v27 = vpop.permute.xlu1 %5462  ;;  %6972 = vmatmul.mubr.msk.bf16.vlgmr.msra.gmra.mxu0 %vm3684_vm3, %v11865_v4 }
 0xc9a   :  { %6976 = vmatpush3.bf16.msra.mxu1 %v5463_v27  ;;  %6983 = vmatprep.mubr.msk.bf16.mxu0 %vm8083_vm2, %v11765_v59  ;;  %v11870_v27 = vpack.c.bf16 %v11000_v23, %v10997_v58 }
 0xc9b   :  { %5894 = vrot.lane.b32.xlu1 %v4451_v60, %s8084_s1  ;;  %6987 = vmatprep.subr.bf16.mxu1 %v11765_v59  ;;  %v8051_v48 = vpop.eup %8050  ;;  %v11869_v60 = vpack.c.bf16 %v10990_v38, %v10987_v21 }
 0xc9c   :  { %5942 = vrot.lane.b32.xlu0 %v4452_v14, %s8084_s1  ;;  %v11145_v42 = vmul.f32 %v8051_v48, %v10938_v7 }
 0xc9d   :  { %6978 = vmatmul.mubr.msk.bf16.vlgmr.msra.gmra.mxu1 %vm3684_vm3, %v11866_v26 }
 0xc9e   :  { %6989 = vmatprep.mubr.msk.bf16.mxu1 %vm8083_vm2, %v11765_v59 }
 0xc9f   :  { %v8053_v52 = vpop.eup %8052  ;;  %7439 = vrot.lane.b32.xlu1 %v11867_v10, %s8085_s0 }
 0xca0   :  { %v11148_v57 = vmul.f32 %v8053_v52, %v10940_v62  ;;  %7444 = vrot.lane.b32.xlu0 %v11868_v8, %s8085_s0  ;;  %v8055_v50 = vpop.eup %8054 }
 0xca1   :  { %v11157_v53 = vmul.f32 %v8055_v50, %v10944_v44 }
 0xca2   :  { %v4415_v16 = vpack.c.bf16 %v11145_v42, %v11148_v57 }
 0xca3   :  { %v8057_v6 = vpop.eup %8056 }
 0xca4   :  { %v11160_v0 = vmul.f32 %v8057_v6, %v10950_v39 }
 0xca6   :  { %v4416_v13 = vpack.c.bf16 %v11160_v0, %v11157_v53 }
 0xcaa   :  { %v11164_v7 = vpop.f32.mrf.mxu0 }
 0xcac   :  { %v6937_v62 = vpop.f32.mrf.mxu0 }
 0xcae   :  { %v11166_v34 = vpop.f32.mrf.mxu0  ;;  %v11168_v45 = vpop.f32.mrf.mxu1 }
 0xcaf   :  { %v7528_v15 = vpack.i.bf16 %v11166_v34, %v11164_v7 }
 0xcb0   :  { %v6938_v17 = vpop.f32.mrf.mxu0  ;;  %v6943_v61 = vpop.f32.mrf.mxu1 }
 0xcb2   :  { %v11172_v44 = vpop.f32.mrf.mxu1 }
 0xcb3   :  { %v7533_v39 = vpack.i.bf16 %v11172_v44, %v11168_v45 }
 0xcb4   :  { %v6944_v28 = vpop.f32.mrf.mxu1 }
 0xcc6   :  { %v4242_v5 = vpop.xlane.xlu0 %4241 }
 0xcca   :  { %v4239_v49 = vpop.xlane.xlu1 %4238  ;;  %v4245_v37 = vpop.xlane.xlu0 %4244 }
 0xccb   :  { %8058 = vrcp.f32 %v4239_v49 }
 0xccc   :  { %8060 = vrcp.f32 %v4242_v5  ;;  %v11871_v5 = vpack.c.bf16 %v11070_v43, %v11067_v2 }
 0xcce   :  { %v4248_v30 = vpop.xlane.xlu1 %4247  ;;  %v5511_v31 = vpop.permute.xlu0 %5510 }
 0xccf   :  { %6982 = vmatpush3.bf16.msra.mxu0 %v5511_v31  ;;  %8062 = vrcp.f32 %v4248_v30 }
 0xcd0   :  { %6993 = vmatprep.subr.bf16.mxu0 %v11765_v59  ;;  %8064 = vrcp.f32 %v4245_v37 }
 0xcd2   :  { %v5559_v25 = vpop.permute.xlu1 %5558  ;;  %6984 = vmatmul.mubr.msk.bf16.vlgmr.msra.gmra.mxu0 %vm3684_vm3, %v11869_v60 }
 0xcd3   :  { %6988 = vmatpush3.bf16.msra.mxu1 %v5559_v25  ;;  %6995 = vmatprep.mubr.msk.bf16.mxu0 %vm8083_vm2, %v11765_v59 }
 0xcd4   :  { %6999 = vmatprep.subr.bf16.mxu1 %v11765_v59 }
 0xcd6   :  { %6990 = vmatmul.mubr.msk.bf16.vlgmr.msra.gmra.mxu1 %vm3684_vm3, %v11870_v27 }
 0xcd7   :  { %7001 = vmatprep.mubr.msk.bf16.mxu1 %vm8083_vm2, %v11765_v59 }
 0xcd8   :  { %v8059_v22 = vpop.eup %8058 }
 0xcd9   :  { %v4381_v2 = vmul.f32 %v8059_v22, %v11016_v41 }
 0xce7   :  { %v5262_v4 = vpop.f32.mrf.mxu0 }
 0xce9   :  { %v6949_v14 = vpop.f32.mrf.mxu0 }
 0xceb   :  { %v5265_v48 = vpop.f32.mrf.mxu0  ;;  %v5310_v21 = vpop.f32.mrf.mxu1 }
 0xcec   :  { %v7448_v38 = vpack.i.bf16 %v5265_v48, %v5262_v4 }
 0xced   :  { %v6950_v26 = vpop.f32.mrf.mxu0  ;;  %v6955_v52 = vpop.f32.mrf.mxu1 }
 0xcee   :  { %7449 = vrot.lane.b32.xlu1 %v7448_v38, %s8086_s4 }
 0xcef   :  { %v5313_v10 = vpop.f32.mrf.mxu1 }
 0xcf0   :  { %v7453_v8 = vpack.i.bf16 %v5313_v10, %v5310_v21 }
 0xcf1   :  { %v6956_v50 = vpop.f32.mrf.mxu1 }
 0xcf2   :  { %7454 = vrot.lane.b32.xlu0 %v7453_v8, %s8086_s4 }
 0xcff   :  { %v4254_v58 = vpop.xlane.xlu0 %4253 }
 0xd03   :  { %v4251_v23 = vpop.xlane.xlu1 %4250  ;;  %v4257_v6 = vpop.xlane.xlu0 %4256 }
 0xd04   :  { %8066 = vrcp.f32 %v4251_v23 }
 0xd05   :  { %8068 = vrcp.f32 %v4254_v58 }
 0xd07   :  { %v4260_v62 = vpop.xlane.xlu1 %4259  ;;  %v5607_v17 = vpop.permute.xlu0 %5606 }
 0xd08   :  { %6994 = vmatpush3.bf16.msra.mxu0 %v5607_v17  ;;  %8070 = vrcp.f32 %v4260_v62 }
 0xd09   :  { %7005 = vmatprep.subr.bf16.mxu0 %v11765_v59  ;;  %8072 = vrcp.f32 %v4257_v6 }
 0xd0b   :  { %v5655_v61 = vpop.permute.xlu1 %5654  ;;  %6996 = vmatmul.mubr.msk.bf16.vlgmr.msra.gmra.mxu0 %vm3684_vm3, %v4413_v35  ;;  %v5751_v28 = vpop.permute.xlu0 %5750 }
 0xd0c   :  { %7000 = vmatpush3.bf16.msra.mxu1 %v5655_v61  ;;  %7007 = vmatprep.mubr.msk.bf16.mxu0 %vm8083_vm2, %v11765_v59  ;;  %v8061_v35 = vpop.eup %8060 }
 0xd0d   :  { %7011 = vmatprep.subr.bf16.mxu1 %v11765_v59  ;;  %v8063_v43 = vpop.eup %8062  ;;  %v4382_v37 = vmul.f32 %v8061_v35, %v11012_v51 }
 0xd0e   :  { %v8065_v42 = vpop.eup %8064 }
 0xd0f   :  { %7002 = vmatmul.mubr.msk.bf16.vlgmr.msra.gmra.mxu1 %vm3684_vm3, %v11871_v5  ;;  %v5703_v49 = vpop.permute.xlu1 %5702  ;;  %v5847_v30 = vpop.permute.xlu0 %5846  ;;  %v4417_v57 = vpack.c.bf16 %v4382_v37, %v4381_v2  ;;  %v4383_v31 = vmul.f32 %v8065_v42, %v11020_v9 }
 0xd10   :  { %7006 = vmatpush3.bf16.msra.mxu0 %v5703_v49  ;;  %7012 = vmatpush3.bf16.msra.mxu1 %v5751_v28 }
 0xd11   :  { %7017 = vmatprep.subr.bf16.mxu0 %v11765_v59  ;;  %7013 = vmatprep.mubr.msk.bf16.mxu1 %vm8083_vm2, %v11765_v59  ;;  %v8067_v41 = vpop.eup %8066 }
 0xd12   :  { %7023 = vmatprep.subr.bf16.mxu1 %v11765_v59  ;;  %v8069_v25 = vpop.eup %8068  ;;  %v4385_v0 = vmul.f32 %v8067_v41, %v11084_v36 }
 0xd13   :  { %v5799_v19 = vpop.permute.xlu1 %5798  ;;  %7008 = vmatmul.mubr.msk.bf16.vlgmr.msra.gmra.mxu0 %vm3684_vm3, %v4415_v16  ;;  %v4384_v16 = vmul.f32 %v8063_v43, %v11026_v54  ;;  %v4386_v60 = vmul.f32 %v8069_v25, %v11080_v12  ;;  %v5943_v54 = vpop.permute.xlu0 %5942 }
 0xd14   :  { %7018 = vmatpush3.bf16.msra.mxu0 %v5799_v19  ;;  %7019 = vmatprep.mubr.msk.bf16.mxu0 %vm8083_vm2, %v11765_v59 }
 0xd15   :  { %7029 = vmatprep.subr.bf16.mxu0 %v11765_v59  ;;  %v4418_v53 = vpack.c.bf16 %v4384_v16, %v4383_v31  ;;  %v4419_v4 = vpack.c.bf16 %v4386_v60, %v4385_v0  ;;  %v7560_v16 = vld [vmem:[%s11468_s5 + $0x8] sm:$0xff]   ;;  %v7561_v31 = vld [vmem:[%s11468_s5] sm:$0xff]  }
 0xd17   :  { %7014 = vmatmul.mubr.msk.bf16.vlgmr.msra.gmra.mxu1 %vm3684_vm3, %v4416_v13  ;;  %v5895_v51 = vpop.permute.xlu1 %5894  ;;  %v8071_v13 = vpop.eup %8070 }
 0xd18   :  { %7024 = vmatpush3.bf16.msra.mxu1 %v5847_v30  ;;  %7025 = vmatprep.mubr.msk.bf16.mxu1 %vm8083_vm2, %v11765_v59  ;;  %v8073_v27 = vpop.eup %8072  ;;  %v4388_v14 = vmul.f32 %v8071_v13, %v11098_v47 }
 0xd19   :  { %7035 = vmatprep.subr.bf16.mxu1 %v11765_v59  ;;  %v4387_v21 = vmul.f32 %v8073_v27, %v11090_v56 }
 0xd1b   :  { %7020 = vmatmul.mubr.msk.bf16.vlgmr.msra.gmra.mxu0 %vm3684_vm3, %v4417_v57  ;;  %v4420_v38 = vpack.c.bf16 %v4388_v14, %v4387_v21  ;;  %v7440_v34 = vpop.permute.xlu1 %7439 }
 0xd1c   :  { %7030 = vmatpush3.bf16.msra.mxu0 %v5895_v51  ;;  %7031 = vmatprep.mubr.msk.bf16.mxu0 %vm8083_vm2, %v11765_v59  ;;  %v7442_v44 = vunpack.i.h.bf16 %v7440_v34 }
 0xd1d   :  { %7041 = vmatprep.subr.bf16.mxu0 %v7560_v16 }
 0xd1f   :  { %7026 = vmatmul.mubr.msk.bf16.vlgmr.msra.gmra.mxu1 %vm3684_vm3, %v4418_v53 }
 0xd20   :  { %7036 = vmatpush3.bf16.msra.mxu1 %v5943_v54  ;;  %v11232_v9 = vpop.f32.mrf.mxu0  ;;  %7037 = vmatprep.mubr.msk.bf16.mxu1 %vm8083_vm2, %v11765_v59 }
 0xd22   :  { %v6961_v48 = vpop.f32.mrf.mxu0 }
 0xd23   :  { %7032 = vmatmul.mubr.msk.bf16.vlgmr.msra.gmra.mxu0 %vm3684_vm3, %v4419_v4  ;;  %v11872_v48 = vpack.i.bf16 %v11004_v32, %v10992_v11 }
 0xd24   :  { %v5361_v36 = vpop.f32.mrf.mxu0  ;;  %v11239_v12 = vpop.f32.mrf.mxu1  ;;  %7042 = vmatpush3.bf16.msra.mxu0 %v7560_v16 }
 0xd25   :  { %v7478_v26 = vpack.i.bf16 %v5361_v36, %v11232_v9  ;;  %7043 = vmatprep.subr.bf16.mxu0 %v7561_v31 }
 0xd26   :  { %v6962_v52 = vpop.f32.mrf.mxu0  ;;  %v6967_v10 = vpop.f32.mrf.mxu1 }
 0xd27   :  { %7038 = vmatmul.mubr.msk.bf16.vlgmr.msra.gmra.mxu1 %vm3684_vm3, %v4420_v38  ;;  %v11873_v52 = vpack.i.bf16 %v11010_v29, %v11006_v40  ;;  %v11874_v40 = vpack.i.bf16 %v11076_v55, %v11074_v33 }
 0xd28   :  { %v5409_v8 = vpop.f32.mrf.mxu1  ;;  %7044 = vmatpush3.bf16.msra.mxu0 %v7561_v31 }
 0xd29   :  { %v7483_v59 = vpack.i.bf16 %v5409_v8, %v11239_v12 }
 0xd2a   :  { %v6968_v50 = vpop.f32.mrf.mxu1 }
 0xd59   :  { %v11244_v47 = vpop.f32.mrf.mxu0 }
 0xd5b   :  { %v6973_v58 = vpop.f32.mrf.mxu0 }
 0xd5d   :  { %v11246_v56 = vpop.f32.mrf.mxu0  ;;  %v11248_v23 = vpop.f32.mrf.mxu1 }
 0xd5e   :  { %v7508_v6 = vpack.i.bf16 %v11246_v56, %v11244_v47 }
 0xd5f   :  { %v6974_v62 = vpop.f32.mrf.mxu0  ;;  %v6979_v17 = vpop.f32.mrf.mxu1 }
 0xd60   :  { %v7450_v45 = vpop.permute.xlu1 %7449 }
 0xd61   :  { %v11252_v61 = vpop.f32.mrf.mxu1  ;;  %v7452_v56 = vunpack.i.h.bf16 %v7450_v45 }
 0xd62   :  { %v7513_v28 = vpack.i.bf16 %v11252_v61, %v11248_v23  ;;  %v7451_v23 = vunpack.i.l.bf16 %v7450_v45 }
 0xd63   :  { %v6980_v5 = vpop.f32.mrf.mxu1 }
 0xd92   :  { %v11256_v49 = vpop.f32.mrf.mxu0 }
 0xd94   :  { %v6985_v22 = vpop.f32.mrf.mxu0 }
 0xd96   :  { %v11258_v19 = vpop.f32.mrf.mxu0  ;;  %v11260_v35 = vpop.f32.mrf.mxu1 }
 0xd97   :  { %v7538_v2 = vpack.i.bf16 %v11258_v19, %v11256_v49  ;;  %v11876_v19 = vld [vmem:[#allocation35_spill] sm:$0xff] }
 0xd98   :  { %v6986_v43 = vpop.f32.mrf.mxu0  ;;  %v6991_v37 = vpop.f32.mrf.mxu1 }
 0xd9a   :  { %v11264_v30 = vpop.f32.mrf.mxu1 }
 0xd9b   :  { %v7543_v42 = vpack.i.bf16 %v11264_v30, %v11260_v35  ;;  %v6182_v35 = vsel %vm213_vm1, %v11876_v19, %v7442_v44 }
 0xd9c   :  { %v6992_v57 = vpop.f32.mrf.mxu1 }
 0xdcb   :  { %v5646_v41 = vpop.f32.mrf.mxu0 }
 0xdcd   :  { %v6997_v51 = vpop.f32.mrf.mxu0 }
 0xdcf   :  { %v5649_v25 = vpop.f32.mrf.mxu0  ;;  %v5694_v53 = vpop.f32.mrf.mxu1 }
 0xdd0   :  { %v7458_v0 = vpack.i.bf16 %v5649_v25, %v5646_v41  ;;  %v6198_v25 = vsel %vm3684_vm3, %v6182_v35, %v7452_v56 }
 0xdd1   :  { %v6998_v13 = vpop.f32.mrf.mxu0  ;;  %v7003_v60 = vpop.f32.mrf.mxu1 }
 0xdd2   :  { %7459 = vrot.lane.b32.xlu1 %v7458_v0, %s8087_s18 }
 0xdd3   :  { %v5697_v54 = vpop.f32.mrf.mxu1  ;;  %v5742_v27 = vpop.f32.mrf.mxu0 }
 0xdd4   :  { %v7463_v9 = vpack.i.bf16 %v5697_v54, %v5694_v53 }
 0xdd5   :  { %v7004_v4 = vpop.f32.mrf.mxu1  ;;  %v7009_v14 = vpop.f32.mrf.mxu0 }
 0xdd6   :  { %7464 = vrot.lane.b32.xlu0 %v7463_v9, %s8087_s18  ;;  %7469 = vrot.lane.b32.xlu1 %v11872_v48, %s8085_s0  ;;  %v11878_v14 = vld [vmem:[#allocation21_spill] sm:$0xff] }
 0xdd7   :  { %v5745_v21 = vpop.f32.mrf.mxu0  ;;  %v5790_v36 = vpop.f32.mrf.mxu1 }
 0xdd8   :  { %v7488_v50 = vpack.i.bf16 %v5745_v21, %v5742_v27  ;;  %v11879_v21 = vld [vmem:[#allocation45_spill] sm:$0xff] }
 0xdd9   :  { %v7010_v12 = vpop.f32.mrf.mxu0  ;;  %v7015_v38 = vpop.f32.mrf.mxu1 }
 0xdda   :  { %7474 = vrot.lane.b32.xlu0 %v11873_v52, %s8085_s0  ;;  %7479 = vrot.lane.b32.xlu1 %v7478_v26, %s8086_s4 }
 0xddb   :  { %v5793_v10 = vpop.f32.mrf.mxu1  ;;  %v5838_v8 = vpop.f32.mrf.mxu0 }
 0xddc   :  { %v7493_v17 = vpack.i.bf16 %v5793_v10, %v5790_v36 }
 0xddd   :  { %v7016_v58 = vpop.f32.mrf.mxu1  ;;  %v7021_v62 = vpop.f32.mrf.mxu0 }
 0xdde   :  { %7484 = vrot.lane.b32.xlu0 %v7483_v59, %s8086_s4  ;;  %7489 = vrot.lane.b32.xlu1 %v7488_v50, %s8087_s18  ;;  %v11875_v59 = vpack.i.bf16 %v11086_v18, %v11078_v46 }
 0xddf   :  { %v5841_v11 = vpop.f32.mrf.mxu0  ;;  %v5886_v32 = vpop.f32.mrf.mxu1 }
 0xde0   :  { %v7518_v41 = vpack.i.bf16 %v5841_v11, %v5838_v8 }
 0xde1   :  { %v7022_v5 = vpop.f32.mrf.mxu0  ;;  %v7027_v22 = vpop.f32.mrf.mxu1 }
 0xde2   :  { %7494 = vrot.lane.b32.xlu0 %v7493_v17, %s8087_s18  ;;  %7499 = vrot.lane.b32.xlu1 %v11874_v40, %s8085_s0 }
 0xde3   :  { %v5889_v29 = vpop.f32.mrf.mxu1  ;;  %v5934_v26 = vpop.f32.mrf.mxu0 }
 0xde4   :  { %v7523_v46 = vpack.i.bf16 %v5889_v29, %v5886_v32 }
 0xde5   :  { %v7028_v43 = vpop.f32.mrf.mxu1  ;;  %v7033_v37 = vpop.f32.mrf.mxu0 }
 0xde6   :  { %7504 = vrot.lane.b32.xlu0 %v11875_v59, %s8085_s0  ;;  %7509 = vrot.lane.b32.xlu1 %v7508_v6, %s8086_s4 }
 0xde7   :  { %v5937_v57 = vpop.f32.mrf.mxu0  ;;  %v5982_v16 = vpop.f32.mrf.mxu1 }
 0xde8   :  { %v7548_v47 = vpack.i.bf16 %v5937_v57, %v5934_v26 }
 0xde9   :  { %v7034_v31 = vpop.f32.mrf.mxu0  ;;  %v7039_v33 = vpop.f32.mrf.mxu1 }
 0xdea   :  { %7514 = vrot.lane.b32.xlu0 %v7513_v28, %s8086_s4  ;;  %7519 = vrot.lane.b32.xlu1 %v7518_v41, %s8087_s18 }
 0xdeb   :  { %v5985_v55 = vpop.f32.mrf.mxu1 }
 0xdec   :  { %v7553_v7 = vpack.i.bf16 %v5985_v55, %v5982_v16 }
 0xded   :  { %v7040_v18 = vpop.f32.mrf.mxu1 }
 0xdee   :  { %7524 = vrot.lane.b32.xlu0 %v7523_v46, %s8087_s18  ;;  %7529 = vrot.lane.b32.xlu1 %v7528_v15, %s8085_s0  ;;  %v7445_v15 = vpop.permute.xlu0 %7444 }
 0xdef   :  { %v7447_v61 = vunpack.i.h.bf16 %v7445_v15  ;;  %v7446_v28 = vunpack.i.l.bf16 %v7445_v15  ;;  %v11881_v15 = vld [vmem:[#allocation9_spill] sm:$0xff] }
 0xdf1   :  { %v6184_v48 = vsel %vm213_vm1, %v11878_v14, %v7447_v61  ;;  %v6183_v36 = vsel %vm213_vm1, %v11879_v21, %v7446_v28 }
 0xdf2   :  { %7534 = vrot.lane.b32.xlu0 %v7533_v39, %s8085_s0  ;;  %7539 = vrot.lane.b32.xlu1 %v7538_v2, %s8086_s4  ;;  %v7441_v39 = vunpack.i.l.bf16 %v7440_v34  ;;  %v7455_v6 = vpop.permute.xlu0 %7454  ;;  %v11877_v2 = vld [vmem:[#allocation43_spill] sm:$0xff] }
 0xdf3   :  { %v7457_v0 = vunpack.i.h.bf16 %v7455_v6  ;;  %v7456_v13 = vunpack.i.l.bf16 %v7455_v6 }
 0xdf4   :  { %v6181_v30 = vsel %vm213_vm1, %v11877_v2, %v7441_v39 }
 0xdf5   :  { %v6197_v53 = vsel %vm3684_vm3, %v6181_v30, %v7451_v23  ;;  %v6199_v52 = vsel %vm3684_vm3, %v6183_v36, %v7456_v13  ;;  %v6200_v10 = vsel %vm3684_vm3, %v6184_v48, %v7457_v0 }
 0xdf6   :  { %7544 = vrot.lane.b32.xlu0 %v7543_v42, %s8086_s4  ;;  %7549 = vrot.lane.b32.xlu1 %v7548_v47, %s8087_s18 }
 0xdfa   :  { %7554 = vrot.lane.b32.xlu0 %v7553_v7, %s8087_s18 }
 0xe44   :  { %v7460_v49 = vpop.permute.xlu1 %7459 }
 0xe45   :  { %v7462_v42 = vunpack.i.h.bf16 %v7460_v49  ;;  %v7461_v51 = vunpack.i.l.bf16 %v7460_v49 }
 0xe47   :  { %v6215_v60 = vsel %vm6213_vm4, %v6198_v25, %v7462_v42  ;;  %v6214_v54 = vsel %vm6213_vm4, %v6197_v53, %v7461_v51 }
 0xe48   :  { %v6230_v27 = vpack.c.bf16 %v6215_v60, %v6214_v54  ;;  %v7465_v9 = vpop.permute.xlu0 %7464  ;;  %v7470_v4 = vpop.permute.xlu1 %7469 }
 0xe49   :  { %v7467_v12 = vunpack.i.h.bf16 %v7465_v9  ;;  %v7466_v38 = vunpack.i.l.bf16 %v7465_v9  ;;  %v7472_v62 = vunpack.i.h.bf16 %v7470_v4  ;;  %v7471_v11 = vunpack.i.l.bf16 %v7470_v4 }
 0xe4a   :  { %7045 = vmatprep.mubr.msk.bf16.mxu0 %vm74_vm0, %v6230_v27 }
 0xe4b   :  { %v6216_v8 = vsel %vm6213_vm4, %v6199_v52, %v7466_v38  ;;  %v6217_v50 = vsel %vm6213_vm4, %v6200_v10, %v7467_v12  ;;  %v6186_v40 = vsel %vm213_vm1, %v10704_v1, %v7472_v62  ;;  %v6185_v29 = vsel %vm213_vm1, %v10702_v20, %v7471_v11  ;;  %v11880_v20 = vld [vmem:[#allocation5_spill] sm:$0xff]  ;;  %v11882_v52 = vld [vmem:[#allocation19_spill] sm:$0xff] }
 0xe4c   :  { %v6231_v58 = vpack.c.bf16 %v6217_v50, %v6216_v8  ;;  %v7475_v32 = vpop.permute.xlu0 %7474  ;;  %v7480_v17 = vpop.permute.xlu1 %7479 }
 0xe4d   :  { %v7482_v5 = vunpack.i.h.bf16 %v7480_v17  ;;  %v7481_v22 = vunpack.i.l.bf16 %v7480_v17  ;;  %v7477_v37 = vunpack.i.h.bf16 %v7475_v32  ;;  %v7476_v59 = vunpack.i.l.bf16 %v7475_v32 }
 0xe4e   :  { %7046 = vmatmul.mubr.msk.bf16.vlgmr.msra.gmra.mxu0 %vm74_vm0, %v6231_v58 }
 0xe4f   :  { %v6201_v41 = vsel %vm3684_vm3, %v6185_v29, %v7481_v22  ;;  %v6202_v31 = vsel %vm3684_vm3, %v6186_v40, %v7482_v5  ;;  %v6188_v34 = vsel %vm213_vm1, %v11880_v20, %v7477_v37  ;;  %v6187_v45 = vsel %vm213_vm1, %v11881_v15, %v7476_v59  ;;  %v11884_v59 = vld [vmem:[#allocation6_spill] sm:$0xff] }
 0xe50   :  { %v7485_v26 = vpop.permute.xlu0 %7484  ;;  %v7490_v43 = vpop.permute.xlu1 %7489 }
 0xe51   :  { %v7492_v57 = vunpack.i.h.bf16 %v7490_v43  ;;  %v7491_v16 = vunpack.i.l.bf16 %v7490_v43  ;;  %v7487_v33 = vunpack.i.h.bf16 %v7485_v26  ;;  %v7486_v55 = vunpack.i.l.bf16 %v7485_v26  ;;  %v11883_v43 = vld [vmem:[#allocation24_spill] sm:$0xff] }
 0xe53   :  { %v6219_v46 = vsel %vm6213_vm4, %v6202_v31, %v7492_v57  ;;  %v6218_v18 = vsel %vm6213_vm4, %v6201_v41, %v7491_v16  ;;  %v6203_v56 = vsel %vm3684_vm3, %v6187_v45, %v7486_v55  ;;  %v6204_v23 = vsel %vm3684_vm3, %v6188_v34, %v7487_v33 }
 0xe54   :  { %v6232_v1 = vpack.c.bf16 %v6219_v46, %v6218_v18  ;;  %v7495_v47 = vpop.permute.xlu0 %7494  ;;  %v7500_v7 = vpop.permute.xlu1 %7499 }
 0xe55   :  { %v7497_v44 = vunpack.i.h.bf16 %v7495_v47  ;;  %v7496_v39 = vunpack.i.l.bf16 %v7495_v47  ;;  %v7502_v49 = vunpack.i.h.bf16 %v7500_v7  ;;  %v7501_v19 = vunpack.i.l.bf16 %v7500_v7 }
 0xe56   :  { %7049 = vmatprep.mubr.msk.bf16.mxu0 %vm74_vm0, %v6232_v1 }
 0xe57   :  { %v6220_v6 = vsel %vm6213_vm4, %v6203_v56, %v7496_v39  ;;  %v6221_v61 = vsel %vm6213_vm4, %v6204_v23, %v7497_v44  ;;  %v6190_v51 = vsel %vm213_vm1, %v10748_v24, %v7502_v49  ;;  %v6189_v25 = vsel %vm213_vm1, %v10740_v63, %v7501_v19  ;;  %v11885_v44 = vld [vmem:[#allocation23_spill] sm:$0xff]  ;;  %v11886_v56 = vld [vmem:[#allocation4_spill] sm:$0xff] }
 0xe58   :  { %v6233_v28 = vpack.c.bf16 %v6221_v61, %v6220_v6  ;;  %v7505_v35 = vpop.permute.xlu0 %7504  ;;  %v7510_v2 = vpop.permute.xlu1 %7509 }
 0xe59   :  { %v7512_v30 = vunpack.i.h.bf16 %v7510_v2  ;;  %v7511_v42 = vunpack.i.l.bf16 %v7510_v2  ;;  %v7507_v13 = vunpack.i.h.bf16 %v7505_v35  ;;  %v7506_v60 = vunpack.i.l.bf16 %v7505_v35 }
 0xe5a   :  { %7050 = vmatmul.mubr.msk.bf16.gmra.mxu0 %vm74_vm0, %v6233_v28 }
 0xe5b   :  { %v6205_v9 = vsel %vm3684_vm3, %v6189_v25, %v7511_v42  ;;  %v6206_v4 = vsel %vm3684_vm3, %v6190_v51, %v7512_v30  ;;  %v6192_v63 = vsel %vm213_vm1, %v10760_v3, %v7507_v13  ;;  %v6191_v10 = vsel %vm213_vm1, %v11882_v52, %v7506_v60  ;;  %v6478_v30 = vld [vmem:[%s11469_s6] ss:$0 sm:$0xff] }
 0xe5c   :  { %v7515_v53 = vpop.permute.xlu0 %7514  ;;  %v7520_v0 = vpop.permute.xlu1 %7519 }
 0xe5d   :  { %v7522_v54 = vunpack.i.h.bf16 %v7520_v0  ;;  %v7521_v27 = vunpack.i.l.bf16 %v7520_v0  ;;  %v7517_v14 = vunpack.i.h.bf16 %v7515_v53  ;;  %v7516_v48 = vunpack.i.l.bf16 %v7515_v53 }
 0xe5f   :  { %v6223_v21 = vsel %vm6213_vm4, %v6206_v4, %v7522_v54  ;;  %v6222_v36 = vsel %vm6213_vm4, %v6205_v9, %v7521_v27  ;;  %v6207_v58 = vsel %vm3684_vm3, %v6191_v10, %v7516_v48  ;;  %v6208_v62 = vsel %vm3684_vm3, %v6192_v63, %v7517_v14 }
 0xe60   :  { %v6234_v24 = vpack.c.bf16 %v6223_v21, %v6222_v36  ;;  %v7525_v12 = vpop.permute.xlu0 %7524  ;;  %v7530_v38 = vpop.permute.xlu1 %7529 }
 0xe61   :  { %v7527_v8 = vunpack.i.h.bf16 %v7525_v12  ;;  %v7526_v50 = vunpack.i.l.bf16 %v7525_v12  ;;  %v7532_v5 = vunpack.i.h.bf16 %v7530_v38  ;;  %v7531_v22 = vunpack.i.l.bf16 %v7530_v38 }
 0xe62   :  { %7053 = vmatprep.mubr.msk.bf16.mxu0 %vm74_vm0, %v6234_v24 }
 0xe63   :  { %v6224_v11 = vsel %vm6213_vm4, %v6207_v58, %v7526_v50  ;;  %v6225_v32 = vsel %vm6213_vm4, %v6208_v62, %v7527_v8  ;;  %v6194_v37 = vsel %vm213_vm1, %v11883_v43, %v7532_v5  ;;  %v6193_v57 = vsel %vm213_vm1, %v11884_v59, %v7531_v22 }
 0xe64   :  { %v6235_v17 = vpack.c.bf16 %v6225_v32, %v6224_v11  ;;  %v7535_v40 = vpop.permute.xlu0 %7534  ;;  %v7540_v3 = vpop.permute.xlu1 %7539 }
 0xe65   :  { %v7542_v29 = vunpack.i.h.bf16 %v7540_v3  ;;  %v7541_v26 = vunpack.i.l.bf16 %v7540_v3  ;;  %v7537_v31 = vunpack.i.h.bf16 %v7535_v40  ;;  %v7536_v33 = vunpack.i.l.bf16 %v7535_v40 }
 0xe66   :  { %7054 = vmatmul.mubr.msk.bf16.gmra.mxu0 %vm74_vm0, %v6235_v17 }
 0xe67   :  { %v6209_v18 = vsel %vm3684_vm3, %v6193_v57, %v7541_v26  ;;  %v6210_v1 = vsel %vm3684_vm3, %v6194_v37, %v7542_v29  ;;  %v6196_v39 = vsel %vm213_vm1, %v11885_v44, %v7537_v31  ;;  %v6195_v23 = vsel %vm213_vm1, %v11886_v56, %v7536_v33 }
 0xe68   :  { %v7545_v16 = vpop.permute.xlu0 %7544  ;;  %v7550_v41 = vpop.permute.xlu1 %7549 }
 0xe69   :  { %v7552_v55 = vunpack.i.h.bf16 %v7550_v41  ;;  %v7551_v46 = vunpack.i.l.bf16 %v7550_v41  ;;  %v7547_v47 = vunpack.i.h.bf16 %v7545_v16  ;;  %v7546_v7 = vunpack.i.l.bf16 %v7545_v16 }
 0xe6b   :  { %v6227_v20 = vsel %vm6213_vm4, %v6210_v1, %v7552_v55  ;;  %v6226_v34 = vsel %vm6213_vm4, %v6209_v18, %v7551_v46  ;;  %v6211_v28 = vsel %vm3684_vm3, %v6195_v23, %v7546_v7  ;;  %v6212_v49 = vsel %vm3684_vm3, %v6196_v39, %v7547_v47 }
 0xe6c   :  { %v6236_v15 = vpack.c.bf16 %v6227_v20, %v6226_v34  ;;  %v7555_v45 = vpop.permute.xlu0 %7554 }
 0xe6d   :  { %v7557_v6 = vunpack.i.h.bf16 %v7555_v45  ;;  %v7556_v61 = vunpack.i.l.bf16 %v7555_v45 }
 0xe6e   :  { %7057 = vmatprep.mubr.msk.bf16.mxu0 %vm74_vm0, %v6236_v15 }
 0xe6f   :  { %v6228_v19 = vsel %vm6213_vm4, %v6211_v28, %v7556_v61  ;;  %v6229_v35 = vsel %vm6213_vm4, %v6212_v49, %v7557_v6 }
 0xe70   :  { %v6237_v2 = vpack.c.bf16 %v6229_v35, %v6228_v19 }
 0xe72   :  { %7058 = vmatmul.mubr.msk.bf16.gmra.mxu0 %vm74_vm0, %v6237_v2 }
 0xf0e   :  { %v7047_v42 = vpop.f32.mrf.mxu0 }
 0xf0f   :  { %v6328_v51 = vadd.f32 %v7047_v42, %v6478_v30 }
 0xf10   :  { %v6319_v25 = vpop.f32.mrf.mxu0 }
 0xf11   :  { %6384 = vst.msk [vmem:[%s11470_s7 + $0x10] sm:$0xff] %vm74_vm0, %v6328_v51  ;;  %v6320_v53 = vadd.f32 %v6478_v30, %v6319_v25 }
 0xf12   :  { %v7048_v0 = vpop.f32.mrf.mxu0 }
 0xf13   :  { %6382 = vst.msk [vmem:[%s11470_s7] sm:$0xff] %vm74_vm0, %v6320_v53  ;;  %v6331_v13 = vadd.f32 %v7048_v0, %v6478_v30 }
 0xf14   :  { %v6322_v60 = vpop.f32.mrf.mxu0 }
 0xf15   :  { %6385 = vst.msk [vmem:[%s11470_s7 + $0x18] sm:$0xff] %vm74_vm0, %v6331_v13  ;;  %v6323_v54 = vadd.f32 %v6478_v30, %v6322_v60 }
 0xf17   :  { %6383 = vst.msk [vmem:[%s11470_s7 + $0x8] sm:$0xff] %vm74_vm0, %v6323_v54 }
 0xf1a   :  { %v7051_v27 = vpop.f32.mrf.mxu0 }
 0xf1b   :  { %v6344_v9 = vadd.f32 %v7051_v27, %v6478_v30 }
 0xf1c   :  { %v6335_v4 = vpop.f32.mrf.mxu0 }
 0xf1d   :  { %6388 = vst.msk [vmem:[%s11470_s7 + $0x30] sm:$0xff] %vm74_vm0, %v6344_v9  ;;  %v6336_v14 = vadd.f32 %v6478_v30, %v6335_v4 }
 0xf1e   :  { %v7052_v48 = vpop.f32.mrf.mxu0 }
 0xf1f   :  { %6386 = vst.msk [vmem:[%s11470_s7 + $0x20] sm:$0xff] %vm74_vm0, %v6336_v14  ;;  %v6347_v21 = vadd.f32 %v7052_v48, %v6478_v30 }
 0xf20   :  { %v6338_v36 = vpop.f32.mrf.mxu0 }
 0xf21   :  { %6389 = vst.msk [vmem:[%s11470_s7 + $0x38] sm:$0xff] %vm74_vm0, %v6347_v21  ;;  %v6339_v24 = vadd.f32 %v6478_v30, %v6338_v36 }
 0xf23   :  { %6387 = vst.msk [vmem:[%s11470_s7 + $0x28] sm:$0xff] %vm74_vm0, %v6339_v24 }
 0xf26   :  { %v7055_v12 = vpop.f32.mrf.mxu0 }
 0xf27   :  { %v6360_v38 = vadd.f32 %v7055_v12, %v6478_v30 }
 0xf28   :  { %v6351_v63 = vpop.f32.mrf.mxu0 }
 0xf29   :  { %6392 = vst.msk [vmem:[%s11470_s7 + $0x50] sm:$0xff] %vm74_vm0, %v6360_v38  ;;  %v6352_v52 = vadd.f32 %v6478_v30, %v6351_v63 }
 0xf2a   :  { %v7056_v10 = vpop.f32.mrf.mxu0 }
 0xf2b   :  { %6390 = vst.msk [vmem:[%s11470_s7 + $0x40] sm:$0xff] %vm74_vm0, %v6352_v52  ;;  %v6363_v8 = vadd.f32 %v7056_v10, %v6478_v30 }
 0xf2c   :  { %v6354_v50 = vpop.f32.mrf.mxu0 }
 0xf2d   :  { %6393 = vst.msk [vmem:[%s11470_s7 + $0x58] sm:$0xff] %vm74_vm0, %v6363_v8  ;;  %v6355_v58 = vadd.f32 %v6478_v30, %v6354_v50 }
 0xf2f   :  { %6391 = vst.msk [vmem:[%s11470_s7 + $0x48] sm:$0xff] %vm74_vm0, %v6355_v58 }
 0xf32   :  { %v7059_v62 = vpop.f32.mrf.mxu0 }
 0xf33   :  { %v6376_v11 = vadd.f32 %v7059_v62, %v6478_v30 }
 0xf34   :  { %v6367_v32 = vpop.f32.mrf.mxu0 }
 0xf35   :  { %6396 = vst.msk [vmem:[%s11470_s7 + $0x70] sm:$0xff] %vm74_vm0, %v6376_v11  ;;  %v6368_v17 = vadd.f32 %v6478_v30, %v6367_v32 }
 0xf36   :  { %v7060_v5 = vpop.f32.mrf.mxu0 }
 0xf37   :  { %6394 = vst.msk [vmem:[%s11470_s7 + $0x60] sm:$0xff] %vm74_vm0, %v6368_v17  ;;  %v6379_v22 = vadd.f32 %v7060_v5, %v6478_v30 }
 0xf38   :  { %v6370_v40 = vpop.f32.mrf.mxu0 }
 0xf39   :  { %6397 = vst.msk [vmem:[%s11470_s7 + $0x78] sm:$0xff] %vm74_vm0, %v6379_v22  ;;  %v6371_v3 = vadd.f32 %v6478_v30, %v6370_v40 }
 0xf3b   :  { %6395 = vst.msk [vmem:[%s11470_s7 + $0x68] sm:$0xff] %vm74_vm0, %v6371_v3 }

</bundles_post_ra>
